<compile_context>
chip_gen: v7x
topology: tpu7x:2x2x1
jax: 0.10.0
libtpu: 0.0.40
codegen_flags: <defaults>
</compile_context>

<pallas_src>
import functools

import jax
import jax.numpy as jnp
from jax.experimental import pallas as pl
from jax.experimental.pallas import tpu as pltpu

LEAK = 0.01            # LeakyReLU negative slope (module arg `leak_rate`)
BN_EPS = 1e-5
IN_CHANNELS = 1        # module arg `input_channels`
SEQ_LEN = 800          # forced by core7: 64 * ((800-15)//5 + 1 - 1) = 10048

L1 = 158               # length after core1 (preserved by the 'same' convs)
L6 = 157               # length after core6 (k=2, valid)
PAD = 4                # 'same' padding for the k=9 convs
VAL0 = 128             # first valid column in padded scratch (aligned stores)
PCOLS = 304            # padded scratch width (tap reads span cols [124, 290))
CSTRIDE = 256          # lane stride per channel in the flattened core6 output
FLATW = 64 * CSTRIDE   # 16384
TRUNK_ROWS = 168       # packed trunk weight rows (8+16+16+32+32+64)
TRUNK_KMAX = 288       # packed trunk weight cols (max merged K = 9*32)
HEAD_ROWS = 133        # packed head parameter rows

_TRUNK_OFF = {1: 0, 2: 8, 3: 24, 4: 40, 5: 72, 6: 104}


# ---------------------------------------------------------------------------
# Fused kernel: core1..core6 trunk + core7..out1 head, one grid step / sample
# ---------------------------------------------------------------------------
def _core_cnn_kernel(x_ref, wt_ref, bt_ref, w7_ref, hp_ref, o_ref,
                     p1, p2, p3, p4, flat, *, leak):
    f32 = jnp.float32

    def leaky(v):
        return jnp.maximum(v, leak * v)

    wt = wt_ref[...]                     # (168, 288) packed trunk weights
    bt = bt_ref[...]                     # (168, 1)   packed trunk biases

    def wb(layer, rows, kdim):
        r0 = _TRUNK_OFF[layer]
        return wt[r0:r0 + rows, 0:kdim], bt[r0:r0 + rows, :]

    # Zero only the pad columns (every step -> megacore-safe); both zero-stores
    # start at 128-aligned lane offsets.
    for p in (p1, p2, p3, p4):
        c = p.shape[0]
        p[:, 0:VAL0] = jnp.zeros((c, VAL0), f32)
        p[:, 2 * VAL0:PCOLS] = jnp.zeros((c, PCOLS - 2 * VAL0), f32)

    # core1 (k=15, stride 5) -> bn1 -> [dropout] -> LeakyReLU
    # expressed as 3 taps over the 5 stride-phase channels of the input.
    w1, b1 = wb(1, 8, 15)
    x = x_ref[0]                                     # (5, 160)
    y = jnp.dot(w1[:, 0:5], x[:, 0:L1], preferred_element_type=f32)
    y = y + jnp.dot(w1[:, 5:10], x[:, 1:1 + L1], preferred_element_type=f32)
    y = y + jnp.dot(w1[:, 10:15], x[:, 2:2 + L1], preferred_element_type=f32)
    p1[:, VAL0:VAL0 + L1] = leaky(y + b1)

    # 'same' k=9 convs: ONE wide-K MXU matmul per layer.  The 9 shifted views
    # stack along the sublane axis (offsets are multiples of 8 -> free concat).
    def same_conv(src, layer, rows, cin):
        w, b = wb(layer, rows, 9 * cin)
        cols = jnp.concatenate(
            [src[:, VAL0 - PAD + k:VAL0 - PAD + k + L1] for k in range(9)],
            axis=0)                                  # (9*cin, 158)
        return jnp.dot(w, cols, preferred_element_type=f32) + b

    p2[:, VAL0:VAL0 + L1] = jnp.tanh(same_conv(p1, 2, 16, 8))    # core2+bn2+tanh
    p3[:, VAL0:VAL0 + L1] = leaky(same_conv(p2, 3, 16, 16))      # core3+bn2+lrelu
    p4[:, VAL0:VAL0 + L1] = jnp.tanh(same_conv(p3, 4, 32, 16))   # core4+bn3+tanh
    a5 = leaky(same_conv(p4, 5, 32, 32))                         # core5+bn3+lrelu

    # core6 (k=2, valid) + bn4 -> (64, 157) channel-first == torch flatten order.
    w6, b6 = wb(6, 64, 64)
    cols6 = jnp.concatenate([a5[:, 0:L6], a5[:, 1:1 + L6]], axis=0)   # (64, 157)
    h6 = jnp.dot(w6, cols6, preferred_element_type=f32) + b6

    # In-VMEM flatten: channel c -> lanes [256c, 256c+157).  Stores are
    # 128-aligned; the padded lanes stay 0 and the matching w7 rows are 0,
    # so the padded core7 contraction is exact.
    flat[...] = jnp.zeros(flat.shape, flat.dtype)
    h6b = h6.astype(flat.dtype)
    for c in range(64):
        flat[:, c * CSTRIDE:c * CSTRIDE + L6] = h6b[c:c + 1, :]

    # MLP head core7..out1 (BN folded, dropout = identity).
    hp = hp_ref[...]                     # (133, 32) packed head params (f32)
    b7 = hp[0:1, :]
    w8, b8 = hp[1:33, :], hp[33:34, :]
    w9, b9 = hp[34:66, :], hp[66:67, :]
    w10, b10 = hp[67:99, :], hp[99:100, :]
    wo, bo = hp[100:132, :], hp[132:133, :]

    h = jnp.tanh(jnp.dot(flat[...], w7_ref[...],
                         preferred_element_type=f32) + b7)        # core7+bn3+tanh
    h = leaky(jnp.dot(h, w8, preferred_element_type=f32) + b8)    # core8+bn3+lrelu
    h = jnp.tanh(jnp.dot(h, w9, preferred_element_type=f32) + b9) # core9+bn2+tanh
    h = leaky(jnp.dot(h, w10, preferred_element_type=f32) + b10)  # core10+bn2+lrelu
    out = jnp.dot(h, wo, preferred_element_type=f32) + bo         # out1 (cols 4.. = 0)
    o_ref[0] = out[:, 0:4]


def core_cnn_forward(x, fp, leak=LEAK):
    """x: (B, 1, 800) float32 -> (B, 4) logits (PyTorch eval-mode semantics)."""
    B, C, L = x.shape
    assert C == IN_CHANNELS and L == SEQ_LEN
    # stride-5 phase split of the single input channel: (B,1,800) -> (B,5,160)
    xr = x.astype(jnp.float32).reshape(B, L // 5, 5).transpose(0, 2, 1)

    kernel = functools.partial(_core_cnn_kernel, leak=leak)

    def cspec(arr):
        return pl.BlockSpec(arr.shape, lambda b: (0, 0))

    out = pl.pallas_call(
        kernel,
        out_shape=jax.ShapeDtypeStruct((B, 1, 4), jnp.float32),
        grid=(B,),
        in_specs=[
            pl.BlockSpec((1, 5, L // 5), lambda b: (b, 0, 0)),
            cspec(fp["wtrunk"]),
            cspec(fp["btrunk"]),
            cspec(fp["w7"]),
            cspec(fp["head"]),
        ],
        out_specs=pl.BlockSpec((1, 1, 4), lambda b: (b, 0, 0)),
        scratch_shapes=[
            pltpu.VMEM((8, PCOLS), jnp.float32),     # core1 output (padded)
            pltpu.VMEM((16, PCOLS), jnp.float32),    # core2 output (padded)
            pltpu.VMEM((16, PCOLS), jnp.float32),    # core3 output (padded)
            pltpu.VMEM((32, PCOLS), jnp.float32),    # core4 output (padded)
            pltpu.VMEM((1, FLATW), jnp.bfloat16),    # flattened core6 output
        ],
        compiler_params=pltpu.CompilerParams(
            dimension_semantics=("parallel",)),
    )(xr, fp["wtrunk"], fp["btrunk"], fp["w7"], fp["head"])
    return out[:, 0, :]


# ---------------------------------------------------------------------------
# Parameters: deterministic synthetic init (PyTorch layouts) + offline folding
# ---------------------------------------------------------------------------
def init_params(key, in_channels):
    keys = iter(jax.random.split(key, 48))

    def u(shape, lo=-0.1, hi=0.1):
        return jax.random.uniform(next(keys), shape, jnp.float32, lo, hi)

    p = {}
    p["core1_w"] = u((8, in_channels, 15));  p["core1_b"] = u((8,))
    p["core2_w"] = u((16, 8, 9));            p["core2_b"] = u((16,))
    p["core3_w"] = u((16, 16, 9));           p["core3_b"] = u((16,))
    p["core4_w"] = u((32, 16, 9));           p["core4_b"] = u((32,))
    p["core5_w"] = u((32, 32, 9));           p["core5_b"] = u((32,))
    p["core6_w"] = u((64, 32, 2));           p["core6_b"] = u((64,))
    p["core7_w"] = u((32, 10048), -0.01, 0.01); p["core7_b"] = u((32,))
    p["core8_w"] = u((32, 32));              p["core8_b"] = u((32,))
    p["core9_w"] = u((16, 32));              p["core9_b"] = u((16,))
    p["core10_w"] = u((16, 16));             p["core10_b"] = u((16,))
    p["out1_w"] = u((4, 16));                p["out1_b"] = u((4,))

    def bn(n):
        gamma = u((n,), 0.5, 1.5)
        beta = u((n,))
        mean = u((n,))
        var = u((n,), 0.5, 1.5)
        scale = gamma / jnp.sqrt(var + BN_EPS)
        shift = beta - mean * scale
        return scale, shift

    p["bn1_scale"], p["bn1_shift"] = bn(8)
    p["bn2_scale"], p["bn2_shift"] = bn(16)
    p["bn3_scale"], p["bn3_shift"] = bn(32)
    p["bn4_scale"], p["bn4_shift"] = bn(64)
    return p


def fold_params(p):
    """Fold BN + biases, merge taps, and pack everything into 4 buffers."""
    f32 = jnp.float32
    s1, t1 = p["bn1_scale"], p["bn1_shift"]
    s2, t2 = p["bn2_scale"], p["bn2_shift"]
    s3, t3 = p["bn3_scale"], p["bn3_shift"]
    s4, t4 = p["bn4_scale"], p["bn4_shift"]

    def conv_cf(w, b, s, t):
        # torch (C_out, C_in, K) -> (C_out, K*C_in) matching the in-kernel
        # im2col row order (K blocks of C_in rows); BN folded into rows/bias.
        co, ci, k = w.shape
        wm = jnp.transpose(w, (0, 2, 1)).reshape(co, k * ci) * s[:, None]
        bm = (b * s + t)[:, None]
        return wm.astype(f32), bm.astype(f32)

    blocks = [
        (_TRUNK_OFF[1], conv_cf(p["core1_w"], p["core1_b"], s1, t1)),
        (_TRUNK_OFF[2], conv_cf(p["core2_w"], p["core2_b"], s2, t2)),
        (_TRUNK_OFF[3], conv_cf(p["core3_w"], p["core3_b"], s2, t2)),
        (_TRUNK_OFF[4], conv_cf(p["core4_w"], p["core4_b"], s3, t3)),
        (_TRUNK_OFF[5], conv_cf(p["core5_w"], p["core5_b"], s3, t3)),
        (_TRUNK_OFF[6], conv_cf(p["core6_w"], p["core6_b"], s4, t4)),
    ]
    wtrunk = jnp.zeros((TRUNK_ROWS, TRUNK_KMAX), f32)
    btrunk = jnp.zeros((TRUNK_ROWS, 1), f32)
    for row, (wm, bm) in blocks:
        wtrunk = wtrunk.at[row:row + wm.shape[0], :wm.shape[1]].set(wm)
        btrunk = btrunk.at[row:row + bm.shape[0], :].set(bm)

    # core7: torch flatten index c*157+l -> padded to lane stride 256/channel,
    # stored bf16 (the only >100 KB operand), BN3 folded into columns.
    w7t = (p["core7_w"].T * s3[None, :]).astype(f32)            # (10048, 32)
    w7r = w7t.reshape(64, L6, 32)
    w7pad = jnp.zeros((64, CSTRIDE, 32), f32).at[:, :L6, :].set(w7r)
    w7 = w7pad.reshape(FLATW, 32).astype(jnp.bfloat16)
    b7 = (p["core7_b"] * s3 + t3).astype(f32)

    def lin(w, b, s, t):
        return (w.T * s[None, :]).astype(f32), (b * s + t).astype(f32)

    w8, b8 = lin(p["core8_w"], p["core8_b"], s3, t3)
    w9, b9 = lin(p["core9_w"], p["core9_b"], s2, t2)
    w10, b10 = lin(p["core10_w"], p["core10_b"], s2, t2)
    wo, bo = p["out1_w"].T.astype(f32), p["out1_b"].astype(f32)

    # Head pack: zero-padded to 32-wide blocks; zeros flow through tanh/leaky
    # as exact zeros and matching zero weight rows keep the math exact.
    hp = jnp.zeros((HEAD_ROWS, 32), f32)
    hp = hp.at[0, :].set(b7)
    hp = hp.at[1:33, :].set(w8)
    hp = hp.at[33, :].set(b8)
    hp = hp.at[34:66, 0:16].set(w9)
    hp = hp.at[66, 0:16].set(b9)
    hp = hp.at[67:83, 0:16].set(w10)
    hp = hp.at[99, 0:16].set(b10)
    hp = hp.at[100:116, 0:4].set(wo)
    hp = hp.at[132, 0:4].set(bo)

    return {"wtrunk": wtrunk, "btrunk": btrunk, "w7": w7, "head": hp}


if __name__ == "__main__":
    key = jax.random.PRNGKey(0)
    pkey, xkey = jax.random.split(key)
    raw_params = init_params(pkey, IN_CHANNELS)
    folded = fold_params(raw_params)        # offline: BN folding, packing, bf16 w7
    x = jax.random.normal(xkey, (2, IN_CHANNELS, SEQ_LEN), jnp.float32)

    fwd = jax.jit(core_cnn_forward)
    out = fwd(x, folded)
    jax.block_until_ready(out)
    assert out.shape == (2, 4) and out.dtype == jnp.float32
    print("KERNEL_OK")
</pallas_src>

<mosaic_0001>
module attributes {stable_mosaic.version = 11 : i64} {
  func.func @_core_cnn_kernel(%arg0: i32, %arg1: memref<1x5x160xf32, #tpu.memory_space<vmem>>, %arg2: memref<168x288xf32, #tpu.memory_space<vmem>>, %arg3: memref<168x1xf32, #tpu.memory_space<vmem>>, %arg4: memref<16384x32xbf16, #tpu.memory_space<vmem>>, %arg5: memref<133x32xf32, #tpu.memory_space<vmem>>, %arg6: memref<1x1x4xf32, #tpu.memory_space<vmem>>, %arg7: memref<8x304xf32, #tpu.memory_space<vmem>>, %arg8: memref<16x304xf32, #tpu.memory_space<vmem>>, %arg9: memref<16x304xf32, #tpu.memory_space<vmem>>, %arg10: memref<32x304xf32, #tpu.memory_space<vmem>>, %arg11: memref<1x16384xbf16, #tpu.memory_space<vmem>>) attributes {dimension_semantics = [#tpu.dimension_semantics<parallel>], iteration_bounds = array<i64: 2>, scalar_prefetch = 0 : i64, scratch_operands = 5 : i64, tpu.core_type = #tpu.core_type<tc>, window_params = [{transform_indices = @transform_0, window_bounds = array<i64: 1, 5, 160>}, {pipeline_mode = #tpu.pipeline_mode<synchronous>, transform_indices = @transform_1, window_bounds = array<i64: 168, 288>}, {pipeline_mode = #tpu.pipeline_mode<synchronous>, transform_indices = @transform_2, window_bounds = array<i64: 168, 1>}, {pipeline_mode = #tpu.pipeline_mode<synchronous>, transform_indices = @transform_3, window_bounds = array<i64: 16384, 32>}, {pipeline_mode = #tpu.pipeline_mode<synchronous>, transform_indices = @transform_4, window_bounds = array<i64: 133, 32>}, {transform_indices = @transform_5, window_bounds = array<i64: 1, 1, 4>}]} {
    %c0 = arith.constant 0 : index
    %c0_0 = arith.constant 0 : index
    %0 = vector.load %arg2[%c0, %c0_0] : memref<168x288xf32, #tpu.memory_space<vmem>>, vector<168x288xf32>
    %c0_1 = arith.constant 0 : index
    %c0_2 = arith.constant 0 : index
    %1 = vector.load %arg3[%c0_1, %c0_2] : memref<168x1xf32, #tpu.memory_space<vmem>>, vector<168x1xf32>
    %cst = arith.constant 0.000000e+00 : f32
    %2 = vector.broadcast %cst : f32 to vector<8x128xf32>
    %c0_3 = arith.constant 0 : index
    %c0_4 = arith.constant 0 : index
    %3 = vector.load %arg7[%c0_3, %c0_4] : memref<8x304xf32, #tpu.memory_space<vmem>>, vector<8x128xf32>
    tpu.vector_store %arg7[%c0_3, %c0_4], %2 {strides = array<i32>} : memref<8x304xf32, #tpu.memory_space<vmem>>, vector<8x128xf32>,
    %cst_5 = arith.constant 0.000000e+00 : f32
    %4 = vector.broadcast %cst_5 : f32 to vector<8x48xf32>
    %c0_6 = arith.constant 0 : index
    %c256 = arith.constant 256 : index
    %5 = vector.load %arg7[%c0_6, %c256] : memref<8x304xf32, #tpu.memory_space<vmem>>, vector<8x48xf32>
    tpu.vector_store %arg7[%c0_6, %c256], %4 {strides = array<i32>} : memref<8x304xf32, #tpu.memory_space<vmem>>, vector<8x48xf32>,
    %cst_7 = arith.constant 0.000000e+00 : f32
    %6 = vector.broadcast %cst_7 : f32 to vector<16x128xf32>
    %c0_8 = arith.constant 0 : index
    %c0_9 = arith.constant 0 : index
    %7 = vector.load %arg8[%c0_8, %c0_9] : memref<16x304xf32, #tpu.memory_space<vmem>>, vector<16x128xf32>
    tpu.vector_store %arg8[%c0_8, %c0_9], %6 {strides = array<i32>} : memref<16x304xf32, #tpu.memory_space<vmem>>, vector<16x128xf32>,
    %cst_10 = arith.constant 0.000000e+00 : f32
    %8 = vector.broadcast %cst_10 : f32 to vector<16x48xf32>
    %c0_11 = arith.constant 0 : index
    %c256_12 = arith.constant 256 : index
    %9 = vector.load %arg8[%c0_11, %c256_12] : memref<16x304xf32, #tpu.memory_space<vmem>>, vector<16x48xf32>
    tpu.vector_store %arg8[%c0_11, %c256_12], %8 {strides = array<i32>} : memref<16x304xf32, #tpu.memory_space<vmem>>, vector<16x48xf32>,
    %cst_13 = arith.constant 0.000000e+00 : f32
    %10 = vector.broadcast %cst_13 : f32 to vector<16x128xf32>
    %c0_14 = arith.constant 0 : index
    %c0_15 = arith.constant 0 : index
    %11 = vector.load %arg9[%c0_14, %c0_15] : memref<16x304xf32, #tpu.memory_space<vmem>>, vector<16x128xf32>
    tpu.vector_store %arg9[%c0_14, %c0_15], %10 {strides = array<i32>} : memref<16x304xf32, #tpu.memory_space<vmem>>, vector<16x128xf32>,
    %cst_16 = arith.constant 0.000000e+00 : f32
    %12 = vector.broadcast %cst_16 : f32 to vector<16x48xf32>
    %c0_17 = arith.constant 0 : index
    %c256_18 = arith.constant 256 : index
    %13 = vector.load %arg9[%c0_17, %c256_18] : memref<16x304xf32, #tpu.memory_space<vmem>>, vector<16x48xf32>
    tpu.vector_store %arg9[%c0_17, %c256_18], %12 {strides = array<i32>} : memref<16x304xf32, #tpu.memory_space<vmem>>, vector<16x48xf32>,
    %cst_19 = arith.constant 0.000000e+00 : f32
    %14 = vector.broadcast %cst_19 : f32 to vector<32x128xf32>
    %c0_20 = arith.constant 0 : index
    %c0_21 = arith.constant 0 : index
    %15 = vector.load %arg10[%c0_20, %c0_21] : memref<32x304xf32, #tpu.memory_space<vmem>>, vector<32x128xf32>
    tpu.vector_store %arg10[%c0_20, %c0_21], %14 {strides = array<i32>} : memref<32x304xf32, #tpu.memory_space<vmem>>, vector<32x128xf32>,
    %cst_22 = arith.constant 0.000000e+00 : f32
    %16 = vector.broadcast %cst_22 : f32 to vector<32x48xf32>
    %c0_23 = arith.constant 0 : index
    %c256_24 = arith.constant 256 : index
    %17 = vector.load %arg10[%c0_23, %c256_24] : memref<32x304xf32, #tpu.memory_space<vmem>>, vector<32x48xf32>
    tpu.vector_store %arg10[%c0_23, %c256_24], %16 {strides = array<i32>} : memref<32x304xf32, #tpu.memory_space<vmem>>, vector<32x48xf32>,
    %18 = vector.extract_strided_slice %0 {offsets = [0, 0], sizes = [8, 15], strides = [1, 1]} : vector<168x288xf32> to vector<8x15xf32>
    %19 = vector.extract_strided_slice %1 {offsets = [0, 0], sizes = [8, 1], strides = [1, 1]} : vector<168x1xf32> to vector<8x1xf32>
    %c0_25 = arith.constant 0 : index
    %c0_26 = arith.constant 0 : index
    %c0_27 = arith.constant 0 : index
    %20 = vector.load %arg1[%c0_25, %c0_26, %c0_27] : memref<1x5x160xf32, #tpu.memory_space<vmem>>, vector<1x5x160xf32>
    %21 = vector.shape_cast %20 : vector<1x5x160xf32> to vector<5x160xf32>
    %22 = vector.extract_strided_slice %18 {offsets = [0, 0], sizes = [8, 5], strides = [1, 1]} : vector<8x15xf32> to vector<8x5xf32>
    %23 = vector.extract_strided_slice %21 {offsets = [0, 0], sizes = [5, 158], strides = [1, 1]} : vector<5x160xf32> to vector<5x158xf32>
    %cst_28 = arith.constant dense<0.000000e+00> : vector<8x158xf32>
    %24 = tpu.matmul %22, %23, %cst_28 {dimension_numbers = #tpu.dot_dimension_numbers<[1], [0], [0], [1], [0, 0, 1, 1], [], []>} : vector<8x5xf32>, vector<5x158xf32>, vector<8x158xf32> -> vector<8x158xf32>
    %25 = vector.extract_strided_slice %18 {offsets = [0, 5], sizes = [8, 5], strides = [1, 1]} : vector<8x15xf32> to vector<8x5xf32>
    %26 = vector.extract_strided_slice %21 {offsets = [0, 1], sizes = [5, 158], strides = [1, 1]} : vector<5x160xf32> to vector<5x158xf32>
    %cst_29 = arith.constant dense<0.000000e+00> : vector<8x158xf32>
    %27 = tpu.matmul %25, %26, %cst_29 {dimension_numbers = #tpu.dot_dimension_numbers<[1], [0], [0], [1], [0, 0, 1, 1], [], []>} : vector<8x5xf32>, vector<5x158xf32>, vector<8x158xf32> -> vector<8x158xf32>
    %28 = arith.addf %24, %27 : vector<8x158xf32>
    %29 = vector.extract_strided_slice %18 {offsets = [0, 10], sizes = [8, 5], strides = [1, 1]} : vector<8x15xf32> to vector<8x5xf32>
    %30 = vector.extract_strided_slice %21 {offsets = [0, 2], sizes = [5, 158], strides = [1, 1]} : vector<5x160xf32> to vector<5x158xf32>
    %cst_30 = arith.constant dense<0.000000e+00> : vector<8x158xf32>
    %31 = tpu.matmul %29, %30, %cst_30 {dimension_numbers = #tpu.dot_dimension_numbers<[1], [0], [0], [1], [0, 0, 1, 1], [], []>} : vector<8x5xf32>, vector<5x158xf32>, vector<8x158xf32> -> vector<8x158xf32>
    %32 = arith.addf %28, %31 : vector<8x158xf32>
    %33 = vector.broadcast %19 : vector<8x1xf32> to vector<8x158xf32>
    %34 = arith.addf %32, %33 : vector<8x158xf32>
    %cst_31 = arith.constant 0.00999999977 : f32
    %35 = vector.broadcast %cst_31 : f32 to vector<8x158xf32>
    %36 = arith.mulf %35, %34 : vector<8x158xf32>
    %37 = arith.maximumf %34, %36 : vector<8x158xf32>
    %c0_32 = arith.constant 0 : index
    %c128 = arith.constant 128 : index
    %38 = vector.load %arg7[%c0_32, %c128] : memref<8x304xf32, #tpu.memory_space<vmem>>, vector<8x158xf32>
    tpu.vector_store %arg7[%c0_32, %c128], %37 {strides = array<i32>} : memref<8x304xf32, #tpu.memory_space<vmem>>, vector<8x158xf32>,
    %39 = vector.extract_strided_slice %0 {offsets = [8, 0], sizes = [16, 72], strides = [1, 1]} : vector<168x288xf32> to vector<16x72xf32>
    %40 = vector.extract_strided_slice %1 {offsets = [8, 0], sizes = [16, 1], strides = [1, 1]} : vector<168x1xf32> to vector<16x1xf32>
    %c0_33 = arith.constant 0 : index
    %c124 = arith.constant 124 : index
    %41 = vector.load %arg7[%c0_33, %c124] : memref<8x304xf32, #tpu.memory_space<vmem>>, vector<8x158xf32>
    %c0_34 = arith.constant 0 : index
    %c125 = arith.constant 125 : index
    %42 = vector.load %arg7[%c0_34, %c125] : memref<8x304xf32, #tpu.memory_space<vmem>>, vector<8x158xf32>
    %c0_35 = arith.constant 0 : index
    %c126 = arith.constant 126 : index
    %43 = vector.load %arg7[%c0_35, %c126] : memref<8x304xf32, #tpu.memory_space<vmem>>, vector<8x158xf32>
    %c0_36 = arith.constant 0 : index
    %c127 = arith.constant 127 : index
    %44 = vector.load %arg7[%c0_36, %c127] : memref<8x304xf32, #tpu.memory_space<vmem>>, vector<8x158xf32>
    %c0_37 = arith.constant 0 : index
    %c128_38 = arith.constant 128 : index
    %45 = vector.load %arg7[%c0_37, %c128_38] : memref<8x304xf32, #tpu.memory_space<vmem>>, vector<8x158xf32>
    %c0_39 = arith.constant 0 : index
    %c129 = arith.constant 129 : index
    %46 = vector.load %arg7[%c0_39, %c129] : memref<8x304xf32, #tpu.memory_space<vmem>>, vector<8x158xf32>
    %c0_40 = arith.constant 0 : index
    %c130 = arith.constant 130 : index
    %47 = vector.load %arg7[%c0_40, %c130] : memref<8x304xf32, #tpu.memory_space<vmem>>, vector<8x158xf32>
    %c0_41 = arith.constant 0 : index
    %c131 = arith.constant 131 : index
    %48 = vector.load %arg7[%c0_41, %c131] : memref<8x304xf32, #tpu.memory_space<vmem>>, vector<8x158xf32>
    %c0_42 = arith.constant 0 : index
    %c132 = arith.constant 132 : index
    %49 = vector.load %arg7[%c0_42, %c132] : memref<8x304xf32, #tpu.memory_space<vmem>>, vector<8x158xf32>
    %50 = tpu.concatenate %41, %42, %43, %44, %45, %46, %47, %48, %49 in 0 : vector<8x158xf32>, vector<8x158xf32>, vector<8x158xf32>, vector<8x158xf32>, vector<8x158xf32>, vector<8x158xf32>, vector<8x158xf32>, vector<8x158xf32>, vector<8x158xf32> -> vector<72x158xf32>
    %cst_43 = arith.constant dense<0.000000e+00> : vector<16x158xf32>
    %51 = tpu.matmul %39, %50, %cst_43 {dimension_numbers = #tpu.dot_dimension_numbers<[1], [0], [0], [1], [0, 0, 1, 1], [], []>} : vector<16x72xf32>, vector<72x158xf32>, vector<16x158xf32> -> vector<16x158xf32>
    %52 = vector.broadcast %40 : vector<16x1xf32> to vector<16x158xf32>
    %53 = arith.addf %51, %52 : vector<16x158xf32>
    %54 = math.tanh %53 : vector<16x158xf32>
    %c0_44 = arith.constant 0 : index
    %c128_45 = arith.constant 128 : index
    %55 = vector.load %arg8[%c0_44, %c128_45] : memref<16x304xf32, #tpu.memory_space<vmem>>, vector<16x158xf32>
    tpu.vector_store %arg8[%c0_44, %c128_45], %54 {strides = array<i32>} : memref<16x304xf32, #tpu.memory_space<vmem>>, vector<16x158xf32>,
    %56 = vector.extract_strided_slice %0 {offsets = [24, 0], sizes = [16, 144], strides = [1, 1]} : vector<168x288xf32> to vector<16x144xf32>
    %57 = vector.extract_strided_slice %1 {offsets = [24, 0], sizes = [16, 1], strides = [1, 1]} : vector<168x1xf32> to vector<16x1xf32>
    %c0_46 = arith.constant 0 : index
    %c124_47 = arith.constant 124 : index
    %58 = vector.load %arg8[%c0_46, %c124_47] : memref<16x304xf32, #tpu.memory_space<vmem>>, vector<16x158xf32>
    %c0_48 = arith.constant 0 : index
    %c125_49 = arith.constant 125 : index
    %59 = vector.load %arg8[%c0_48, %c125_49] : memref<16x304xf32, #tpu.memory_space<vmem>>, vector<16x158xf32>
    %c0_50 = arith.constant 0 : index
    %c126_51 = arith.constant 126 : index
    %60 = vector.load %arg8[%c0_50, %c126_51] : memref<16x304xf32, #tpu.memory_space<vmem>>, vector<16x158xf32>
    %c0_52 = arith.constant 0 : index
    %c127_53 = arith.constant 127 : index
    %61 = vector.load %arg8[%c0_52, %c127_53] : memref<16x304xf32, #tpu.memory_space<vmem>>, vector<16x158xf32>
    %c0_54 = arith.constant 0 : index
    %c128_55 = arith.constant 128 : index
    %62 = vector.load %arg8[%c0_54, %c128_55] : memref<16x304xf32, #tpu.memory_space<vmem>>, vector<16x158xf32>
    %c0_56 = arith.constant 0 : index
    %c129_57 = arith.constant 129 : index
    %63 = vector.load %arg8[%c0_56, %c129_57] : memref<16x304xf32, #tpu.memory_space<vmem>>, vector<16x158xf32>
    %c0_58 = arith.constant 0 : index
    %c130_59 = arith.constant 130 : index
    %64 = vector.load %arg8[%c0_58, %c130_59] : memref<16x304xf32, #tpu.memory_space<vmem>>, vector<16x158xf32>
    %c0_60 = arith.constant 0 : index
    %c131_61 = arith.constant 131 : index
    %65 = vector.load %arg8[%c0_60, %c131_61] : memref<16x304xf32, #tpu.memory_space<vmem>>, vector<16x158xf32>
    %c0_62 = arith.constant 0 : index
    %c132_63 = arith.constant 132 : index
    %66 = vector.load %arg8[%c0_62, %c132_63] : memref<16x304xf32, #tpu.memory_space<vmem>>, vector<16x158xf32>
    %67 = tpu.concatenate %58, %59, %60, %61, %62, %63, %64, %65, %66 in 0 : vector<16x158xf32>, vector<16x158xf32>, vector<16x158xf32>, vector<16x158xf32>, vector<16x158xf32>, vector<16x158xf32>, vector<16x158xf32>, vector<16x158xf32>, vector<16x158xf32> -> vector<144x158xf32>
    %cst_64 = arith.constant dense<0.000000e+00> : vector<16x158xf32>
    %68 = tpu.matmul %56, %67, %cst_64 {dimension_numbers = #tpu.dot_dimension_numbers<[1], [0], [0], [1], [0, 0, 1, 1], [], []>} : vector<16x144xf32>, vector<144x158xf32>, vector<16x158xf32> -> vector<16x158xf32>
    %69 = vector.broadcast %57 : vector<16x1xf32> to vector<16x158xf32>
    %70 = arith.addf %68, %69 : vector<16x158xf32>
    %cst_65 = arith.constant 0.00999999977 : f32
    %71 = vector.broadcast %cst_65 : f32 to vector<16x158xf32>
    %72 = arith.mulf %71, %70 : vector<16x158xf32>
    %73 = arith.maximumf %70, %72 : vector<16x158xf32>
    %c0_66 = arith.constant 0 : index
    %c128_67 = arith.constant 128 : index
    %74 = vector.load %arg9[%c0_66, %c128_67] : memref<16x304xf32, #tpu.memory_space<vmem>>, vector<16x158xf32>
    tpu.vector_store %arg9[%c0_66, %c128_67], %73 {strides = array<i32>} : memref<16x304xf32, #tpu.memory_space<vmem>>, vector<16x158xf32>,
    %75 = vector.extract_strided_slice %0 {offsets = [40, 0], sizes = [32, 144], strides = [1, 1]} : vector<168x288xf32> to vector<32x144xf32>
    %76 = vector.extract_strided_slice %1 {offsets = [40, 0], sizes = [32, 1], strides = [1, 1]} : vector<168x1xf32> to vector<32x1xf32>
    %c0_68 = arith.constant 0 : index
    %c124_69 = arith.constant 124 : index
    %77 = vector.load %arg9[%c0_68, %c124_69] : memref<16x304xf32, #tpu.memory_space<vmem>>, vector<16x158xf32>
    %c0_70 = arith.constant 0 : index
    %c125_71 = arith.constant 125 : index
    %78 = vector.load %arg9[%c0_70, %c125_71] : memref<16x304xf32, #tpu.memory_space<vmem>>, vector<16x158xf32>
    %c0_72 = arith.constant 0 : index
    %c126_73 = arith.constant 126 : index
    %79 = vector.load %arg9[%c0_72, %c126_73] : memref<16x304xf32, #tpu.memory_space<vmem>>, vector<16x158xf32>
    %c0_74 = arith.constant 0 : index
    %c127_75 = arith.constant 127 : index
    %80 = vector.load %arg9[%c0_74, %c127_75] : memref<16x304xf32, #tpu.memory_space<vmem>>, vector<16x158xf32>
    %c0_76 = arith.constant 0 : index
    %c128_77 = arith.constant 128 : index
    %81 = vector.load %arg9[%c0_76, %c128_77] : memref<16x304xf32, #tpu.memory_space<vmem>>, vector<16x158xf32>
    %c0_78 = arith.constant 0 : index
    %c129_79 = arith.constant 129 : index
    %82 = vector.load %arg9[%c0_78, %c129_79] : memref<16x304xf32, #tpu.memory_space<vmem>>, vector<16x158xf32>
    %c0_80 = arith.constant 0 : index
    %c130_81 = arith.constant 130 : index
    %83 = vector.load %arg9[%c0_80, %c130_81] : memref<16x304xf32, #tpu.memory_space<vmem>>, vector<16x158xf32>
    %c0_82 = arith.constant 0 : index
    %c131_83 = arith.constant 131 : index
    %84 = vector.load %arg9[%c0_82, %c131_83] : memref<16x304xf32, #tpu.memory_space<vmem>>, vector<16x158xf32>
    %c0_84 = arith.constant 0 : index
    %c132_85 = arith.constant 132 : index
    %85 = vector.load %arg9[%c0_84, %c132_85] : memref<16x304xf32, #tpu.memory_space<vmem>>, vector<16x158xf32>
    %86 = tpu.concatenate %77, %78, %79, %80, %81, %82, %83, %84, %85 in 0 : vector<16x158xf32>, vector<16x158xf32>, vector<16x158xf32>, vector<16x158xf32>, vector<16x158xf32>, vector<16x158xf32>, vector<16x158xf32>, vector<16x158xf32>, vector<16x158xf32> -> vector<144x158xf32>
    %cst_86 = arith.constant dense<0.000000e+00> : vector<32x158xf32>
    %87 = tpu.matmul %75, %86, %cst_86 {dimension_numbers = #tpu.dot_dimension_numbers<[1], [0], [0], [1], [0, 0, 1, 1], [], []>} : vector<32x144xf32>, vector<144x158xf32>, vector<32x158xf32> -> vector<32x158xf32>
    %88 = vector.broadcast %76 : vector<32x1xf32> to vector<32x158xf32>
    %89 = arith.addf %87, %88 : vector<32x158xf32>
    %90 = math.tanh %89 : vector<32x158xf32>
    %c0_87 = arith.constant 0 : index
    %c128_88 = arith.constant 128 : index
    %91 = vector.load %arg10[%c0_87, %c128_88] : memref<32x304xf32, #tpu.memory_space<vmem>>, vector<32x158xf32>
    tpu.vector_store %arg10[%c0_87, %c128_88], %90 {strides = array<i32>} : memref<32x304xf32, #tpu.memory_space<vmem>>, vector<32x158xf32>,
    %92 = vector.extract_strided_slice %0 {offsets = [72, 0], sizes = [32, 288], strides = [1, 1]} : vector<168x288xf32> to vector<32x288xf32>
    %93 = vector.extract_strided_slice %1 {offsets = [72, 0], sizes = [32, 1], strides = [1, 1]} : vector<168x1xf32> to vector<32x1xf32>
    %c0_89 = arith.constant 0 : index
    %c124_90 = arith.constant 124 : index
    %94 = vector.load %arg10[%c0_89, %c124_90] : memref<32x304xf32, #tpu.memory_space<vmem>>, vector<32x158xf32>
    %c0_91 = arith.constant 0 : index
    %c125_92 = arith.constant 125 : index
    %95 = vector.load %arg10[%c0_91, %c125_92] : memref<32x304xf32, #tpu.memory_space<vmem>>, vector<32x158xf32>
    %c0_93 = arith.constant 0 : index
    %c126_94 = arith.constant 126 : index
    %96 = vector.load %arg10[%c0_93, %c126_94] : memref<32x304xf32, #tpu.memory_space<vmem>>, vector<32x158xf32>
    %c0_95 = arith.constant 0 : index
    %c127_96 = arith.constant 127 : index
    %97 = vector.load %arg10[%c0_95, %c127_96] : memref<32x304xf32, #tpu.memory_space<vmem>>, vector<32x158xf32>
    %c0_97 = arith.constant 0 : index
    %c128_98 = arith.constant 128 : index
    %98 = vector.load %arg10[%c0_97, %c128_98] : memref<32x304xf32, #tpu.memory_space<vmem>>, vector<32x158xf32>
    %c0_99 = arith.constant 0 : index
    %c129_100 = arith.constant 129 : index
    %99 = vector.load %arg10[%c0_99, %c129_100] : memref<32x304xf32, #tpu.memory_space<vmem>>, vector<32x158xf32>
    %c0_101 = arith.constant 0 : index
    %c130_102 = arith.constant 130 : index
    %100 = vector.load %arg10[%c0_101, %c130_102] : memref<32x304xf32, #tpu.memory_space<vmem>>, vector<32x158xf32>
    %c0_103 = arith.constant 0 : index
    %c131_104 = arith.constant 131 : index
    %101 = vector.load %arg10[%c0_103, %c131_104] : memref<32x304xf32, #tpu.memory_space<vmem>>, vector<32x158xf32>
    %c0_105 = arith.constant 0 : index
    %c132_106 = arith.constant 132 : index
    %102 = vector.load %arg10[%c0_105, %c132_106] : memref<32x304xf32, #tpu.memory_space<vmem>>, vector<32x158xf32>
    %103 = tpu.concatenate %94, %95, %96, %97, %98, %99, %100, %101, %102 in 0 : vector<32x158xf32>, vector<32x158xf32>, vector<32x158xf32>, vector<32x158xf32>, vector<32x158xf32>, vector<32x158xf32>, vector<32x158xf32>, vector<32x158xf32>, vector<32x158xf32> -> vector<288x158xf32>
    %cst_107 = arith.constant dense<0.000000e+00> : vector<32x158xf32>
    %104 = tpu.matmul %92, %103, %cst_107 {dimension_numbers = #tpu.dot_dimension_numbers<[1], [0], [0], [1], [0, 0, 1, 1], [], []>} : vector<32x288xf32>, vector<288x158xf32>, vector<32x158xf32> -> vector<32x158xf32>
    %105 = vector.broadcast %93 : vector<32x1xf32> to vector<32x158xf32>
    %106 = arith.addf %104, %105 : vector<32x158xf32>
    %cst_108 = arith.constant 0.00999999977 : f32
    %107 = vector.broadcast %cst_108 : f32 to vector<32x158xf32>
    %108 = arith.mulf %107, %106 : vector<32x158xf32>
    %109 = arith.maximumf %106, %108 : vector<32x158xf32>
    %110 = vector.extract_strided_slice %0 {offsets = [104, 0], sizes = [64, 64], strides = [1, 1]} : vector<168x288xf32> to vector<64x64xf32>
    %111 = vector.extract_strided_slice %1 {offsets = [104, 0], sizes = [64, 1], strides = [1, 1]} : vector<168x1xf32> to vector<64x1xf32>
    %112 = vector.extract_strided_slice %109 {offsets = [0, 0], sizes = [32, 157], strides = [1, 1]} : vector<32x158xf32> to vector<32x157xf32>
    %113 = vector.extract_strided_slice %109 {offsets = [0, 1], sizes = [32, 157], strides = [1, 1]} : vector<32x158xf32> to vector<32x157xf32>
    %114 = tpu.concatenate %112, %113 in 0 : vector<32x157xf32>, vector<32x157xf32> -> vector<64x157xf32>
    %cst_109 = arith.constant dense<0.000000e+00> : vector<64x157xf32>
    %115 = tpu.matmul %110, %114, %cst_109 {dimension_numbers = #tpu.dot_dimension_numbers<[1], [0], [0], [1], [0, 0, 1, 1], [], []>} : vector<64x64xf32>, vector<64x157xf32>, vector<64x157xf32> -> vector<64x157xf32>
    %116 = vector.broadcast %111 : vector<64x1xf32> to vector<64x157xf32>
    %117 = arith.addf %115, %116 : vector<64x157xf32>
    %cst_110 = arith.constant 0.000000e+00 : bf16
    %118 = vector.broadcast %cst_110 : bf16 to vector<1x16384xbf16>
    %c0_111 = arith.constant 0 : index
    %c0_112 = arith.constant 0 : index
    %119 = vector.load %arg11[%c0_111, %c0_112] : memref<1x16384xbf16, #tpu.memory_space<vmem>>, vector<1x16384xbf16>
    tpu.vector_store %arg11[%c0_111, %c0_112], %118 {strides = array<i32>} : memref<1x16384xbf16, #tpu.memory_space<vmem>>, vector<1x16384xbf16>,
    %120 = arith.truncf %117 : vector<64x157xf32> to vector<64x157xbf16>
    %121 = vector.extract_strided_slice %120 {offsets = [0, 0], sizes = [1, 157], strides = [1, 1]} : vector<64x157xbf16> to vector<1x157xbf16>
    %c0_113 = arith.constant 0 : index
    %c0_114 = arith.constant 0 : index
    %122 = vector.load %arg11[%c0_113, %c0_114] : memref<1x16384xbf16, #tpu.memory_space<vmem>>, vector<1x157xbf16>
    tpu.vector_store %arg11[%c0_113, %c0_114], %121 {strides = array<i32>} : memref<1x16384xbf16, #tpu.memory_space<vmem>>, vector<1x157xbf16>,
    %123 = vector.extract_strided_slice %120 {offsets = [1, 0], sizes = [1, 157], strides = [1, 1]} : vector<64x157xbf16> to vector<1x157xbf16>
    %c0_115 = arith.constant 0 : index
    %c256_116 = arith.constant 256 : index
    %124 = vector.load %arg11[%c0_115, %c256_116] : memref<1x16384xbf16, #tpu.memory_space<vmem>>, vector<1x157xbf16>
    tpu.vector_store %arg11[%c0_115, %c256_116], %123 {strides = array<i32>} : memref<1x16384xbf16, #tpu.memory_space<vmem>>, vector<1x157xbf16>,
    %125 = vector.extract_strided_slice %120 {offsets = [2, 0], sizes = [1, 157], strides = [1, 1]} : vector<64x157xbf16> to vector<1x157xbf16>
    %c0_117 = arith.constant 0 : index
    %c512 = arith.constant 512 : index
    %126 = vector.load %arg11[%c0_117, %c512] : memref<1x16384xbf16, #tpu.memory_space<vmem>>, vector<1x157xbf16>
    tpu.vector_store %arg11[%c0_117, %c512], %125 {strides = array<i32>} : memref<1x16384xbf16, #tpu.memory_space<vmem>>, vector<1x157xbf16>,
    %127 = vector.extract_strided_slice %120 {offsets = [3, 0], sizes = [1, 157], strides = [1, 1]} : vector<64x157xbf16> to vector<1x157xbf16>
    %c0_118 = arith.constant 0 : index
    %c768 = arith.constant 768 : index
    %128 = vector.load %arg11[%c0_118, %c768] : memref<1x16384xbf16, #tpu.memory_space<vmem>>, vector<1x157xbf16>
    tpu.vector_store %arg11[%c0_118, %c768], %127 {strides = array<i32>} : memref<1x16384xbf16, #tpu.memory_space<vmem>>, vector<1x157xbf16>,
    %129 = vector.extract_strided_slice %120 {offsets = [4, 0], sizes = [1, 157], strides = [1, 1]} : vector<64x157xbf16> to vector<1x157xbf16>
    %c0_119 = arith.constant 0 : index
    %c1024 = arith.constant 1024 : index
    %130 = vector.load %arg11[%c0_119, %c1024] : memref<1x16384xbf16, #tpu.memory_space<vmem>>, vector<1x157xbf16>
    tpu.vector_store %arg11[%c0_119, %c1024], %129 {strides = array<i32>} : memref<1x16384xbf16, #tpu.memory_space<vmem>>, vector<1x157xbf16>,
    %131 = vector.extract_strided_slice %120 {offsets = [5, 0], sizes = [1, 157], strides = [1, 1]} : vector<64x157xbf16> to vector<1x157xbf16>
    %c0_120 = arith.constant 0 : index
    %c1280 = arith.constant 1280 : index
    %132 = vector.load %arg11[%c0_120, %c1280] : memref<1x16384xbf16, #tpu.memory_space<vmem>>, vector<1x157xbf16>
    tpu.vector_store %arg11[%c0_120, %c1280], %131 {strides = array<i32>} : memref<1x16384xbf16, #tpu.memory_space<vmem>>, vector<1x157xbf16>,
    %133 = vector.extract_strided_slice %120 {offsets = [6, 0], sizes = [1, 157], strides = [1, 1]} : vector<64x157xbf16> to vector<1x157xbf16>
    %c0_121 = arith.constant 0 : index
    %c1536 = arith.constant 1536 : index
    %134 = vector.load %arg11[%c0_121, %c1536] : memref<1x16384xbf16, #tpu.memory_space<vmem>>, vector<1x157xbf16>
    tpu.vector_store %arg11[%c0_121, %c1536], %133 {strides = array<i32>} : memref<1x16384xbf16, #tpu.memory_space<vmem>>, vector<1x157xbf16>,
    %135 = vector.extract_strided_slice %120 {offsets = [7, 0], sizes = [1, 157], strides = [1, 1]} : vector<64x157xbf16> to vector<1x157xbf16>
    %c0_122 = arith.constant 0 : index
    %c1792 = arith.constant 1792 : index
    %136 = vector.load %arg11[%c0_122, %c1792] : memref<1x16384xbf16, #tpu.memory_space<vmem>>, vector<1x157xbf16>
    tpu.vector_store %arg11[%c0_122, %c1792], %135 {strides = array<i32>} : memref<1x16384xbf16, #tpu.memory_space<vmem>>, vector<1x157xbf16>,
    %137 = vector.extract_strided_slice %120 {offsets = [8, 0], sizes = [1, 157], strides = [1, 1]} : vector<64x157xbf16> to vector<1x157xbf16>
    %c0_123 = arith.constant 0 : index
    %c2048 = arith.constant 2048 : index
    %138 = vector.load %arg11[%c0_123, %c2048] : memref<1x16384xbf16, #tpu.memory_space<vmem>>, vector<1x157xbf16>
    tpu.vector_store %arg11[%c0_123, %c2048], %137 {strides = array<i32>} : memref<1x16384xbf16, #tpu.memory_space<vmem>>, vector<1x157xbf16>,
    %139 = vector.extract_strided_slice %120 {offsets = [9, 0], sizes = [1, 157], strides = [1, 1]} : vector<64x157xbf16> to vector<1x157xbf16>
    %c0_124 = arith.constant 0 : index
    %c2304 = arith.constant 2304 : index
    %140 = vector.load %arg11[%c0_124, %c2304] : memref<1x16384xbf16, #tpu.memory_space<vmem>>, vector<1x157xbf16>
    tpu.vector_store %arg11[%c0_124, %c2304], %139 {strides = array<i32>} : memref<1x16384xbf16, #tpu.memory_space<vmem>>, vector<1x157xbf16>,
    %141 = vector.extract_strided_slice %120 {offsets = [10, 0], sizes = [1, 157], strides = [1, 1]} : vector<64x157xbf16> to vector<1x157xbf16>
    %c0_125 = arith.constant 0 : index
    %c2560 = arith.constant 2560 : index
    %142 = vector.load %arg11[%c0_125, %c2560] : memref<1x16384xbf16, #tpu.memory_space<vmem>>, vector<1x157xbf16>
    tpu.vector_store %arg11[%c0_125, %c2560], %141 {strides = array<i32>} : memref<1x16384xbf16, #tpu.memory_space<vmem>>, vector<1x157xbf16>,
    %143 = vector.extract_strided_slice %120 {offsets = [11, 0], sizes = [1, 157], strides = [1, 1]} : vector<64x157xbf16> to vector<1x157xbf16>
    %c0_126 = arith.constant 0 : index
    %c2816 = arith.constant 2816 : index
    %144 = vector.load %arg11[%c0_126, %c2816] : memref<1x16384xbf16, #tpu.memory_space<vmem>>, vector<1x157xbf16>
    tpu.vector_store %arg11[%c0_126, %c2816], %143 {strides = array<i32>} : memref<1x16384xbf16, #tpu.memory_space<vmem>>, vector<1x157xbf16>,
    %145 = vector.extract_strided_slice %120 {offsets = [12, 0], sizes = [1, 157], strides = [1, 1]} : vector<64x157xbf16> to vector<1x157xbf16>
    %c0_127 = arith.constant 0 : index
    %c3072 = arith.constant 3072 : index
    %146 = vector.load %arg11[%c0_127, %c3072] : memref<1x16384xbf16, #tpu.memory_space<vmem>>, vector<1x157xbf16>
    tpu.vector_store %arg11[%c0_127, %c3072], %145 {strides = array<i32>} : memref<1x16384xbf16, #tpu.memory_space<vmem>>, vector<1x157xbf16>,
    %147 = vector.extract_strided_slice %120 {offsets = [13, 0], sizes = [1, 157], strides = [1, 1]} : vector<64x157xbf16> to vector<1x157xbf16>
    %c0_128 = arith.constant 0 : index
    %c3328 = arith.constant 3328 : index
    %148 = vector.load %arg11[%c0_128, %c3328] : memref<1x16384xbf16, #tpu.memory_space<vmem>>, vector<1x157xbf16>
    tpu.vector_store %arg11[%c0_128, %c3328], %147 {strides = array<i32>} : memref<1x16384xbf16, #tpu.memory_space<vmem>>, vector<1x157xbf16>,
    %149 = vector.extract_strided_slice %120 {offsets = [14, 0], sizes = [1, 157], strides = [1, 1]} : vector<64x157xbf16> to vector<1x157xbf16>
    %c0_129 = arith.constant 0 : index
    %c3584 = arith.constant 3584 : index
    %150 = vector.load %arg11[%c0_129, %c3584] : memref<1x16384xbf16, #tpu.memory_space<vmem>>, vector<1x157xbf16>
    tpu.vector_store %arg11[%c0_129, %c3584], %149 {strides = array<i32>} : memref<1x16384xbf16, #tpu.memory_space<vmem>>, vector<1x157xbf16>,
    %151 = vector.extract_strided_slice %120 {offsets = [15, 0], sizes = [1, 157], strides = [1, 1]} : vector<64x157xbf16> to vector<1x157xbf16>
    %c0_130 = arith.constant 0 : index
    %c3840 = arith.constant 3840 : index
    %152 = vector.load %arg11[%c0_130, %c3840] : memref<1x16384xbf16, #tpu.memory_space<vmem>>, vector<1x157xbf16>
    tpu.vector_store %arg11[%c0_130, %c3840], %151 {strides = array<i32>} : memref<1x16384xbf16, #tpu.memory_space<vmem>>, vector<1x157xbf16>,
    %153 = vector.extract_strided_slice %120 {offsets = [16, 0], sizes = [1, 157], strides = [1, 1]} : vector<64x157xbf16> to vector<1x157xbf16>
    %c0_131 = arith.constant 0 : index
    %c4096 = arith.constant 4096 : index
    %154 = vector.load %arg11[%c0_131, %c4096] : memref<1x16384xbf16, #tpu.memory_space<vmem>>, vector<1x157xbf16>
    tpu.vector_store %arg11[%c0_131, %c4096], %153 {strides = array<i32>} : memref<1x16384xbf16, #tpu.memory_space<vmem>>, vector<1x157xbf16>,
    %155 = vector.extract_strided_slice %120 {offsets = [17, 0], sizes = [1, 157], strides = [1, 1]} : vector<64x157xbf16> to vector<1x157xbf16>
    %c0_132 = arith.constant 0 : index
    %c4352 = arith.constant 4352 : index
    %156 = vector.load %arg11[%c0_132, %c4352] : memref<1x16384xbf16, #tpu.memory_space<vmem>>, vector<1x157xbf16>
    tpu.vector_store %arg11[%c0_132, %c4352], %155 {strides = array<i32>} : memref<1x16384xbf16, #tpu.memory_space<vmem>>, vector<1x157xbf16>,
    %157 = vector.extract_strided_slice %120 {offsets = [18, 0], sizes = [1, 157], strides = [1, 1]} : vector<64x157xbf16> to vector<1x157xbf16>
    %c0_133 = arith.constant 0 : index
    %c4608 = arith.constant 4608 : index
    %158 = vector.load %arg11[%c0_133, %c4608] : memref<1x16384xbf16, #tpu.memory_space<vmem>>, vector<1x157xbf16>
    tpu.vector_store %arg11[%c0_133, %c4608], %157 {strides = array<i32>} : memref<1x16384xbf16, #tpu.memory_space<vmem>>, vector<1x157xbf16>,
    %159 = vector.extract_strided_slice %120 {offsets = [19, 0], sizes = [1, 157], strides = [1, 1]} : vector<64x157xbf16> to vector<1x157xbf16>
    %c0_134 = arith.constant 0 : index
    %c4864 = arith.constant 4864 : index
    %160 = vector.load %arg11[%c0_134, %c4864] : memref<1x16384xbf16, #tpu.memory_space<vmem>>, vector<1x157xbf16>
    tpu.vector_store %arg11[%c0_134, %c4864], %159 {strides = array<i32>} : memref<1x16384xbf16, #tpu.memory_space<vmem>>, vector<1x157xbf16>,
    %161 = vector.extract_strided_slice %120 {offsets = [20, 0], sizes = [1, 157], strides = [1, 1]} : vector<64x157xbf16> to vector<1x157xbf16>
    %c0_135 = arith.constant 0 : index
    %c5120 = arith.constant 5120 : index
    %162 = vector.load %arg11[%c0_135, %c5120] : memref<1x16384xbf16, #tpu.memory_space<vmem>>, vector<1x157xbf16>
    tpu.vector_store %arg11[%c0_135, %c5120], %161 {strides = array<i32>} : memref<1x16384xbf16, #tpu.memory_space<vmem>>, vector<1x157xbf16>,
    %163 = vector.extract_strided_slice %120 {offsets = [21, 0], sizes = [1, 157], strides = [1, 1]} : vector<64x157xbf16> to vector<1x157xbf16>
    %c0_136 = arith.constant 0 : index
    %c5376 = arith.constant 5376 : index
    %164 = vector.load %arg11[%c0_136, %c5376] : memref<1x16384xbf16, #tpu.memory_space<vmem>>, vector<1x157xbf16>
    tpu.vector_store %arg11[%c0_136, %c5376], %163 {strides = array<i32>} : memref<1x16384xbf16, #tpu.memory_space<vmem>>, vector<1x157xbf16>,
    %165 = vector.extract_strided_slice %120 {offsets = [22, 0], sizes = [1, 157], strides = [1, 1]} : vector<64x157xbf16> to vector<1x157xbf16>
    %c0_137 = arith.constant 0 : index
    %c5632 = arith.constant 5632 : index
    %166 = vector.load %arg11[%c0_137, %c5632] : memref<1x16384xbf16, #tpu.memory_space<vmem>>, vector<1x157xbf16>
    tpu.vector_store %arg11[%c0_137, %c5632], %165 {strides = array<i32>} : memref<1x16384xbf16, #tpu.memory_space<vmem>>, vector<1x157xbf16>,
    %167 = vector.extract_strided_slice %120 {offsets = [23, 0], sizes = [1, 157], strides = [1, 1]} : vector<64x157xbf16> to vector<1x157xbf16>
    %c0_138 = arith.constant 0 : index
    %c5888 = arith.constant 5888 : index
    %168 = vector.load %arg11[%c0_138, %c5888] : memref<1x16384xbf16, #tpu.memory_space<vmem>>, vector<1x157xbf16>
    tpu.vector_store %arg11[%c0_138, %c5888], %167 {strides = array<i32>} : memref<1x16384xbf16, #tpu.memory_space<vmem>>, vector<1x157xbf16>,
    %169 = vector.extract_strided_slice %120 {offsets = [24, 0], sizes = [1, 157], strides = [1, 1]} : vector<64x157xbf16> to vector<1x157xbf16>
    %c0_139 = arith.constant 0 : index
    %c6144 = arith.constant 6144 : index
    %170 = vector.load %arg11[%c0_139, %c6144] : memref<1x16384xbf16, #tpu.memory_space<vmem>>, vector<1x157xbf16>
    tpu.vector_store %arg11[%c0_139, %c6144], %169 {strides = array<i32>} : memref<1x16384xbf16, #tpu.memory_space<vmem>>, vector<1x157xbf16>,
    %171 = vector.extract_strided_slice %120 {offsets = [25, 0], sizes = [1, 157], strides = [1, 1]} : vector<64x157xbf16> to vector<1x157xbf16>
    %c0_140 = arith.constant 0 : index
    %c6400 = arith.constant 6400 : index
    %172 = vector.load %arg11[%c0_140, %c6400] : memref<1x16384xbf16, #tpu.memory_space<vmem>>, vector<1x157xbf16>
    tpu.vector_store %arg11[%c0_140, %c6400], %171 {strides = array<i32>} : memref<1x16384xbf16, #tpu.memory_space<vmem>>, vector<1x157xbf16>,
    %173 = vector.extract_strided_slice %120 {offsets = [26, 0], sizes = [1, 157], strides = [1, 1]} : vector<64x157xbf16> to vector<1x157xbf16>
    %c0_141 = arith.constant 0 : index
    %c6656 = arith.constant 6656 : index
    %174 = vector.load %arg11[%c0_141, %c6656] : memref<1x16384xbf16, #tpu.memory_space<vmem>>, vector<1x157xbf16>
    tpu.vector_store %arg11[%c0_141, %c6656], %173 {strides = array<i32>} : memref<1x16384xbf16, #tpu.memory_space<vmem>>, vector<1x157xbf16>,
    %175 = vector.extract_strided_slice %120 {offsets = [27, 0], sizes = [1, 157], strides = [1, 1]} : vector<64x157xbf16> to vector<1x157xbf16>
    %c0_142 = arith.constant 0 : index
    %c6912 = arith.constant 6912 : index
    %176 = vector.load %arg11[%c0_142, %c6912] : memref<1x16384xbf16, #tpu.memory_space<vmem>>, vector<1x157xbf16>
    tpu.vector_store %arg11[%c0_142, %c6912], %175 {strides = array<i32>} : memref<1x16384xbf16, #tpu.memory_space<vmem>>, vector<1x157xbf16>,
    %177 = vector.extract_strided_slice %120 {offsets = [28, 0], sizes = [1, 157], strides = [1, 1]} : vector<64x157xbf16> to vector<1x157xbf16>
    %c0_143 = arith.constant 0 : index
    %c7168 = arith.constant 7168 : index
    %178 = vector.load %arg11[%c0_143, %c7168] : memref<1x16384xbf16, #tpu.memory_space<vmem>>, vector<1x157xbf16>
    tpu.vector_store %arg11[%c0_143, %c7168], %177 {strides = array<i32>} : memref<1x16384xbf16, #tpu.memory_space<vmem>>, vector<1x157xbf16>,
    %179 = vector.extract_strided_slice %120 {offsets = [29, 0], sizes = [1, 157], strides = [1, 1]} : vector<64x157xbf16> to vector<1x157xbf16>
    %c0_144 = arith.constant 0 : index
    %c7424 = arith.constant 7424 : index
    %180 = vector.load %arg11[%c0_144, %c7424] : memref<1x16384xbf16, #tpu.memory_space<vmem>>, vector<1x157xbf16>
    tpu.vector_store %arg11[%c0_144, %c7424], %179 {strides = array<i32>} : memref<1x16384xbf16, #tpu.memory_space<vmem>>, vector<1x157xbf16>,
    %181 = vector.extract_strided_slice %120 {offsets = [30, 0], sizes = [1, 157], strides = [1, 1]} : vector<64x157xbf16> to vector<1x157xbf16>
    %c0_145 = arith.constant 0 : index
    %c7680 = arith.constant 7680 : index
    %182 = vector.load %arg11[%c0_145, %c7680] : memref<1x16384xbf16, #tpu.memory_space<vmem>>, vector<1x157xbf16>
    tpu.vector_store %arg11[%c0_145, %c7680], %181 {strides = array<i32>} : memref<1x16384xbf16, #tpu.memory_space<vmem>>, vector<1x157xbf16>,
    %183 = vector.extract_strided_slice %120 {offsets = [31, 0], sizes = [1, 157], strides = [1, 1]} : vector<64x157xbf16> to vector<1x157xbf16>
    %c0_146 = arith.constant 0 : index
    %c7936 = arith.constant 7936 : index
    %184 = vector.load %arg11[%c0_146, %c7936] : memref<1x16384xbf16, #tpu.memory_space<vmem>>, vector<1x157xbf16>
    tpu.vector_store %arg11[%c0_146, %c7936], %183 {strides = array<i32>} : memref<1x16384xbf16, #tpu.memory_space<vmem>>, vector<1x157xbf16>,
    %185 = vector.extract_strided_slice %120 {offsets = [32, 0], sizes = [1, 157], strides = [1, 1]} : vector<64x157xbf16> to vector<1x157xbf16>
    %c0_147 = arith.constant 0 : index
    %c8192 = arith.constant 8192 : index
    %186 = vector.load %arg11[%c0_147, %c8192] : memref<1x16384xbf16, #tpu.memory_space<vmem>>, vector<1x157xbf16>
    tpu.vector_store %arg11[%c0_147, %c8192], %185 {strides = array<i32>} : memref<1x16384xbf16, #tpu.memory_space<vmem>>, vector<1x157xbf16>,
    %187 = vector.extract_strided_slice %120 {offsets = [33, 0], sizes = [1, 157], strides = [1, 1]} : vector<64x157xbf16> to vector<1x157xbf16>
    %c0_148 = arith.constant 0 : index
    %c8448 = arith.constant 8448 : index
    %188 = vector.load %arg11[%c0_148, %c8448] : memref<1x16384xbf16, #tpu.memory_space<vmem>>, vector<1x157xbf16>
    tpu.vector_store %arg11[%c0_148, %c8448], %187 {strides = array<i32>} : memref<1x16384xbf16, #tpu.memory_space<vmem>>, vector<1x157xbf16>,
    %189 = vector.extract_strided_slice %120 {offsets = [34, 0], sizes = [1, 157], strides = [1, 1]} : vector<64x157xbf16> to vector<1x157xbf16>
    %c0_149 = arith.constant 0 : index
    %c8704 = arith.constant 8704 : index
    %190 = vector.load %arg11[%c0_149, %c8704] : memref<1x16384xbf16, #tpu.memory_space<vmem>>, vector<1x157xbf16>
    tpu.vector_store %arg11[%c0_149, %c8704], %189 {strides = array<i32>} : memref<1x16384xbf16, #tpu.memory_space<vmem>>, vector<1x157xbf16>,
    %191 = vector.extract_strided_slice %120 {offsets = [35, 0], sizes = [1, 157], strides = [1, 1]} : vector<64x157xbf16> to vector<1x157xbf16>
    %c0_150 = arith.constant 0 : index
    %c8960 = arith.constant 8960 : index
    %192 = vector.load %arg11[%c0_150, %c8960] : memref<1x16384xbf16, #tpu.memory_space<vmem>>, vector<1x157xbf16>
    tpu.vector_store %arg11[%c0_150, %c8960], %191 {strides = array<i32>} : memref<1x16384xbf16, #tpu.memory_space<vmem>>, vector<1x157xbf16>,
    %193 = vector.extract_strided_slice %120 {offsets = [36, 0], sizes = [1, 157], strides = [1, 1]} : vector<64x157xbf16> to vector<1x157xbf16>
    %c0_151 = arith.constant 0 : index
    %c9216 = arith.constant 9216 : index
    %194 = vector.load %arg11[%c0_151, %c9216] : memref<1x16384xbf16, #tpu.memory_space<vmem>>, vector<1x157xbf16>
    tpu.vector_store %arg11[%c0_151, %c9216], %193 {strides = array<i32>} : memref<1x16384xbf16, #tpu.memory_space<vmem>>, vector<1x157xbf16>,
    %195 = vector.extract_strided_slice %120 {offsets = [37, 0], sizes = [1, 157], strides = [1, 1]} : vector<64x157xbf16> to vector<1x157xbf16>
    %c0_152 = arith.constant 0 : index
    %c9472 = arith.constant 9472 : index
    %196 = vector.load %arg11[%c0_152, %c9472] : memref<1x16384xbf16, #tpu.memory_space<vmem>>, vector<1x157xbf16>
    tpu.vector_store %arg11[%c0_152, %c9472], %195 {strides = array<i32>} : memref<1x16384xbf16, #tpu.memory_space<vmem>>, vector<1x157xbf16>,
    %197 = vector.extract_strided_slice %120 {offsets = [38, 0], sizes = [1, 157], strides = [1, 1]} : vector<64x157xbf16> to vector<1x157xbf16>
    %c0_153 = arith.constant 0 : index
    %c9728 = arith.constant 9728 : index
    %198 = vector.load %arg11[%c0_153, %c9728] : memref<1x16384xbf16, #tpu.memory_space<vmem>>, vector<1x157xbf16>
    tpu.vector_store %arg11[%c0_153, %c9728], %197 {strides = array<i32>} : memref<1x16384xbf16, #tpu.memory_space<vmem>>, vector<1x157xbf16>,
    %199 = vector.extract_strided_slice %120 {offsets = [39, 0], sizes = [1, 157], strides = [1, 1]} : vector<64x157xbf16> to vector<1x157xbf16>
    %c0_154 = arith.constant 0 : index
    %c9984 = arith.constant 9984 : index
    %200 = vector.load %arg11[%c0_154, %c9984] : memref<1x16384xbf16, #tpu.memory_space<vmem>>, vector<1x157xbf16>
    tpu.vector_store %arg11[%c0_154, %c9984], %199 {strides = array<i32>} : memref<1x16384xbf16, #tpu.memory_space<vmem>>, vector<1x157xbf16>,
    %201 = vector.extract_strided_slice %120 {offsets = [40, 0], sizes = [1, 157], strides = [1, 1]} : vector<64x157xbf16> to vector<1x157xbf16>
    %c0_155 = arith.constant 0 : index
    %c10240 = arith.constant 10240 : index
    %202 = vector.load %arg11[%c0_155, %c10240] : memref<1x16384xbf16, #tpu.memory_space<vmem>>, vector<1x157xbf16>
    tpu.vector_store %arg11[%c0_155, %c10240], %201 {strides = array<i32>} : memref<1x16384xbf16, #tpu.memory_space<vmem>>, vector<1x157xbf16>,
    %203 = vector.extract_strided_slice %120 {offsets = [41, 0], sizes = [1, 157], strides = [1, 1]} : vector<64x157xbf16> to vector<1x157xbf16>
    %c0_156 = arith.constant 0 : index
    %c10496 = arith.constant 10496 : index
    %204 = vector.load %arg11[%c0_156, %c10496] : memref<1x16384xbf16, #tpu.memory_space<vmem>>, vector<1x157xbf16>
    tpu.vector_store %arg11[%c0_156, %c10496], %203 {strides = array<i32>} : memref<1x16384xbf16, #tpu.memory_space<vmem>>, vector<1x157xbf16>,
    %205 = vector.extract_strided_slice %120 {offsets = [42, 0], sizes = [1, 157], strides = [1, 1]} : vector<64x157xbf16> to vector<1x157xbf16>
    %c0_157 = arith.constant 0 : index
    %c10752 = arith.constant 10752 : index
    %206 = vector.load %arg11[%c0_157, %c10752] : memref<1x16384xbf16, #tpu.memory_space<vmem>>, vector<1x157xbf16>
    tpu.vector_store %arg11[%c0_157, %c10752], %205 {strides = array<i32>} : memref<1x16384xbf16, #tpu.memory_space<vmem>>, vector<1x157xbf16>,
    %207 = vector.extract_strided_slice %120 {offsets = [43, 0], sizes = [1, 157], strides = [1, 1]} : vector<64x157xbf16> to vector<1x157xbf16>
    %c0_158 = arith.constant 0 : index
    %c11008 = arith.constant 11008 : index
    %208 = vector.load %arg11[%c0_158, %c11008] : memref<1x16384xbf16, #tpu.memory_space<vmem>>, vector<1x157xbf16>
    tpu.vector_store %arg11[%c0_158, %c11008], %207 {strides = array<i32>} : memref<1x16384xbf16, #tpu.memory_space<vmem>>, vector<1x157xbf16>,
    %209 = vector.extract_strided_slice %120 {offsets = [44, 0], sizes = [1, 157], strides = [1, 1]} : vector<64x157xbf16> to vector<1x157xbf16>
    %c0_159 = arith.constant 0 : index
    %c11264 = arith.constant 11264 : index
    %210 = vector.load %arg11[%c0_159, %c11264] : memref<1x16384xbf16, #tpu.memory_space<vmem>>, vector<1x157xbf16>
    tpu.vector_store %arg11[%c0_159, %c11264], %209 {strides = array<i32>} : memref<1x16384xbf16, #tpu.memory_space<vmem>>, vector<1x157xbf16>,
    %211 = vector.extract_strided_slice %120 {offsets = [45, 0], sizes = [1, 157], strides = [1, 1]} : vector<64x157xbf16> to vector<1x157xbf16>
    %c0_160 = arith.constant 0 : index
    %c11520 = arith.constant 11520 : index
    %212 = vector.load %arg11[%c0_160, %c11520] : memref<1x16384xbf16, #tpu.memory_space<vmem>>, vector<1x157xbf16>
    tpu.vector_store %arg11[%c0_160, %c11520], %211 {strides = array<i32>} : memref<1x16384xbf16, #tpu.memory_space<vmem>>, vector<1x157xbf16>,
    %213 = vector.extract_strided_slice %120 {offsets = [46, 0], sizes = [1, 157], strides = [1, 1]} : vector<64x157xbf16> to vector<1x157xbf16>
    %c0_161 = arith.constant 0 : index
    %c11776 = arith.constant 11776 : index
    %214 = vector.load %arg11[%c0_161, %c11776] : memref<1x16384xbf16, #tpu.memory_space<vmem>>, vector<1x157xbf16>
    tpu.vector_store %arg11[%c0_161, %c11776], %213 {strides = array<i32>} : memref<1x16384xbf16, #tpu.memory_space<vmem>>, vector<1x157xbf16>,
    %215 = vector.extract_strided_slice %120 {offsets = [47, 0], sizes = [1, 157], strides = [1, 1]} : vector<64x157xbf16> to vector<1x157xbf16>
    %c0_162 = arith.constant 0 : index
    %c12032 = arith.constant 12032 : index
    %216 = vector.load %arg11[%c0_162, %c12032] : memref<1x16384xbf16, #tpu.memory_space<vmem>>, vector<1x157xbf16>
    tpu.vector_store %arg11[%c0_162, %c12032], %215 {strides = array<i32>} : memref<1x16384xbf16, #tpu.memory_space<vmem>>, vector<1x157xbf16>,
    %217 = vector.extract_strided_slice %120 {offsets = [48, 0], sizes = [1, 157], strides = [1, 1]} : vector<64x157xbf16> to vector<1x157xbf16>
    %c0_163 = arith.constant 0 : index
    %c12288 = arith.constant 12288 : index
    %218 = vector.load %arg11[%c0_163, %c12288] : memref<1x16384xbf16, #tpu.memory_space<vmem>>, vector<1x157xbf16>
    tpu.vector_store %arg11[%c0_163, %c12288], %217 {strides = array<i32>} : memref<1x16384xbf16, #tpu.memory_space<vmem>>, vector<1x157xbf16>,
    %219 = vector.extract_strided_slice %120 {offsets = [49, 0], sizes = [1, 157], strides = [1, 1]} : vector<64x157xbf16> to vector<1x157xbf16>
    %c0_164 = arith.constant 0 : index
    %c12544 = arith.constant 12544 : index
    %220 = vector.load %arg11[%c0_164, %c12544] : memref<1x16384xbf16, #tpu.memory_space<vmem>>, vector<1x157xbf16>
    tpu.vector_store %arg11[%c0_164, %c12544], %219 {strides = array<i32>} : memref<1x16384xbf16, #tpu.memory_space<vmem>>, vector<1x157xbf16>,
    %221 = vector.extract_strided_slice %120 {offsets = [50, 0], sizes = [1, 157], strides = [1, 1]} : vector<64x157xbf16> to vector<1x157xbf16>
    %c0_165 = arith.constant 0 : index
    %c12800 = arith.constant 12800 : index
    %222 = vector.load %arg11[%c0_165, %c12800] : memref<1x16384xbf16, #tpu.memory_space<vmem>>, vector<1x157xbf16>
    tpu.vector_store %arg11[%c0_165, %c12800], %221 {strides = array<i32>} : memref<1x16384xbf16, #tpu.memory_space<vmem>>, vector<1x157xbf16>,
    %223 = vector.extract_strided_slice %120 {offsets = [51, 0], sizes = [1, 157], strides = [1, 1]} : vector<64x157xbf16> to vector<1x157xbf16>
    %c0_166 = arith.constant 0 : index
    %c13056 = arith.constant 13056 : index
    %224 = vector.load %arg11[%c0_166, %c13056] : memref<1x16384xbf16, #tpu.memory_space<vmem>>, vector<1x157xbf16>
    tpu.vector_store %arg11[%c0_166, %c13056], %223 {strides = array<i32>} : memref<1x16384xbf16, #tpu.memory_space<vmem>>, vector<1x157xbf16>,
    %225 = vector.extract_strided_slice %120 {offsets = [52, 0], sizes = [1, 157], strides = [1, 1]} : vector<64x157xbf16> to vector<1x157xbf16>
    %c0_167 = arith.constant 0 : index
    %c13312 = arith.constant 13312 : index
    %226 = vector.load %arg11[%c0_167, %c13312] : memref<1x16384xbf16, #tpu.memory_space<vmem>>, vector<1x157xbf16>
    tpu.vector_store %arg11[%c0_167, %c13312], %225 {strides = array<i32>} : memref<1x16384xbf16, #tpu.memory_space<vmem>>, vector<1x157xbf16>,
    %227 = vector.extract_strided_slice %120 {offsets = [53, 0], sizes = [1, 157], strides = [1, 1]} : vector<64x157xbf16> to vector<1x157xbf16>
    %c0_168 = arith.constant 0 : index
    %c13568 = arith.constant 13568 : index
    %228 = vector.load %arg11[%c0_168, %c13568] : memref<1x16384xbf16, #tpu.memory_space<vmem>>, vector<1x157xbf16>
    tpu.vector_store %arg11[%c0_168, %c13568], %227 {strides = array<i32>} : memref<1x16384xbf16, #tpu.memory_space<vmem>>, vector<1x157xbf16>,
    %229 = vector.extract_strided_slice %120 {offsets = [54, 0], sizes = [1, 157], strides = [1, 1]} : vector<64x157xbf16> to vector<1x157xbf16>
    %c0_169 = arith.constant 0 : index
    %c13824 = arith.constant 13824 : index
    %230 = vector.load %arg11[%c0_169, %c13824] : memref<1x16384xbf16, #tpu.memory_space<vmem>>, vector<1x157xbf16>
    tpu.vector_store %arg11[%c0_169, %c13824], %229 {strides = array<i32>} : memref<1x16384xbf16, #tpu.memory_space<vmem>>, vector<1x157xbf16>,
    %231 = vector.extract_strided_slice %120 {offsets = [55, 0], sizes = [1, 157], strides = [1, 1]} : vector<64x157xbf16> to vector<1x157xbf16>
    %c0_170 = arith.constant 0 : index
    %c14080 = arith.constant 14080 : index
    %232 = vector.load %arg11[%c0_170, %c14080] : memref<1x16384xbf16, #tpu.memory_space<vmem>>, vector<1x157xbf16>
    tpu.vector_store %arg11[%c0_170, %c14080], %231 {strides = array<i32>} : memref<1x16384xbf16, #tpu.memory_space<vmem>>, vector<1x157xbf16>,
    %233 = vector.extract_strided_slice %120 {offsets = [56, 0], sizes = [1, 157], strides = [1, 1]} : vector<64x157xbf16> to vector<1x157xbf16>
    %c0_171 = arith.constant 0 : index
    %c14336 = arith.constant 14336 : index
    %234 = vector.load %arg11[%c0_171, %c14336] : memref<1x16384xbf16, #tpu.memory_space<vmem>>, vector<1x157xbf16>
    tpu.vector_store %arg11[%c0_171, %c14336], %233 {strides = array<i32>} : memref<1x16384xbf16, #tpu.memory_space<vmem>>, vector<1x157xbf16>,
    %235 = vector.extract_strided_slice %120 {offsets = [57, 0], sizes = [1, 157], strides = [1, 1]} : vector<64x157xbf16> to vector<1x157xbf16>
    %c0_172 = arith.constant 0 : index
    %c14592 = arith.constant 14592 : index
    %236 = vector.load %arg11[%c0_172, %c14592] : memref<1x16384xbf16, #tpu.memory_space<vmem>>, vector<1x157xbf16>
    tpu.vector_store %arg11[%c0_172, %c14592], %235 {strides = array<i32>} : memref<1x16384xbf16, #tpu.memory_space<vmem>>, vector<1x157xbf16>,
    %237 = vector.extract_strided_slice %120 {offsets = [58, 0], sizes = [1, 157], strides = [1, 1]} : vector<64x157xbf16> to vector<1x157xbf16>
    %c0_173 = arith.constant 0 : index
    %c14848 = arith.constant 14848 : index
    %238 = vector.load %arg11[%c0_173, %c14848] : memref<1x16384xbf16, #tpu.memory_space<vmem>>, vector<1x157xbf16>
    tpu.vector_store %arg11[%c0_173, %c14848], %237 {strides = array<i32>} : memref<1x16384xbf16, #tpu.memory_space<vmem>>, vector<1x157xbf16>,
    %239 = vector.extract_strided_slice %120 {offsets = [59, 0], sizes = [1, 157], strides = [1, 1]} : vector<64x157xbf16> to vector<1x157xbf16>
    %c0_174 = arith.constant 0 : index
    %c15104 = arith.constant 15104 : index
    %240 = vector.load %arg11[%c0_174, %c15104] : memref<1x16384xbf16, #tpu.memory_space<vmem>>, vector<1x157xbf16>
    tpu.vector_store %arg11[%c0_174, %c15104], %239 {strides = array<i32>} : memref<1x16384xbf16, #tpu.memory_space<vmem>>, vector<1x157xbf16>,
    %241 = vector.extract_strided_slice %120 {offsets = [60, 0], sizes = [1, 157], strides = [1, 1]} : vector<64x157xbf16> to vector<1x157xbf16>
    %c0_175 = arith.constant 0 : index
    %c15360 = arith.constant 15360 : index
    %242 = vector.load %arg11[%c0_175, %c15360] : memref<1x16384xbf16, #tpu.memory_space<vmem>>, vector<1x157xbf16>
    tpu.vector_store %arg11[%c0_175, %c15360], %241 {strides = array<i32>} : memref<1x16384xbf16, #tpu.memory_space<vmem>>, vector<1x157xbf16>,
    %243 = vector.extract_strided_slice %120 {offsets = [61, 0], sizes = [1, 157], strides = [1, 1]} : vector<64x157xbf16> to vector<1x157xbf16>
    %c0_176 = arith.constant 0 : index
    %c15616 = arith.constant 15616 : index
    %244 = vector.load %arg11[%c0_176, %c15616] : memref<1x16384xbf16, #tpu.memory_space<vmem>>, vector<1x157xbf16>
    tpu.vector_store %arg11[%c0_176, %c15616], %243 {strides = array<i32>} : memref<1x16384xbf16, #tpu.memory_space<vmem>>, vector<1x157xbf16>,
    %245 = vector.extract_strided_slice %120 {offsets = [62, 0], sizes = [1, 157], strides = [1, 1]} : vector<64x157xbf16> to vector<1x157xbf16>
    %c0_177 = arith.constant 0 : index
    %c15872 = arith.constant 15872 : index
    %246 = vector.load %arg11[%c0_177, %c15872] : memref<1x16384xbf16, #tpu.memory_space<vmem>>, vector<1x157xbf16>
    tpu.vector_store %arg11[%c0_177, %c15872], %245 {strides = array<i32>} : memref<1x16384xbf16, #tpu.memory_space<vmem>>, vector<1x157xbf16>,
    %247 = vector.extract_strided_slice %120 {offsets = [63, 0], sizes = [1, 157], strides = [1, 1]} : vector<64x157xbf16> to vector<1x157xbf16>
    %c0_178 = arith.constant 0 : index
    %c16128 = arith.constant 16128 : index
    %248 = vector.load %arg11[%c0_178, %c16128] : memref<1x16384xbf16, #tpu.memory_space<vmem>>, vector<1x157xbf16>
    tpu.vector_store %arg11[%c0_178, %c16128], %247 {strides = array<i32>} : memref<1x16384xbf16, #tpu.memory_space<vmem>>, vector<1x157xbf16>,
    %c0_179 = arith.constant 0 : index
    %c0_180 = arith.constant 0 : index
    %249 = vector.load %arg5[%c0_179, %c0_180] : memref<133x32xf32, #tpu.memory_space<vmem>>, vector<133x32xf32>
    %250 = vector.extract_strided_slice %249 {offsets = [0, 0], sizes = [1, 32], strides = [1, 1]} : vector<133x32xf32> to vector<1x32xf32>
    %251 = vector.extract_strided_slice %249 {offsets = [1, 0], sizes = [32, 32], strides = [1, 1]} : vector<133x32xf32> to vector<32x32xf32>
    %252 = vector.extract_strided_slice %249 {offsets = [33, 0], sizes = [1, 32], strides = [1, 1]} : vector<133x32xf32> to vector<1x32xf32>
    %253 = vector.extract_strided_slice %249 {offsets = [34, 0], sizes = [32, 32], strides = [1, 1]} : vector<133x32xf32> to vector<32x32xf32>
    %254 = vector.extract_strided_slice %249 {offsets = [66, 0], sizes = [1, 32], strides = [1, 1]} : vector<133x32xf32> to vector<1x32xf32>
    %255 = vector.extract_strided_slice %249 {offsets = [67, 0], sizes = [32, 32], strides = [1, 1]} : vector<133x32xf32> to vector<32x32xf32>
    %256 = vector.extract_strided_slice %249 {offsets = [99, 0], sizes = [1, 32], strides = [1, 1]} : vector<133x32xf32> to vector<1x32xf32>
    %257 = vector.extract_strided_slice %249 {offsets = [100, 0], sizes = [32, 32], strides = [1, 1]} : vector<133x32xf32> to vector<32x32xf32>
    %258 = vector.extract_strided_slice %249 {offsets = [132, 0], sizes = [1, 32], strides = [1, 1]} : vector<133x32xf32> to vector<1x32xf32>
    %c0_181 = arith.constant 0 : index
    %c0_182 = arith.constant 0 : index
    %259 = vector.load %arg11[%c0_181, %c0_182] : memref<1x16384xbf16, #tpu.memory_space<vmem>>, vector<1x16384xbf16>
    %c0_183 = arith.constant 0 : index
    %c0_184 = arith.constant 0 : index
    %260 = vector.load %arg4[%c0_183, %c0_184] : memref<16384x32xbf16, #tpu.memory_space<vmem>>, vector<16384x32xbf16>
    %cst_185 = arith.constant dense<0.000000e+00> : vector<1x32xf32>
    %261 = tpu.matmul %259, %260, %cst_185 {dimension_numbers = #tpu.dot_dimension_numbers<[1], [0], [0], [1], [0, 0, 1, 1], [], []>} : vector<1x16384xbf16>, vector<16384x32xbf16>, vector<1x32xf32> -> vector<1x32xf32>
    %262 = arith.addf %261, %250 : vector<1x32xf32>
    %263 = math.tanh %262 : vector<1x32xf32>
    %cst_186 = arith.constant dense<0.000000e+00> : vector<1x32xf32>
    %264 = tpu.matmul %263, %251, %cst_186 {dimension_numbers = #tpu.dot_dimension_numbers<[1], [0], [0], [1], [0, 0, 1, 1], [], []>} : vector<1x32xf32>, vector<32x32xf32>, vector<1x32xf32> -> vector<1x32xf32>
    %265 = arith.addf %264, %252 : vector<1x32xf32>
    %cst_187 = arith.constant 0.00999999977 : f32
    %266 = vector.broadcast %cst_187 : f32 to vector<1x32xf32>
    %267 = arith.mulf %266, %265 : vector<1x32xf32>
    %268 = arith.maximumf %265, %267 : vector<1x32xf32>
    %cst_188 = arith.constant dense<0.000000e+00> : vector<1x32xf32>
    %269 = tpu.matmul %268, %253, %cst_188 {dimension_numbers = #tpu.dot_dimension_numbers<[1], [0], [0], [1], [0, 0, 1, 1], [], []>} : vector<1x32xf32>, vector<32x32xf32>, vector<1x32xf32> -> vector<1x32xf32>
    %270 = arith.addf %269, %254 : vector<1x32xf32>
    %271 = math.tanh %270 : vector<1x32xf32>
    %cst_189 = arith.constant dense<0.000000e+00> : vector<1x32xf32>
    %272 = tpu.matmul %271, %255, %cst_189 {dimension_numbers = #tpu.dot_dimension_numbers<[1], [0], [0], [1], [0, 0, 1, 1], [], []>} : vector<1x32xf32>, vector<32x32xf32>, vector<1x32xf32> -> vector<1x32xf32>
    %273 = arith.addf %272, %256 : vector<1x32xf32>
    %cst_190 = arith.constant 0.00999999977 : f32
    %274 = vector.broadcast %cst_190 : f32 to vector<1x32xf32>
    %275 = arith.mulf %274, %273 : vector<1x32xf32>
    %276 = arith.maximumf %273, %275 : vector<1x32xf32>
    %cst_191 = arith.constant dense<0.000000e+00> : vector<1x32xf32>
    %277 = tpu.matmul %276, %257, %cst_191 {dimension_numbers = #tpu.dot_dimension_numbers<[1], [0], [0], [1], [0, 0, 1, 1], [], []>} : vector<1x32xf32>, vector<32x32xf32>, vector<1x32xf32> -> vector<1x32xf32>
    %278 = arith.addf %277, %258 : vector<1x32xf32>
    %279 = vector.extract_strided_slice %278 {offsets = [0, 0], sizes = [1, 4], strides = [1, 1]} : vector<1x32xf32> to vector<1x4xf32>
    %c0_192 = arith.constant 0 : index
    %c0_193 = arith.constant 0 : index
    %c0_194 = arith.constant 0 : index
    %280 = vector.load %arg6[%c0_192, %c0_193, %c0_194] : memref<1x1x4xf32, #tpu.memory_space<vmem>>, vector<1x1x4xf32>
    %281 = vector.shape_cast %280 : vector<1x1x4xf32> to vector<1x4xf32>
    %282 = vector.shape_cast %279 : vector<1x4xf32> to vector<1x1x4xf32>
    tpu.vector_store %arg6[%c0_192, %c0_193, %c0_194], %282 {strides = array<i32>} : memref<1x1x4xf32, #tpu.memory_space<vmem>>, vector<1x1x4xf32>,
    return
  }
  func.func @transform_0(%arg0: i32) -> (i32, i32, i32) {
    %c0_i32 = arith.constant 0 : i32
    %c0_i32_0 = arith.constant 0 : i32
    %c0_i32_1 = arith.constant 0 : i32
    return %arg0, %c0_i32, %c0_i32_0 : i32, i32, i32
  }
  func.func @transform_1(%arg0: i32) -> (i32, i32) {
    %c0_i32 = arith.constant 0 : i32
    %c0_i32_0 = arith.constant 0 : i32
    %c0_i32_1 = arith.constant 0 : i32
    return %c0_i32, %c0_i32_0 : i32, i32
  }
  func.func @transform_2(%arg0: i32) -> (i32, i32) {
    %c0_i32 = arith.constant 0 : i32
    %c0_i32_0 = arith.constant 0 : i32
    %c0_i32_1 = arith.constant 0 : i32
    return %c0_i32, %c0_i32_0 : i32, i32
  }
  func.func @transform_3(%arg0: i32) -> (i32, i32) {
    %c0_i32 = arith.constant 0 : i32
    %c0_i32_0 = arith.constant 0 : i32
    %c0_i32_1 = arith.constant 0 : i32
    return %c0_i32, %c0_i32_0 : i32, i32
  }
  func.func @transform_4(%arg0: i32) -> (i32, i32) {
    %c0_i32 = arith.constant 0 : i32
    %c0_i32_0 = arith.constant 0 : i32
    %c0_i32_1 = arith.constant 0 : i32
    return %c0_i32, %c0_i32_0 : i32, i32
  }
  func.func @transform_5(%arg0: i32) -> (i32, i32, i32) {
    %c0_i32 = arith.constant 0 : i32
    %c0_i32_0 = arith.constant 0 : i32
    %c0_i32_1 = arith.constant 0 : i32
    return %arg0, %c0_i32, %c0_i32_0 : i32, i32, i32
  }
}

</mosaic_0001>

<bundles_post_ra>
// kernel: core_cnn_forward.1
= control target key start
LH: loop header
LB: loop body
LE: loop exit
PB: predicated region body
PF: predicated region fallthrough
CT: control target
= control target key end

     0   :  { %10 = vsyncpa [#allocation8], 0  ;;  %s25852_s0 = inlined_call_operand.vmem [shape: f32[2,5,160], index: 0, kind: input, shape index: {}]   ;;  %s25853_s1 = inlined_call_operand.vmem [shape: f32[168,288], index: 1, kind: input, shape index: {}]   ;;  %s25854_s2 = inlined_call_operand.vmem [shape: f32[168,1], index: 2, kind: input, shape index: {}]   ;;  %s25855_s3 = inlined_call_operand.vmem [shape: bf16[16384,32], index: 3, kind: input, shape index: {}]   ;;  %s25856_s4 = inlined_call_operand.vmem [shape: f32[133,32], index: 4, kind: input, shape index: {}]   ;;  %s25857_s5 = inlined_call_operand.hbm [shape: f32[2,1,4], index: 5, kind: output, shape index: {}]  }
   0x1   :  { %12 = vsyncpa [#allocation8 + $0x1], 0  ;;  %s20612_s18 = smov 0   ;;  %s20614_s19 = smov 0  }
   0x2   :  { %s20616_s20 = smov 0   ;;  %s20618_s21 = smov 0  }
   0x3 LB: > { %s20633_s22 = sadd.s32 4294967295, %s20564_s21   ;;  %s15537_s23 = sadd.s32 4294967294, %s20564_s21   ;;  %s20564_s21 = sphi %s20618_s21, %s25884_s21   ;;  %s20560_s20 = sphi %s20616_s20, %s25883_s20   ;;  %s20556_s19 = sphi %s20614_s19, %s25882_s19   ;;  %s20552_s18 = sphi %s20612_s18, %s25881_s18  }
   0x4   : > { %s20637_s24 = sadd.s32 1, %s20564_s21   ;;  %s135_s25 = sadd.s32 1, %s20560_s20 }
   0x5   : > { %s132_s26 = ssub.s32 %s20564_s21, %s20637_s24  ;;  %p145_p0 = scmp.ne.s32.totalorder %s20560_s20, %s20556_s19 }
   0x6   : > { %p133_p1 = scmp.eq.s32.totalorder %s132_s26, 0  ;;  %p146_p2 = scmp.eq.s32.totalorder %s20633_s22, 1 }
   0x7   : > { %p151_p3 = scmp.ne.s32.totalorder %s20556_s19, %s20552_s18  ;;  %p152_p4 = scmp.eq.s32.totalorder %s15537_s23, 1 }
   0x8   : > { %s20648_s27 = scalar_select %p133_p1, %s20560_s20, %s135_s25  }
   0x9   : > { %p20650_p5 = por %p146_p2, %p145_p0  ;;  %p20654_p6 = por %p152_p4, %p151_p3 }
   0xa   : > { %p15540_p7 = scmp.ge.s32.totalorder %s20564_s21, 1  ;;  %p190_p8 = scmp.lt.s32.totalorder %s20564_s21, 3 }
   0xc   : > { %p191_p9 = pnand %p15540_p7, %p190_p8 }
   0xd   : > { %p217_p10 = scmp.lt.s32.totalorder (!%p191_p9), %s20633_s22, 1  ;;  %v20566_v0 = vmov (!%p191_p9), 0.0   ;;  %vm25860_vm0 = vcmask (!%p191_p9), 1044480   ;;  %v20567_v1 = vmov (!%p191_p9), 0   ;;  %s20568_s10 = smov (!%p191_p9), 126   ;;  %v223_v4 = vld [vmem:[%s25853_s1] sm:$0xff] (!%p191_p9) }
   0xe   : > { %194 = sbr.rel (%p191_p9) target bundleno = 5071 (0x13cf), region = 40  ;;  %460 = vmatprep.mubr.f32.mxu0 (!%p191_p9), %v20566_v0  ;;  %279 = vst [vmem:[#allocation2] sm:$0xff] (!%p191_p9), %v20566_v0  ;;  %383 = vmatprep.mubr.f32.mxu1 (!%p191_p9), %v20566_v0  ;;  %s20569_s11 = smov (!%p191_p9), 127   ;;  %vm311_vm1 = vcmask (!%p191_p9), 39936   ;;  %v258_v5 = vld [vmem:[%s25854_s2] sm:$0xff] (!%p191_p9)  ;;  %vm473_vm2 = vcmask (!%p191_p9), 1031168  }
   0xf   : > { %18390 = vset.pattern.permute.xlu0 (!%p191_p9), %v20567_v1  ;;  %18486 = vset.pattern.permute.xlu1 (!%p191_p9), %v20567_v1  ;;  %s20570_s16 = smov (!%p191_p9), 118   ;;  %s20571_s17 = smov (!%p191_p9), 123   ;;  %vm309_vm3 = vcmask (!%p191_p9), 1039360   ;;  %vm280_vm4 = vcmask (!%p191_p9), 392192   ;;  %vm566_vm5 = vcmask (!%p191_p9), 244736   ;;  %vm596_vm6 = vcmask (!%p191_p9), 1022976  }
  0x10   : > { %s20572_s23 = smov (!%p191_p9), 125   ;;  %s20573_s25 = smov (!%p191_p9), 124   ;;  %vm609_vm7 = vcmask (!%p191_p9), 1006592   ;;  %vm603_vm8 = vcmask (!%p191_p9), 1014784   ;;  %vm615_vm9 = vcmask (!%p191_p9), 998400   ;;  %vm621_vm10 = vcmask (!%p191_p9), 990208  }
  0x11   : > { %s20574_s26 = smov (!%p191_p9), 122   ;;  %s20577_s7 = smov (!%p191_p9), 4   ;;  %vm627_vm11 = vcmask (!%p191_p9), 982016   ;;  %vm693_vm12 = vcmask (!%p191_p9), 31744   ;;  %vm730_vm13 = vcmask (!%p191_p9), 588800   ;;  %vm1122_vm14 = vcmask (!%p191_p9), 130048  }
  0x12   : > { %vm25861_vm15 = vcmask (!%p191_p9), 261120   ;;  %s215_s8 = sand.u32 (!%p191_p9), 1, %s20556_s19  }
  0x13   : > { %s15470_s14 = scalar_lea.sflag (!%p191_p9), [#allocation8], %s215_s8 }
  0x15   : > { %s218_s30 = scalar_select %p217_p10, %s20633_s22, 1  ;;  %v20495_v14 = vld [vmem:[#allocation2] sm:$0xff] }
  0x16   : > { %281 = vst.msk [vmem:[#allocation2 + $0x10] sm:$0xff] %vm280_vm4, %v20495_v14  ;;  %284 = vst.msk [vmem:[#allocation3 + $0x10] sm:$0xff] %vm280_vm4, %v20495_v14  ;;  %v20496_v56 = vld [vmem:[#allocation2] sm:$0xff] }
  0x17   : > { %s16643_s6 = sshll.u32 %s218_s30, 4  ;;  %285 = vst.msk [vmem:[#allocation3 + $0x28] sm:$0xff] %vm280_vm4, %v20495_v14  ;;  %288 = vst.msk [vmem:[#allocation4 + $0x10] sm:$0xff] %vm280_vm4, %v20495_v14  ;;  %s25858_s30 = smov 120  }
  0x18   : > { %s221_s9 = scalar_lea.vmem %s25852_s0, %s16643_s6  ;;  %289 = vst.msk [vmem:[#allocation4 + $0x28] sm:$0xff] %vm280_vm4, %v20495_v14  ;;  %294 = vst.msk [vmem:[#allocation5 + $0x10] sm:$0xff] %vm280_vm4, %v20495_v14  ;;  %s20576_s6 = smov 121  }
  0x19   : > { %v298_v2 = vld [vmem:[%s221_s9] sm:$0x1f]  ;;  %v299_v3 = vld [vmem:[%s221_s9 + $0x8] sm:$0x1f]  ;;  %295 = vst.msk [vmem:[#allocation5 + $0x28] sm:$0xff] %vm280_vm4, %v20495_v14  ;;  %296 = vst.msk [vmem:[#allocation5 + $0x40] sm:$0xff] %vm280_vm4, %v20495_v14 }
  0x1a   : > { %469 = vrot.lane.b32.xlu1 %v298_v2, %s20568_s10  ;;  %305 = vrot.lane.b32.xlu0 %v298_v2, %s20569_s11  ;;  %297 = vst.msk [vmem:[#allocation5 + $0x58] sm:$0xff] %vm280_vm4, %v20495_v14  ;;  %vm2669_vm4 = vcmask 1041409   ;;  %s216_s9 = scalar_lea.vmem [#allocation7], %s215_s8 }
  0x1b   : > { %15546 = vmatprep.subr.msk.mxu0 %vm25860_vm0, %v299_v3  ;;  %s15482_s12 = sshll.u32 %s216_s9, 4  ;;  %s25812_s12 = int_to_ptr.vmem [resolvable:$true] %s15482_s12 }
  0x1c   : > { %15547 = vmatpush1.msk.msra.mxu0 %vm25860_vm0, %v298_v2  ;;  %s20502_s15 = scalar_lea.vmem %s25812_s12, 16 }
  0x1d   : > { %15548 = vmatmul.mubr.msk.f32.vlgmr.msra.gmra.mrb[0].mxu0 %vm311_vm1, %v223_v4  ;;  %p20503_p11 = scmp.ne.s32.totalorder %s25812_s12, %s20502_s15 }
  0x1e   : > { %471 = vrot.lane.b32.xlu1 %v299_v3, %s20568_s10  ;;  %307 = vrot.lane.b32.xlu0 %v299_v3, %s20569_s11 }
  0x1f   : > { %545 = vmatprep.mubr.f32.mxu0 %v20566_v0  ;;  %p20504_p12 = pnand %p20503_p11, %p20650_p5 }
  0x21   : > { %p20505_p13 = pneg %p20504_p12 }
  0x22   : > { %467 = vrot.lane.b32.xlu1 %v223_v4, %s20570_s16  ;;  %301 = vrot.lane.b32.xlu0 %v223_v4, %s20571_s17  ;;  %s25864_s16 = smov 120  }
  0x26   : > { %556 = vperm.xlu0 %18390, %v258_v5   ;;  %574 = vrot.lane.b32.xlu1 %v20566_v0, %s20569_s11 }
  0x2a   : > { %582 = vrot.lane.b32.xlu0 %v20566_v0, %s20568_s10  ;;  %590 = vrot.lane.b32.xlu1 %v20495_v14, %s20572_s23 }
  0x8c   : > { %v470_v6 = vpop.permute.xlu1 %469  ;;  %v306_v7 = vpop.permute.xlu0 %305 }
  0x90   : > { %v472_v8 = vpop.permute.xlu1 %471  ;;  %v308_v9 = vpop.permute.xlu0 %307 }
  0x91   : > { %v474_v10 = vsel %vm473_vm2, %v470_v6, %v472_v8  ;;  %15543 = vmatprep.subr.msk.mxu1 %vm25860_vm0, %v308_v9  ;;  %15549 = vmatprep.subr.msk.mxu0 %vm25860_vm0, %v472_v8  ;;  %v310_v11 = vsel %vm309_vm3, %v306_v7, %v308_v9 }
  0x92   : > { %15544 = vmatpush1.msk.msra.mxu1 %vm25860_vm0, %v310_v11  ;;  %15550 = vmatpush1.msk.msra.mxu0 %vm25860_vm0, %v474_v10  ;;  %vm2682_vm0 = vsmask.f32 4352 }
  0x94   : > { %v468_v12 = vpop.permute.xlu1 %467  ;;  %v302_v13 = vpop.permute.xlu0 %301 }
  0x95   : > { %15545 = vmatmul.mubr.msk.f32.vlgmr.msra.gmra.mrb[0].mxu1 %vm311_vm1, %v302_v13  ;;  %15551 = vmatmul.mubr.msk.f32.vlgmr.msra.gmra.mrb[0].mxu0 %vm311_vm1, %v468_v12  ;;  %vm2528_vm1 = vcmask 523264  }
  0x96   : > { %801 = vmatprep.mubr.f32.mxu1 %v20566_v0 }
  0x98   : > { %v575_v30 = vpop.permute.xlu1 %574 }
  0x9c   : > { %v591_v31 = vpop.permute.xlu1 %590 }
  0xa5   : > { %v557_v15 = vpop.permute.xlu0 %556 }
  0xa9   : > { %v583_v32 = vpop.permute.xlu0 %582 }
 0x168   : > { %v385_v16 = vpop.f32.mrb[0].mxu1  ;;  %v547_v17 = vpop.f32.mrb[0].mxu0 }
 0x169   : > { %v18316_v18 = vadd.f32 %v547_v17, %v385_v16  ;;  %v387_v19 = vpop.f32.mrb[1].mxu1  ;;  %v549_v20 = vpop.f32.mrb[1].mxu0  ;;  %v259_v16 = vld [vmem:[%s25854_s2 + $0x8] sm:$0xff] }
 0x16a   : > { %v18317_v21 = vadd.f32 %v549_v20, %v387_v19 }
 0x16b   : > { %v559_v22 = vadd.f32 %v18316_v18, %v557_v15 }
 0x16c   : > { %v560_v23 = vadd.f32 %v18317_v21, %v557_v15  ;;  %v260_v15 = vld [vmem:[%s25854_s2 + $0x10] sm:$0xff] }
 0x16d   : > { %v561_v24 = vmul.f32 0.01, %v559_v22 }
 0x16e   : > { %v562_v25 = vmul.f32 0.01, %v560_v23 }
 0x16f   : > { %v563_v26 = vmax.f32 %v559_v22, %v561_v24 }
 0x170   : > { %v564_v27 = vmax.f32 %v560_v23, %v562_v25 }
 0x172   : > { %567 = vst.msk [vmem:[#allocation2 + $0x10] sm:$0xff] %vm566_vm5, %v564_v27 }
 0x179   : > { %v570_v28 = vld [vmem:[#allocation2 + $0x10] sm:$0xff] }
 0x17a   : > { %v18396_v29 = vpack.i.bf16 %v570_v28, %v563_v26 }
 0x17c   : > { %18397 = vrot.lane.b32.xlu0 %v18396_v29, %s20568_s10  ;;  %18392 = vrot.lane.b32.xlu1 %v18396_v29, %s20569_s11 }
 0x180   : > { %18407 = vrot.lane.b32.xlu0 %v18396_v29, %s20573_s25  ;;  %18402 = vrot.lane.b32.xlu1 %v18396_v29, %s20572_s23 }
 0x184   : > { %18417 = vrot.lane.b32.xlu0 %v18396_v29, %s20574_s26  ;;  %18412 = vrot.lane.b32.xlu1 %v18396_v29, %s20571_s17 }
 0x188   : > { %623 = vrot.lane.b32.xlu0 %v563_v26, %s25858_s30  ;;  %18422 = vrot.lane.b32.xlu1 %v18396_v29, %s20576_s6 }
 0x18c   : > { %18427 = vrot.lane.b32.xlu0 %v18396_v29, %s20577_s7  ;;  %625 = vrot.lane.b32.xlu1 %v570_v28, %s25858_s30 }
 0x1ee   : > { %v18398_v33 = vpop.permute.xlu0 %18397  ;;  %v18393_v34 = vpop.permute.xlu1 %18392 }
 0x1ef   : > { %v18399_v35 = vunpack.i.l.bf16 %v18398_v33  ;;  %v18395_v37 = vunpack.i.h.bf16 %v18393_v34  ;;  %v18394_v38 = vunpack.i.l.bf16 %v18393_v34  ;;  %v18400_v45 = vunpack.i.h.bf16 %v18398_v33 }
 0x1f1   : > { %v588_v41 = vsel %vm473_vm2, %v583_v32, %v18399_v35  ;;  %v581_v48 = vsel %vm309_vm3, %v18394_v38, %v18395_v37  ;;  %v580_v52 = vsel %vm309_vm3, %v575_v30, %v18394_v38  ;;  %v589_v54 = vsel %vm473_vm2, %v18399_v35, %v18400_v45 }
 0x1f2   : > { %v18403_v36 = vpop.permute.xlu1 %18402  ;;  %v18408_v40 = vpop.permute.xlu0 %18407  ;;  %v18446_v51 = vpack.i.bf16 %v18395_v37, %v581_v48  ;;  %v18436_v57 = vpack.i.bf16 %v580_v52, %v20496_v56  ;;  %v18451_v59 = vpack.i.bf16 %v18400_v45, %v589_v54 }
 0x1f3   : > { %v18404_v39 = vunpack.i.l.bf16 %v18403_v36  ;;  %v18409_v46 = vunpack.i.l.bf16 %v18408_v40  ;;  %v18405_v50 = vunpack.i.h.bf16 %v18403_v36  ;;  %v18410_v58 = vunpack.i.h.bf16 %v18408_v40 }
 0x1f5   : > { %v597_v42 = vsel %vm596_vm6, %v591_v31, %v18404_v39  ;;  %v598_v60 = vsel %vm596_vm6, %v18404_v39, %v18405_v50  ;;  %v604_v5 = vsel %vm603_vm8, %v18409_v46, %v18410_v58 }
 0x1f6   : > { %v18413_v43 = vpop.permute.xlu1 %18412  ;;  %v18441_v44 = vpack.i.bf16 %v597_v42, %v588_v41  ;;  %v18418_v55 = vpop.permute.xlu0 %18417  ;;  %v18456_v1 = vpack.i.bf16 %v18405_v50, %v598_v60  ;;  %v18461_v7 = vpack.i.bf16 %v18410_v58, %v604_v5 }
 0x1f7   : > { %v18414_v47 = vunpack.i.l.bf16 %v18413_v43  ;;  %v18415_v53 = vunpack.i.h.bf16 %v18413_v43  ;;  %v18420_v61 = vunpack.i.h.bf16 %v18418_v55  ;;  %v18419_v62 = vunpack.i.l.bf16 %v18418_v55 }
 0x1f8   : > { %18442 = vrot.lane.b32.xlu1 %v18441_v44, %s20577_s7 }
 0x1f9   : > { %v18431_v49 = vpack.i.bf16 %v18414_v47, %v18409_v46  ;;  %v610_v0 = vsel %vm609_vm7, %v18414_v47, %v18415_v53  ;;  %v616_v6 = vsel %vm615_vm9, %v18419_v62, %v18420_v61 }
 0x1fa   : > { %v18423_v63 = vpop.permute.xlu1 %18422  ;;  %v18466_v4 = vpack.i.bf16 %v18415_v53, %v610_v0  ;;  %v18471_v8 = vpack.i.bf16 %v18420_v61, %v616_v6  ;;  %v624_v13 = vpop.permute.xlu0 %623 }
 0x1fb   : > { %18432 = vrot.lane.b32.xlu0 %v18431_v49, %s20577_s7  ;;  %v18425_v2 = vunpack.i.h.bf16 %v18423_v63  ;;  %v18424_v3 = vunpack.i.l.bf16 %v18423_v63 }
 0x1fc   : > { %18447 = vrot.lane.b32.xlu1 %v18446_v51, %s20577_s7 }
 0x1fd   : > { %v622_v9 = vsel %vm621_vm10, %v18424_v3, %v18425_v2  ;;  %v18476_v11 = vpack.i.bf16 %v18424_v3, %v18419_v62 }
 0x1fe   : > { %v18481_v10 = vpack.i.bf16 %v18425_v2, %v622_v9  ;;  %v626_v12 = vpop.permute.xlu1 %625  ;;  %v18428_v17 = vpop.permute.xlu0 %18427 }
 0x1ff   : > { %18437 = vrot.lane.b32.xlu0 %v18436_v57, %s20577_s7  ;;  %v628_v14 = vsel %vm627_vm11, %v624_v13, %v626_v12  ;;  %v18430_v19 = vunpack.i.h.bf16 %v18428_v17  ;;  %v18429_v20 = vunpack.i.l.bf16 %v18428_v17 }
 0x200   : > { %18452 = vrot.lane.b32.xlu1 %v18451_v59, %s20577_s7 }
 0x201   : > { %v695_v26 = vsel %vm693_vm12, %v18429_v20, %v18430_v19  ;;  %v225_v19 = vld [vmem:[%s25853_s1 + $0x30] sm:$0xff] }
 0x203   : > { %18457 = vrot.lane.b32.xlu0 %v18456_v1, %s20577_s7 }
 0x204   : > { %18467 = vrot.lane.b32.xlu1 %v18466_v4, %s20577_s7 }
 0x207   : > { %18462 = vrot.lane.b32.xlu0 %v18461_v7, %s20577_s7 }
 0x208   : > { %18472 = vrot.lane.b32.xlu1 %v18471_v8, %s20577_s7 }
 0x20b   : > { %18482 = vrot.lane.b32.xlu0 %v18481_v10, %s20577_s7 }
 0x20c   : > { %18477 = vrot.lane.b32.xlu1 %v18476_v11, %s20577_s7 }
 0x20f   : > { %689 = vrot.lane.b32.xlu0 %v628_v14, %s20577_s7 }
 0x210   : > { %691 = vrot.lane.b32.xlu1 %v626_v12, %s20577_s7 }
 0x213   : > { %687 = vrot.lane.b32.xlu0 %v624_v13, %s20577_s7 }
 0x214   : > { %631 = vperm.xlu1 %18486, %v259_v16   ;;  %v224_v16 = vld [vmem:[%s25853_s1 + $0x18] sm:$0xff] }
 0x217   : > { %636 = vperm.xlu0 %18390, %v260_v15  }
 0x26a   : > { %v18443_v18 = vpop.permute.xlu1 %18442 }
 0x26b   : > { %v18445_v38 = vunpack.i.h.bf16 %v18443_v18  ;;  %v18444_v39 = vunpack.i.l.bf16 %v18443_v18 }
 0x26d   : > { %v18433_v21 = vpop.permute.xlu0 %18432 }
 0x26e   : > { %v18448_v22 = vpop.permute.xlu1 %18447  ;;  %v18435_v49 = vunpack.i.h.bf16 %v18433_v21  ;;  %v18434_v53 = vunpack.i.l.bf16 %v18433_v21 }
 0x26f   : > { %v18450_v23 = vunpack.i.h.bf16 %v18448_v22  ;;  %v18449_v24 = vunpack.i.l.bf16 %v18448_v22 }
 0x271   : > { %v18438_v25 = vpop.permute.xlu0 %18437  ;;  %v697_v27 = vsel %vm693_vm12, %v18449_v24, %v18450_v23 }
 0x272   : > { %v18440_v28 = vunpack.i.h.bf16 %v18438_v25  ;;  %v18439_v29 = vunpack.i.l.bf16 %v18438_v25  ;;  %v18453_v30 = vpop.permute.xlu1 %18452  ;;  %v18116_v31 = vpack.c.bf16 %v697_v27, %v695_v26 }
 0x273   : > { %v18455_v34 = vunpack.i.h.bf16 %v18453_v30  ;;  %v18454_v35 = vunpack.i.l.bf16 %v18453_v30 }
 0x274   : > { %v696_v32 = vsel %vm693_vm12, %v18440_v28, %v18449_v24  ;;  %v694_v33 = vsel %vm693_vm12, %v18439_v29, %v18429_v20  ;;  %18117 = vmatprep.subr.bf16.mxu1 %v18116_v31  ;;  %v20497_v20 = vld [vmem:[#allocation2] sm:$0xff] }
 0x275   : > { %v18458_v36 = vpop.permute.xlu0 %18457  ;;  %v18118_v37 = vpack.c.bf16 %v696_v32, %v694_v33  ;;  %v698_v45 = vsel %vm693_vm12, %v18444_v39, %v18454_v35  ;;  %v699_v47 = vsel %vm693_vm12, %v18454_v35, %v18455_v34  ;;  %v20758_v21 = vpack.i.bf16 %v20497_v20, %v20497_v20 }
 0x276   : > { %v18460_v40 = vunpack.i.h.bf16 %v18458_v36  ;;  %v18459_v41 = vunpack.i.l.bf16 %v18458_v36  ;;  %v18468_v42 = vpop.permute.xlu1 %18467 }
 0x277   : > { %v18470_v43 = vunpack.i.h.bf16 %v18468_v42  ;;  %v18469_v44 = vunpack.i.l.bf16 %v18468_v42  ;;  %18119 = vmatpush1.bf16.msra.mxu1 %v18118_v37  ;;  %18488 = vrot.lane.b32.xlu1 %v20758_v21, %s20569_s11 }
 0x278   : > { %v700_v46 = vsel %vm693_vm12, %v18445_v38, %v18459_v41  ;;  %v701_v48 = vsel %vm693_vm12, %v18459_v41, %v18460_v40 }
 0x279   : > { %v18463_v50 = vpop.permute.xlu0 %18462  ;;  %v18120_v51 = vpack.c.bf16 %v701_v48, %v699_v47  ;;  %v18122_v52 = vpack.c.bf16 %v700_v46, %v698_v45  ;;  %v704_v57 = vsel %vm693_vm12, %v18435_v49, %v18469_v44  ;;  %v705_v58 = vsel %vm693_vm12, %v18469_v44, %v18470_v43 }
 0x27a   : > { %v18465_v54 = vunpack.i.h.bf16 %v18463_v50  ;;  %v18464_v55 = vunpack.i.l.bf16 %v18463_v50  ;;  %v18473_v56 = vpop.permute.xlu1 %18472 }
 0x27b   : > { %18121 = vmatprep.subr.bf16.mxu1 %v18120_v51  ;;  %v18475_v60 = vunpack.i.h.bf16 %v18473_v56  ;;  %v18474_v61 = vunpack.i.l.bf16 %v18473_v56 }
 0x27c   : > { %v702_v59 = vsel %vm693_vm12, %v18434_v53, %v18464_v55  ;;  %18123 = vmatpush1.bf16.msra.mxu1 %v18122_v52  ;;  %v703_v62 = vsel %vm693_vm12, %v18464_v55, %v18465_v54 }
 0x27d   : > { %v18483_v63 = vpop.permute.xlu0 %18482  ;;  %v18124_v0 = vpack.c.bf16 %v705_v58, %v703_v62  ;;  %v18126_v1 = vpack.c.bf16 %v704_v57, %v702_v59  ;;  %v707_v7 = vsel %vm693_vm12, %v18474_v61, %v18475_v60 }
 0x27e   : > { %v18485_v2 = vunpack.i.h.bf16 %v18483_v63  ;;  %v18484_v3 = vunpack.i.l.bf16 %v18483_v63  ;;  %v18478_v4 = vpop.permute.xlu1 %18477 }
 0x27f   : > { %v18480_v5 = vunpack.i.h.bf16 %v18478_v4  ;;  %v18479_v6 = vunpack.i.l.bf16 %v18478_v4  ;;  %18125 = vmatprep.subr.bf16.mxu1 %v18124_v0 }
 0x280   : > { %18127 = vmatpush1.bf16.msra.mxu1 %v18126_v1  ;;  %v709_v8 = vsel %vm693_vm12, %v18484_v3, %v18485_v2 }
 0x281   : > { %v706_v9 = vsel %vm693_vm12, %v18479_v6, %v18474_v61  ;;  %v708_v10 = vsel %vm693_vm12, %v18480_v5, %v18484_v3  ;;  %v690_v11 = vpop.permute.xlu0 %689  ;;  %v18128_v12 = vpack.c.bf16 %v709_v8, %v707_v7 }
 0x282   : > { %v692_v13 = vpop.permute.xlu1 %691  ;;  %v18130_v14 = vpack.c.bf16 %v708_v10, %v706_v9 }
 0x283   : > { %18129 = vmatprep.subr.bf16.mxu1 %v18128_v12  ;;  %v711_v15 = vsel %vm693_vm12, %v690_v11, %v692_v13 }
 0x284   : > { %18131 = vmatpush1.bf16.msra.mxu1 %v18130_v14 }
 0x285   : > { %v688_v17 = vpop.permute.xlu0 %687  ;;  %753 = vmatprep.subr.mxu1 %v711_v15 }
 0x286   : > { %v710_v18 = vsel %vm693_vm12, %v688_v17, %v690_v11 }
 0x288   : > { %754 = vmatpush1.msra.mxu1 %v710_v18 }
 0x289   : > { %15552 = vmatmul.mubr.msk.f32.vlgmr.msra.gmra.mrb[2].mxu1 %vm730_vm13, %v224_v16 }
 0x28a   : > { %807 = vmatprep.mubr.f32.mxu1 %v20497_v20 }
 0x28d   : > { %15553 = vmatmul.mubr.msk.f32.gmra.mrb[4].mxu1 %vm730_vm13, %v225_v19 }
 0x293   : > { %v632_v22 = vpop.permute.xlu1 %631 }
 0x296   : > { %v637_v27 = vpop.permute.xlu0 %636 }
 0x2e9   : > { %v18489_v40 = vpop.permute.xlu1 %18488 }
 0x2ea   : > { %v18491_v53 = vunpack.i.h.bf16 %v18489_v40  ;;  %v18490_v57 = vunpack.i.l.bf16 %v18489_v40 }
 0x35c   : > { %v803_v23 = vpop.f32.mrb[2].mxu1 }
 0x35d   : > { %v804_v24 = vadd.f32 %v803_v23, %v632_v22  ;;  %v805_v25 = vpop.f32.mrb[3].mxu1 }
 0x35e   : > { %v806_v26 = vadd.f32 %v805_v25, %v632_v22 }
 0x35f   : > { %20467 = vtanh.f32 %v804_v24 }
 0x360   : > { %20469 = vtanh.f32 %v806_v26  ;;  %v809_v28 = vpop.f32.mrb[4].mxu1 }
 0x361   : > { %v810_v29 = vadd.f32 %v809_v28, %v637_v27  ;;  %v811_v30 = vpop.f32.mrb[5].mxu1 }
 0x362   : > { %v812_v31 = vadd.f32 %v811_v30, %v637_v27 }
 0x363   : > { %20471 = vtanh.f32 %v810_v29 }
 0x364   : > { %20473 = vtanh.f32 %v812_v31 }
 0x369   : > { %v20468_v32 = vpop.eup %20467 }
 0x36a   : > { %v20470_v33 = vpop.eup %20469 }
 0x36b   : > { %819 = vst.msk [vmem:[#allocation3 + $0x10] sm:$0xff] %vm566_vm5, %v20470_v33 }
 0x36d   : > { %v20472_v34 = vpop.eup %20471 }
 0x36e   : > { %v20474_v35 = vpop.eup %20473 }
 0x36f   : > { %821 = vst.msk [vmem:[#allocation3 + $0x28] sm:$0xff] %vm566_vm5, %v20474_v35 }
 0x372   : > { %v824_v36 = vld [vmem:[#allocation3 + $0x10] sm:$0xff] }
 0x373   : > { %v18497_v37 = vpack.i.bf16 %v824_v36, %v20468_v32 }
 0x375   : > { %18498 = vrot.lane.b32.xlu0 %v18497_v37, %s20568_s10  ;;  %18493 = vrot.lane.b32.xlu1 %v18497_v37, %s20569_s11 }
 0x376   : > { %v827_v38 = vld [vmem:[#allocation3 + $0x28] sm:$0xff] }
 0x377   : > { %v18502_v39 = vpack.i.bf16 %v827_v38, %v20472_v34 }
 0x379   : > { %18503 = vrot.lane.b32.xlu0 %v18502_v39, %s20569_s11  ;;  %18513 = vrot.lane.b32.xlu1 %v18497_v37, %s20572_s23 }
 0x37d   : > { %18508 = vrot.lane.b32.xlu0 %v20758_v21, %s20568_s10  ;;  %18518 = vrot.lane.b32.xlu1 %v18502_v39, %s20568_s10 }
 0x381   : > { %18528 = vrot.lane.b32.xlu0 %v18502_v39, %s20572_s23  ;;  %18523 = vrot.lane.b32.xlu1 %v20758_v21, %s20572_s23 }
 0x385   : > { %18533 = vrot.lane.b32.xlu0 %v18497_v37, %s20573_s25  ;;  %18558 = vrot.lane.b32.xlu1 %v18502_v39, %s20573_s25 }
 0x389   : > { %18538 = vrot.lane.b32.xlu0 %v18497_v37, %s20571_s17  ;;  %18563 = vrot.lane.b32.xlu1 %v18502_v39, %s20571_s17 }
 0x38d   : > { %18543 = vrot.lane.b32.xlu0 %v18497_v37, %s20574_s26  ;;  %18568 = vrot.lane.b32.xlu1 %v18502_v39, %s20574_s26 }
 0x391   : > { %18548 = vrot.lane.b32.xlu0 %v18497_v37, %s20576_s6  ;;  %18573 = vrot.lane.b32.xlu1 %v18502_v39, %s20576_s6 }
 0x395   : > { %18553 = vrot.lane.b32.xlu0 %v18497_v37, %s25858_s30  ;;  %18578 = vrot.lane.b32.xlu1 %v18502_v39, %s25858_s30 }
 0x399   : > { %18583 = vrot.lane.b32.xlu0 %v18497_v37, %s20577_s7  ;;  %18593 = vrot.lane.b32.xlu1 %v18502_v39, %s20577_s7 }
 0x39d   : > { %18588 = vrot.lane.b32.xlu0 %v20758_v21, %s20577_s7 }
 0x3e7   : > { %v18499_v41 = vpop.permute.xlu0 %18498  ;;  %v18494_v42 = vpop.permute.xlu1 %18493 }
 0x3e8   : > { %v18501_v43 = vunpack.i.h.bf16 %v18499_v41  ;;  %v18500_v44 = vunpack.i.l.bf16 %v18499_v41  ;;  %v18496_v45 = vunpack.i.h.bf16 %v18494_v42  ;;  %v18495_v46 = vunpack.i.l.bf16 %v18494_v42 }
 0x3ea   : > { %v847_v47 = vsel %vm309_vm3, %v18495_v46, %v18496_v45  ;;  %v863_v48 = vsel %vm473_vm2, %v18500_v44, %v18501_v43  ;;  %v846_v63 = vsel %vm309_vm3, %v18490_v57, %v18495_v46 }
 0x3eb   : > { %v18504_v49 = vpop.permute.xlu0 %18503  ;;  %v18514_v50 = vpop.permute.xlu1 %18513  ;;  %v18597_v51 = vpack.i.bf16 %v18496_v45, %v847_v47  ;;  %v18602_v52 = vpack.i.bf16 %v18501_v43, %v863_v48 }
 0x3ec   : > { %v18505_v54 = vunpack.i.l.bf16 %v18504_v49  ;;  %v18516_v55 = vunpack.i.h.bf16 %v18514_v50  ;;  %v18515_v56 = vunpack.i.l.bf16 %v18514_v50  ;;  %v18506_v17 = vunpack.i.h.bf16 %v18504_v49 }
 0x3ed   : > { %18598 = vrot.lane.b32.xlu1 %v18597_v51, %s20577_s7  ;;  %18603 = vrot.lane.b32.xlu0 %v18602_v52, %s20577_s7 }
 0x3ee   : > { %v879_v58 = vsel %vm596_vm6, %v18515_v56, %v18516_v55  ;;  %v848_v62 = vsel %vm309_vm3, %v18491_v53, %v18505_v54  ;;  %v849_v32 = vsel %vm309_vm3, %v18505_v54, %v18506_v17 }
 0x3ef   : > { %v18509_v59 = vpop.permute.xlu0 %18508  ;;  %v18519_v60 = vpop.permute.xlu1 %18518  ;;  %v18607_v61 = vpack.i.bf16 %v18516_v55, %v879_v58  ;;  %v18617_v2 = vpack.i.bf16 %v848_v62, %v846_v63  ;;  %v18632_v38 = vpack.i.bf16 %v18506_v17, %v849_v32  ;;  %v261_v32 = vld [vmem:[%s25854_s2 + $0x18] sm:$0xff] }
 0x3f0   : > { %v18511_v8 = vunpack.i.h.bf16 %v18509_v59  ;;  %v18510_v12 = vunpack.i.l.bf16 %v18509_v59  ;;  %v18520_v13 = vunpack.i.l.bf16 %v18519_v60  ;;  %v18521_v18 = vunpack.i.h.bf16 %v18519_v60 }
 0x3f1   : > { %18608 = vrot.lane.b32.xlu1 %v18607_v61, %s20577_s7 }
 0x3f2   : > { %v862_v25 = vsel %vm473_vm2, %v18510_v12, %v18500_v44  ;;  %v864_v26 = vsel %vm473_vm2, %v18511_v8, %v18520_v13  ;;  %v865_v33 = vsel %vm473_vm2, %v18520_v13, %v18521_v18 }
 0x3f3   : > { %v20796_v0 = vpop.permute.xlu0 %18528  ;;  %v18524_v1 = vpop.permute.xlu1 %18523  ;;  %v18622_v30 = vpack.i.bf16 %v864_v26, %v862_v25  ;;  %v18647_v39 = vpack.i.bf16 %v18521_v18, %v865_v33 }
 0x3f4   : > { %v18530_v3 = vunpack.i.l.bf16 %v20796_v0  ;;  %v18526_v4 = vunpack.i.h.bf16 %v18524_v1  ;;  %v18525_v5 = vunpack.i.l.bf16 %v18524_v1  ;;  %v18531_v40 = vunpack.i.h.bf16 %v20796_v0 }
 0x3f5   : > { %18618 = vrot.lane.b32.xlu1 %v18617_v2, %s20577_s7 }
 0x3f6   : > { %v878_v6 = vsel %vm596_vm6, %v18525_v5, %v18515_v56  ;;  %v880_v7 = vsel %vm596_vm6, %v18526_v4, %v18530_v3  ;;  %v881_v48 = vsel %vm596_vm6, %v18530_v3, %v18531_v40 }
 0x3f7   : > { %v18534_v9 = vpop.permute.xlu0 %18533  ;;  %v18559_v10 = vpop.permute.xlu1 %18558  ;;  %v18627_v11 = vpack.i.bf16 %v880_v7, %v878_v6  ;;  %v18657_v55 = vpack.i.bf16 %v18531_v40, %v881_v48 }
 0x3f8   : > { %v18536_v14 = vunpack.i.h.bf16 %v18534_v9  ;;  %v18535_v15 = vunpack.i.l.bf16 %v18534_v9  ;;  %v18560_v34 = vunpack.i.l.bf16 %v18559_v10  ;;  %v18561_v41 = vunpack.i.h.bf16 %v18559_v10 }
 0x3f9   : > { %18628 = vrot.lane.b32.xlu1 %v18627_v11, %s20577_s7 }
 0x3fa   : > { %v890_v16 = vsel %vm603_vm8, %v18535_v15, %v18536_v14  ;;  %v18637_v46 = vpack.i.bf16 %v18560_v34, %v18535_v15  ;;  %v891_v49 = vsel %vm603_vm8, %v18560_v34, %v18561_v41  ;;  %v262_v34 = vld [vmem:[%s25854_s2 + $0x20] sm:$0xff] }
 0x3fb   : > { %v18539_v19 = vpop.permute.xlu0 %18538  ;;  %v20804_v20 = vpop.permute.xlu1 %18563  ;;  %v18612_v22 = vpack.i.bf16 %v18536_v14, %v890_v16  ;;  %v18667_v56 = vpack.i.bf16 %v18561_v41, %v891_v49 }
 0x3fc   : > { %v18541_v23 = vunpack.i.h.bf16 %v18539_v19  ;;  %v18540_v24 = vunpack.i.l.bf16 %v18539_v19  ;;  %v18565_v35 = vunpack.i.l.bf16 %v20804_v20  ;;  %v18566_v52 = vunpack.i.h.bf16 %v20804_v20 }
 0x3fd   : > { %18613 = vrot.lane.b32.xlu0 %v18612_v22, %s20577_s7 }
 0x3fe   : > { %v900_v27 = vsel %vm609_vm7, %v18540_v24, %v18541_v23  ;;  %v18652_v47 = vpack.i.bf16 %v18565_v35, %v18540_v24  ;;  %v901_v9 = vsel %vm609_vm7, %v18565_v35, %v18566_v52 }
 0x3ff   : > { %v20810_v28 = vpop.permute.xlu0 %18543  ;;  %v20812_v29 = vpop.permute.xlu1 %18568  ;;  %v18642_v31 = vpack.i.bf16 %v18541_v23, %v900_v27  ;;  %v18672_v14 = vpack.i.bf16 %v18566_v52, %v901_v9 }
 0x400   : > { %v18546_v42 = vunpack.i.h.bf16 %v20810_v28  ;;  %v18545_v43 = vunpack.i.l.bf16 %v20810_v28  ;;  %v18571_v62 = vunpack.i.h.bf16 %v20812_v29  ;;  %v18570_v63 = vunpack.i.l.bf16 %v20812_v29 }
 0x401   : > { %18623 = vrot.lane.b32.xlu0 %v18622_v30, %s20577_s7  ;;  %18643 = vrot.lane.b32.xlu1 %v18642_v31, %s20577_s7  ;;  %v227_v30 = vld [vmem:[%s25853_s1 + $0x50] sm:$0xff] }
 0x402   : > { %v910_v57 = vsel %vm615_vm9, %v18545_v43, %v18546_v42  ;;  %v911_v10 = vsel %vm615_vm9, %v18570_v63, %v18571_v62  ;;  %v18677_v20 = vpack.i.bf16 %v18570_v63, %v18545_v43  ;;  %15554 = vmatprep.mubr.msk.f32.mxu0 %vm1122_vm14, %v227_v30 }
 0x403   : > { %v20819_v36 = vpop.permute.xlu0 %18548  ;;  %v20821_v37 = vpop.permute.xlu1 %18573  ;;  %v18662_v5 = vpack.i.bf16 %v18546_v42, %v910_v57  ;;  %v18687_v17 = vpack.i.bf16 %v18571_v62, %v911_v10 }
 0x404   : > { %v18551_v50 = vunpack.i.h.bf16 %v20819_v36  ;;  %v18550_v51 = vunpack.i.l.bf16 %v20819_v36  ;;  %v18576_v15 = vunpack.i.h.bf16 %v20821_v37  ;;  %v18575_v16 = vunpack.i.l.bf16 %v20821_v37 }
 0x405   : > { %18633 = vrot.lane.b32.xlu0 %v18632_v38, %s20577_s7  ;;  %18648 = vrot.lane.b32.xlu1 %v18647_v39, %s20577_s7 }
 0x406   : > { %v920_v0 = vsel %vm621_vm10, %v18550_v51, %v18551_v50  ;;  %v18692_v24 = vpack.i.bf16 %v18575_v16, %v18550_v51  ;;  %v921_v25 = vsel %vm621_vm10, %v18575_v16, %v18576_v15 }
 0x407   : > { %v20828_v44 = vpop.permute.xlu0 %18553  ;;  %v20830_v45 = vpop.permute.xlu1 %18578  ;;  %v18682_v8 = vpack.i.bf16 %v18551_v50, %v920_v0  ;;  %v18697_v27 = vpack.i.bf16 %v18576_v15, %v921_v25 }
 0x408   : > { %v18581_v18 = vunpack.i.h.bf16 %v20830_v45  ;;  %v18580_v19 = vunpack.i.l.bf16 %v20830_v45  ;;  %v18556_v22 = vunpack.i.h.bf16 %v20828_v44  ;;  %v18555_v23 = vunpack.i.l.bf16 %v20828_v44 }
 0x409   : > { %18638 = vrot.lane.b32.xlu0 %v18637_v46, %s20577_s7  ;;  %18653 = vrot.lane.b32.xlu1 %v18652_v47, %s20577_s7 }
 0x40a   : > { %v931_v26 = vsel %vm627_vm11, %v18580_v19, %v18581_v18  ;;  %v930_v29 = vsel %vm627_vm11, %v18555_v23, %v18556_v22  ;;  %v18712_v33 = vpack.i.bf16 %v18580_v19, %v18555_v23 }
 0x40b   : > { %v18584_v53 = vpop.permute.xlu0 %18583  ;;  %v18594_v54 = vpop.permute.xlu1 %18593  ;;  %v18707_v28 = vpack.i.bf16 %v18581_v18, %v931_v26  ;;  %v18702_v31 = vpack.i.bf16 %v18556_v22, %v930_v29 }
 0x40c   : > { %v18586_v58 = vunpack.i.h.bf16 %v18584_v53  ;;  %v18585_v59 = vunpack.i.l.bf16 %v18584_v53  ;;  %v18596_v60 = vunpack.i.h.bf16 %v18594_v54  ;;  %v18595_v61 = vunpack.i.l.bf16 %v18594_v54 }
 0x40d   : > { %18658 = vrot.lane.b32.xlu0 %v18657_v55, %s20577_s7  ;;  %18668 = vrot.lane.b32.xlu1 %v18667_v56, %s20577_s7 }
 0x40e   : > { %v1051_v1 = vsel %vm693_vm12, %v18585_v59, %v18586_v58  ;;  %v1053_v2 = vsel %vm693_vm12, %v18595_v61, %v18596_v60 }
 0x40f   : > { %v18589_v3 = vpop.permute.xlu0 %18588  ;;  %v18132_v4 = vpack.c.bf16 %v1053_v2, %v1051_v1 }
 0x410   : > { %v18591_v6 = vunpack.i.h.bf16 %v18589_v3  ;;  %v18590_v7 = vunpack.i.l.bf16 %v18589_v3 }
 0x411   : > { %18133 = vmatprep.subr.bf16.mxu0 %v18132_v4  ;;  %18663 = vrot.lane.b32.xlu0 %v18662_v5, %s20577_s7 }
 0x412   : > { %v1050_v11 = vsel %vm693_vm12, %v18590_v7, %v18585_v59  ;;  %v1052_v12 = vsel %vm693_vm12, %v18591_v6, %v18595_v61  ;;  %18683 = vrot.lane.b32.xlu1 %v18682_v8, %s20577_s7 }
 0x413   : > { %v18134_v13 = vpack.c.bf16 %v1052_v12, %v1050_v11 }
 0x415   : > { %18135 = vmatpush1.bf16.msra.mxu0 %v18134_v13  ;;  %18673 = vrot.lane.b32.xlu0 %v18672_v14, %s20577_s7 }
 0x416   : > { %18688 = vrot.lane.b32.xlu1 %v18687_v17, %s20577_s7 }
 0x419   : > { %18678 = vrot.lane.b32.xlu0 %v18677_v20, %s20577_s7 }
 0x41a   : > { %18693 = vrot.lane.b32.xlu1 %v18692_v24, %s20577_s7 }
 0x41d   : > { %18698 = vrot.lane.b32.xlu0 %v18697_v27, %s20577_s7 }
 0x41e   : > { %18708 = vrot.lane.b32.xlu1 %v18707_v28, %s20577_s7 }
 0x421   : > { %18703 = vrot.lane.b32.xlu0 %v18702_v31, %s20577_s7 }
 0x422   : > { %934 = vperm.xlu1 %18486, %v261_v32  }
 0x425   : > { %18713 = vrot.lane.b32.xlu0 %v18712_v33, %s20577_s7 }
 0x426   : > { %18718 = vrot.lane.b32.xlu1 %v20758_v21, %s20569_s11 }
 0x429   : > { %939 = vperm.xlu0 %18390, %v262_v34  }
 0x45f   : > { %v18599_v35 = vpop.permute.xlu1 %18598  ;;  %v18604_v38 = vpop.permute.xlu0 %18603 }
 0x460   : > { %v18601_v43 = vunpack.i.h.bf16 %v18599_v35  ;;  %v18600_v44 = vunpack.i.l.bf16 %v18599_v35  ;;  %v18606_v46 = vunpack.i.h.bf16 %v18604_v38  ;;  %v18605_v47 = vunpack.i.l.bf16 %v18604_v38 }
 0x462   : > { %v1055_v57 = vsel %vm693_vm12, %v18600_v44, %v18601_v43  ;;  %v1059_v3 = vsel %vm693_vm12, %v18605_v47, %v18606_v46 }
 0x463   : > { %v18609_v36 = vpop.permute.xlu1 %18608 }
 0x464   : > { %v18611_v4 = vunpack.i.h.bf16 %v18609_v36  ;;  %v18610_v5 = vunpack.i.l.bf16 %v18609_v36 }
 0x466   : > { %v1063_v22 = vsel %vm693_vm12, %v18610_v5, %v18611_v4 }
 0x467   : > { %v18619_v37 = vpop.permute.xlu1 %18618 }
 0x468   : > { %v18620_v45 = vunpack.i.l.bf16 %v18619_v37  ;;  %v18621_v48 = vunpack.i.h.bf16 %v18619_v37 }
 0x46a   : > { %v1054_v55 = vsel %vm693_vm12, %v18620_v45, %v18600_v44 }
 0x46b   : > { %v18629_v39 = vpop.permute.xlu1 %18628 }
 0x46c   : > { %v18630_v6 = vunpack.i.l.bf16 %v18629_v39  ;;  %v18631_v9 = vunpack.i.h.bf16 %v18629_v39 }
 0x46e   : > { %v1062_v19 = vsel %vm693_vm12, %v18630_v6, %v18610_v5 }
 0x46f   : > { %v20882_v40 = vpop.permute.xlu0 %18613 }
 0x470   : > { %v18616_v10 = vunpack.i.h.bf16 %v20882_v40  ;;  %v18615_v11 = vunpack.i.l.bf16 %v20882_v40 }
 0x472   : > { %v1067_v32 = vsel %vm693_vm12, %v18615_v11, %v18616_v10 }
 0x473   : > { %v18624_v41 = vpop.permute.xlu0 %18623  ;;  %v20884_v42 = vpop.permute.xlu1 %18643 }
 0x474   : > { %v18626_v56 = vunpack.i.h.bf16 %v18624_v41  ;;  %v18625_v58 = vunpack.i.l.bf16 %v18624_v41  ;;  %v18646_v34 = vunpack.i.h.bf16 %v20884_v42  ;;  %v18645_v35 = vunpack.i.l.bf16 %v20884_v42 }
 0x476   : > { %v1058_v8 = vsel %vm693_vm12, %v18625_v58, %v18605_v47  ;;  %v1071_v42 = vsel %vm693_vm12, %v18645_v35, %v18646_v34 }
 0x477   : > { %v18634_v49 = vpop.permute.xlu0 %18633  ;;  %v18649_v50 = vpop.permute.xlu1 %18648 }
 0x478   : > { %v18636_v51 = vunpack.i.h.bf16 %v18634_v49  ;;  %v18635_v52 = vunpack.i.l.bf16 %v18634_v49  ;;  %v18651_v53 = vunpack.i.h.bf16 %v18649_v50  ;;  %v18650_v54 = vunpack.i.l.bf16 %v18649_v50 }
 0x47a   : > { %v1056_v59 = vsel %vm693_vm12, %v18621_v48, %v18635_v52  ;;  %v1057_v60 = vsel %vm693_vm12, %v18635_v52, %v18636_v51  ;;  %v1061_v61 = vsel %vm693_vm12, %v18650_v54, %v18651_v53  ;;  %v1060_v2 = vsel %vm693_vm12, %v18626_v56, %v18650_v54 }
 0x47b   : > { %v18639_v62 = vpop.permute.xlu0 %18638  ;;  %v18654_v63 = vpop.permute.xlu1 %18653  ;;  %v18136_v0 = vpack.c.bf16 %v1057_v60, %v1055_v57  ;;  %v18138_v1 = vpack.c.bf16 %v1056_v59, %v1054_v55  ;;  %v18140_v7 = vpack.c.bf16 %v1061_v61, %v1059_v3  ;;  %v18142_v14 = vpack.c.bf16 %v1060_v2, %v1058_v8 }
 0x47c   : > { %v18641_v20 = vunpack.i.h.bf16 %v18639_v62  ;;  %v18640_v23 = vunpack.i.l.bf16 %v18639_v62  ;;  %v18655_v37 = vunpack.i.l.bf16 %v18654_v63  ;;  %v18656_v38 = vunpack.i.h.bf16 %v18654_v63 }
 0x47d   : > { %18137 = vmatprep.subr.bf16.mxu0 %v18136_v0 }
 0x47e   : > { %18139 = vmatpush1.bf16.msra.mxu0 %v18138_v1  ;;  %v1066_v36 = vsel %vm693_vm12, %v18640_v23, %v18615_v11  ;;  %v1070_v49 = vsel %vm693_vm12, %v18655_v37, %v18645_v35 }
 0x47f   : > { %v18659_v12 = vpop.permute.xlu0 %18658  ;;  %v18669_v13 = vpop.permute.xlu1 %18668  ;;  %18141 = vmatprep.subr.bf16.mxu0 %v18140_v7 }
 0x480   : > { %v18661_v15 = vunpack.i.h.bf16 %v18659_v12  ;;  %v18660_v16 = vunpack.i.l.bf16 %v18659_v12  ;;  %v18671_v17 = vunpack.i.h.bf16 %v18669_v13  ;;  %v18670_v18 = vunpack.i.l.bf16 %v18669_v13 }
 0x482   : > { %v1064_v24 = vsel %vm693_vm12, %v18631_v9, %v18660_v16  ;;  %18143 = vmatpush1.bf16.msra.mxu0 %v18142_v14  ;;  %v1065_v25 = vsel %vm693_vm12, %v18660_v16, %v18661_v15  ;;  %v1069_v26 = vsel %vm693_vm12, %v18670_v18, %v18671_v17  ;;  %v1068_v30 = vsel %vm693_vm12, %v18641_v20, %v18670_v18 }
 0x483   : > { %v18664_v27 = vpop.permute.xlu0 %18663  ;;  %v18144_v28 = vpack.c.bf16 %v1065_v25, %v1063_v22  ;;  %v18146_v29 = vpack.c.bf16 %v1064_v24, %v1062_v19  ;;  %v18148_v33 = vpack.c.bf16 %v1069_v26, %v1067_v32  ;;  %v18150_v40 = vpack.c.bf16 %v1068_v30, %v1066_v36  ;;  %v229_v30 = vld [vmem:[%s25853_s1 + $0x68] sm:$0xff] }
 0x484   : > { %v18684_v31 = vpop.permute.xlu1 %18683  ;;  %v18666_v41 = vunpack.i.h.bf16 %v18664_v27  ;;  %v18665_v43 = vunpack.i.l.bf16 %v18664_v27 }
 0x485   : > { %18145 = vmatprep.subr.bf16.mxu0 %v18144_v28  ;;  %v18686_v60 = vunpack.i.h.bf16 %v18684_v31  ;;  %v18685_v61 = vunpack.i.l.bf16 %v18684_v31  ;;  %v228_v31 = vld [vmem:[%s25853_s1 + $0x60] sm:$0xff] }
 0x486   : > { %18147 = vmatpush1.bf16.msra.mxu0 %v18146_v29  ;;  %v1075_v59 = vsel %vm693_vm12, %v18665_v43, %v18666_v41  ;;  %v226_v29 = vld [vmem:[%s25853_s1 + $0x48] sm:$0xff] }
 0x487   : > { %v18674_v39 = vpop.permute.xlu0 %18673  ;;  %18149 = vmatprep.subr.bf16.mxu0 %v18148_v33  ;;  %v1079_v9 = vsel %vm693_vm12, %v18685_v61, %v18686_v60 }
 0x488   : > { %v18676_v44 = vunpack.i.h.bf16 %v18674_v39  ;;  %v18675_v45 = vunpack.i.l.bf16 %v18674_v39  ;;  %v18689_v46 = vpop.permute.xlu1 %18688 }
 0x489   : > { %v18691_v47 = vunpack.i.h.bf16 %v18689_v46  ;;  %v18690_v48 = vunpack.i.l.bf16 %v18689_v46 }
 0x48a   : > { %v1072_v50 = vsel %vm693_vm12, %v18656_v38, %v18675_v45  ;;  %18151 = vmatpush1.bf16.msra.mxu0 %v18150_v40  ;;  %v1073_v51 = vsel %vm693_vm12, %v18675_v45, %v18676_v44 }
 0x48b   : > { %v18679_v52 = vpop.permute.xlu0 %18678  ;;  %v18152_v53 = vpack.c.bf16 %v1073_v51, %v1071_v42  ;;  %v18154_v54 = vpack.c.bf16 %v1072_v50, %v1070_v49  ;;  %v1077_v55 = vsel %vm693_vm12, %v18690_v48, %v18691_v47 }
 0x48c   : > { %v18681_v56 = vunpack.i.h.bf16 %v18679_v52  ;;  %v18680_v57 = vunpack.i.l.bf16 %v18679_v52  ;;  %v18694_v58 = vpop.permute.xlu1 %18693  ;;  %v18156_v63 = vpack.c.bf16 %v1077_v55, %v1075_v59 }
 0x48d   : > { %v18695_v62 = vunpack.i.l.bf16 %v18694_v58  ;;  %18153 = vmatprep.subr.bf16.mxu0 %v18152_v53  ;;  %v18696_v4 = vunpack.i.h.bf16 %v18694_v58 }
 0x48e   : > { %v1074_v0 = vsel %vm693_vm12, %v18680_v57, %v18665_v43  ;;  %v1076_v1 = vsel %vm693_vm12, %v18681_v56, %v18690_v48  ;;  %18155 = vmatpush1.bf16.msra.mxu0 %v18154_v54 }
 0x48f   : > { %v18699_v2 = vpop.permute.xlu0 %18698  ;;  %18157 = vmatprep.subr.bf16.mxu0 %v18156_v63  ;;  %v18158_v3 = vpack.c.bf16 %v1076_v1, %v1074_v0  ;;  %v1078_v8 = vsel %vm693_vm12, %v18695_v62, %v18685_v61 }
 0x490   : > { %v18701_v5 = vunpack.i.h.bf16 %v18699_v2  ;;  %v18700_v6 = vunpack.i.l.bf16 %v18699_v2  ;;  %v18709_v7 = vpop.permute.xlu1 %18708 }
 0x491   : > { %v18711_v11 = vunpack.i.h.bf16 %v18709_v7  ;;  %v18710_v12 = vunpack.i.l.bf16 %v18709_v7 }
 0x492   : > { %v1080_v10 = vsel %vm693_vm12, %v18696_v4, %v18700_v6  ;;  %18159 = vmatpush1.bf16.msra.mxu0 %v18158_v3  ;;  %v1081_v13 = vsel %vm693_vm12, %v18700_v6, %v18701_v5 }
 0x493   : > { %v18704_v14 = vpop.permute.xlu0 %18703  ;;  %v18160_v15 = vpack.c.bf16 %v1081_v13, %v1079_v9  ;;  %v18162_v16 = vpack.c.bf16 %v1080_v10, %v1078_v8  ;;  %v1085_v20 = vsel %vm693_vm12, %v18710_v12, %v18711_v11 }
 0x494   : > { %v18706_v17 = vunpack.i.h.bf16 %v18704_v14  ;;  %v18705_v18 = vunpack.i.l.bf16 %v18704_v14 }
 0x495   : > { %18161 = vmatprep.subr.bf16.mxu0 %v18160_v15 }
 0x496   : > { %18163 = vmatpush1.bf16.msra.mxu0 %v18162_v16  ;;  %v1083_v19 = vsel %vm693_vm12, %v18705_v18, %v18706_v17 }
 0x497   : > { %v18714_v22 = vpop.permute.xlu0 %18713  ;;  %v18164_v23 = vpack.c.bf16 %v1085_v20, %v1083_v19 }
 0x498   : > { %v18716_v24 = vunpack.i.h.bf16 %v18714_v22  ;;  %v18715_v25 = vunpack.i.l.bf16 %v18714_v22 }
 0x499   : > { %18165 = vmatprep.subr.bf16.mxu0 %v18164_v23 }
 0x49a   : > { %v1082_v26 = vsel %vm693_vm12, %v18715_v25, %v18705_v18  ;;  %v1084_v27 = vsel %vm693_vm12, %v18716_v24, %v18710_v12 }
 0x49b   : > { %v18166_v28 = vpack.c.bf16 %v1084_v27, %v1082_v26 }
 0x49d   : > { %18167 = vmatpush1.bf16.msra.mxu0 %v18166_v28 }
 0x4a0   : > { %1194 = vmatmul.mubr.f32.vlgmr.msra.gmra.mrb[2].mxu0 %v226_v29 }
 0x4a1   : > { %15555 = vmatprep.mubr.msk.f32.mxu0 %vm1122_vm14, %v229_v30  ;;  %v935_v32 = vpop.permute.xlu1 %934 }
 0x4a4   : > { %1200 = vmatmul.mubr.f32.gmra.mrb[4].mxu0 %v228_v31 }
 0x4a5   : > { %v18719_v54 = vpop.permute.xlu1 %18718 }
 0x4a6   : > { %v18721_v3 = vunpack.i.h.bf16 %v18719_v54 }
 0x4a8   : > { %v940_v38 = vpop.permute.xlu0 %939 }
 0x573   : > { %v1195_v33 = vpop.f32.mrb[2].mxu0 }
 0x574   : > { %v1196_v34 = vadd.f32 %v1195_v33, %v935_v32  ;;  %v1197_v35 = vpop.f32.mrb[3].mxu0 }
 0x575   : > { %v1198_v36 = vadd.f32 %v1197_v35, %v935_v32 }
 0x576   : > { %v1206_v37 = vmul.f32 0.01, %v1196_v34 }
 0x577   : > { %v1207_v39 = vmul.f32 0.01, %v1198_v36  ;;  %v1201_v40 = vpop.f32.mrb[4].mxu0 }
 0x578   : > { %v1210_v41 = vmax.f32 %v1196_v34, %v1206_v37  ;;  %v1202_v43 = vadd.f32 %v1201_v40, %v940_v38  ;;  %v1203_v44 = vpop.f32.mrb[5].mxu0 }
 0x579   : > { %v1211_v45 = vmax.f32 %v1198_v36, %v1207_v39  ;;  %v1204_v46 = vadd.f32 %v1203_v44, %v940_v38 }
 0x57a   : > { %v1208_v47 = vmul.f32 0.01, %v1202_v43 }
 0x57b   : > { %1215 = vst.msk [vmem:[#allocation4 + $0x10] sm:$0xff] %vm566_vm5, %v1211_v45  ;;  %v1209_v48 = vmul.f32 0.01, %v1204_v46 }
 0x57c   : > { %v1212_v49 = vmax.f32 %v1202_v43, %v1208_v47 }
 0x57d   : > { %v1213_v50 = vmax.f32 %v1204_v46, %v1209_v48 }
 0x57f   : > { %1217 = vst.msk [vmem:[#allocation4 + $0x28] sm:$0xff] %vm566_vm5, %v1213_v50 }
 0x582   : > { %v1220_v42 = vld [vmem:[#allocation4 + $0x10] sm:$0xff] }
 0x583   : > { %v18727_v51 = vpack.i.bf16 %v1220_v42, %v1210_v41 }
 0x585   : > { %18728 = vrot.lane.b32.xlu0 %v18727_v51, %s20568_s10  ;;  %18723 = vrot.lane.b32.xlu1 %v18727_v51, %s20569_s11 }
 0x586   : > { %v1223_v52 = vld [vmem:[#allocation4 + $0x28] sm:$0xff] }
 0x587   : > { %v18732_v53 = vpack.i.bf16 %v1223_v52, %v1212_v49 }
 0x589   : > { %18733 = vrot.lane.b32.xlu0 %v18732_v53, %s20569_s11  ;;  %18743 = vrot.lane.b32.xlu1 %v18727_v51, %s20572_s23 }
 0x58d   : > { %18738 = vrot.lane.b32.xlu0 %v20758_v21, %s20568_s10  ;;  %18748 = vrot.lane.b32.xlu1 %v18732_v53, %s20568_s10 }
 0x591   : > { %18758 = vrot.lane.b32.xlu0 %v18732_v53, %s20572_s23  ;;  %18753 = vrot.lane.b32.xlu1 %v20758_v21, %s20572_s23 }
 0x595   : > { %18763 = vrot.lane.b32.xlu0 %v18727_v51, %s20573_s25  ;;  %18788 = vrot.lane.b32.xlu1 %v18732_v53, %s20573_s25 }
 0x599   : > { %18768 = vrot.lane.b32.xlu0 %v18727_v51, %s20571_s17  ;;  %18793 = vrot.lane.b32.xlu1 %v18732_v53, %s20571_s17 }
 0x59d   : > { %18773 = vrot.lane.b32.xlu0 %v18727_v51, %s20574_s26  ;;  %18798 = vrot.lane.b32.xlu1 %v18732_v53, %s20574_s26 }
 0x5a1   : > { %18778 = vrot.lane.b32.xlu0 %v18727_v51, %s20576_s6  ;;  %18803 = vrot.lane.b32.xlu1 %v18732_v53, %s20576_s6 }
 0x5a5   : > { %18783 = vrot.lane.b32.xlu0 %v18727_v51, %s25858_s30  ;;  %18808 = vrot.lane.b32.xlu1 %v18732_v53, %s25858_s30  ;;  %s16640_s30 = sshll.u32 %s20633_s22, 4  ;;  %s20581_s22 = smov [#allocation7]  }
 0x5a9   : > { %18813 = vrot.lane.b32.xlu0 %v18727_v51, %s20577_s7  ;;  %18823 = vrot.lane.b32.xlu1 %v18732_v53, %s20577_s7 }
 0x5ad   : > { %18818 = vrot.lane.b32.xlu0 %v20758_v21, %s20577_s7  ;;  %v18720_v21 = vunpack.i.l.bf16 %v18719_v54 }
 0x5f7   : > { %v18729_v55 = vpop.permute.xlu0 %18728  ;;  %v18724_v56 = vpop.permute.xlu1 %18723 }
 0x5f8   : > { %v18731_v57 = vunpack.i.h.bf16 %v18729_v55  ;;  %v18730_v58 = vunpack.i.l.bf16 %v18729_v55  ;;  %v18726_v59 = vunpack.i.h.bf16 %v18724_v56  ;;  %v18725_v60 = vunpack.i.l.bf16 %v18724_v56 }
 0x5fa   : > { %v1259_v61 = vsel %vm473_vm2, %v18730_v58, %v18731_v57  ;;  %v1243_v62 = vsel %vm309_vm3, %v18725_v60, %v18726_v59  ;;  %v1242_v12 = vsel %vm309_vm3, %v18720_v21, %v18725_v60 }
 0x5fb   : > { %v18832_v63 = vpack.i.bf16 %v18731_v57, %v1259_v61  ;;  %v18827_v0 = vpack.i.bf16 %v18726_v59, %v1243_v62  ;;  %v18734_v1 = vpop.permute.xlu0 %18733  ;;  %v18744_v2 = vpop.permute.xlu1 %18743 }
 0x5fc   : > { %v18735_v4 = vunpack.i.l.bf16 %v18734_v1  ;;  %v18746_v5 = vunpack.i.h.bf16 %v18744_v2  ;;  %v18745_v6 = vunpack.i.l.bf16 %v18744_v2  ;;  %v18736_v31 = vunpack.i.h.bf16 %v18734_v1 }
 0x5fd   : > { %18833 = vrot.lane.b32.xlu0 %v18832_v63, %s20577_s7  ;;  %18828 = vrot.lane.b32.xlu1 %v18827_v0, %s20577_s7 }
 0x5fe   : > { %v1275_v7 = vsel %vm596_vm6, %v18745_v6, %v18746_v5  ;;  %v1244_v11 = vsel %vm309_vm3, %v18721_v3, %v18735_v4  ;;  %v1245_v46 = vsel %vm309_vm3, %v18735_v4, %v18736_v31 }
 0x5ff   : > { %v18837_v8 = vpack.i.bf16 %v18746_v5, %v1275_v7  ;;  %v18739_v9 = vpop.permute.xlu0 %18738  ;;  %v18749_v10 = vpop.permute.xlu1 %18748  ;;  %v18847_v15 = vpack.i.bf16 %v1244_v11, %v1242_v12  ;;  %v18862_v48 = vpack.i.bf16 %v18736_v31, %v1245_v46 }
 0x600   : > { %v18741_v22 = vunpack.i.h.bf16 %v18739_v9  ;;  %v18740_v26 = vunpack.i.l.bf16 %v18739_v9  ;;  %v18750_v27 = vunpack.i.l.bf16 %v18749_v10  ;;  %v18751_v32 = vunpack.i.h.bf16 %v18749_v10 }
 0x601   : > { %18838 = vrot.lane.b32.xlu1 %v18837_v8, %s20577_s7 }
 0x602   : > { %v1258_v36 = vsel %vm473_vm2, %v18740_v26, %v18730_v58  ;;  %v1260_v37 = vsel %vm473_vm2, %v18741_v22, %v18750_v27  ;;  %v1261_v47 = vsel %vm473_vm2, %v18750_v27, %v18751_v32 }
 0x603   : > { %v18759_v13 = vpop.permute.xlu0 %18758  ;;  %v18754_v14 = vpop.permute.xlu1 %18753  ;;  %v18852_v45 = vpack.i.bf16 %v1260_v37, %v1258_v36  ;;  %v18877_v49 = vpack.i.bf16 %v18751_v32, %v1261_v47  ;;  %v265_v47 = vld [vmem:[%s25854_s2 + $0x38] sm:$0xff] }
 0x604   : > { %v18760_v16 = vunpack.i.l.bf16 %v18759_v13  ;;  %v18756_v17 = vunpack.i.h.bf16 %v18754_v14  ;;  %v18755_v18 = vunpack.i.l.bf16 %v18754_v14  ;;  %v18761_v53 = vunpack.i.h.bf16 %v18759_v13 }
 0x605   : > { %18848 = vrot.lane.b32.xlu1 %v18847_v15, %s20577_s7 }
 0x606   : > { %v1276_v19 = vsel %vm596_vm6, %v18756_v17, %v18760_v16  ;;  %v1274_v20 = vsel %vm596_vm6, %v18755_v18, %v18745_v6  ;;  %v1277_v61 = vsel %vm596_vm6, %v18760_v16, %v18761_v53 }
 0x607   : > { %v18764_v23 = vpop.permute.xlu0 %18763  ;;  %v18789_v24 = vpop.permute.xlu1 %18788  ;;  %v18857_v25 = vpack.i.bf16 %v1276_v19, %v1274_v20  ;;  %v18887_v1 = vpack.i.bf16 %v18761_v53, %v1277_v61 }
 0x608   : > { %v18766_v28 = vunpack.i.h.bf16 %v18764_v23  ;;  %v18765_v29 = vunpack.i.l.bf16 %v18764_v23  ;;  %v18790_v50 = vunpack.i.l.bf16 %v18789_v24  ;;  %v18791_v54 = vunpack.i.h.bf16 %v18789_v24 }
 0x609   : > { %18858 = vrot.lane.b32.xlu1 %v18857_v25, %s20577_s7 }
 0x60a   : > { %v1286_v30 = vsel %vm603_vm8, %v18765_v29, %v18766_v28  ;;  %v18867_v55 = vpack.i.bf16 %v18790_v50, %v18765_v29  ;;  %v1287_v62 = vsel %vm603_vm8, %v18790_v50, %v18791_v54 }
 0x60b   : > { %v18842_v33 = vpack.i.bf16 %v18766_v28, %v1286_v30  ;;  %v18769_v34 = vpop.permute.xlu0 %18768  ;;  %v20971_v35 = vpop.permute.xlu1 %18793  ;;  %v18897_v2 = vpack.i.bf16 %v18791_v54, %v1287_v62 }
 0x60c   : > { %v18771_v38 = vunpack.i.h.bf16 %v18769_v34  ;;  %v18770_v39 = vunpack.i.l.bf16 %v18769_v34  ;;  %v18795_v42 = vunpack.i.l.bf16 %v20971_v35  ;;  %v18796_v3 = vunpack.i.h.bf16 %v20971_v35 }
 0x60d   : > { %18843 = vrot.lane.b32.xlu0 %v18842_v33, %s20577_s7 }
 0x60e   : > { %v1296_v40 = vsel %vm609_vm7, %v18770_v39, %v18771_v38  ;;  %v18882_v56 = vpack.i.bf16 %v18795_v42, %v18770_v39  ;;  %v1297_v18 = vsel %vm609_vm7, %v18795_v42, %v18796_v3 }
 0x60f   : > { %v18872_v41 = vpack.i.bf16 %v18771_v38, %v1296_v40  ;;  %v20977_v43 = vpop.permute.xlu0 %18773  ;;  %v20979_v44 = vpop.permute.xlu1 %18798  ;;  %v18902_v26 = vpack.i.bf16 %v18796_v3, %v1297_v18 }
 0x610   : > { %v18776_v57 = vunpack.i.h.bf16 %v20977_v43  ;;  %v18775_v58 = vunpack.i.l.bf16 %v20977_v43  ;;  %v18801_v10 = vunpack.i.h.bf16 %v20979_v44  ;;  %v18800_v11 = vunpack.i.l.bf16 %v20979_v44  ;;  %v231_v43 = vld [vmem:[%s25853_s1 + $0x80] sm:$0xff] }
 0x611   : > { %18853 = vrot.lane.b32.xlu0 %v18852_v45, %s20577_s7  ;;  %18873 = vrot.lane.b32.xlu1 %v18872_v41, %s20577_s7  ;;  %v263_v45 = vld [vmem:[%s25854_s2 + $0x28] sm:$0xff] }
 0x612   : > { %v1306_v4 = vsel %vm615_vm9, %v18775_v58, %v18776_v57  ;;  %v1307_v23 = vsel %vm615_vm9, %v18800_v11, %v18801_v10  ;;  %v18907_v33 = vpack.i.bf16 %v18800_v11, %v18775_v58  ;;  %15556 = vmatprep.mubr.msk.f32.mxu1 %vm1122_vm14, %v231_v43 }
 0x613   : > { %v18779_v51 = vpop.permute.xlu0 %18778  ;;  %v20986_v52 = vpop.permute.xlu1 %18803  ;;  %v18892_v15 = vpack.i.bf16 %v18776_v57, %v1306_v4  ;;  %v18917_v28 = vpack.i.bf16 %v18801_v10, %v1307_v23 }
 0x614   : > { %v18781_v63 = vunpack.i.h.bf16 %v18779_v51  ;;  %v18780_v0 = vunpack.i.l.bf16 %v18779_v51  ;;  %v18806_v29 = vunpack.i.h.bf16 %v20986_v52  ;;  %v18805_v30 = vunpack.i.l.bf16 %v20986_v52 }
 0x615   : > { %18863 = vrot.lane.b32.xlu0 %v18862_v48, %s20577_s7  ;;  %18878 = vrot.lane.b32.xlu1 %v18877_v49, %s20577_s7  ;;  %v264_v48 = vld [vmem:[%s25854_s2 + $0x30] sm:$0xff]  ;;  %v266_v49 = vld [vmem:[%s25854_s2 + $0x40] sm:$0xff] }
 0x616   : > { %v1316_v12 = vsel %vm621_vm10, %v18780_v0, %v18781_v63  ;;  %v1317_v34 = vsel %vm621_vm10, %v18805_v30, %v18806_v29  ;;  %v18922_v35 = vpack.i.bf16 %v18805_v30, %v18780_v0 }
 0x617   : > { %v20992_v59 = vpop.permute.xlu0 %18783  ;;  %v20994_v60 = vpop.permute.xlu1 %18808  ;;  %v18912_v19 = vpack.i.bf16 %v18781_v63, %v1316_v12  ;;  %v18927_v39 = vpack.i.bf16 %v18806_v29, %v1317_v34 }
 0x618   : > { %v18811_v31 = vunpack.i.h.bf16 %v20994_v60  ;;  %v18810_v32 = vunpack.i.l.bf16 %v20994_v60  ;;  %v18786_v36 = vunpack.i.h.bf16 %v20992_v59  ;;  %v18785_v37 = vunpack.i.l.bf16 %v20992_v59 }
 0x619   : > { %18868 = vrot.lane.b32.xlu0 %v18867_v55, %s20577_s7  ;;  %18883 = vrot.lane.b32.xlu1 %v18882_v56, %s20577_s7 }
 0x61a   : > { %v1327_v38 = vsel %vm627_vm11, %v18810_v32, %v18811_v31  ;;  %v1326_v40 = vsel %vm627_vm11, %v18785_v37, %v18786_v36  ;;  %v18942_v46 = vpack.i.bf16 %v18810_v32, %v18785_v37 }
 0x61b   : > { %v18814_v5 = vpop.permute.xlu0 %18813  ;;  %v18824_v6 = vpop.permute.xlu1 %18823  ;;  %v18937_v41 = vpack.i.bf16 %v18811_v31, %v1327_v38  ;;  %v18932_v44 = vpack.i.bf16 %v18786_v36, %v1326_v40 }
 0x61c   : > { %v18816_v21 = vunpack.i.h.bf16 %v18814_v5  ;;  %v18815_v7 = vunpack.i.l.bf16 %v18814_v5  ;;  %v18826_v8 = vunpack.i.h.bf16 %v18824_v6  ;;  %v18825_v9 = vunpack.i.l.bf16 %v18824_v6 }
 0x61d   : > { %18888 = vrot.lane.b32.xlu0 %v18887_v1, %s20577_s7  ;;  %18898 = vrot.lane.b32.xlu1 %v18897_v2, %s20577_s7 }
 0x61e   : > { %v1457_v13 = vsel %vm693_vm12, %v18815_v7, %v18816_v21  ;;  %v1459_v14 = vsel %vm693_vm12, %v18825_v9, %v18826_v8 }
 0x61f   : > { %v18819_v16 = vpop.permute.xlu0 %18818  ;;  %v18168_v17 = vpack.c.bf16 %v1459_v14, %v1457_v13 }
 0x620   : > { %v18821_v20 = vunpack.i.h.bf16 %v18819_v16  ;;  %v18820_v22 = vunpack.i.l.bf16 %v18819_v16 }
 0x621   : > { %18169 = vmatprep.subr.bf16.mxu1 %v18168_v17  ;;  %18893 = vrot.lane.b32.xlu0 %v18892_v15, %s20577_s7 }
 0x622   : > { %v1456_v24 = vsel %vm693_vm12, %v18820_v22, %v18815_v7  ;;  %v1458_v25 = vsel %vm693_vm12, %v18821_v20, %v18825_v9  ;;  %18913 = vrot.lane.b32.xlu1 %v18912_v19, %s20577_s7 }
 0x623   : > { %v18170_v27 = vpack.c.bf16 %v1458_v25, %v1456_v24 }
 0x625   : > { %18171 = vmatpush1.bf16.msra.mxu1 %v18170_v27  ;;  %18903 = vrot.lane.b32.xlu0 %v18902_v26, %s20577_s7 }
 0x626   : > { %18918 = vrot.lane.b32.xlu1 %v18917_v28, %s20577_s7 }
 0x629   : > { %18908 = vrot.lane.b32.xlu0 %v18907_v33, %s20577_s7 }
 0x62a   : > { %18923 = vrot.lane.b32.xlu1 %v18922_v35, %s20577_s7 }
 0x62d   : > { %18928 = vrot.lane.b32.xlu0 %v18927_v39, %s20577_s7 }
 0x62e   : > { %18938 = vrot.lane.b32.xlu1 %v18937_v41, %s20577_s7 }
 0x631   : > { %18933 = vrot.lane.b32.xlu0 %v18932_v44, %s20577_s7 }
 0x632   : > { %1330 = vperm.xlu1 %18486, %v263_v45  }
 0x635   : > { %18943 = vrot.lane.b32.xlu0 %v18942_v46, %s20577_s7 }
 0x636   : > { %1340 = vperm.xlu1 %18486, %v265_v47  }
 0x639   : > { %1335 = vperm.xlu0 %18390, %v264_v48  }
 0x63d   : > { %1345 = vperm.xlu0 %18390, %v266_v49  }
 0x66f   : > { %v18829_v50 = vpop.permute.xlu1 %18828  ;;  %v18834_v52 = vpop.permute.xlu0 %18833 }
 0x670   : > { %v18831_v57 = vunpack.i.h.bf16 %v18829_v50  ;;  %v18830_v58 = vunpack.i.l.bf16 %v18829_v50  ;;  %v18836_v60 = vunpack.i.h.bf16 %v18834_v52  ;;  %v18835_v61 = vunpack.i.l.bf16 %v18834_v52 }
 0x672   : > { %v1461_v21 = vsel %vm693_vm12, %v18830_v58, %v18831_v57  ;;  %v1465_v16 = vsel %vm693_vm12, %v18835_v61, %v18836_v60 }
 0x673   : > { %v18839_v42 = vpop.permute.xlu1 %18838 }
 0x674   : > { %v18841_v17 = vunpack.i.h.bf16 %v18839_v42  ;;  %v18840_v18 = vunpack.i.l.bf16 %v18839_v42 }
 0x676   : > { %v1469_v35 = vsel %vm693_vm12, %v18840_v18, %v18841_v17 }
 0x677   : > { %v18849_v51 = vpop.permute.xlu1 %18848 }
 0x678   : > { %v18850_v59 = vunpack.i.l.bf16 %v18849_v51  ;;  %v18851_v62 = vunpack.i.h.bf16 %v18849_v51 }
 0x67a   : > { %v1460_v5 = vsel %vm693_vm12, %v18850_v59, %v18830_v58 }
 0x67b   : > { %v18859_v53 = vpop.permute.xlu1 %18858 }
 0x67c   : > { %v18860_v19 = vunpack.i.l.bf16 %v18859_v53  ;;  %v18861_v23 = vunpack.i.h.bf16 %v18859_v53 }
 0x67e   : > { %v1468_v33 = vsel %vm693_vm12, %v18860_v19, %v18840_v18 }
 0x67f   : > { %v21048_v54 = vpop.permute.xlu0 %18843 }
 0x680   : > { %v18846_v24 = vunpack.i.h.bf16 %v21048_v54  ;;  %v18845_v25 = vunpack.i.l.bf16 %v21048_v54 }
 0x682   : > { %v1473_v46 = vsel %vm693_vm12, %v18845_v25, %v18846_v24 }
 0x683   : > { %v18854_v55 = vpop.permute.xlu0 %18853  ;;  %v21050_v56 = vpop.permute.xlu1 %18873 }
 0x684   : > { %v18856_v6 = vunpack.i.h.bf16 %v18854_v55  ;;  %v18855_v7 = vunpack.i.l.bf16 %v18854_v55  ;;  %v18876_v48 = vunpack.i.h.bf16 %v21050_v56  ;;  %v18875_v49 = vunpack.i.l.bf16 %v21050_v56 }
 0x686   : > { %v1464_v22 = vsel %vm693_vm12, %v18855_v7, %v18835_v61  ;;  %v1477_v56 = vsel %vm693_vm12, %v18875_v49, %v18876_v48  ;;  %v236_v48 = vld [vmem:[%s25853_s1 + $0xc0] sm:$0xff] }
 0x687   : > { %v18864_v63 = vpop.permute.xlu0 %18863  ;;  %v18879_v0 = vpop.permute.xlu1 %18878 }
 0x688   : > { %v18866_v1 = vunpack.i.h.bf16 %v18864_v63  ;;  %v18865_v2 = vunpack.i.l.bf16 %v18864_v63  ;;  %v18881_v3 = vunpack.i.h.bf16 %v18879_v0  ;;  %v18880_v4 = vunpack.i.l.bf16 %v18879_v0 }
 0x68a   : > { %v1462_v8 = vsel %vm693_vm12, %v18851_v62, %v18865_v2  ;;  %v1463_v9 = vsel %vm693_vm12, %v18865_v2, %v18866_v1  ;;  %v1467_v10 = vsel %vm693_vm12, %v18880_v4, %v18881_v3  ;;  %v1466_v15 = vsel %vm693_vm12, %v18856_v6, %v18880_v4 }
 0x68b   : > { %v18869_v11 = vpop.permute.xlu0 %18868  ;;  %v18884_v12 = vpop.permute.xlu1 %18883  ;;  %v18172_v13 = vpack.c.bf16 %v1463_v9, %v1461_v21  ;;  %v18174_v14 = vpack.c.bf16 %v1462_v8, %v1460_v5  ;;  %v18176_v20 = vpack.c.bf16 %v1467_v10, %v1465_v16  ;;  %v18178_v28 = vpack.c.bf16 %v1466_v15, %v1464_v22 }
 0x68c   : > { %v18871_v34 = vunpack.i.h.bf16 %v18869_v11  ;;  %v18870_v36 = vunpack.i.l.bf16 %v18869_v11  ;;  %v18885_v42 = vunpack.i.l.bf16 %v18884_v12  ;;  %v18886_v51 = vunpack.i.h.bf16 %v18884_v12 }
 0x68d   : > { %18173 = vmatprep.subr.bf16.mxu1 %v18172_v13 }
 0x68e   : > { %18175 = vmatpush1.bf16.msra.mxu1 %v18174_v14  ;;  %v1472_v50 = vsel %vm693_vm12, %v18870_v36, %v18845_v25  ;;  %v1476_v62 = vsel %vm693_vm12, %v18885_v42, %v18875_v49  ;;  %v20498_v49 = vld [vmem:[#allocation2] sm:$0xff] }
 0x68f   : > { %v18889_v26 = vpop.permute.xlu0 %18888  ;;  %v18899_v27 = vpop.permute.xlu1 %18898  ;;  %18177 = vmatprep.subr.bf16.mxu1 %v18176_v20 }
 0x690   : > { %v18891_v29 = vunpack.i.h.bf16 %v18889_v26  ;;  %v18890_v30 = vunpack.i.l.bf16 %v18889_v26  ;;  %v18901_v31 = vunpack.i.h.bf16 %v18899_v27  ;;  %v18900_v32 = vunpack.i.l.bf16 %v18899_v27 }
 0x692   : > { %v1470_v37 = vsel %vm693_vm12, %v18861_v23, %v18890_v30  ;;  %18179 = vmatpush1.bf16.msra.mxu1 %v18178_v28  ;;  %v1471_v38 = vsel %vm693_vm12, %v18890_v30, %v18891_v29  ;;  %v1475_v39 = vsel %vm693_vm12, %v18900_v32, %v18901_v31  ;;  %v1474_v44 = vsel %vm693_vm12, %v18871_v34, %v18900_v32 }
 0x693   : > { %v18894_v40 = vpop.permute.xlu0 %18893  ;;  %v18180_v41 = vpack.c.bf16 %v1471_v38, %v1469_v35  ;;  %v18182_v43 = vpack.c.bf16 %v1470_v37, %v1468_v33  ;;  %v18184_v47 = vpack.c.bf16 %v1475_v39, %v1473_v46  ;;  %v18186_v53 = vpack.c.bf16 %v1474_v44, %v1472_v50  ;;  %v232_v44 = vld [vmem:[%s25853_s1 + $0x90] sm:$0xff]  ;;  %v234_v46 = vld [vmem:[%s25853_s1 + $0xa8] sm:$0xff] }
 0x694   : > { %v18914_v45 = vpop.permute.xlu1 %18913  ;;  %v18896_v54 = vunpack.i.h.bf16 %v18894_v40  ;;  %v18895_v55 = vunpack.i.l.bf16 %v18894_v40  ;;  %v21112_v50 = vpack.i.bf16 %v20498_v49, %v20498_v49 }
 0x695   : > { %18181 = vmatprep.subr.bf16.mxu1 %v18180_v41  ;;  %v18916_v8 = vunpack.i.h.bf16 %v18914_v45  ;;  %v18915_v9 = vunpack.i.l.bf16 %v18914_v45  ;;  %v230_v41 = vld [vmem:[%s25853_s1 + $0x78] sm:$0xff]  ;;  %v235_v45 = vld [vmem:[%s25853_s1 + $0xb0] sm:$0xff] }
 0x696   : > { %18183 = vmatpush1.bf16.msra.mxu1 %v18182_v43  ;;  %v1481_v7 = vsel %vm693_vm12, %v18895_v55, %v18896_v54  ;;  %v233_v43 = vld [vmem:[%s25853_s1 + $0x98] sm:$0xff]  ;;  %18948 = vrot.lane.b32.xlu1 %v21112_v50, %s20569_s11 }
 0x697   : > { %v18904_v52 = vpop.permute.xlu0 %18903  ;;  %18185 = vmatprep.subr.bf16.mxu1 %v18184_v47  ;;  %v1485_v22 = vsel %vm693_vm12, %v18915_v9, %v18916_v8  ;;  %v237_v47 = vld [vmem:[%s25853_s1 + $0xc8] sm:$0xff]  ;;  %18953 = vrot.lane.b32.xlu0 %v21112_v50, %s20569_s11 }
 0x698   : > { %v18906_v57 = vunpack.i.h.bf16 %v18904_v52  ;;  %v18905_v58 = vunpack.i.l.bf16 %v18904_v52  ;;  %v18919_v59 = vpop.permute.xlu1 %18918 }
 0x699   : > { %v18921_v60 = vunpack.i.h.bf16 %v18919_v59  ;;  %v18920_v61 = vunpack.i.l.bf16 %v18919_v59 }
 0x69a   : > { %v1478_v63 = vsel %vm693_vm12, %v18886_v51, %v18905_v58  ;;  %18187 = vmatpush1.bf16.msra.mxu1 %v18186_v53  ;;  %v1479_v0 = vsel %vm693_vm12, %v18905_v58, %v18906_v57  ;;  %18958 = vrot.lane.b32.xlu1 %v21112_v50, %s20568_s10 }
 0x69b   : > { %v18909_v1 = vpop.permute.xlu0 %18908  ;;  %v18188_v2 = vpack.c.bf16 %v1479_v0, %v1477_v56  ;;  %v18190_v3 = vpack.c.bf16 %v1478_v63, %v1476_v62  ;;  %v1483_v4 = vsel %vm693_vm12, %v18920_v61, %v18921_v60  ;;  %18963 = vrot.lane.b32.xlu0 %v21112_v50, %s20568_s10 }
 0x69c   : > { %v18911_v5 = vunpack.i.h.bf16 %v18909_v1  ;;  %v18910_v6 = vunpack.i.l.bf16 %v18909_v1  ;;  %v18924_v21 = vpop.permute.xlu1 %18923  ;;  %v18192_v11 = vpack.c.bf16 %v1483_v4, %v1481_v7 }
 0x69d   : > { %v18925_v10 = vunpack.i.l.bf16 %v18924_v21  ;;  %18189 = vmatprep.subr.bf16.mxu1 %v18188_v2  ;;  %v18926_v16 = vunpack.i.h.bf16 %v18924_v21 }
 0x69e   : > { %v1480_v12 = vsel %vm693_vm12, %v18910_v6, %v18895_v55  ;;  %v1482_v13 = vsel %vm693_vm12, %v18911_v5, %v18920_v61  ;;  %18191 = vmatpush1.bf16.msra.mxu1 %v18190_v3  ;;  %18968 = vrot.lane.b32.xlu1 %v21112_v50, %s20572_s23 }
 0x69f   : > { %v18929_v14 = vpop.permute.xlu0 %18928  ;;  %18193 = vmatprep.subr.bf16.mxu1 %v18192_v11  ;;  %v18194_v15 = vpack.c.bf16 %v1482_v13, %v1480_v12  ;;  %v1484_v20 = vsel %vm693_vm12, %v18925_v10, %v18915_v9  ;;  %18973 = vrot.lane.b32.xlu0 %v21112_v50, %s20572_s23 }
 0x6a0   : > { %v18931_v17 = vunpack.i.h.bf16 %v18929_v14  ;;  %v18930_v18 = vunpack.i.l.bf16 %v18929_v14  ;;  %v18939_v19 = vpop.permute.xlu1 %18938 }
 0x6a1   : > { %v18941_v24 = vunpack.i.h.bf16 %v18939_v19  ;;  %v18940_v25 = vunpack.i.l.bf16 %v18939_v19 }
 0x6a2   : > { %v1486_v23 = vsel %vm693_vm12, %v18926_v16, %v18930_v18  ;;  %18195 = vmatpush1.bf16.msra.mxu1 %v18194_v15  ;;  %v1487_v26 = vsel %vm693_vm12, %v18930_v18, %v18931_v17 }
 0x6a3   : > { %v18934_v27 = vpop.permute.xlu0 %18933  ;;  %v18196_v28 = vpack.c.bf16 %v1487_v26, %v1485_v22  ;;  %v18198_v29 = vpack.c.bf16 %v1486_v23, %v1484_v20  ;;  %v1491_v33 = vsel %vm693_vm12, %v18940_v25, %v18941_v24 }
 0x6a4   : > { %v18936_v30 = vunpack.i.h.bf16 %v18934_v27  ;;  %v18935_v31 = vunpack.i.l.bf16 %v18934_v27 }
 0x6a5   : > { %18197 = vmatprep.subr.bf16.mxu1 %v18196_v28 }
 0x6a6   : > { %18199 = vmatpush1.bf16.msra.mxu1 %v18198_v29  ;;  %v1489_v32 = vsel %vm693_vm12, %v18935_v31, %v18936_v30 }
 0x6a7   : > { %v18944_v34 = vpop.permute.xlu0 %18943  ;;  %v18200_v35 = vpack.c.bf16 %v1491_v33, %v1489_v32 }
 0x6a8   : > { %v18946_v36 = vunpack.i.h.bf16 %v18944_v34  ;;  %v18945_v37 = vunpack.i.l.bf16 %v18944_v34 }
 0x6a9   : > { %18201 = vmatprep.subr.bf16.mxu1 %v18200_v35 }
 0x6aa   : > { %v1488_v38 = vsel %vm693_vm12, %v18945_v37, %v18935_v31  ;;  %v1490_v39 = vsel %vm693_vm12, %v18946_v36, %v18940_v25 }
 0x6ab   : > { %v18202_v40 = vpack.c.bf16 %v1490_v39, %v1488_v38 }
 0x6ad   : > { %18203 = vmatpush1.bf16.msra.mxu1 %v18202_v40 }
 0x6b0   : > { %1605 = vmatmul.mubr.f32.vlgmr.msra.gmra.mrb[6].mxu1 %v230_v41 }
 0x6b1   : > { %15557 = vmatprep.mubr.msk.f32.mxu1 %vm1122_vm14, %v233_v43  ;;  %v1331_v42 = vpop.permute.xlu1 %1330 }
 0x6b4   : > { %1611 = vmatmul.mubr.f32.gmra.mrb[8].mxu1 %v232_v44 }
 0x6b5   : > { %15558 = vmatprep.mubr.msk.f32.mxu1 %vm1122_vm14, %v235_v45  ;;  %v1341_v61 = vpop.permute.xlu1 %1340 }
 0x6b8   : > { %1617 = vmatmul.mubr.f32.gmra.mrb[10].mxu1 %v234_v46  ;;  %v1336_v55 = vpop.permute.xlu0 %1335 }
 0x6b9   : > { %15559 = vmatprep.mubr.msk.f32.mxu1 %vm1122_vm14, %v237_v47 }
 0x6bc   : > { %1623 = vmatmul.mubr.f32.gmra.mrb[12].mxu1 %v236_v48  ;;  %v1346_v1 = vpop.permute.xlu0 %1345 }
 0x6bd   : > { %2617 = vmatprep.mubr.f32.mxu1 %v20498_v49 }
 0x708   : > { %v21170_v22 = vpop.permute.xlu1 %18948 }
 0x709   : > { %v21172_v23 = vpop.permute.xlu0 %18953 }
 0x70c   : > { %v21174_v24 = vpop.permute.xlu1 %18958 }
 0x70d   : > { %v21176_v25 = vpop.permute.xlu0 %18963 }
 0x710   : > { %v21178_v26 = vpop.permute.xlu1 %18968 }
 0x711   : > { %v21180_v27 = vpop.permute.xlu0 %18973 }
 0x783   : > { %v1606_v51 = vpop.f32.mrb[6].mxu1 }
 0x784   : > { %v1607_v52 = vadd.f32 %v1606_v51, %v1331_v42  ;;  %v1608_v53 = vpop.f32.mrb[7].mxu1 }
 0x785   : > { %v1609_v54 = vadd.f32 %v1608_v53, %v1331_v42 }
 0x786   : > { %20475 = vtanh.f32 %v1607_v52 }
 0x787   : > { %20477 = vtanh.f32 %v1609_v54  ;;  %v1612_v57 = vpop.f32.mrb[8].mxu1 }
 0x788   : > { %v1613_v58 = vadd.f32 %v1612_v57, %v1336_v55  ;;  %v1614_v59 = vpop.f32.mrb[9].mxu1 }
 0x789   : > { %v1615_v60 = vadd.f32 %v1614_v59, %v1336_v55 }
 0x78a   : > { %20479 = vtanh.f32 %v1613_v58 }
 0x78b   : > { %20481 = vtanh.f32 %v1615_v60  ;;  %v1618_v62 = vpop.f32.mrb[10].mxu1 }
 0x78c   : > { %v1619_v63 = vadd.f32 %v1618_v62, %v1341_v61  ;;  %v1620_v56 = vpop.f32.mrb[11].mxu1 }
 0x78d   : > { %v1621_v0 = vadd.f32 %v1620_v56, %v1341_v61 }
 0x78e   : > { %20483 = vtanh.f32 %v1619_v63 }
 0x78f   : > { %20485 = vtanh.f32 %v1621_v0  ;;  %v1624_v2 = vpop.f32.mrb[12].mxu1 }
 0x790   : > { %v20476_v3 = vpop.eup %20475  ;;  %v1625_v4 = vadd.f32 %v1624_v2, %v1346_v1  ;;  %v1626_v5 = vpop.f32.mrb[13].mxu1 }
 0x791   : > { %v20478_v6 = vpop.eup %20477  ;;  %v1627_v21 = vadd.f32 %v1626_v5, %v1346_v1 }
 0x792   : > { %1638 = vst.msk [vmem:[#allocation5 + $0x10] sm:$0xff] %vm566_vm5, %v20478_v6  ;;  %20487 = vtanh.f32 %v1625_v4 }
 0x793   : > { %20489 = vtanh.f32 %v1627_v21 }
 0x794   : > { %v20480_v7 = vpop.eup %20479 }
 0x795   : > { %v20482_v8 = vpop.eup %20481 }
 0x796   : > { %1640 = vst.msk [vmem:[#allocation5 + $0x28] sm:$0xff] %vm566_vm5, %v20482_v8  ;;  %v18950_v8 = vunpack.i.l.bf16 %v21170_v22 }
 0x798   : > { %v20484_v9 = vpop.eup %20483 }
 0x799   : > { %v20486_v10 = vpop.eup %20485  ;;  %v1647_v11 = vld [vmem:[#allocation5 + $0x10] sm:$0xff] }
 0x79a   : > { %1642 = vst.msk [vmem:[#allocation5 + $0x40] sm:$0xff] %vm566_vm5, %v20486_v10  ;;  %v18977_v12 = vpack.i.bf16 %v1647_v11, %v20476_v3  ;;  %v18951_v3 = vunpack.i.h.bf16 %v21170_v22  ;;  %v18961_v10 = vunpack.i.h.bf16 %v21174_v24 }
 0x79c   : > { %v20488_v13 = vpop.eup %20487  ;;  %18978 = vrot.lane.b32.xlu1 %v18977_v12, %s20569_s11 }
 0x79d   : > { %v20490_v14 = vpop.eup %20489  ;;  %v1650_v15 = vld [vmem:[#allocation5 + $0x28] sm:$0xff] }
 0x79e   : > { %1644 = vst.msk [vmem:[#allocation5 + $0x58] sm:$0xff] %vm566_vm5, %v20490_v14  ;;  %v19017_v16 = vpack.i.bf16 %v1650_v15, %v20480_v7  ;;  %v18960_v15 = vunpack.i.l.bf16 %v21174_v24  ;;  %vm2670_vm5 = vsmask.f32 1280 }
 0x7a0   : > { %19018 = vrot.lane.b32.xlu0 %v19017_v16, %s20569_s11  ;;  %18983 = vrot.lane.b32.xlu1 %v18977_v12, %s20568_s10 }
 0x7a1   : > { %v1653_v17 = vld [vmem:[#allocation5 + $0x40] sm:$0xff] }
 0x7a2   : > { %v19072_v18 = vpack.i.bf16 %v1653_v17, %v20484_v9  ;;  %v18971_v17 = vunpack.i.h.bf16 %v21178_v26 }
 0x7a4   : > { %19023 = vrot.lane.b32.xlu0 %v19017_v16, %s20568_s10  ;;  %18988 = vrot.lane.b32.xlu1 %v18977_v12, %s20572_s23 }
 0x7a5   : > { %v1656_v19 = vld [vmem:[#allocation5 + $0x58] sm:$0xff] }
 0x7a6   : > { %v19092_v20 = vpack.i.bf16 %v1656_v19, %v20488_v13 }
 0x7a8   : > { %19028 = vrot.lane.b32.xlu0 %v19017_v16, %s20572_s23  ;;  %18993 = vrot.lane.b32.xlu1 %v18977_v12, %s20573_s25 }
 0x7ac   : > { %19033 = vrot.lane.b32.xlu0 %v19017_v16, %s20573_s25  ;;  %18998 = vrot.lane.b32.xlu1 %v18977_v12, %s20571_s17 }
 0x7b0   : > { %19038 = vrot.lane.b32.xlu0 %v19017_v16, %s20571_s17  ;;  %19003 = vrot.lane.b32.xlu1 %v18977_v12, %s20574_s26 }
 0x7b4   : > { %19043 = vrot.lane.b32.xlu0 %v19017_v16, %s20574_s26  ;;  %19008 = vrot.lane.b32.xlu1 %v18977_v12, %s20576_s6 }
 0x7b8   : > { %19048 = vrot.lane.b32.xlu0 %v19017_v16, %s20576_s6  ;;  %19013 = vrot.lane.b32.xlu1 %v18977_v12, %s20577_s7 }
 0x7bc   : > { %19053 = vrot.lane.b32.xlu0 %v19017_v16, %s20577_s7  ;;  %19073 = vrot.lane.b32.xlu1 %v19072_v18, %s20573_s25 }
 0x7c0   : > { %19058 = vrot.lane.b32.xlu0 %v19072_v18, %s20569_s11  ;;  %19078 = vrot.lane.b32.xlu1 %v19072_v18, %s20571_s17 }
 0x7c4   : > { %19063 = vrot.lane.b32.xlu0 %v19072_v18, %s20568_s10  ;;  %19083 = vrot.lane.b32.xlu1 %v19072_v18, %s20574_s26 }
 0x7c8   : > { %19068 = vrot.lane.b32.xlu0 %v19072_v18, %s20572_s23  ;;  %19088 = vrot.lane.b32.xlu1 %v19072_v18, %s20576_s6 }
 0x7cc   : > { %19103 = vrot.lane.b32.xlu0 %v19072_v18, %s20577_s7  ;;  %19093 = vrot.lane.b32.xlu1 %v19092_v20, %s20569_s11 }
 0x7d0   : > { %19108 = vrot.lane.b32.xlu0 %v21112_v50, %s20577_s7  ;;  %19098 = vrot.lane.b32.xlu1 %v21112_v50, %s20577_s7 }
 0x7d4   : > { %19113 = vrot.lane.b32.xlu0 %v18977_v12, %s25864_s16  ;;  %19118 = vrot.lane.b32.xlu1 %v19092_v20, %s20568_s10 }
 0x7d8   : > { %19138 = vrot.lane.b32.xlu0 %v19092_v20, %s20573_s25  ;;  %19123 = vrot.lane.b32.xlu1 %v19017_v16, %s25864_s16 }
 0x7dc   : > { %19143 = vrot.lane.b32.xlu0 %v19092_v20, %s20571_s17  ;;  %19128 = vrot.lane.b32.xlu1 %v19092_v20, %s20572_s23 }
 0x7e0   : > { %19148 = vrot.lane.b32.xlu0 %v19092_v20, %s20574_s26  ;;  %19133 = vrot.lane.b32.xlu1 %v19072_v18, %s25864_s16 }
 0x7e4   : > { %19153 = vrot.lane.b32.xlu0 %v19092_v20, %s20576_s6  ;;  %19158 = vrot.lane.b32.xlu1 %v19092_v20, %s20577_s7 }
 0x7e8   : > { %19163 = vrot.lane.b32.xlu0 %v19092_v20, %s25864_s16  ;;  %s20506_s16 = sshll.u32 %s20581_s22, 4  ;;  %s20507_s16 = int_to_ptr.vmem [resolvable:$false] %s20506_s16 }
 0x7e9   : > { %s20508_s10 = scalar_lea.vmem %s20507_s16, 32  ;;  %p20509_p0 = scmp.lt.s32.totalorder %s25812_s12, %s20507_s16 }
 0x7ea   : > { %p20510_p1 = scmp.lt.s32.totalorder %s20508_s10, %s20502_s15 }
 0x7ec   : > { %p20511_p2 = por %p20510_p1, %p20509_p0 }
 0x7ee   : > { %p20512_p3 = pnand %p20511_p2, %p20505_p13 }
 0x80e   : > { %v18979_v28 = vpop.permute.xlu1 %18978 }
 0x80f   : > { %v18981_v29 = vunpack.i.h.bf16 %v18979_v28  ;;  %v18980_v30 = vunpack.i.l.bf16 %v18979_v28  ;;  %v18970_v28 = vunpack.i.l.bf16 %v21178_v26 }
 0x811   : > { %v1694_v31 = vsel %vm309_vm3, %v18980_v30, %v18981_v29  ;;  %v1693_v11 = vsel %vm309_vm3, %v18950_v8, %v18980_v30 }
 0x812   : > { %v19167_v32 = vpack.i.bf16 %v18981_v29, %v1694_v31  ;;  %v19019_v33 = vpop.permute.xlu0 %19018  ;;  %v18984_v34 = vpop.permute.xlu1 %18983 }
 0x813   : > { %v19021_v35 = vunpack.i.h.bf16 %v19019_v33  ;;  %v19020_v36 = vunpack.i.l.bf16 %v19019_v33  ;;  %v18986_v37 = vunpack.i.h.bf16 %v18984_v34  ;;  %v18985_v38 = vunpack.i.l.bf16 %v18984_v34 }
 0x814   : > { %19168 = vrot.lane.b32.xlu1 %v19167_v32, %s20577_s7 }
 0x815   : > { %v1696_v39 = vsel %vm309_vm3, %v19020_v36, %v19021_v35  ;;  %v1726_v40 = vsel %vm473_vm2, %v18985_v38, %v18986_v37  ;;  %v1695_v9 = vsel %vm309_vm3, %v18951_v3, %v19020_v36  ;;  %v1725_v18 = vsel %vm473_vm2, %v18960_v15, %v18985_v38 }
 0x816   : > { %v19207_v41 = vpack.i.bf16 %v19021_v35, %v1696_v39  ;;  %v19172_v43 = vpack.i.bf16 %v18986_v37, %v1726_v40  ;;  %v19024_v44 = vpop.permute.xlu0 %19023  ;;  %v18989_v45 = vpop.permute.xlu1 %18988  ;;  %v19192_v14 = vpack.i.bf16 %v1695_v9, %v1693_v11  ;;  %v18956_v3 = vunpack.i.h.bf16 %v21172_v23 }
 0x817   : > { %v19026_v46 = vunpack.i.h.bf16 %v19024_v44  ;;  %v19025_v47 = vunpack.i.l.bf16 %v19024_v44  ;;  %v18991_v48 = vunpack.i.h.bf16 %v18989_v45  ;;  %v18990_v49 = vunpack.i.l.bf16 %v18989_v45 }
 0x818   : > { %19208 = vrot.lane.b32.xlu0 %v19207_v41, %s20577_s7  ;;  %19173 = vrot.lane.b32.xlu1 %v19172_v43, %s20577_s7 }
 0x819   : > { %v1728_v50 = vsel %vm473_vm2, %v19025_v47, %v19026_v46  ;;  %v1758_v42 = vsel %vm596_vm6, %v18990_v49, %v18991_v48  ;;  %v1727_v16 = vsel %vm473_vm2, %v18961_v10, %v19025_v47  ;;  %v1757_v24 = vsel %vm596_vm6, %v18970_v28, %v18990_v49 }
 0x81a   : > { %v19212_v51 = vpack.i.bf16 %v19026_v46, %v1728_v50  ;;  %v19177_v52 = vpack.i.bf16 %v18991_v48, %v1758_v42  ;;  %v19029_v53 = vpop.permute.xlu0 %19028  ;;  %v18994_v54 = vpop.permute.xlu1 %18993  ;;  %v19197_v22 = vpack.i.bf16 %v1727_v16, %v1725_v18  ;;  %v18955_v10 = vunpack.i.l.bf16 %v21172_v23 }
 0x81b   : > { %v19031_v55 = vunpack.i.h.bf16 %v19029_v53  ;;  %v19030_v57 = vunpack.i.l.bf16 %v19029_v53  ;;  %v18996_v58 = vunpack.i.h.bf16 %v18994_v54  ;;  %v18995_v59 = vunpack.i.l.bf16 %v18994_v54 }
 0x81c   : > { %19213 = vrot.lane.b32.xlu0 %v19212_v51, %s20577_s7  ;;  %19178 = vrot.lane.b32.xlu1 %v19177_v52, %s20577_s7 }
 0x81d   : > { %v1760_v60 = vsel %vm596_vm6, %v19030_v57, %v19031_v55  ;;  %v1781_v61 = vsel %vm603_vm8, %v18995_v59, %v18996_v58  ;;  %v1759_v29 = vsel %vm596_vm6, %v18971_v17, %v19030_v57 }
 0x81e   : > { %v19217_v62 = vpack.i.bf16 %v19031_v55, %v1760_v60  ;;  %v19182_v63 = vpack.i.bf16 %v18996_v58, %v1781_v61  ;;  %v19034_v56 = vpop.permute.xlu0 %19033  ;;  %v21194_v0 = vpop.permute.xlu1 %18998  ;;  %v19202_v32 = vpack.i.bf16 %v1759_v29, %v1757_v24 }
 0x81f   : > { %v19036_v1 = vunpack.i.h.bf16 %v19034_v56  ;;  %v19035_v2 = vunpack.i.l.bf16 %v19034_v56 }
 0x820   : > { %19218 = vrot.lane.b32.xlu0 %v19217_v62, %s20577_s7  ;;  %19183 = vrot.lane.b32.xlu1 %v19182_v63, %s20577_s7 }
 0x821   : > { %v1782_v4 = vsel %vm603_vm8, %v19035_v2, %v19036_v1  ;;  %v19187_v5 = vpack.i.bf16 %v19035_v2, %v18995_v59  ;;  %v19000_v2 = vunpack.i.l.bf16 %v21194_v0 }
 0x822   : > { %v19222_v6 = vpack.i.bf16 %v19036_v1, %v1782_v4  ;;  %v21200_v21 = vpop.permute.xlu0 %19038  ;;  %v21202_v7 = vpop.permute.xlu1 %19003  ;;  %v19001_v1 = vunpack.i.h.bf16 %v21194_v0 }
 0x824   : > { %19223 = vrot.lane.b32.xlu0 %v19222_v6, %s20577_s7  ;;  %19188 = vrot.lane.b32.xlu1 %v19187_v5, %s20577_s7  ;;  %v1801_v16 = vsel %vm609_vm7, %v19000_v2, %v19001_v1 }
 0x825   : > { %v19272_v29 = vpack.i.bf16 %v19001_v1, %v1801_v16 }
 0x826   : > { %v21210_v12 = vpop.permute.xlu0 %19043  ;;  %v21212_v13 = vpop.permute.xlu1 %19008 }
 0x828   : > { %19193 = vrot.lane.b32.xlu1 %v19192_v14, %s20577_s7 }
 0x82a   : > { %v21219_v19 = vpop.permute.xlu0 %19048  ;;  %v21221_v20 = vpop.permute.xlu1 %19013 }
 0x82b   : > { %v19016_v30 = vunpack.i.h.bf16 %v21221_v20  ;;  %v19015_v31 = vunpack.i.l.bf16 %v21221_v20 }
 0x82c   : > { %19198 = vrot.lane.b32.xlu1 %v19197_v22, %s20577_s7 }
 0x82d   : > { %v2102_v26 = vsel %vm693_vm12, %v19015_v31, %v19016_v30 }
 0x82e   : > { %v19054_v33 = vpop.permute.xlu0 %19053  ;;  %v21229_v34 = vpop.permute.xlu1 %19073 }
 0x82f   : > { %v19056_v35 = vunpack.i.h.bf16 %v19054_v33  ;;  %v19055_v36 = vunpack.i.l.bf16 %v19054_v33  ;;  %v19076_v53 = vunpack.i.h.bf16 %v21229_v34  ;;  %v19075_v54 = vunpack.i.l.bf16 %v21229_v34 }
 0x830   : > { %19203 = vrot.lane.b32.xlu1 %v19202_v32, %s20577_s7 }
 0x831   : > { %v2104_v37 = vsel %vm693_vm12, %v19055_v36, %v19056_v35  ;;  %v1783_v62 = vsel %vm603_vm8, %v19075_v54, %v19076_v53 }
 0x832   : > { %v19059_v38 = vpop.permute.xlu0 %19058  ;;  %v21234_v39 = vpop.permute.xlu1 %19078  ;;  %v18204_v40 = vpack.c.bf16 %v2104_v37, %v2102_v26  ;;  %v19242_v5 = vpack.i.bf16 %v19076_v53, %v1783_v62  ;;  %v18966_v26 = vunpack.i.h.bf16 %v21176_v25  ;;  %v19005_v53 = vunpack.i.l.bf16 %v21202_v7 }
 0x833   : > { %v19061_v41 = vunpack.i.h.bf16 %v19059_v38  ;;  %v19060_v43 = vunpack.i.l.bf16 %v19059_v38  ;;  %v18965_v38 = vunpack.i.l.bf16 %v21176_v25 }
 0x834   : > { %18205 = vmatprep.subr.bf16.mxu0 %v18204_v40 }
 0x835   : > { %v1698_v44 = vsel %vm309_vm3, %v19060_v43, %v19061_v41  ;;  %v1697_v0 = vsel %vm309_vm3, %v18955_v10, %v19060_v43  ;;  %v18976_v43 = vunpack.i.h.bf16 %v21180_v27 }
 0x836   : > { %v19227_v45 = vpack.i.bf16 %v19061_v41, %v1698_v44  ;;  %v21237_v46 = vpop.permute.xlu0 %19063  ;;  %v21239_v47 = vpop.permute.xlu1 %19083 }
 0x837   : > { %v19066_v48 = vunpack.i.h.bf16 %v21237_v46  ;;  %v19065_v49 = vunpack.i.l.bf16 %v21237_v46 }
 0x838   : > { %19228 = vrot.lane.b32.xlu0 %v19227_v45, %s20577_s7 }
 0x839   : > { %v1730_v50 = vsel %vm473_vm2, %v19065_v49, %v19066_v48  ;;  %v1729_v25 = vsel %vm473_vm2, %v18965_v38, %v19065_v49 }
 0x83a   : > { %v19232_v42 = vpack.i.bf16 %v19066_v48, %v1730_v50  ;;  %v21247_v51 = vpop.permute.xlu0 %19068  ;;  %v21249_v52 = vpop.permute.xlu1 %19088  ;;  %v19041_v50 = vunpack.i.h.bf16 %v21200_v21 }
 0x83b   : > { %v19071_v55 = vunpack.i.h.bf16 %v21247_v51  ;;  %v19070_v57 = vunpack.i.l.bf16 %v21247_v51 }
 0x83c   : > { %19233 = vrot.lane.b32.xlu0 %v19232_v42, %s20577_s7  ;;  %v19006_v42 = vunpack.i.h.bf16 %v21202_v7 }
 0x83d   : > { %v1762_v58 = vsel %vm596_vm6, %v19070_v57, %v19071_v55 }
 0x83e   : > { %v19237_v59 = vpack.i.bf16 %v19071_v55, %v1762_v58  ;;  %v21259_v60 = vpop.permute.xlu0 %19103  ;;  %v19094_v61 = vpop.permute.xlu1 %19093  ;;  %v18975_v58 = vunpack.i.l.bf16 %v21180_v27  ;;  %v1821_v7 = vsel %vm615_vm9, %v19005_v53, %v19006_v42 }
 0x83f   : > { %v19096_v63 = vunpack.i.h.bf16 %v19094_v61  ;;  %v19095_v56 = vunpack.i.l.bf16 %v19094_v61  ;;  %v19105_v27 = vunpack.i.l.bf16 %v21259_v60 }
 0x840   : > { %19238 = vrot.lane.b32.xlu0 %v19237_v59, %s20577_s7  ;;  %v1761_v46 = vsel %vm596_vm6, %v18975_v58, %v19070_v57 }
 0x841   : > { %v1700_v4 = vsel %vm309_vm3, %v19095_v56, %v19096_v63  ;;  %v1699_v11 = vsel %vm309_vm3, %v18956_v3, %v19095_v56  ;;  %v19080_v3 = vunpack.i.l.bf16 %v21234_v39 }
 0x842   : > { %v19267_v6 = vpack.i.bf16 %v19096_v63, %v1700_v4  ;;  %v21267_v8 = vpop.permute.xlu0 %19108  ;;  %v19099_v9 = vpop.permute.xlu1 %19098  ;;  %v19247_v20 = vpack.i.bf16 %v1699_v11, %v1697_v0  ;;  %v19106_v63 = vunpack.i.h.bf16 %v21259_v60 }
 0x843   : > { %v19101_v14 = vunpack.i.h.bf16 %v19099_v9  ;;  %v19100_v15 = vunpack.i.l.bf16 %v19099_v9  ;;  %v19110_v56 = vunpack.i.l.bf16 %v21267_v8  ;;  %v19111_v51 = vunpack.i.h.bf16 %v21267_v8 }
 0x844   : > { %19243 = vrot.lane.b32.xlu0 %v19242_v5, %s20577_s7  ;;  %19268 = vrot.lane.b32.xlu1 %v19267_v6, %s20577_s7  ;;  %v19307_v5 = vpack.i.bf16 %v19006_v42, %v1821_v7  ;;  %v19050_v42 = vunpack.i.l.bf16 %v21219_v19 }
 0x845   : > { %v2103_v17 = vsel %vm693_vm12, %v19101_v14, %v19055_v36  ;;  %v2101_v18 = vsel %vm693_vm12, %v19100_v15, %v19015_v31  ;;  %v19040_v31 = vunpack.i.l.bf16 %v21200_v21  ;;  %v2105_v10 = vsel %vm693_vm12, %v19110_v56, %v19105_v27 }
 0x846   : > { %v18206_v22 = vpack.c.bf16 %v2103_v17, %v2101_v18  ;;  %v21277_v28 = vpop.permute.xlu0 %19113  ;;  %v19119_v23 = vpop.permute.xlu1 %19118  ;;  %v19045_v17 = vunpack.i.l.bf16 %v21210_v12 }
 0x847   : > { %v19121_v24 = vunpack.i.h.bf16 %v19119_v23  ;;  %v19120_v30 = vunpack.i.l.bf16 %v19119_v23  ;;  %v19287_v44 = vpack.i.bf16 %v19040_v31, %v19000_v2  ;;  %v1802_v21 = vsel %vm609_vm7, %v19040_v31, %v19041_v50 }
 0x848   : > { %19248 = vrot.lane.b32.xlu0 %v19247_v20, %s20577_s7  ;;  %18207 = vmatpush1.bf16.msra.mxu0 %v18206_v22  ;;  %v19081_v2 = vunpack.i.h.bf16 %v21234_v39  ;;  %v19277_v9 = vpack.i.bf16 %v19041_v50, %v1802_v21  ;;  %v2106_v39 = vsel %vm693_vm12, %v19105_v27, %v19106_v63  ;;  %v19116_v7 = vunpack.i.h.bf16 %v21277_v28 }
 0x849   : > { %v1732_v32 = vsel %vm473_vm2, %v19120_v30, %v19121_v24  ;;  %19273 = vrot.lane.b32.xlu1 %v19272_v29, %s20577_s7  ;;  %v1731_v40 = vsel %vm473_vm2, %v18966_v26, %v19120_v30  ;;  %v19046_v29 = vunpack.i.h.bf16 %v21210_v12  ;;  %v19011_v30 = vunpack.i.h.bf16 %v21212_v13 }
 0x84a   : > { %v19282_v33 = vpack.i.bf16 %v19121_v24, %v1732_v32  ;;  %v19139_v34 = vpop.permute.xlu0 %19138  ;;  %v21282_v35 = vpop.permute.xlu1 %19123  ;;  %v1803_v8 = vsel %vm609_vm7, %v19080_v3, %v19081_v2  ;;  %v19322_v24 = vpack.i.bf16 %v19045_v17, %v19005_v53  ;;  %v19010_v32 = vunpack.i.l.bf16 %v21212_v13 }
 0x84b   : > { %v19140_v36 = vunpack.i.l.bf16 %v19139_v34  ;;  %v19141_v49 = vunpack.i.h.bf16 %v19139_v34  ;;  %v19292_v23 = vpack.i.bf16 %v19081_v2, %v1803_v8  ;;  %v19086_v26 = vunpack.i.h.bf16 %v21239_v47 }
 0x84c   : > { %v1841_v38 = vsel %vm621_vm10, %v19010_v32, %v19011_v30  ;;  %v19357_v21 = vpack.i.bf16 %v19050_v42, %v19010_v32  ;;  %v19126_v2 = vunpack.i.h.bf16 %v21282_v35  ;;  %vm2666_vm2 = vcmask 1040384  }
 0x84d   : > { %v19252_v37 = vpack.i.bf16 %v19140_v36, %v19075_v54  ;;  %19283 = vrot.lane.b32.xlu1 %v19282_v33, %s20577_s7  ;;  %v19257_v54 = vpack.i.bf16 %v1731_v40, %v1729_v25  ;;  %v1784_v60 = vsel %vm603_vm8, %v19140_v36, %v19141_v49  ;;  %v1822_v36 = vsel %vm615_vm9, %v19045_v17, %v19046_v29  ;;  %v268_v17 = vld [vmem:[%s25854_s2 + $0x50] sm:$0xff] }
 0x84e   : > { %v19129_v41 = vpop.permute.xlu1 %19128  ;;  %v19144_v11 = vpop.permute.xlu0 %19143  ;;  %v19317_v18 = vpack.i.bf16 %v19141_v49, %v1784_v60  ;;  %v19312_v13 = vpack.i.bf16 %v19046_v29, %v1822_v36  ;;  %vm2674_vm8 = vsmask.f32 2304 }
 0x84f   : > { %v19131_v45 = vunpack.i.h.bf16 %v19129_v41  ;;  %v19130_v48 = vunpack.i.l.bf16 %v19129_v41  ;;  %19253 = vrot.lane.b32.xlu0 %v19252_v37, %s20577_s7  ;;  %v19146_v20 = vunpack.i.h.bf16 %v19144_v11  ;;  %v19145_v22 = vunpack.i.l.bf16 %v19144_v11 }
 0x850   : > { %v19085_v37 = vunpack.i.l.bf16 %v21239_v47  ;;  %v19051_v47 = vunpack.i.h.bf16 %v21219_v19  ;;  %v19115_v19 = vunpack.i.l.bf16 %v21277_v28  ;;  %v239_v28 = vld [vmem:[%s25853_s1 + $0xe0] sm:$0xff] }
 0x851   : > { %v1764_v55 = vsel %vm596_vm6, %v19130_v48, %v19131_v45  ;;  %19288 = vrot.lane.b32.xlu1 %v19287_v44, %s20577_s7  ;;  %v1763_v61 = vsel %vm596_vm6, %v18976_v43, %v19130_v48  ;;  %v1804_v33 = vsel %vm609_vm7, %v19145_v22, %v19146_v20  ;;  %v19297_v34 = vpack.i.bf16 %v19145_v22, %v19080_v3 }
 0x852   : > { %v19302_v59 = vpack.i.bf16 %v19131_v45, %v1764_v55  ;;  %v21301_v62 = vpop.permute.xlu1 %19133  ;;  %v19262_v1 = vpack.i.bf16 %v1763_v61, %v1761_v46  ;;  %v19149_v31 = vpop.permute.xlu0 %19148  ;;  %v19337_v12 = vpack.i.bf16 %v19146_v20, %v1804_v33  ;;  %v1823_v43 = vsel %vm615_vm9, %v19085_v37, %v19086_v26  ;;  %2322 = vmatprep.mubr.f32.mxu0 %v239_v28 }
 0x853   : > { %19258 = vrot.lane.b32.xlu0 %v19257_v54, %s20577_s7  ;;  %v19151_v40 = vunpack.i.h.bf16 %v19149_v31  ;;  %v19150_v41 = vunpack.i.l.bf16 %v19149_v31  ;;  %v19342_v44 = vpack.i.bf16 %v19011_v30, %v1841_v38  ;;  %v19327_v48 = vpack.i.bf16 %v19086_v26, %v1823_v43  ;;  %v270_v30 = vld [vmem:[%s25854_s2 + $0x60] sm:$0xff] }
 0x854   : > { %v1842_v58 = vsel %vm621_vm10, %v19050_v42, %v19051_v47  ;;  %v19090_v61 = vunpack.i.l.bf16 %v21249_v52  ;;  %v1861_v56 = vsel %vm627_vm11, %v19115_v19, %v19116_v7  ;;  %v19125_v3 = vunpack.i.l.bf16 %v21282_v35 }
 0x855   : > { %19303 = vrot.lane.b32.xlu1 %v19302_v59, %s20577_s7  ;;  %v1824_v45 = vsel %vm615_vm9, %v19150_v41, %v19151_v40  ;;  %v19332_v55 = vpack.i.bf16 %v19150_v41, %v19085_v37  ;;  %v19091_v59 = vunpack.i.h.bf16 %v21249_v52  ;;  %v19347_v49 = vpack.i.bf16 %v19051_v47, %v1842_v58  ;;  %vm2671_vm9 = vmand %vm2669_vm4, %vm2670_vm5 }
 0x856   : > { %v19159_v4 = vpop.permute.xlu1 %19158  ;;  %v19154_v50 = vpop.permute.xlu0 %19153  ;;  %v19352_v53 = vpack.i.bf16 %v19151_v40, %v1824_v45  ;;  %v19135_v60 = vunpack.i.l.bf16 %v21301_v62  ;;  %vm2673_vm7 = vcmask 1042434   ;;  %vm2686_vm4 = vsmask.f32 5376 }
 0x857   : > { %v19161_v6 = vunpack.i.h.bf16 %v19159_v4  ;;  %v19160_v57 = vunpack.i.l.bf16 %v19159_v4  ;;  %19263 = vrot.lane.b32.xlu0 %v19262_v1, %s20577_s7  ;;  %v19156_v25 = vunpack.i.h.bf16 %v19154_v50  ;;  %v19155_v54 = vunpack.i.l.bf16 %v19154_v50  ;;  %vm2675_vm13 = vmand %vm2673_vm7, %vm2674_vm8 }
 0x858   : > { %v1843_v63 = vsel %vm621_vm10, %v19090_v61, %v19091_v59  ;;  %v19377_v4 = vpack.i.bf16 %v19116_v7, %v1861_v56  ;;  %vm2689_vm8 = vcmask 1046534  }
 0x859   : > { %v2107_v14 = vsel %vm693_vm12, %v19111_v51, %v19160_v57  ;;  %19308 = vrot.lane.b32.xlu1 %v19307_v5, %s20577_s7  ;;  %v2108_v15 = vsel %vm693_vm12, %v19160_v57, %v19161_v6  ;;  %v1844_v46 = vsel %vm621_vm10, %v19155_v54, %v19156_v25  ;;  %v19362_v52 = vpack.i.bf16 %v19091_v59, %v1843_v63 }
 0x85a   : > { %v18210_v16 = vpack.c.bf16 %v2107_v14, %v2105_v10  ;;  %v18208_v0 = vpack.c.bf16 %v2108_v15, %v2106_v39  ;;  %v19367_v27 = vpack.i.bf16 %v19156_v25, %v1844_v46  ;;  %v19164_v1 = vpop.permute.xlu0 %19163  ;;  %v19372_v6 = vpack.i.bf16 %v19155_v54, %v19090_v61 }
 0x85b   : > { %19278 = vrot.lane.b32.xlu0 %v19277_v9, %s20577_s7  ;;  %v19166_v5 = vunpack.i.h.bf16 %v19164_v1  ;;  %v19165_v51 = vunpack.i.l.bf16 %v19164_v1  ;;  %v1862_v57 = vsel %vm627_vm11, %v19125_v3, %v19126_v2  ;;  %v19136_v9 = vunpack.i.h.bf16 %v21301_v62  ;;  %v267_v62 = vld [vmem:[%s25854_s2 + $0x48] sm:$0xff] }
 0x85c   : > { %18209 = vmatprep.subr.bf16.mxu0 %v18208_v0  ;;  %v19387_v10 = vpack.i.bf16 %v19125_v3, %v19115_v19  ;;  %v19382_v11 = vpack.i.bf16 %v19126_v2, %v1862_v57  ;;  %v269_v0 = vld [vmem:[%s25854_s2 + $0x58] sm:$0xff] }
 0x85d   : > { %19318 = vrot.lane.b32.xlu1 %v19317_v18, %s20577_s7  ;;  %18211 = vmatpush1.bf16.msra.mxu0 %v18210_v16  ;;  %v1864_v35 = vsel %vm627_vm11, %v19165_v51, %v19166_v5  ;;  %v1863_v14 = vsel %vm627_vm11, %v19135_v60, %v19136_v9  ;;  %v19402_v8 = vpack.i.bf16 %v19165_v51, %v19135_v60  ;;  %vm2677_vm11 = vcmask 1043459  }
 0x85e   : > { %v19397_v39 = vpack.i.bf16 %v19166_v5, %v1864_v35  ;;  %v19392_v15 = vpack.i.bf16 %v19136_v9, %v1863_v14 }
 0x85f   : > { %19293 = vrot.lane.b32.xlu0 %v19292_v23, %s20577_s7 }
 0x861   : > { %19323 = vrot.lane.b32.xlu1 %v19322_v24, %s20577_s7 }
 0x863   : > { %19298 = vrot.lane.b32.xlu0 %v19297_v34, %s20577_s7 }
 0x865   : > { %19338 = vrot.lane.b32.xlu1 %v19337_v12, %s20577_s7 }
 0x867   : > { %19313 = vrot.lane.b32.xlu0 %v19312_v13, %s20577_s7 }
 0x869   : > { %19343 = vrot.lane.b32.xlu1 %v19342_v44, %s20577_s7 }
 0x86b   : > { %19328 = vrot.lane.b32.xlu0 %v19327_v48, %s20577_s7 }
 0x86d   : > { %19353 = vrot.lane.b32.xlu1 %v19352_v53, %s20577_s7 }
 0x86f   : > { %19333 = vrot.lane.b32.xlu0 %v19332_v55, %s20577_s7 }
 0x871   : > { %19358 = vrot.lane.b32.xlu1 %v19357_v21, %s20577_s7 }
 0x873   : > { %19348 = vrot.lane.b32.xlu0 %v19347_v49, %s20577_s7 }
 0x875   : > { %19368 = vrot.lane.b32.xlu1 %v19367_v27, %s20577_s7 }
 0x877   : > { %19363 = vrot.lane.b32.xlu0 %v19362_v52, %s20577_s7 }
 0x879   : > { %19378 = vrot.lane.b32.xlu1 %v19377_v4, %s20577_s7 }
 0x87b   : > { %19373 = vrot.lane.b32.xlu0 %v19372_v6, %s20577_s7 }
 0x87d   : > { %19388 = vrot.lane.b32.xlu1 %v19387_v10, %s20577_s7 }
 0x87f   : > { %19383 = vrot.lane.b32.xlu0 %v19382_v11, %s20577_s7 }
 0x881   : > { %19398 = vrot.lane.b32.xlu1 %v19397_v39, %s20577_s7 }
 0x883   : > { %19393 = vrot.lane.b32.xlu0 %v19392_v15, %s20577_s7 }
 0x885   : > { %1867 = vperm.xlu1 %18486, %v267_v62  }
 0x886   : > { %v19169_v16 = vpop.permute.xlu1 %19168 }
 0x887   : > { %19403 = vrot.lane.b32.xlu0 %v19402_v8, %s20577_s7  ;;  %v19171_v18 = vunpack.i.h.bf16 %v19169_v16  ;;  %v19170_v20 = vunpack.i.l.bf16 %v19169_v16 }
 0x889   : > { %1877 = vperm.xlu1 %18486, %v269_v0   ;;  %v2110_v32 = vsel %vm693_vm12, %v19170_v20, %v19171_v18 }
 0x88a   : > { %v19209_v22 = vpop.permute.xlu0 %19208  ;;  %v19174_v23 = vpop.permute.xlu1 %19173 }
 0x88b   : > { %v19211_v29 = vunpack.i.h.bf16 %v19209_v22  ;;  %v19210_v24 = vunpack.i.l.bf16 %v19209_v22  ;;  %1872 = vperm.xlu0 %18390, %v268_v17   ;;  %v19176_v49 = vunpack.i.h.bf16 %v19174_v23  ;;  %v19175_v63 = vunpack.i.l.bf16 %v19174_v23 }
 0x88d   : > { %v2112_v33 = vsel %vm693_vm12, %v19210_v24, %v19211_v29  ;;  %v2118_v60 = vsel %vm693_vm12, %v19175_v63, %v19176_v49 }
 0x88e   : > { %v21391_v34 = vpop.permute.xlu1 %19178  ;;  %v18212_v31 = vpack.c.bf16 %v2112_v33, %v2110_v32  ;;  %v19214_v37 = vpop.permute.xlu0 %19213 }
 0x88f   : > { %1882 = vperm.xlu0 %18390, %v270_v30   ;;  %v19216_v21 = vunpack.i.h.bf16 %v19214_v37  ;;  %v19215_v7 = vunpack.i.l.bf16 %v19214_v37  ;;  %v19180_v22 = vunpack.i.l.bf16 %v21391_v34 }
 0x890   : > { %18213 = vmatprep.subr.bf16.mxu0 %v18212_v31 }
 0x891   : > { %v2120_v4 = vsel %vm693_vm12, %v19215_v7, %v19216_v21 }
 0x892   : > { %v21393_v36 = vpop.permute.xlu1 %19183  ;;  %v21399_v44 = vpop.permute.xlu0 %19218  ;;  %v18220_v14 = vpack.c.bf16 %v2120_v4, %v2118_v60 }
 0x893   : > { %v19221_v62 = vunpack.i.h.bf16 %v21399_v44  ;;  %v19220_v8 = vunpack.i.l.bf16 %v21399_v44 }
 0x895   : > { %v2128_v30 = vsel %vm693_vm12, %v19220_v8, %v19221_v62 }
 0x896   : > { %v21395_v26 = vpop.permute.xlu1 %19188  ;;  %v21401_v45 = vpop.permute.xlu0 %19223 }
 0x89a   : > { %v19194_v12 = vpop.permute.xlu1 %19193 }
 0x89b   : > { %v19196_v38 = vunpack.i.h.bf16 %v19194_v12  ;;  %v19195_v40 = vunpack.i.l.bf16 %v19194_v12 }
 0x89d   : > { %v2111_v41 = vsel %vm693_vm12, %v19196_v38, %v19210_v24  ;;  %v2109_v13 = vsel %vm693_vm12, %v19195_v40, %v19170_v20  ;;  %v19181_v20 = vunpack.i.h.bf16 %v21391_v34 }
 0x89e   : > { %v18214_v43 = vpack.c.bf16 %v2111_v41, %v2109_v13  ;;  %v19199_v50 = vpop.permute.xlu1 %19198 }
 0x89f   : > { %v19201_v52 = vunpack.i.h.bf16 %v19199_v50  ;;  %v19200_v1 = vunpack.i.l.bf16 %v19199_v50  ;;  %v2126_v38 = vsel %vm693_vm12, %v19180_v22, %v19181_v20 }
 0x8a0   : > { %18215 = vmatpush1.bf16.msra.mxu0 %v18214_v43 }
 0x8a1   : > { %v2119_v10 = vsel %vm693_vm12, %v19201_v52, %v19215_v7  ;;  %v2117_v35 = vsel %vm693_vm12, %v19200_v1, %v19175_v63 }
 0x8a2   : > { %v21403_v42 = vpop.permute.xlu1 %19203  ;;  %v18222_v0 = vpack.c.bf16 %v2119_v10, %v2117_v35 }
 0x8a3   : > { %v19206_v32 = vunpack.i.h.bf16 %v21403_v42  ;;  %v19205_v33 = vunpack.i.l.bf16 %v21403_v42 }
 0x8a5   : > { %v2127_v42 = vsel %vm693_vm12, %v19206_v32, %v19220_v8 }
 0x8aa   : > { %v19229_v48 = vpop.permute.xlu0 %19228 }
 0x8ab   : > { %v19231_v25 = vunpack.i.h.bf16 %v19229_v48  ;;  %v19230_v54 = vunpack.i.l.bf16 %v19229_v48 }
 0x8ad   : > { %v2114_v19 = vsel %vm693_vm12, %v19230_v54, %v19231_v25  ;;  %v2125_v25 = vsel %vm693_vm12, %v19205_v33, %v19180_v22 }
 0x8ae   : > { %v19234_v47 = vpop.permute.xlu0 %19233  ;;  %v18230_v49 = vpack.c.bf16 %v2127_v42, %v2125_v25 }
 0x8af   : > { %v19236_v6 = vunpack.i.h.bf16 %v19234_v47  ;;  %v19235_v57 = vunpack.i.l.bf16 %v19234_v47  ;;  %v18228_v47 = vpack.c.bf16 %v2128_v30, %v2126_v38 }
 0x8b1   : > { %v2122_v17 = vsel %vm693_vm12, %v19235_v57, %v19236_v6 }
 0x8b2   : > { %v21405_v53 = vpop.permute.xlu0 %19238 }
 0x8b3   : > { %v19241_v43 = vunpack.i.h.bf16 %v21405_v53  ;;  %v19240_v44 = vunpack.i.l.bf16 %v21405_v53  ;;  %v19186_v53 = vunpack.i.h.bf16 %v21393_v36 }
 0x8b6   : > { %v21407_v55 = vpop.permute.xlu0 %19243  ;;  %v19269_v58 = vpop.permute.xlu1 %19268 }
 0x8b7   : > { %v19271_v59 = vunpack.i.h.bf16 %v19269_v58  ;;  %v19270_v61 = vunpack.i.l.bf16 %v19269_v58  ;;  %v19246_v6 = vunpack.i.h.bf16 %v21407_v55 }
 0x8b9   : > { %v2116_v46 = vsel %vm693_vm12, %v19270_v61, %v19271_v59  ;;  %v19226_v59 = vunpack.i.h.bf16 %v21401_v45 }
 0x8ba   : > { %v19249_v27 = vpop.permute.xlu0 %19248  ;;  %v18216_v56 = vpack.c.bf16 %v2116_v46, %v2114_v19  ;;  %v19185_v19 = vunpack.i.l.bf16 %v21393_v36  ;;  %v19191_v46 = vunpack.i.h.bf16 %v21395_v26 }
 0x8bb   : > { %v19251_v28 = vunpack.i.h.bf16 %v19249_v27  ;;  %v19250_v2 = vunpack.i.l.bf16 %v19249_v27  ;;  %v21411_v3 = vpop.permute.xlu1 %19273  ;;  %v2130_v27 = vsel %vm693_vm12, %v19240_v44, %v19241_v43 }
 0x8bc   : > { %18217 = vmatprep.subr.bf16.mxu0 %v18216_v56  ;;  %v19190_v56 = vunpack.i.l.bf16 %v21395_v26  ;;  %v19245_v26 = vunpack.i.l.bf16 %v21407_v55  ;;  %v19276_v10 = vunpack.i.h.bf16 %v21411_v3  ;;  %v19275_v35 = vunpack.i.l.bf16 %v21411_v3 }
 0x8bd   : > { %v2113_v5 = vsel %vm693_vm12, %v19250_v2, %v19230_v54  ;;  %v2115_v51 = vsel %vm693_vm12, %v19251_v28, %v19270_v61  ;;  %v19225_v61 = vunpack.i.l.bf16 %v21401_v45 }
 0x8be   : > { %v18218_v9 = vpack.c.bf16 %v2115_v51, %v2113_v5  ;;  %v2134_v5 = vsel %vm693_vm12, %v19185_v19, %v19186_v53  ;;  %v2133_v60 = vsel %vm693_vm12, %v19190_v56, %v19185_v19  ;;  %v2142_v30 = vsel %vm693_vm12, %v19275_v35, %v19276_v10 }
 0x8bf   : > { %v19284_v11 = vpop.permute.xlu1 %19283  ;;  %v2136_v2 = vsel %vm693_vm12, %v19225_v61, %v19226_v59  ;;  %v2135_v51 = vsel %vm693_vm12, %v19191_v46, %v19225_v61 }
 0x8c0   : > { %v19286_v39 = vunpack.i.h.bf16 %v19284_v11  ;;  %v19285_v15 = vunpack.i.l.bf16 %v19284_v11  ;;  %18219 = vmatpush1.bf16.msra.mxu0 %v18218_v9  ;;  %v18236_v11 = vpack.c.bf16 %v2136_v2, %v2134_v5 }
 0x8c1   : > { %v21421_v16 = vpop.permute.xlu0 %19253  ;;  %18221 = vmatprep.subr.bf16.mxu0 %v18220_v14 }
 0x8c2   : > { %v2124_v18 = vsel %vm693_vm12, %v19285_v15, %v19286_v39  ;;  %v19255_v14 = vunpack.i.l.bf16 %v21421_v16  ;;  %v19256_v55 = vunpack.i.h.bf16 %v21421_v16 }
 0x8c3   : > { %v21427_v23 = vpop.permute.xlu1 %19288  ;;  %v18224_v29 = vpack.c.bf16 %v2124_v18, %v2122_v17  ;;  %v2138_v18 = vsel %vm693_vm12, %v19245_v26, %v19246_v6 }
 0x8c4   : > { %18223 = vmatpush1.bf16.msra.mxu0 %v18222_v0  ;;  %v18238_v0 = vpack.c.bf16 %v2135_v51, %v2133_v60  ;;  %v2137_v22 = vsel %vm693_vm12, %v19255_v14, %v19245_v26  ;;  %v19290_v16 = vunpack.i.l.bf16 %v21427_v23 }
 0x8c5   : > { %v19259_v24 = vpop.permute.xlu0 %19258  ;;  %18225 = vmatprep.subr.bf16.mxu0 %v18224_v29  ;;  %v19291_v29 = vunpack.i.h.bf16 %v21427_v23 }
 0x8c6   : > { %v19261_v31 = vunpack.i.h.bf16 %v19259_v24  ;;  %v19260_v37 = vunpack.i.l.bf16 %v19259_v24  ;;  %v2141_v23 = vsel %vm693_vm12, %v19290_v16, %v19275_v35 }
 0x8c7   : > { %v19304_v12 = vpop.permute.xlu1 %19303 }
 0x8c8   : > { %v2121_v40 = vsel %vm693_vm12, %v19260_v37, %v19235_v57  ;;  %v2123_v34 = vsel %vm693_vm12, %v19261_v31, %v19285_v15  ;;  %v19306_v41 = vunpack.i.h.bf16 %v19304_v12  ;;  %v19305_v13 = vunpack.i.l.bf16 %v19304_v12 }
 0x8c9   : > { %v18226_v48 = vpack.c.bf16 %v2123_v34, %v2121_v40  ;;  %v19264_v50 = vpop.permute.xlu0 %19263 }
 0x8ca   : > { %v19266_v54 = vunpack.i.h.bf16 %v19264_v50  ;;  %v19265_v58 = vunpack.i.l.bf16 %v19264_v50  ;;  %v2132_v7 = vsel %vm693_vm12, %v19305_v13, %v19306_v41 }
 0x8cb   : > { %v21441_v21 = vpop.permute.xlu1 %19308  ;;  %18227 = vmatpush1.bf16.msra.mxu0 %v18226_v48  ;;  %v18232_v1 = vpack.c.bf16 %v2132_v7, %v2130_v27 }
 0x8cc   : > { %18229 = vmatprep.subr.bf16.mxu0 %v18228_v47  ;;  %v2129_v45 = vsel %vm693_vm12, %v19265_v58, %v19240_v44  ;;  %v2131_v52 = vsel %vm693_vm12, %v19266_v54, %v19305_v13  ;;  %v19311_v42 = vunpack.i.h.bf16 %v21441_v21  ;;  %v19310_v25 = vunpack.i.l.bf16 %v21441_v21 }
 0x8cd   : > { %v19279_v63 = vpop.permute.xlu0 %19278  ;;  %v18234_v57 = vpack.c.bf16 %v2131_v52, %v2129_v45 }
 0x8ce   : > { %v19281_v39 = vunpack.i.h.bf16 %v19279_v63  ;;  %v19280_v15 = vunpack.i.l.bf16 %v19279_v63  ;;  %v2150_v52 = vsel %vm693_vm12, %v19310_v25, %v19311_v42 }
 0x8cf   : > { %v19319_v28 = vpop.permute.xlu1 %19318  ;;  %18231 = vmatpush1.bf16.msra.mxu0 %v18230_v49 }
 0x8d0   : > { %v19321_v4 = vunpack.i.h.bf16 %v19319_v28  ;;  %v19320_v36 = vunpack.i.l.bf16 %v19319_v28  ;;  %18233 = vmatprep.subr.bf16.mxu0 %v18232_v1  ;;  %v2144_v32 = vsel %vm693_vm12, %v19280_v15, %v19281_v39  ;;  %v2143_v13 = vsel %vm693_vm12, %v19291_v29, %v19280_v15 }
 0x8d1   : > { %v19294_v9 = vpop.permute.xlu0 %19293  ;;  %v18244_v48 = vpack.c.bf16 %v2144_v32, %v2142_v30  ;;  %v18246_v54 = vpack.c.bf16 %v2143_v13, %v2141_v23 }
 0x8d2   : > { %v2140_v8 = vsel %vm693_vm12, %v19320_v36, %v19321_v4  ;;  %v2139_v20 = vsel %vm693_vm12, %v19256_v55, %v19320_v36  ;;  %v19296_v33 = vunpack.i.h.bf16 %v19294_v9  ;;  %v19295_v38 = vunpack.i.l.bf16 %v19294_v9 }
 0x8d3   : > { %v21460_v62 = vpop.permute.xlu1 %19323  ;;  %18235 = vmatpush1.bf16.msra.mxu0 %v18234_v57  ;;  %v18240_v3 = vpack.c.bf16 %v2140_v8, %v2138_v18  ;;  %v18242_v12 = vpack.c.bf16 %v2139_v20, %v2137_v22 }
 0x8d4   : > { %18237 = vmatprep.subr.bf16.mxu0 %v18236_v11  ;;  %v2146_v7 = vsel %vm693_vm12, %v19295_v38, %v19296_v33  ;;  %v19326_v63 = vunpack.i.h.bf16 %v21460_v62  ;;  %v19325_v21 = vunpack.i.l.bf16 %v21460_v62 }
 0x8d5   : > { %v19299_v17 = vpop.permute.xlu0 %19298 }
 0x8d6   : > { %v19301_v40 = vunpack.i.h.bf16 %v19299_v17  ;;  %v19300_v34 = vunpack.i.l.bf16 %v19299_v17  ;;  %v2149_v60 = vsel %vm693_vm12, %v19325_v21, %v19310_v25  ;;  %v242_v21 = vld [vmem:[%s25853_s1 + $0xf8] sm:$0xff] }
 0x8d7   : > { %v19339_v24 = vpop.permute.xlu1 %19338  ;;  %18239 = vmatpush1.bf16.msra.mxu0 %v18238_v0 }
 0x8d8   : > { %v19341_v31 = vunpack.i.h.bf16 %v19339_v24  ;;  %v19340_v37 = vunpack.i.l.bf16 %v19339_v24  ;;  %18241 = vmatprep.subr.bf16.mxu0 %v18240_v3  ;;  %v2145_v58 = vsel %vm693_vm12, %v19300_v34, %v19295_v38 }
 0x8d9   : > { %v19314_v41 = vpop.permute.xlu0 %19313 }
 0x8da   : > { %v19316_v43 = vunpack.i.h.bf16 %v19314_v41  ;;  %v19315_v44 = vunpack.i.l.bf16 %v19314_v41  ;;  %v2148_v47 = vsel %vm693_vm12, %v19340_v37, %v19341_v31  ;;  %v2147_v59 = vsel %vm693_vm12, %v19301_v40, %v19340_v37 }
 0x8db   : > { %v21472_v50 = vpop.permute.xlu1 %19343  ;;  %18243 = vmatpush1.bf16.msra.mxu0 %v18242_v12  ;;  %v18248_v46 = vpack.c.bf16 %v2148_v47, %v2146_v7  ;;  %v18250_v1 = vpack.c.bf16 %v2147_v59, %v2145_v58 }
 0x8dc   : > { %18245 = vmatprep.subr.bf16.mxu0 %v18244_v48  ;;  %v2152_v49 = vsel %vm693_vm12, %v19315_v44, %v19316_v43  ;;  %v2151_v28 = vsel %vm693_vm12, %v19326_v63, %v19315_v44  ;;  %v19346_v26 = vunpack.i.h.bf16 %v21472_v50  ;;  %v19345_v57 = vunpack.i.l.bf16 %v21472_v50 }
 0x8dd   : > { %v19329_v61 = vpop.permute.xlu0 %19328  ;;  %v18252_v4 = vpack.c.bf16 %v2152_v49, %v2150_v52  ;;  %v18254_v10 = vpack.c.bf16 %v2151_v28, %v2149_v60 }
 0x8de   : > { %v19331_v53 = vunpack.i.h.bf16 %v19329_v61  ;;  %v19330_v19 = vunpack.i.l.bf16 %v19329_v61  ;;  %v2158_v0 = vsel %vm693_vm12, %v19345_v57, %v19346_v26 }
 0x8df   : > { %v19354_v27 = vpop.permute.xlu1 %19353  ;;  %18247 = vmatpush1.bf16.msra.mxu0 %v18246_v54 }
 0x8e0   : > { %v19356_v56 = vunpack.i.h.bf16 %v19354_v27  ;;  %v19355_v45 = vunpack.i.l.bf16 %v19354_v27  ;;  %18249 = vmatprep.subr.bf16.mxu0 %v18248_v46  ;;  %v2154_v51 = vsel %vm693_vm12, %v19330_v19, %v19331_v53  ;;  %v238_v53 = vld [vmem:[%s25853_s1 + $0xd8] sm:$0xff] }
 0x8e1   : > { %v19334_v2 = vpop.permute.xlu0 %19333 }
 0x8e2   : > { %v19336_v36 = vunpack.i.h.bf16 %v19334_v2  ;;  %v19335_v5 = vunpack.i.l.bf16 %v19334_v2  ;;  %v2156_v6 = vsel %vm693_vm12, %v19355_v45, %v19356_v56  ;;  %v241_v2 = vld [vmem:[%s25853_s1 + $0xf0] sm:$0xff] }
 0x8e3   : > { %v19359_v9 = vpop.permute.xlu1 %19358  ;;  %18251 = vmatpush1.bf16.msra.mxu0 %v18250_v1  ;;  %v18256_v11 = vpack.c.bf16 %v2156_v6, %v2154_v51 }
 0x8e4   : > { %18253 = vmatprep.subr.bf16.mxu0 %v18252_v4  ;;  %v2153_v14 = vsel %vm693_vm12, %v19335_v5, %v19330_v19  ;;  %v2155_v39 = vsel %vm693_vm12, %v19336_v36, %v19355_v45  ;;  %v19361_v8 = vunpack.i.h.bf16 %v19359_v9  ;;  %v19360_v17 = vunpack.i.l.bf16 %v19359_v9  ;;  %v245_v5 = vld [vmem:[%s25853_s1 + $0x110] sm:$0xff]  ;;  %v244_v9 = vld [vmem:[%s25853_s1 + $0x108] sm:$0xff] }
 0x8e5   : > { %v19349_v35 = vpop.permute.xlu0 %19348  ;;  %v18258_v22 = vpack.c.bf16 %v2155_v39, %v2153_v14  ;;  %v247_v14 = vld [vmem:[%s25853_s1 + $0x120] sm:$0xff]  ;;  %v21530_v39 = vld [vmem:[#allocation2] sm:$0xff] }
 0x8e6   : > { %v19351_v15 = vunpack.i.h.bf16 %v19349_v35  ;;  %v19350_v62 = vunpack.i.l.bf16 %v19349_v35  ;;  %v2157_v31 = vsel %vm693_vm12, %v19360_v17, %v19345_v57  ;;  %v248_v35 = vld [vmem:[%s25853_s1 + $0x128] sm:$0xff] }
 0x8e7   : > { %v19369_v55 = vpop.permute.xlu1 %19368  ;;  %18255 = vmatpush1.bf16.msra.mxu0 %v18254_v10 }
 0x8e8   : > { %v19371_v18 = vunpack.i.h.bf16 %v19369_v55  ;;  %v19370_v20 = vunpack.i.l.bf16 %v19369_v55  ;;  %18257 = vmatprep.subr.bf16.mxu0 %v18256_v11  ;;  %v2160_v3 = vsel %vm693_vm12, %v19350_v62, %v19351_v15  ;;  %v2159_v30 = vsel %vm693_vm12, %v19361_v8, %v19350_v62  ;;  %v240_v15 = vld [vmem:[%s25853_s1 + $0xe8] sm:$0xff]  ;;  %v243_v62 = vld [vmem:[%s25853_s1 + $0x100] sm:$0xff]  ;;  %v246_v8 = vld [vmem:[%s25853_s1 + $0x118] sm:$0xff] }
 0x8e9   : > { %v19364_v29 = vpop.permute.xlu0 %19363  ;;  %v18260_v24 = vpack.c.bf16 %v2160_v3, %v2158_v0  ;;  %v18262_v38 = vpack.c.bf16 %v2159_v30, %v2157_v31  ;;  %v249_v55 = vld [vmem:[%s25853_s1 + $0x130] sm:$0xff] }
 0x8ea   : > { %v19366_v32 = vunpack.i.h.bf16 %v19364_v29  ;;  %v19365_v16 = vunpack.i.l.bf16 %v19364_v29  ;;  %v2164_v12 = vsel %vm693_vm12, %v19370_v20, %v19371_v18 }
 0x8eb   : > { %v19379_v33 = vpop.permute.xlu1 %19378  ;;  %18259 = vmatpush1.bf16.msra.mxu0 %v18258_v22 }
 0x8ec   : > { %18261 = vmatprep.subr.bf16.mxu0 %v18260_v24  ;;  %v2162_v37 = vsel %vm693_vm12, %v19365_v16, %v19366_v32  ;;  %v19381_v43 = vunpack.i.h.bf16 %v19379_v33  ;;  %v19380_v44 = vunpack.i.l.bf16 %v19379_v33 }
 0x8ed   : > { %v19374_v40 = vpop.permute.xlu0 %19373  ;;  %v18264_v34 = vpack.c.bf16 %v2164_v12, %v2162_v37 }
 0x8ee   : > { %v19376_v41 = vunpack.i.h.bf16 %v19374_v40  ;;  %v19375_v13 = vunpack.i.l.bf16 %v19374_v40  ;;  %v2166_v19 = vsel %vm693_vm12, %v19380_v44, %v19381_v43 }
 0x8ef   : > { %v19389_v48 = vpop.permute.xlu1 %19388  ;;  %18263 = vmatpush1.bf16.msra.mxu0 %v18262_v38 }
 0x8f0   : > { %v2161_v50 = vsel %vm693_vm12, %v19375_v13, %v19365_v16  ;;  %v2163_v47 = vsel %vm693_vm12, %v19376_v41, %v19370_v20  ;;  %v19390_v23 = vunpack.i.l.bf16 %v19389_v48  ;;  %18265 = vmatprep.subr.bf16.mxu0 %v18264_v34  ;;  %v19391_v54 = vunpack.i.h.bf16 %v19389_v48 }
 0x8f1   : > { %v18266_v42 = vpack.c.bf16 %v2163_v47, %v2161_v50  ;;  %v19384_v25 = vpop.permute.xlu0 %19383 }
 0x8f2   : > { %v19386_v58 = vunpack.i.h.bf16 %v19384_v25  ;;  %v19385_v59 = vunpack.i.l.bf16 %v19384_v25  ;;  %v2165_v61 = vsel %vm693_vm12, %v19390_v23, %v19380_v44 }
 0x8f3   : > { %v19399_v7 = vpop.permute.xlu1 %19398  ;;  %18267 = vmatpush1.bf16.msra.mxu0 %v18266_v42 }
 0x8f4   : > { %v2167_v46 = vsel %vm693_vm12, %v19391_v54, %v19385_v59  ;;  %v19401_v49 = vunpack.i.h.bf16 %v19399_v7  ;;  %v19400_v63 = vunpack.i.l.bf16 %v19399_v7  ;;  %v2168_v27 = vsel %vm693_vm12, %v19385_v59, %v19386_v58 }
 0x8f5   : > { %v18270_v56 = vpack.c.bf16 %v2167_v46, %v2165_v61  ;;  %v19394_v45 = vpop.permute.xlu0 %19393  ;;  %v18268_v52 = vpack.c.bf16 %v2168_v27, %v2166_v19 }
 0x8f6   : > { %v19396_v1 = vunpack.i.h.bf16 %v19394_v45  ;;  %v19395_v28 = vunpack.i.l.bf16 %v19394_v45  ;;  %2323 = vmatmul.mubr.f32.vlgmr.msra.gmra.mrb[6].mxu0 %v238_v53  ;;  %v2172_v36 = vsel %vm693_vm12, %v19400_v63, %v19401_v49 }
 0x8f7   : > { %18269 = vmatprep.subr.bf16.mxu0 %v18268_v52  ;;  %2328 = vmatprep.mubr.f32.mxu0 %v242_v21  ;;  %v271_v52 = vld [vmem:[%s25854_s2 + $0x68] sm:$0xff] }
 0x8f8   : > { %18271 = vmatpush1.bf16.msra.mxu0 %v18270_v56  ;;  %v2170_v4 = vsel %vm693_vm12, %v19395_v28, %v19396_v1 }
 0x8f9   : > { %v19404_v51 = vpop.permute.xlu0 %19403  ;;  %v18272_v6 = vpack.c.bf16 %v2172_v36, %v2170_v4  ;;  %v273_v4 = vld [vmem:[%s25854_s2 + $0x78] sm:$0xff]  ;;  %v274_v36 = vld [vmem:[%s25854_s2 + $0x80] sm:$0xff] }
 0x8fa   : > { %v19406_v26 = vunpack.i.h.bf16 %v19404_v51  ;;  %v19405_v57 = vunpack.i.l.bf16 %v19404_v51  ;;  %2329 = vmatmul.mubr.f32.gmra.mrb[8].mxu0 %v241_v2  ;;  %v272_v2 = vld [vmem:[%s25854_s2 + $0x70] sm:$0xff] }
 0x8fb   : > { %18273 = vmatprep.subr.bf16.mxu0 %v18272_v6  ;;  %2334 = vmatprep.mubr.f32.mxu0 %v245_v5  ;;  %v275_v5 = vld [vmem:[%s25854_s2 + $0x88] sm:$0xff]  ;;  %v276_v51 = vld [vmem:[%s25854_s2 + $0x90] sm:$0xff]  ;;  %v277_v6 = vld [vmem:[%s25854_s2 + $0x98] sm:$0xff] }
 0x8fc   : > { %v2169_v60 = vsel %vm693_vm12, %v19405_v57, %v19395_v28  ;;  %v2171_v10 = vsel %vm693_vm12, %v19406_v26, %v19400_v63  ;;  %v278_v26 = vld [vmem:[%s25854_s2 + $0xa0] sm:$0xff]  ;;  %vm2678_vm12 = vsmask.f32 3328 }
 0x8fd   : > { %v18274_v11 = vpack.c.bf16 %v2171_v10, %v2169_v60  ;;  %v19429_v57 = vld [vmem:[%s25855_s3 + $0x140] sm:$0xff]  }
 0x8fe   : > { %2335 = vmatmul.mubr.f32.gmra.mrb[10].mxu0 %v244_v9 }
 0x8ff   : > { %18275 = vmatpush1.bf16.msra.mxu0 %v18274_v11  ;;  %2340 = vmatprep.mubr.f32.mxu0 %v248_v35 }
 0x900   : > { %16688 = vmatprep.subr.bf16.mxu0 %v19429_v57  ;;  %v19444_v57 = vld [vmem:[%s25855_s3 + $0x20] sm:$0xff]  }
 0x902   : > { %2341 = vmatmul.mubr.f32.gmra.mrb[12].mxu0 %v247_v14 }
 0x903   : > { %2411 = vmatprep.mubr.f32.mxu0 %v21530_v39 }
 0x904   : > { %v1868_v0 = vpop.permute.xlu1 %1867 }
 0x906   : > { %15560 = vmatmul.mubr.msk.f32.vlgmr.msra.gmra.mrb[6].mxu0 %vm25861_vm15, %v240_v15 }
 0x907   : > { %2417 = vmatprep.mubr.f32.mxu0 %v21530_v39 }
 0x908   : > { %v1878_v38 = vpop.permute.xlu1 %1877 }
 0x90a   : > { %15561 = vmatmul.mubr.msk.f32.gmra.mrb[8].mxu0 %vm25861_vm15, %v243_v62  ;;  %v1873_v29 = vpop.permute.xlu0 %1872 }
 0x90b   : > { %2423 = vmatprep.mubr.f32.mxu0 %v21530_v39 }
 0x90e   : > { %15562 = vmatmul.mubr.msk.f32.gmra.mrb[10].mxu0 %vm25861_vm15, %v246_v8  ;;  %v1883_v42 = vpop.permute.xlu0 %1882 }
 0x90f   : > { %2429 = vmatprep.mubr.f32.mxu0 %v21530_v39 }
 0x912   : > { %15563 = vmatmul.mubr.msk.f32.gmra.mrb[12].mxu0 %vm25861_vm15, %v249_v55  ;;  %vm2685_vm15 = vcmask 1045509  }
 0x9d9   : > { %v2413_v17 = vpop.f32.mrb[6].mxu0 }
 0x9da   : > { %v18318_v18 = vadd.f32 %v2413_v17, %v1868_v0  ;;  %v2415_v20 = vpop.f32.mrb[7].mxu0 }
 0x9db   : > { %v18319_v3 = vadd.f32 %v2415_v20, %v1868_v0 }
 0x9dc   : > { %v2436_v22 = vmul.f32 0.01, %v18318_v18 }
 0x9dd   : > { %v2437_v24 = vmul.f32 0.01, %v18319_v3  ;;  %v2419_v30 = vpop.f32.mrb[8].mxu0 }
 0x9de   : > { %v2444_v32 = vmax.f32 %v18318_v18, %v2436_v22  ;;  %v18320_v16 = vadd.f32 %v2419_v30, %v1873_v29  ;;  %v2421_v33 = vpop.f32.mrb[9].mxu0 }
 0x9df   : > { %v2445_v31 = vmax.f32 %v18319_v3, %v2437_v24  ;;  %v18321_v37 = vadd.f32 %v2421_v33, %v1873_v29  ;;  %v250_v33 = vld [vmem:[%s25853_s1 + $0x138] sm:$0xff] }
 0x9e0   : > { %v2438_v12 = vmul.f32 0.01, %v18320_v16 }
 0x9e1   : > { %v19407_v40 = vpack.i.bf16 %v2445_v31, %v2444_v32  ;;  %v2439_v34 = vmul.f32 0.01, %v18321_v37  ;;  %v2425_v41 = vpop.f32.mrb[10].mxu0 }
 0x9e2   : > { %v2446_v13 = vmax.f32 %v18320_v16, %v2438_v12  ;;  %v18322_v43 = vadd.f32 %v2425_v41, %v1878_v38  ;;  %v2427_v44 = vpop.f32.mrb[11].mxu0  ;;  %v252_v12 = vld [vmem:[%s25853_s1 + $0x168] sm:$0xff] }
 0x9e3   : > { %v2447_v48 = vmax.f32 %v18321_v37, %v2439_v34  ;;  %v18323_v50 = vadd.f32 %v2427_v44, %v1878_v38  ;;  %19408 = vrot.lane.b32.xlu1 %v19407_v40, %s20569_s11  ;;  %v251_v37 = vld [vmem:[%s25853_s1 + $0x150] sm:$0xff]  ;;  %v253_v38 = vld [vmem:[%s25853_s1 + $0x180] sm:$0xff]  ;;  %v254_v40 = vld [vmem:[%s25853_s1 + $0x198] sm:$0xff] }
 0x9e4   : > { %v18278_v47 = vpack.c.bf16 %v2446_v13, %v2444_v32  ;;  %v2440_v23 = vmul.f32 0.01, %v18322_v43  ;;  %v19427_v32 = vld [vmem:[%s25855_s3 + $0x40] sm:$0xff]   ;;  %v255_v34 = vld [vmem:[%s25853_s1 + $0x1b0] sm:$0xff]  ;;  %v256_v41 = vld [vmem:[%s25853_s1 + $0x1c8] sm:$0xff] }
 0x9e5   : > { %v19412_v25 = vpack.i.bf16 %v2447_v48, %v2446_v13  ;;  %v2441_v54 = vmul.f32 0.01, %v18323_v50  ;;  %v2431_v58 = vpop.f32.mrb[12].mxu0  ;;  %v18276_v59 = vpack.c.bf16 %v2447_v48, %v2445_v31  ;;  %v19428_v31 = vld [vmem:[%s25855_s3] sm:$0xff]   ;;  %v19431_v44 = vld [vmem:[%s25855_s3 + $0x48] sm:$0xff]  }
 0x9e6   : > { %v2448_v61 = vmax.f32 %v18322_v43, %v2440_v23  ;;  %v18324_v7 = vadd.f32 %v2431_v58, %v1883_v42  ;;  %v2433_v53 = vpop.f32.mrb[13].mxu0  ;;  %v257_v13 = vld [vmem:[%s25853_s1 + $0x1e0] sm:$0xff]  ;;  %v19432_v48 = vld [vmem:[%s25855_s3 + $0x8] sm:$0xff]   ;;  %v19435_v58 = vld [vmem:[%s25855_s3 + $0x50] sm:$0xff]  }
 0x9e7   : > { %v2449_v19 = vmax.f32 %v18323_v50, %v2441_v54  ;;  %v18325_v46 = vadd.f32 %v2433_v53, %v1883_v42  ;;  %19413 = vrot.lane.b32.xlu0 %v19412_v25, %s20569_s11  ;;  %18277 = vmatprep.subr.bf16.mxu1 %v18276_v59  ;;  %v19434_v23 = vld [vmem:[%s25855_s3 + $0x108] sm:$0xff]   ;;  %v2697_v42 = vld [vmem:[#allocation6] sm:$0xff]  ;;  %v2700_v25 = vld [vmem:[#allocation6 + $0x8] sm:$0xff] }
 0x9e8   : > { %v2442_v49 = vmul.f32 0.01, %v18324_v7  ;;  %18279 = vmatpush1.bf16.msra.mxu1 %v18278_v47  ;;  %v19433_v47 = vld [vmem:[%s25855_s3 + $0x148] sm:$0xff]   ;;  %v2703_v54 = vld [vmem:[#allocation6 + $0x10] sm:$0xff]  ;;  %v19437_v53 = vld [vmem:[%s25855_s3 + $0x150] sm:$0xff]  }
 0x9e9   : > { %v19417_v63 = vpack.i.bf16 %v2449_v19, %v2448_v61  ;;  %v2443_v27 = vmul.f32 0.01, %v18325_v46  ;;  %v2706_v59 = vld [vmem:[#allocation6 + $0x18] sm:$0xff] }
 0x9ea   : > { %v2450_v21 = vmax.f32 %v18324_v7, %v2442_v49 }
 0x9eb   : > { %v2451_v56 = vmax.f32 %v18325_v46, %v2443_v27  ;;  %19418 = vrot.lane.b32.xlu1 %v19417_v63, %s20569_s11  ;;  %v19438_v27 = vld [vmem:[%s25855_s3 + $0x110] sm:$0xff]  }
 0x9ec   : > { %v18282_v45 = vpack.c.bf16 %v2450_v21, %v2448_v61  ;;  %v19436_v61 = vld [vmem:[%s25855_s3 + $0x10] sm:$0xff]  }
 0x9ed   : > { %v19422_v1 = vpack.i.bf16 %v2451_v56, %v2450_v21  ;;  %v18280_v28 = vpack.c.bf16 %v2451_v56, %v2449_v19  ;;  %v2709_v56 = vld [vmem:[#allocation6 + $0x20] sm:$0xff] }
 0x9ee   : > { %v19469_v21 = vld [vmem:[%s25855_s3 + $0x90] sm:$0xff]  }
 0x9ef   : > { %19423 = vrot.lane.b32.xlu0 %v19422_v1, %s20569_s11  ;;  %2490 = vperm.xlu1 %18486, %v271_v52   ;;  %v19439_v52 = vld [vmem:[%s25855_s3 + $0x58] sm:$0xff]   ;;  %s25810_s11 = scalar_lea.hbm %s25857_s5, %s16640_s30 }
 0x9f0   : > { %18281 = vmatprep.subr.bf16.mxu1 %v18280_v28  ;;  %v2712_v1 = vld [vmem:[#allocation6 + $0x28] sm:$0xff] }
 0x9f1   : > { %18283 = vmatpush1.bf16.msra.mxu1 %v18282_v45  ;;  %v19440_v28 = vld [vmem:[%s25855_s3 + $0x18] sm:$0xff]  }
 0x9f3   : > { %2495 = vperm.xlu0 %18390, %v272_v2   ;;  %2500 = vperm.xlu1 %18486, %v273_v4   ;;  %v19441_v4 = vld [vmem:[%s25855_s3 + $0x158] sm:$0xff]  }
 0x9f7   : > { %2505 = vperm.xlu0 %18390, %v274_v36   ;;  %2510 = vperm.xlu1 %18486, %v275_v5   ;;  %v19442_v36 = vld [vmem:[%s25855_s3 + $0x118] sm:$0xff]   ;;  %v19443_v5 = vld [vmem:[%s25855_s3 + $0x60] sm:$0xff]  }
 0x9fb   : > { %2515 = vperm.xlu0 %18390, %v276_v51   ;;  %2520 = vperm.xlu1 %18486, %v277_v6   ;;  %v2715_v51 = vld [vmem:[#allocation6 + $0x30] sm:$0xff] }
 0x9ff   : > { %2525 = vperm.xlu0 %18390, %v278_v26   ;;  %v2718_v26 = vld [vmem:[#allocation6 + $0x38] sm:$0xff] }
 0xa55   : > { %v19409_v9 = vpop.permute.xlu1 %19408 }
 0xa56   : > { %v19411_v60 = vunpack.i.h.bf16 %v19409_v9  ;;  %v19410_v10 = vunpack.i.l.bf16 %v19409_v9  ;;  %v19445_v9 = vld [vmem:[%s25855_s3 + $0x160] sm:$0xff]  }
 0xa58   : > { %v2476_v15 = vsel %vm309_vm3, %v19410_v10, %v19411_v60  ;;  %v19446_v10 = vld [vmem:[%s25855_s3 + $0x120] sm:$0xff]  }
 0xa59   : > { %v19414_v35 = vpop.permute.xlu0 %19413 }
 0xa5a   : > { %v19416_v11 = vunpack.i.h.bf16 %v19414_v35  ;;  %v19415_v14 = vunpack.i.l.bf16 %v19414_v35  ;;  %v2721_v35 = vld [vmem:[#allocation6 + $0x40] sm:$0xff] }
 0xa5c   : > { %v2477_v62 = vsel %vm309_vm3, %v19415_v14, %v19416_v11  ;;  %v18284_v8 = vpack.c.bf16 %v19416_v11, %v19411_v60  ;;  %v2724_v14 = vld [vmem:[#allocation6 + $0x48] sm:$0xff] }
 0xa5d   : > { %v18286_v55 = vpack.c.bf16 %v2477_v62, %v2476_v15  ;;  %v19419_v0 = vpop.permute.xlu1 %19418  ;;  %v19447_v62 = vld [vmem:[%s25855_s3 + $0x68] sm:$0xff]  }
 0xa5e   : > { %18285 = vmatprep.subr.bf16.mxu1 %v18284_v8  ;;  %v19421_v17 = vunpack.i.h.bf16 %v19419_v0  ;;  %v19420_v18 = vunpack.i.l.bf16 %v19419_v0  ;;  %v19448_v8 = vld [vmem:[%s25855_s3 + $0x28] sm:$0xff]  }
 0xa5f   : > { %18287 = vmatpush1.bf16.msra.mxu1 %v18286_v55  ;;  %v19449_v55 = vld [vmem:[%s25855_s3 + $0x168] sm:$0xff]  }
 0xa60   : > { %v2478_v29 = vsel %vm309_vm3, %v19420_v18, %v19421_v17  ;;  %v19450_v0 = vld [vmem:[%s25855_s3 + $0x128] sm:$0xff]  }
 0xa61   : > { %v19424_v20 = vpop.permute.xlu0 %19423 }
 0xa62   : > { %v19426_v3 = vunpack.i.h.bf16 %v19424_v20  ;;  %v19425_v22 = vunpack.i.l.bf16 %v19424_v20  ;;  %v19451_v20 = vld [vmem:[%s25855_s3 + $0x70] sm:$0xff]  }
 0xa64   : > { %v2479_v24 = vsel %vm309_vm3, %v19425_v22, %v19426_v3  ;;  %v18288_v30 = vpack.c.bf16 %v19426_v3, %v19421_v17  ;;  %vm2667_vm3 = vsmask.f32 256  ;;  %v2727_v17 = vld [vmem:[#allocation6 + $0x50] sm:$0xff]  ;;  %v2730_v3 = vld [vmem:[#allocation6 + $0x58] sm:$0xff]  ;;  %v19452_v22 = vld [vmem:[%s25855_s3 + $0x30] sm:$0xff]  }
 0xa65   : > { %v18290_v16 = vpack.c.bf16 %v2479_v24, %v2478_v29  ;;  %vm21632_vm6 = vmand %vm2666_vm2, %vm2667_vm3  ;;  %v19453_v24 = vld [vmem:[%s25855_s3 + $0x170] sm:$0xff]  }
 0xa66   : > { %18289 = vmatprep.subr.bf16.mxu1 %v18288_v30  ;;  %vm2672_vm10 = vmor %vm2671_vm9, %vm21632_vm6  ;;  %v19454_v30 = vld [vmem:[%s25855_s3 + $0x130] sm:$0xff]  }
 0xa67   : > { %18291 = vmatpush1.bf16.msra.mxu1 %v18290_v16  ;;  %vm2676_vm14 = vmor %vm2675_vm13, %vm2672_vm10  ;;  %vm2690_vm10 = vsmask.f32 6400  ;;  %vm2694_vm13 = vsmask.f32 7424  ;;  %v2736_v16 = vld [vmem:[#allocation6 + $0x68] sm:$0xff] }
 0xa68   : > { %16644 = vmatprep.subr.bf16.mxu1 %v19427_v32  ;;  %vm2679_vm2 = vmand %vm2677_vm11, %vm2678_vm12  ;;  %vm2693_vm12 = vcmask 1047559   ;;  %v2733_v32 = vld [vmem:[#allocation6 + $0x60] sm:$0xff] }
 0xa69   : > { %vm2680_vm3 = vmor %vm2679_vm2, %vm2676_vm14 }
 0xa6a   : > { %15564 = vmatmul.mubr.msk.f32.vlgmr.msra.gmra.mrb[14].mxu1 %vm2528_vm1, %v250_v33  ;;  %vm2687_vm11 = vmand %vm2685_vm15, %vm2686_vm4 }
 0xa6b   : > { %2623 = vmatprep.mubr.f32.mxu1 %v21530_v39  ;;  %16645 = vmatpush3.bf16.msra.mxu1 %v19428_v31  ;;  %vm2691_vm14 = vmand %vm2689_vm8, %vm2690_vm10  ;;  %vm15193_vm8 = vcmask 1045504  }
 0xa6c   : > { %16646 = vmatprep.subr.bf16.mxu1 %v19431_v44  ;;  %vm2695_vm15 = vmand %vm2693_vm12, %vm2694_vm13  ;;  %v19462_v44 = vld [vmem:[%s25855_s3 + $0x240] sm:$0xff]  }
 0xa6e   : > { %15565 = vmatmul.mubr.msk.f32.gmra.mrb[16].mxu1 %vm2528_vm1, %v251_v37  ;;  %v19455_v37 = vld [vmem:[%s25855_s3 + $0x78] sm:$0xff]  }
 0xa6f   : > { %2629 = vmatprep.mubr.f32.mxu1 %v21530_v39  ;;  %16647 = vmatpush3.bf16.msra.mxu1 %v19432_v48  ;;  %v20578_v48 = vmov 1966171168  }
 0xa70   : > { %16648 = vmatprep.subr.bf16.mxu1 %v19435_v58  ;;  %v2757_v50 = vunpack.c.l.s4 %v20578_v48 }
 0xa72   : > { %15566 = vmatmul.mubr.msk.f32.gmra.mrb[18].mxu1 %vm2528_vm1, %v252_v12  ;;  %v19456_v12 = vld [vmem:[%s25855_s3 + $0x38] sm:$0xff]  }
 0xa73   : > { %2635 = vmatprep.mubr.f32.mxu1 %v21530_v39  ;;  %16649 = vmatpush3.bf16.msra.mxu1 %v19436_v61 }
 0xa74   : > { %16650 = vmatprep.subr.bf16.mxu1 %v19439_v52 }
 0xa76   : > { %15567 = vmatmul.mubr.msk.f32.gmra.mrb[20].mxu1 %vm2528_vm1, %v253_v38  ;;  %v19457_v38 = vld [vmem:[%s25855_s3 + $0x178] sm:$0xff]  }
 0xa77   : > { %2641 = vmatprep.mubr.f32.mxu1 %v21530_v39  ;;  %16651 = vmatpush3.bf16.msra.mxu1 %v19440_v28 }
 0xa78   : > { %16652 = vmatprep.subr.bf16.mxu1 %v19443_v5 }
 0xa7a   : > { %15568 = vmatmul.mubr.msk.f32.gmra.mrb[22].mxu1 %vm2528_vm1, %v254_v40  ;;  %v19458_v40 = vld [vmem:[%s25855_s3 + $0x138] sm:$0xff]  }
 0xa7b   : > { %2647 = vmatprep.mubr.f32.mxu1 %v21530_v39  ;;  %16653 = vmatpush3.bf16.msra.mxu1 %v19444_v57 }
 0xa7c   : > { %16654 = vmatprep.subr.bf16.mxu1 %v19447_v62 }
 0xa7e   : > { %15569 = vmatmul.mubr.msk.f32.gmra.mrb[24].mxu1 %vm2528_vm1, %v255_v34  ;;  %v2739_v34 = vld [vmem:[#allocation6 + $0x70] sm:$0xff] }
 0xa7f   : > { %2653 = vmatprep.mubr.f32.mxu1 %v21530_v39  ;;  %16655 = vmatpush3.bf16.msra.mxu1 %v19448_v8 }
 0xa80   : > { %16656 = vmatprep.subr.bf16.mxu1 %v19451_v20 }
 0xa82   : > { %15570 = vmatmul.mubr.msk.f32.gmra.mrb[26].mxu1 %vm2528_vm1, %v256_v41  ;;  %v2742_v41 = vld [vmem:[#allocation6 + $0x78] sm:$0xff] }
 0xa83   : > { %2659 = vmatprep.mubr.f32.mxu1 %v21530_v39  ;;  %v19430_v39 = vld [vmem:[%s25855_s3 + $0x100] sm:$0xff]   ;;  %16657 = vmatpush3.bf16.msra.mxu1 %v19452_v22 }
 0xa84   : > { %16689 = vmatpush3.bf16.msra.mxu0 %v19430_v39  ;;  %16658 = vmatprep.subr.bf16.mxu1 %v19455_v37  ;;  %v19459_v39 = vld [vmem:[%s25855_s3 + $0xc0] sm:$0xff]  }
 0xa85   : > { %16690 = vmatprep.subr.bf16.mxu0 %v19433_v47  ;;  %v2759_v47 = vlaneseq }
 0xa86   : > { %15571 = vmatmul.mubr.msk.f32.gmra.mrb[28].mxu1 %vm2528_vm1, %v257_v13  ;;  %vm2681_vm1 = vcmask 1044484  }
 0xa87   : > { %vm2683_vm9 = vmand %vm2681_vm1, %vm2682_vm0  ;;  %16659 = vmatpush3.bf16.msra.mxu1 %v19456_v12 }
 0xa88   : > { %vm21648_vm7 = vmor %vm2683_vm9, %vm2680_vm3  ;;  %16691 = vmatpush3.bf16.msra.mxu0 %v19434_v23  ;;  %vm2771_vm3 = vcmask 230401   ;;  %16666 = vmatprep.subr.bf16.mxu1 %v19459_v39  ;;  %v2758_v23 = vunpack.c.0.s8 %v2757_v50 }
 0xa89   : > { %vm2688_vm0 = vmor %vm2687_vm11, %vm21648_vm7  ;;  %16692 = vmatprep.subr.bf16.mxu0 %v19437_v53  ;;  %v2496_v53 = vpop.permute.xlu0 %2495  ;;  %vm25873_vm7 = vcmask 261120   ;;  %vm25875_vm11 = vcmask 1044480  }
 0xa8a   : > { %vm2692_vm1 = vmor %vm2691_vm14, %vm2688_vm0 }
 0xa8b   : > { %vm21666_vm2 = vmor %vm2695_vm15, %vm2692_vm1  ;;  %vm15379_vm1 = vcmask 1043456  }
 0xa8c   : > { %v2698_v19 = vsel %vm21666_vm2, 0, %v2697_v42  ;;  %v2701_v46 = vsel %vm21666_vm2, 0, %v2700_v25  ;;  %vm2772_vm4 = vmand %vm2771_vm3, %vm2670_vm5  ;;  %v2704_v49 = vsel %vm21666_vm2, 0, %v2703_v54  ;;  %v2707_v63 = vsel %vm21666_vm2, 0, %v2706_v59  ;;  %16693 = vmatpush3.bf16.msra.mxu0 %v19438_v27  ;;  %v2491_v25 = vpop.permute.xlu1 %2490 }
 0xa8d   : > { %2699 = vst [vmem:[#allocation6] sm:$0xff] %v2698_v19  ;;  %2702 = vst [vmem:[#allocation6 + $0x8] sm:$0xff] %v2701_v46  ;;  %v2710_v45 = vsel %vm21666_vm2, 0, %v2709_v56  ;;  %v2713_v2 = vsel %vm21666_vm2, 0, %v2712_v1  ;;  %16694 = vmatprep.subr.bf16.mxu0 %v19441_v4  ;;  %v2716_v6 = vsel %vm21666_vm2, 0, %v2715_v51  ;;  %v2719_v60 = vsel %vm21666_vm2, 0, %v2718_v26 }
 0xa8e   : > { %vm21687_vm9 = vmor %vm2772_vm4, %vm21632_vm6  ;;  %2705 = vst [vmem:[#allocation6 + $0x10] sm:$0xff] %v2704_v49  ;;  %v2722_v11 = vsel %vm21666_vm2, 0, %v2721_v35  ;;  %v2725_v15 = vsel %vm21666_vm2, 0, %v2724_v14  ;;  %v2728_v18 = vsel %vm21666_vm2, 0, %v2727_v17  ;;  %v2731_v29 = vsel %vm21666_vm2, 0, %v2730_v3  ;;  %v2506_v3 = vpop.permute.xlu0 %2505 }
 0xa8f   : > { %2708 = vst [vmem:[#allocation6 + $0x18] sm:$0xff] %v2707_v63  ;;  %2711 = vst [vmem:[#allocation6 + $0x20] sm:$0xff] %v2710_v45  ;;  %v2734_v33 = vsel %vm21666_vm2, 0, %v2733_v32  ;;  %v2737_v31 = vsel %vm21666_vm2, 0, %v2736_v16  ;;  %v2740_v13 = vsel %vm21666_vm2, 0, %v2739_v34  ;;  %v2743_v43 = vsel %vm21666_vm2, 0, %v2742_v41 }
 0xa90   : > { %2714 = vst [vmem:[#allocation6 + $0x28] sm:$0xff] %v2713_v2  ;;  %16695 = vmatpush3.bf16.msra.mxu0 %v19442_v36  ;;  %2717 = vst [vmem:[#allocation6 + $0x30] sm:$0xff] %v2716_v6  ;;  %v2760_v42 = vshrl.u32 %v2759_v47, 7  ;;  %v2501_v52 = vpop.permute.xlu1 %2500  ;;  %vm15099_vm5 = vcmask 1046528   ;;  %vm20580_vm6 = vmmov 0   ;;  %vm15467_vm2 = vcmask 24576  }
 0xa91   : > { %2720 = vst [vmem:[#allocation6 + $0x38] sm:$0xff] %v2719_v60  ;;  %16696 = vmatprep.subr.bf16.mxu0 %v19445_v9  ;;  %2723 = vst [vmem:[#allocation6 + $0x40] sm:$0xff] %v2722_v11 }
 0xa92   : > { %2726 = vst [vmem:[#allocation6 + $0x48] sm:$0xff] %v2725_v15  ;;  %2729 = vst [vmem:[#allocation6 + $0x50] sm:$0xff] %v2728_v18  ;;  %v21781_v7 = vsub.s32 %v2758_v23, %v2760_v42 }
 0xa93   : > { %2732 = vst [vmem:[#allocation6 + $0x58] sm:$0xff] %v2731_v29  ;;  %2735 = vst [vmem:[#allocation6 + $0x60] sm:$0xff] %v2734_v33 }
 0xa94   : > { %16697 = vmatpush3.bf16.msra.mxu0 %v19446_v10  ;;  %2738 = vst [vmem:[#allocation6 + $0x68] sm:$0xff] %v2737_v31  ;;  %2741 = vst [vmem:[#allocation6 + $0x70] sm:$0xff] %v2740_v13  ;;  %v2774_v45 = vld [vmem:[#allocation6] sm:$0x3]  ;;  %v2783_v28 = vld [vmem:[#allocation6 + $0x2] sm:$0x3] }
 0xa95   : > { %16698 = vmatprep.subr.bf16.mxu0 %v19449_v55  ;;  %2744 = vst [vmem:[#allocation6 + $0x78] sm:$0xff] %v2743_v43  ;;  %v2795_v5 = vld [vmem:[#allocation6 + $0x4] sm:$0x3]  ;;  %v2809_v51 = vld [vmem:[#allocation6 + $0x8] sm:$0x3]  ;;  %vm25874_vm10 = vmmov %vm25873_vm7 }
 0xa96   : > { %v2804_v35 = vld [vmem:[#allocation6 + $0x6] sm:$0x3]  ;;  %v2818_v11 = vld [vmem:[#allocation6 + $0xa] sm:$0x3]  ;;  %v2823_v17 = vld [vmem:[#allocation6 + $0xc] sm:$0x3] }
 0xa97   : > { %v2851_v18 = vld [vmem:[#allocation6 + $0x10] sm:$0x3]  ;;  %v2832_v33 = vld [vmem:[#allocation6 + $0xe] sm:$0x3]  ;;  %v2860_v31 = vld [vmem:[#allocation6 + $0x12] sm:$0x3] }
 0xa98   : > { %16699 = vmatpush3.bf16.msra.mxu0 %v19450_v0  ;;  %v2872_v43 = vld [vmem:[#allocation6 + $0x14] sm:$0x3]  ;;  %v2886_v39 = vld [vmem:[#allocation6 + $0x18] sm:$0x3]  ;;  %vm25876_vm0 = vmmov %vm25875_vm11 }
 0xa99   : > { %16700 = vmatprep.subr.bf16.mxu0 %v19453_v24  ;;  %vm25877_vm12 = vmmov %vm25876_vm0 }
 0xa9a   : > { %vm25878_vm13 = vmmov %vm25876_vm0 }
 0xa9b   : > { %vm25879_vm14 = vmmov %vm25873_vm7 }
 0xa9c   : > { %16701 = vmatpush3.bf16.msra.mxu0 %v19454_v30  ;;  %vm25880_vm15 = vmmov %vm25873_vm7 }
 0xa9d   : > { %16702 = vmatprep.subr.bf16.mxu0 %v19457_v38 }
 0xaa0   : > { %16703 = vmatpush3.bf16.msra.mxu0 %v19458_v40 }
 0xaa1   : > { %16732 = vmatprep.subr.bf16.mxu0 %v19462_v44  ;;  %v2511_v44 = vpop.permute.xlu1 %2510 }
 0xb3d   : > { %v2619_v54 = vpop.f32.mrb[14].mxu1 }
 0xb3e   : > { %v2620_v58 = vadd.f32 %v2619_v54, %v2491_v25  ;;  %v2621_v59 = vpop.f32.mrb[15].mxu1  ;;  %v2881_v54 = vld [vmem:[#allocation6 + $0x16] sm:$0x3] }
 0xb3f   : > { %v2622_v61 = vadd.f32 %v2621_v59, %v2491_v25 }
 0xb41   : > { %v15572_v19 = vpack.c.bf16 %v2622_v61, %v2620_v58  ;;  %v2625_v46 = vpop.f32.mrb[16].mxu1  ;;  %v2895_v58 = vld [vmem:[#allocation6 + $0x1a] sm:$0x3] }
 0xb42   : > { %v2626_v49 = vadd.f32 %v2625_v46, %v2496_v53  ;;  %v2627_v63 = vpop.f32.mrb[17].mxu1 }
 0xb43   : > { %v2762_v27 = vrot.slane %v15572_v19, %v21781_v7  ;;  %v2628_v56 = vadd.f32 %v2627_v63, %v2496_v53 }
 0xb45   : > { %v2769_v1 = vrot.slane %v2762_v27, %v21781_v7  ;;  %v2786_v2 = vcombine.high %v2762_v27, %v2762_v27  ;;  %v15577_v4 = vpack.c.bf16 %v2628_v56, %v2626_v49  ;;  %v2631_v36 = vpop.f32.mrb[18].mxu1  ;;  %v2900_v27 = vld [vmem:[#allocation6 + $0x1c] sm:$0x3]  ;;  %v2930_v56 = vld [vmem:[#allocation6 + $0x20] sm:$0x3] }
 0xb46   : > { %v2632_v6 = vadd.f32 %v2631_v36, %v2501_v52  ;;  %v2633_v26 = vpop.f32.mrb[19].mxu1  ;;  %v2939_v36 = vld [vmem:[#allocation6 + $0x22] sm:$0x3] }
 0xb47   : > { %v2775_v57 = vsel %vm21687_vm9, %v2769_v1, %v2774_v45  ;;  %v2778_v9 = vshrl.u32 %v2769_v1, 16  ;;  %v2793_v60 = vrot.slane %v2786_v2, %v21781_v7  ;;  %v2807_v10 = vcombine.high %v2769_v1, %v2769_v1 }
 0xb48   : > { %2776 = vst [vmem:[#allocation6] sm:$0x3] %v2775_v57  ;;  %v2842_v14 = vrot.slane %v15577_v4, %v21781_v7  ;;  %v2634_v15 = vadd.f32 %v2633_v26, %v2501_v52  ;;  %v2909_v4 = vld [vmem:[#allocation6 + $0x1e] sm:$0x3] }
 0xb49   : > { %v2784_v62 = vsel %vm21687_vm9, %v2778_v9, %v2783_v28  ;;  %v2796_v8 = vsel %vm21687_vm9, %v2793_v60, %v2795_v5  ;;  %v2799_v55 = vshrl.u32 %v2793_v60, 16  ;;  %v2810_v0 = vsel %vm21687_vm9, %v2807_v10, %v2809_v51  ;;  %v2637_v20 = vpop.f32.mrb[20].mxu1 }
 0xb4a   : > { %2785 = vst [vmem:[#allocation6 + $0x2] sm:$0x3] %v2784_v62  ;;  %2797 = vst [vmem:[#allocation6 + $0x4] sm:$0x3] %v2796_v8  ;;  %v2813_v22 = vshrl.u32 %v2807_v10, 16  ;;  %v2821_v29 = vcombine.high %v2793_v60, %v2793_v60  ;;  %v2849_v24 = vrot.slane %v2842_v14, %v21781_v7  ;;  %v2863_v30 = vcombine.high %v2842_v14, %v2842_v14  ;;  %v2639_v32 = vpop.f32.mrb[21].mxu1  ;;  %v21828_v14 = vpop.permute.xlu0 %2515 }
 0xb4b   : > { %2811 = vst [vmem:[#allocation6 + $0x8] sm:$0x3] %v2810_v0  ;;  %v2805_v16 = vsel %vm21687_vm9, %v2799_v55, %v2804_v35  ;;  %v15582_v37 = vpack.c.bf16 %v2634_v15, %v2632_v6  ;;  %v2638_v12 = vadd.f32 %v2637_v20, %v2506_v3  ;;  %v2640_v38 = vadd.f32 %v2639_v32, %v2506_v3  ;;  %v2951_v10 = vld [vmem:[#allocation6 + $0x24] sm:$0x3]  ;;  %v2965_v35 = vld [vmem:[#allocation6 + $0x28] sm:$0x3] }
 0xb4c   : > { %2806 = vst [vmem:[#allocation6 + $0x6] sm:$0x3] %v2805_v16  ;;  %v2819_v40 = vsel %vm21687_vm9, %v2813_v22, %v2818_v11  ;;  %v2824_v34 = vsel %vm21687_vm9, %v2821_v29, %v2823_v17  ;;  %v2827_v41 = vshrl.u32 %v2821_v29, 16  ;;  %v2852_v13 = vsel %vm21687_vm9, %v2849_v24, %v2851_v18  ;;  %v3007_v0 = vld [vmem:[#allocation6 + $0x30] sm:$0x3] }
 0xb4d   : > { %2820 = vst [vmem:[#allocation6 + $0xa] sm:$0x3] %v2819_v40  ;;  %2825 = vst [vmem:[#allocation6 + $0xc] sm:$0x3] %v2824_v34  ;;  %v2855_v48 = vshrl.u32 %v2849_v24, 16  ;;  %v2870_v50 = vrot.slane %v2863_v30, %v21781_v7  ;;  %v2884_v47 = vcombine.high %v2849_v24, %v2849_v24  ;;  %v2921_v23 = vrot.slane %v15582_v37, %v21781_v7  ;;  %v2643_v42 = vpop.f32.mrb[22].mxu1 }
 0xb4e   : > { %2853 = vst [vmem:[#allocation6 + $0x10] sm:$0x3] %v2852_v13  ;;  %v2833_v25 = vsel %vm21687_vm9, %v2827_v41, %v2832_v33  ;;  %v15587_v59 = vpack.c.bf16 %v2640_v38, %v2638_v12  ;;  %v21808_v61 = vadd.f32 %v2643_v42, %v2511_v44  ;;  %v2645_v53 = vpop.f32.mrb[23].mxu1  ;;  %v2960_v18 = vld [vmem:[#allocation6 + $0x26] sm:$0x3] }
 0xb4f   : > { %2834 = vst [vmem:[#allocation6 + $0xe] sm:$0x3] %v2833_v25  ;;  %v2861_v19 = vsel %vm21687_vm9, %v2855_v48, %v2860_v31  ;;  %v2873_v46 = vsel %vm21687_vm9, %v2870_v50, %v2872_v43  ;;  %v2876_v49 = vshrl.u32 %v2870_v50, 16  ;;  %v2887_v63 = vsel %vm21687_vm9, %v2884_v47, %v2886_v39  ;;  %v2974_v20 = vld [vmem:[#allocation6 + $0x2a] sm:$0x3] }
 0xb50   : > { %2862 = vst [vmem:[#allocation6 + $0x12] sm:$0x3] %v2861_v19  ;;  %2874 = vst [vmem:[#allocation6 + $0x14] sm:$0x3] %v2873_v46  ;;  %v2890_v45 = vshrl.u32 %v2884_v47, 16  ;;  %v2898_v52 = vcombine.high %v2870_v50, %v2870_v50  ;;  %v2928_v1 = vrot.slane %v2921_v23, %v21781_v7  ;;  %v2942_v28 = vcombine.high %v2921_v23, %v2921_v23 }
 0xb51   : > { %2888 = vst [vmem:[#allocation6 + $0x18] sm:$0x3] %v2887_v63  ;;  %v2882_v2 = vsel %vm21687_vm9, %v2876_v49, %v2881_v54  ;;  %v2998_v5 = vrot.slane %v15587_v59, %v21781_v7  ;;  %v2646_v51 = vadd.f32 %v2645_v53, %v2511_v44  ;;  %v2649_v6 = vpop.f32.mrb[24].mxu1  ;;  %v2979_v3 = vld [vmem:[#allocation6 + $0x2c] sm:$0x3] }
 0xb52   : > { %2883 = vst [vmem:[#allocation6 + $0x16] sm:$0x3] %v2882_v2  ;;  %v2896_v26 = vsel %vm21687_vm9, %v2890_v45, %v2895_v58  ;;  %v2901_v57 = vsel %vm21687_vm9, %v2898_v52, %v2900_v27  ;;  %v2904_v9 = vshrl.u32 %v2898_v52, 16  ;;  %v2931_v60 = vsel %vm21687_vm9, %v2928_v1, %v2930_v56  ;;  %v21826_v11 = vpop.f32.mrb[25].mxu1  ;;  %v3016_v31 = vld [vmem:[#allocation6 + $0x32] sm:$0x3]  ;;  %v2521_v56 = vpop.permute.xlu1 %2520 }
 0xb53   : > { %2897 = vst [vmem:[#allocation6 + $0x1a] sm:$0x3] %v2896_v26  ;;  %2902 = vst [vmem:[#allocation6 + $0x1c] sm:$0x3] %v2901_v57  ;;  %v2934_v15 = vshrl.u32 %v2928_v1, 16  ;;  %v2949_v62 = vrot.slane %v2942_v28, %v21781_v7  ;;  %v2963_v8 = vcombine.high %v2928_v1, %v2928_v1  ;;  %v3005_v55 = vrot.slane %v2998_v5, %v21781_v7 }
 0xb54   : > { %2932 = vst [vmem:[#allocation6 + $0x20] sm:$0x3] %v2931_v60  ;;  %v2910_v17 = vsel %vm21687_vm9, %v2904_v9, %v2909_v4  ;;  %v3019_v22 = vcombine.high %v2998_v5, %v2998_v5  ;;  %v15592_v29 = vpack.c.bf16 %v2646_v51, %v21808_v61  ;;  %v21836_v24 = vadd.f32 %v2649_v6, %v21828_v14  ;;  %v3028_v37 = vld [vmem:[#allocation6 + $0x34] sm:$0x3]  ;;  %v3042_v13 = vld [vmem:[#allocation6 + $0x38] sm:$0x3] }
 0xb55   : > { %2911 = vst [vmem:[#allocation6 + $0x1e] sm:$0x3] %v2910_v17  ;;  %v2940_v30 = vsel %vm21687_vm9, %v2934_v15, %v2939_v36  ;;  %v2952_v32 = vsel %vm21687_vm9, %v2949_v62, %v2951_v10  ;;  %v2955_v16 = vshrl.u32 %v2949_v62, 16  ;;  %v2966_v33 = vsel %vm21687_vm9, %v2963_v8, %v2965_v35  ;;  %v2655_v12 = vpop.f32.mrb[26].mxu1  ;;  %v2988_v44 = vld [vmem:[#allocation6 + $0x2e] sm:$0x3] }
 0xb56   : > { %2941 = vst [vmem:[#allocation6 + $0x22] sm:$0x3] %v2940_v30  ;;  %2953 = vst [vmem:[#allocation6 + $0x24] sm:$0x3] %v2952_v32  ;;  %v2969_v38 = vshrl.u32 %v2963_v8, 16  ;;  %v2977_v40 = vcombine.high %v2949_v62, %v2949_v62  ;;  %v3008_v34 = vsel %vm21687_vm9, %v3005_v55, %v3007_v0  ;;  %v3011_v41 = vshrl.u32 %v3005_v55, 16  ;;  %v2526_v62 = vpop.permute.xlu0 %2525 }
 0xb57   : > { %2967 = vst [vmem:[#allocation6 + $0x28] sm:$0x3] %v2966_v33  ;;  %v2657_v43 = vpop.f32.mrb[27].mxu1  ;;  %v2961_v39 = vsel %vm21687_vm9, %v2955_v16, %v2960_v18  ;;  %3009 = vst [vmem:[#allocation6 + $0x30] sm:$0x3] %v3008_v34  ;;  %v3026_v48 = vrot.slane %v3019_v22, %v21781_v7  ;;  %v3040_v47 = vcombine.high %v3005_v55, %v3005_v55 }
 0xb58   : > { %v3037_v50 = vld [vmem:[#allocation6 + $0x36] sm:$0x3]  ;;  %v3077_v23 = vrot.slane %v15592_v29, %v21781_v7  ;;  %2962 = vst [vmem:[#allocation6 + $0x26] sm:$0x3] %v2961_v39  ;;  %v2975_v42 = vsel %vm21687_vm9, %v2969_v38, %v2974_v20  ;;  %v2980_v25 = vsel %vm21687_vm9, %v2977_v40, %v2979_v3  ;;  %v2983_v54 = vshrl.u32 %v2977_v40, 16  ;;  %v21879_v29 = vld [vmem:[#allocation6] sm:$0xff] }
 0xb59   : > { %v3017_v58 = vsel %vm21687_vm9, %v3011_v41, %v3016_v31  ;;  %v3051_v59 = vld [vmem:[#allocation6 + $0x3a] sm:$0x3]  ;;  %v3056_v61 = vld [vmem:[#allocation6 + $0x3c] sm:$0x3]  ;;  %2976 = vst [vmem:[#allocation6 + $0x2a] sm:$0x3] %v2975_v42  ;;  %v3029_v53 = vsel %vm21687_vm9, %v3026_v48, %v3028_v37  ;;  %v3043_v46 = vsel %vm21687_vm9, %v3040_v47, %v3042_v13  ;;  %v3054_v52 = vcombine.high %v3026_v48, %v3026_v48 }
 0xb5a   : > { %2981 = vst [vmem:[#allocation6 + $0x2c] sm:$0x3] %v2980_v25  ;;  %3018 = vst [vmem:[#allocation6 + $0x32] sm:$0x3] %v3017_v58  ;;  %v3032_v19 = vshrl.u32 %v3026_v48, 16  ;;  %v3046_v49 = vshrl.u32 %v3040_v47, 16  ;;  %v2989_v45 = vsel %vm21687_vm9, %v2983_v54, %v2988_v44  ;;  %v3084_v1 = vrot.slane %v3077_v23, %v21781_v7 }
 0xb5b   : > { %v3086_v63 = vld [vmem:[#allocation6 + $0x40] sm:$0x3]  ;;  %v2661_v27 = vpop.f32.mrb[28].mxu1  ;;  %3030 = vst [vmem:[#allocation6 + $0x34] sm:$0x3] %v3029_v53  ;;  %v3098_v28 = vcombine.high %v3077_v23, %v3077_v23  ;;  %v2652_v6 = vadd.f32 %v21826_v11, %v21828_v14  ;;  %v2656_v26 = vadd.f32 %v2655_v12, %v2521_v56  ;;  %v3057_v57 = vsel %vm21687_vm9, %v3054_v52, %v3056_v61 }
 0xb5c   : > { %3044 = vst [vmem:[#allocation6 + $0x38] sm:$0x3] %v3043_v46  ;;  %v2663_v2 = vpop.f32.mrb[29].mxu1  ;;  %2990 = vst [vmem:[#allocation6 + $0x2e] sm:$0x3] %v2989_v45  ;;  %v3038_v4 = vsel %vm21687_vm9, %v3032_v19, %v3037_v50  ;;  %v3052_v36 = vsel %vm21687_vm9, %v3046_v49, %v3051_v59  ;;  %v3060_v9 = vshrl.u32 %v3054_v52, 16  ;;  %v3087_v60 = vsel %vm21687_vm9, %v3084_v1, %v3086_v63 }
 0xb5d   : > { %v3065_v5 = vld [vmem:[#allocation6 + $0x3e] sm:$0x3]  ;;  %v3095_v51 = vld [vmem:[#allocation6 + $0x42] sm:$0x3]  ;;  %3039 = vst [vmem:[#allocation6 + $0x36] sm:$0x3] %v3038_v4  ;;  %v3105_v8 = vrot.slane %v3098_v28, %v21781_v7  ;;  %v3119_v55 = vcombine.high %v3084_v1, %v3084_v1  ;;  %v15597_v11 = vpack.c.bf16 %v2652_v6, %v21836_v24  ;;  %v2658_v14 = vadd.f32 %v2657_v43, %v2521_v56 }
 0xb5e   : > { %3053 = vst [vmem:[#allocation6 + $0x3a] sm:$0x3] %v3052_v36  ;;  %v3090_v10 = vshrl.u32 %v3084_v1, 16  ;;  %v3107_v35 = vld [vmem:[#allocation6 + $0x44] sm:$0x3]  ;;  %v3066_v0 = vsel %vm21687_vm9, %v3060_v9, %v3065_v5  ;;  %v2662_v3 = vadd.f32 %v2661_v27, %v2526_v62  ;;  %v2664_v22 = vadd.f32 %v2663_v2, %v2526_v62 }
 0xb5f   : > { %v3121_v15 = vld [vmem:[#allocation6 + $0x48] sm:$0x3]  ;;  %3058 = vst [vmem:[#allocation6 + $0x3c] sm:$0x3] %v3057_v57  ;;  %3088 = vst [vmem:[#allocation6 + $0x40] sm:$0x3] %v3087_v60  ;;  %v3108_v30 = vsel %vm21687_vm9, %v3105_v8, %v3107_v35  ;;  %v3133_v31 = vcombine.high %v3105_v8, %v3105_v8  ;;  %v3154_v37 = vrot.slane %v15597_v11, %v21781_v7 }
 0xb60   : > { %v3096_v17 = vsel %vm21687_vm9, %v3090_v10, %v3095_v51  ;;  %v3116_v18 = vld [vmem:[#allocation6 + $0x46] sm:$0x3]  ;;  %v3130_v20 = vld [vmem:[#allocation6 + $0x4a] sm:$0x3]  ;;  %3067 = vst [vmem:[#allocation6 + $0x3e] sm:$0x3] %v3066_v0  ;;  %v3122_v24 = vsel %vm21687_vm9, %v3119_v55, %v3121_v15  ;;  %v15602_v12 = vpack.c.bf16 %v2658_v14, %v2656_v26  ;;  %v15607_v38 = vpack.c.bf16 %v2664_v22, %v2662_v3 }
 0xb61   : > { %3097 = vst [vmem:[#allocation6 + $0x42] sm:$0x3] %v3096_v17  ;;  %v3111_v32 = vshrl.u32 %v3105_v8, 16  ;;  %v3125_v16 = vshrl.u32 %v3119_v55, 16  ;;  %v3135_v33 = vld [vmem:[#allocation6 + $0x4c] sm:$0x3]  ;;  %v21892_v43 = vrot.slane %v21879_v29, %v21781_v7  ;;  %v5477_v39 = vcombine.high %v21879_v29, %v21879_v29 }
 0xb62   : > { %3109 = vst [vmem:[#allocation6 + $0x44] sm:$0x3] %v3108_v30  ;;  %3123 = vst [vmem:[#allocation6 + $0x48] sm:$0x3] %v3122_v24  ;;  %v3144_v41 = vld [vmem:[#allocation6 + $0x4e] sm:$0x3]  ;;  %v3136_v44 = vsel %vm21687_vm9, %v3133_v31, %v3135_v33  ;;  %v3161_v50 = vrot.slane %v3154_v37, %v21781_v7  ;;  %v3175_v47 = vcombine.high %v3154_v37, %v3154_v37 }
 0xb63   : > { %v3117_v40 = vsel %vm21687_vm9, %v3111_v32, %v3116_v18  ;;  %v3131_v34 = vsel %vm21687_vm9, %v3125_v16, %v3130_v20  ;;  %v3163_v13 = vld [vmem:[#allocation6 + $0x50] sm:$0x3]  ;;  %v3139_v48 = vshrl.u32 %v3133_v31, 16  ;;  %3137 = vst [vmem:[#allocation6 + $0x4c] sm:$0x3] %v3136_v44  ;;  %v3233_v25 = vrot.slane %v15602_v12, %v21781_v7 }
 0xb64   : > { %3118 = vst [vmem:[#allocation6 + $0x46] sm:$0x3] %v3117_v40  ;;  %3132 = vst [vmem:[#allocation6 + $0x4a] sm:$0x3] %v3131_v34  ;;  %v3172_v23 = vld [vmem:[#allocation6 + $0x52] sm:$0x3]  ;;  %v21901_v54 = vrot.slane %v15607_v38, %v21781_v7  ;;  %v5492_v58 = vcombine.high %v21892_v43, %v21892_v43  ;;  %v21907_v59 = vrot.slane %v21892_v43, %v21781_v7 }
 0xb65   : > { %v3184_v42 = vld [vmem:[#allocation6 + $0x54] sm:$0x3]  ;;  %v3145_v61 = vsel %vm21687_vm9, %v3139_v48, %v3144_v41  ;;  %v3164_v53 = vsel %vm21687_vm9, %v3161_v50, %v3163_v13  ;;  %v3167_v19 = vshrl.u32 %v3161_v50, 16  ;;  %v3182_v46 = vrot.slane %v3175_v47, %v21781_v7  ;;  %v3198_v49 = vld [vmem:[#allocation6 + $0x58] sm:$0x3] }
 0xb66   : > { %v3242_v63 = vld [vmem:[#allocation6 + $0x60] sm:$0x3]  ;;  %3146 = vst [vmem:[#allocation6 + $0x4e] sm:$0x3] %v3145_v61  ;;  %3165 = vst [vmem:[#allocation6 + $0x50] sm:$0x3] %v3164_v53  ;;  %v3196_v56 = vcombine.high %v3161_v50, %v3161_v50  ;;  %v3240_v1 = vrot.slane %v3233_v25, %v21781_v7  ;;  %v3254_v28 = vcombine.high %v3233_v25, %v3233_v25 }
 0xb67   : > { %v3193_v27 = vld [vmem:[#allocation6 + $0x56] sm:$0x3]  ;;  %v3207_v45 = vld [vmem:[#allocation6 + $0x5a] sm:$0x3]  ;;  %v3212_v52 = vld [vmem:[#allocation6 + $0x5c] sm:$0x3]  ;;  %v3317_v2 = vrot.slane %v21901_v54, %v21781_v7  ;;  %v3173_v4 = vsel %vm21687_vm9, %v3167_v19, %v3172_v23  ;;  %v3185_v36 = vsel %vm21687_vm9, %v3182_v46, %v3184_v42  ;;  %v3210_v51 = vcombine.high %v3182_v46, %v3182_v46 }
 0xb68   : > { %v3188_v5 = vshrl.u32 %v3182_v46, 16  ;;  %v3251_v6 = vld [vmem:[#allocation6 + $0x62] sm:$0x3]  ;;  %v3319_v26 = vld [vmem:[#allocation6 + $0x70] sm:$0x3]  ;;  %v3199_v57 = vsel %vm21687_vm9, %v3196_v56, %v3198_v49  ;;  %v3202_v9 = vshrl.u32 %v3196_v56, 16  ;;  %v3243_v10 = vsel %vm21687_vm9, %v3240_v1, %v3242_v63 }
 0xb69   : > { %3174 = vst [vmem:[#allocation6 + $0x52] sm:$0x3] %v3173_v4  ;;  %3186 = vst [vmem:[#allocation6 + $0x54] sm:$0x3] %v3185_v36  ;;  %v3221_v60 = vld [vmem:[#allocation6 + $0x5e] sm:$0x3]  ;;  %v3213_v8 = vsel %vm21687_vm9, %v3210_v51, %v3212_v52  ;;  %v3261_v11 = vrot.slane %v3254_v28, %v21781_v7  ;;  %v3275_v20 = vcombine.high %v3240_v1, %v3240_v1 }
 0xb6a   : > { %v3246_v35 = vshrl.u32 %v3240_v1, 16  ;;  %v3263_v15 = vld [vmem:[#allocation6 + $0x64] sm:$0x3]  ;;  %v3194_v62 = vsel %vm21687_vm9, %v3188_v5, %v3193_v27  ;;  %3200 = vst [vmem:[#allocation6 + $0x58] sm:$0x3] %v3199_v57  ;;  %v3216_v55 = vshrl.u32 %v3210_v51, 16  ;;  %v3208_v0 = vsel %vm21687_vm9, %v3202_v9, %v3207_v45 }
 0xb6b   : > { %3244 = vst [vmem:[#allocation6 + $0x60] sm:$0x3] %v3243_v10  ;;  %v3277_v14 = vld [vmem:[#allocation6 + $0x68] sm:$0x3]  ;;  %3195 = vst [vmem:[#allocation6 + $0x56] sm:$0x3] %v3194_v62  ;;  %v3320_v22 = vsel %vm21687_vm9, %v3317_v2, %v3319_v26  ;;  %v3264_v32 = vsel %vm21687_vm9, %v3261_v11, %v3263_v15  ;;  %v3289_v33 = vcombine.high %v3261_v11, %v3261_v11 }
 0xb6c   : > { %3214 = vst [vmem:[#allocation6 + $0x5c] sm:$0x3] %v3213_v8  ;;  %v3252_v17 = vsel %vm21687_vm9, %v3246_v35, %v3251_v6  ;;  %v3272_v18 = vld [vmem:[#allocation6 + $0x66] sm:$0x3]  ;;  %v3291_v3 = vld [vmem:[#allocation6 + $0x6c] sm:$0x3]  ;;  %v3222_v30 = vsel %vm21687_vm9, %v3216_v55, %v3221_v60  ;;  %v3278_v37 = vsel %vm21687_vm9, %v3275_v20, %v3277_v14  ;;  %v3331_v34 = vcombine.high %v21901_v54, %v21901_v54 }
 0xb6d   : > { %3209 = vst [vmem:[#allocation6 + $0x5a] sm:$0x3] %v3208_v0  ;;  %3253 = vst [vmem:[#allocation6 + $0x62] sm:$0x3] %v3252_v17  ;;  %v3267_v24 = vshrl.u32 %v3261_v11, 16  ;;  %v3281_v12 = vshrl.u32 %v3275_v20, 16  ;;  %v3292_v44 = vsel %vm21687_vm9, %v3289_v33, %v3291_v3  ;;  %v3352_v47 = vcombine.high %v3317_v2, %v3317_v2 }
 0xb6e   : > { %v3286_v16 = vld [vmem:[#allocation6 + $0x6a] sm:$0x3]  ;;  %3321 = vst [vmem:[#allocation6 + $0x70] sm:$0x3] %v3320_v22  ;;  %v3328_v31 = vld [vmem:[#allocation6 + $0x72] sm:$0x3]  ;;  %v3338_v25 = vrot.slane %v3331_v34, %v21781_v7  ;;  %v5514_v61 = vrot.slane %v5492_v58, %v21781_v7  ;;  %v5491_v43 = vrot.slane %v5477_v39, %v21781_v7 }
 0xb6f   : > { %3223 = vst [vmem:[#allocation6 + $0x5e] sm:$0x3] %v3222_v30  ;;  %3265 = vst [vmem:[#allocation6 + $0x64] sm:$0x3] %v3264_v32  ;;  %v3300_v38 = vld [vmem:[#allocation6 + $0x6e] sm:$0x3]  ;;  %v3273_v13 = vsel %vm21687_vm9, %v3267_v24, %v3272_v18  ;;  %v3287_v23 = vsel %vm21687_vm9, %v3281_v12, %v3286_v16 }
 0xb70   : > { %v3323_v40 = vshrl.u32 %v3317_v2, 16  ;;  %v3354_v41 = vld [vmem:[#allocation6 + $0x78] sm:$0x3]  ;;  %3279 = vst [vmem:[#allocation6 + $0x68] sm:$0x3] %v3278_v37  ;;  %v3295_v48 = vshrl.u32 %v3289_v33, 16  ;;  %v3366_v1 = vcombine.high %v3338_v25, %v3338_v25  ;;  %12565 = vmatprep.mubr.bf16.mxu1 %v5514_v61  ;;  %v5524_v28 = vcombine.high %v5514_v61, %v5514_v61 }
 0xb71   : > { %v3340_v50 = vld [vmem:[#allocation6 + $0x74] sm:$0x3]  ;;  %3274 = vst [vmem:[#allocation6 + $0x66] sm:$0x3] %v3273_v13  ;;  %3293 = vst [vmem:[#allocation6 + $0x6c] sm:$0x3] %v3292_v44  ;;  %v3355_v63 = vsel %vm21687_vm9, %v3352_v47, %v3354_v41  ;;  %12566 = vmatmul.mubr.bf16.vlgmr.msra.gmra.mrb[32].mxu1 %v21907_v59  ;;  %v5493_v29 = vcombine.high %v5491_v43, %v5491_v43  ;;  %v22000_v10 = vrot.slane %v5491_v43, %v21781_v7 }
 0xb72   : > { %v3329_v42 = vsel %vm21687_vm9, %v3323_v40, %v3328_v31  ;;  %v3363_v54 = vld [vmem:[#allocation6 + $0x7a] sm:$0x3]  ;;  %v19460_v53 = vld [vmem:[%s25855_s3 + $0x80] sm:$0xff]   ;;  %v21960_v19 = vld [vmem:[#allocation6 + $0x8] sm:$0xff]  ;;  %3288 = vst [vmem:[#allocation6 + $0x6a] sm:$0x3] %v3287_v23  ;;  %v3301_v46 = vsel %vm21687_vm9, %v3295_v48, %v3300_v38  ;;  %v3341_v45 = vsel %vm21687_vm9, %v3338_v25, %v3340_v50  ;;  %12605 = vmatprep.mubr.bf16.mxu1 %v5524_v28 }
 0xb73   : > { %3330 = vst [vmem:[#allocation6 + $0x72] sm:$0x3] %v3329_v42  ;;  %v3349_v49 = vld [vmem:[#allocation6 + $0x76] sm:$0x3]  ;;  %v3358_v27 = vshrl.u32 %v3352_v47, 16  ;;  %v19464_v58 = vld [vmem:[%s25855_s3 + $0xc8] sm:$0xff]   ;;  %v21980_v39 = vrot.slane %v21960_v19, %v21781_v7  ;;  %16667 = vmatpush3.bf16.msra.mxu1 %v19460_v53  ;;  %v21990_v26 = vrot.slane %v5493_v29, %v21781_v7  ;;  %v5526_v40 = vcombine.high %v21960_v19, %v21960_v19 }
 0xb74   : > { %v3368_v56 = vld [vmem:[#allocation6 + $0x7c] sm:$0x3]  ;;  %3302 = vst [vmem:[#allocation6 + $0x6e] sm:$0x3] %v3301_v46  ;;  %v3344_v52 = vshrl.u32 %v3338_v25, 16  ;;  %v3372_v51 = vshrl.u32 %v3366_v1, 16  ;;  %16668 = vmatprep.subr.bf16.mxu1 %v19464_v58  ;;  %v5522_v23 = vcombine.high %v21907_v59, %v21907_v59 }
 0xb75   : > { %3356 = vst [vmem:[#allocation6 + $0x78] sm:$0x3] %v3355_v63  ;;  %3342 = vst [vmem:[#allocation6 + $0x74] sm:$0x3] %v3341_v45  ;;  %v3364_v2 = vsel %vm21687_vm9, %v3358_v27, %v3363_v54  ;;  %v3377_v4 = vld [vmem:[#allocation6 + $0x7e] sm:$0x3]  ;;  %v3369_v5 = vsel %vm21687_vm9, %v3366_v1, %v3368_v56  ;;  %v5541_v9 = vcombine.high %v21980_v39, %v21980_v39  ;;  %12645 = vmatprep.mubr.bf16.mxu0 %v21990_v26 }
 0xb76   : > { %v3350_v36 = vsel %vm21687_vm9, %v3344_v52, %v3349_v49  ;;  %3365 = vst [vmem:[#allocation6 + $0x7a] sm:$0x3] %v3364_v2  ;;  %v19465_v6 = vld [vmem:[%s25855_s3 + $0x88] sm:$0xff]   ;;  %3370 = vst [vmem:[#allocation6 + $0x7c] sm:$0x3] %v3369_v5  ;;  %v19463_v57 = vld [vmem:[%s25855_s3 + $0x200] sm:$0xff]   ;;  %v3378_v60 = vsel %vm21687_vm9, %v3372_v51, %v3377_v4  ;;  %12646 = vmatmul.mubr.bf16.vlgmr.msra.gmra.mrb[16].mxu0 %v22000_v10  ;;  %v22089_v48 = vrot.slane %v5526_v40, %v21781_v7 }
 0xb77   : > { %3351 = vst [vmem:[#allocation6 + $0x76] sm:$0x3] %v3350_v36  ;;  %v19466_v35 = vld [vmem:[%s25855_s3 + $0x248] sm:$0xff]   ;;  %v19468_v15 = vld [vmem:[%s25855_s3 + $0xd0] sm:$0xff]   ;;  %3379 = vst [vmem:[#allocation6 + $0x7e] sm:$0x3] %v3378_v60  ;;  %v22010_v62 = vrot.slane %v5541_v9, %v21781_v7  ;;  %16669 = vmatpush3.bf16.msra.mxu1 %v19465_v6  ;;  %16733 = vmatpush3.bf16.msra.mxu0 %v19463_v57  ;;  %v5525_v25 = vcombine.high %v21990_v26, %v21990_v26 }
 0xb78   : > { %v19467_v8 = vld [vmem:[%s25855_s3 + $0x208] sm:$0xff]   ;;  %v19472_v55 = vld [vmem:[%s25855_s3 + $0xd8] sm:$0xff]   ;;  %16734 = vmatprep.subr.bf16.mxu0 %v19466_v35  ;;  %16670 = vmatprep.subr.bf16.mxu1 %v19468_v15  ;;  %v19470_v11 = vld [vmem:[%s25855_s3 + $0x250] sm:$0xff]   ;;  %v5542_v61 = vcombine.high %v22089_v48, %v22089_v48  ;;  %v22117_v19 = vrot.slane %v21980_v39, %v21781_v7 }
 0xb79   : > { %12725 = vmatprep.mubr.bf16.mxu0 %v22010_v62  ;;  %v19473_v14 = vld [vmem:[%s25855_s3 + $0x98] sm:$0xff]   ;;  %v19471_v0 = vld [vmem:[%s25855_s3 + $0x210] sm:$0xff]   ;;  %v19476_v17 = vld [vmem:[%s25855_s3 + $0xe0] sm:$0xff]  }
 0xb7a   : > { %v19474_v18 = vld [vmem:[%s25855_s3 + $0x258] sm:$0xff]   ;;  %v19477_v20 = vld [vmem:[%s25855_s3 + $0xa0] sm:$0xff]   ;;  %v19480_v22 = vld [vmem:[%s25855_s3 + $0xe8] sm:$0xff]   ;;  %v22126_v63 = vrot.slane %v5542_v61, %v21781_v7 }
 0xb7b   : > { %16671 = vmatpush3.bf16.msra.mxu1 %v19469_v21  ;;  %16735 = vmatpush3.bf16.msra.mxu0 %v19467_v8  ;;  %v19475_v3 = vld [vmem:[%s25855_s3 + $0x218] sm:$0xff]   ;;  %v19478_v30 = vld [vmem:[%s25855_s3 + $0x260] sm:$0xff]   ;;  %v19481_v32 = vld [vmem:[%s25855_s3 + $0xa8] sm:$0xff]  }
 0xb7c   : > { %16672 = vmatprep.subr.bf16.mxu1 %v19472_v55  ;;  %16736 = vmatprep.subr.bf16.mxu0 %v19470_v11  ;;  %v19479_v24 = vld [vmem:[%s25855_s3 + $0x220] sm:$0xff]   ;;  %v19484_v16 = vld [vmem:[%s25855_s3 + $0xf0] sm:$0xff]   ;;  %v19482_v33 = vld [vmem:[%s25855_s3 + $0x268] sm:$0xff]  }
 0xb7d   : > { %v19485_v31 = vld [vmem:[%s25855_s3 + $0xb0] sm:$0xff]   ;;  %v19483_v37 = vld [vmem:[%s25855_s3 + $0x228] sm:$0xff]   ;;  %v19488_v12 = vld [vmem:[%s25855_s3 + $0xf8] sm:$0xff]  }
 0xb7e   : > { %v19486_v38 = vld [vmem:[%s25855_s3 + $0x270] sm:$0xff]   ;;  %v19489_v34 = vld [vmem:[%s25855_s3 + $0xb8] sm:$0xff]   ;;  %v19492_v13 = vld [vmem:[%s25855_s3 + $0x1c0] sm:$0xff]  }
 0xb7f   : > { %16673 = vmatpush3.bf16.msra.mxu1 %v19473_v14  ;;  %16737 = vmatpush3.bf16.msra.mxu0 %v19471_v0  ;;  %v19487_v41 = vld [vmem:[%s25855_s3 + $0x230] sm:$0xff]   ;;  %v19490_v44 = vld [vmem:[%s25855_s3 + $0x278] sm:$0xff]   ;;  %v19493_v50 = vld [vmem:[%s25855_s3 + $0x180] sm:$0xff]  }
 0xb80   : > { %16674 = vmatprep.subr.bf16.mxu1 %v19476_v17  ;;  %16738 = vmatprep.subr.bf16.mxu0 %v19474_v18  ;;  %v19491_v47 = vld [vmem:[%s25855_s3 + $0x238] sm:$0xff]   ;;  %v19497_v42 = vld [vmem:[%s25855_s3 + $0x1c8] sm:$0xff]   ;;  %v19494_v54 = vld [vmem:[%s25855_s3 + $0x340] sm:$0xff]   ;;  %v5523_v17 = vcombine.high %v22000_v10, %v22000_v10 }
 0xb81   : > { %v19498_v59 = vld [vmem:[%s25855_s3 + $0x188] sm:$0xff]   ;;  %v19495_v53 = vld [vmem:[%s25855_s3 + $0x300] sm:$0xff]   ;;  %v19501_v49 = vld [vmem:[%s25855_s3 + $0x1d0] sm:$0xff]  }
 0xb82   : > { %v19499_v46 = vld [vmem:[%s25855_s3 + $0x348] sm:$0xff]   ;;  %v19502_v27 = vld [vmem:[%s25855_s3 + $0x190] sm:$0xff]   ;;  %v19505_v43 = vld [vmem:[%s25855_s3 + $0x1d8] sm:$0xff]  }
 0xb83   : > { %16675 = vmatpush3.bf16.msra.mxu1 %v19477_v20  ;;  %16739 = vmatpush3.bf16.msra.mxu0 %v19475_v3  ;;  %v19500_v56 = vld [vmem:[%s25855_s3 + $0x308] sm:$0xff]   ;;  %v19503_v58 = vld [vmem:[%s25855_s3 + $0x350] sm:$0xff]   ;;  %v19506_v45 = vld [vmem:[%s25855_s3 + $0x198] sm:$0xff]   ;;  %v5573_v20 = vcombine.high %v22010_v62, %v22010_v62  ;;  %v22234_v62 = vrot.slane %v22089_v48, %v21781_v7 }
 0xb84   : > { %16676 = vmatprep.subr.bf16.mxu1 %v19480_v22  ;;  %16740 = vmatprep.subr.bf16.mxu0 %v19478_v30  ;;  %v19504_v52 = vld [vmem:[%s25855_s3 + $0x310] sm:$0xff]   ;;  %v19509_v1 = vld [vmem:[%s25855_s3 + $0x1e0] sm:$0xff]   ;;  %v19507_v28 = vld [vmem:[%s25855_s3 + $0x358] sm:$0xff]  }
 0xb85   : > { %v19510_v2 = vld [vmem:[%s25855_s3 + $0x1a0] sm:$0xff]   ;;  %v19508_v4 = vld [vmem:[%s25855_s3 + $0x318] sm:$0xff]   ;;  %v19513_v29 = vld [vmem:[%s25855_s3 + $0x1e8] sm:$0xff]  }
 0xb86   : > { %v19511_v39 = vld [vmem:[%s25855_s3 + $0x360] sm:$0xff]   ;;  %v19514_v36 = vld [vmem:[%s25855_s3 + $0x1a8] sm:$0xff]   ;;  %v19517_v51 = vld [vmem:[%s25855_s3 + $0x1f0] sm:$0xff]  }
 0xb87   : > { %16677 = vmatpush3.bf16.msra.mxu1 %v19481_v32  ;;  %16741 = vmatpush3.bf16.msra.mxu0 %v19479_v24  ;;  %v19512_v5 = vld [vmem:[%s25855_s3 + $0x320] sm:$0xff]   ;;  %v19515_v6 = vld [vmem:[%s25855_s3 + $0x368] sm:$0xff]   ;;  %v19518_v26 = vld [vmem:[%s25855_s3 + $0x1b0] sm:$0xff]  }
 0xb88   : > { %16678 = vmatprep.subr.bf16.mxu1 %v19484_v16  ;;  %16742 = vmatprep.subr.bf16.mxu0 %v19482_v33  ;;  %v19516_v57 = vld [vmem:[%s25855_s3 + $0x328] sm:$0xff]   ;;  %v19521_v9 = vld [vmem:[%s25855_s3 + $0x1f8] sm:$0xff]   ;;  %v19519_v60 = vld [vmem:[%s25855_s3 + $0x370] sm:$0xff]  }
 0xb89   : > { %v19522_v35 = vld [vmem:[%s25855_s3 + $0x1b8] sm:$0xff]   ;;  %v22193_v15 = vld [vmem:[#allocation6 + $0x10] sm:$0xff]  ;;  %v19520_v21 = vld [vmem:[%s25855_s3 + $0x330] sm:$0xff]  }
 0xb8a   : > { %v19525_v8 = vld [vmem:[%s25855_s3 + $0x2c0] sm:$0xff]   ;;  %v19523_v55 = vld [vmem:[%s25855_s3 + $0x378] sm:$0xff]   ;;  %v22206_v11 = vrot.slane %v22193_v15, %v21781_v7  ;;  %v19529_v18 = vld [vmem:[%s25855_s3 + $0x2c8] sm:$0xff]  }
 0xb8b   : > { %16679 = vmatpush3.bf16.msra.mxu1 %v19485_v31  ;;  %16743 = vmatpush3.bf16.msra.mxu0 %v19483_v37  ;;  %v19526_v14 = vld [vmem:[%s25855_s3 + $0x280] sm:$0xff]   ;;  %v19524_v0 = vld [vmem:[%s25855_s3 + $0x338] sm:$0xff]   ;;  %v19530_v10 = vld [vmem:[%s25855_s3 + $0x288] sm:$0xff]  }
 0xb8c   : > { %16680 = vmatprep.subr.bf16.mxu1 %v19488_v12  ;;  %16744 = vmatprep.subr.bf16.mxu0 %v19486_v38  ;;  %v19527_v3 = vld [vmem:[%s25855_s3 + $0x440] sm:$0xff]   ;;  %v5590_v22 = vcombine.high %v22206_v11, %v22206_v11  ;;  %v19531_v32 = vld [vmem:[%s25855_s3 + $0x448] sm:$0xff]   ;;  %v19533_v24 = vld [vmem:[%s25855_s3 + $0x2d0] sm:$0xff]  }
 0xb8d   : > { %v19528_v30 = vld [vmem:[%s25855_s3 + $0x400] sm:$0xff]   ;;  %v19534_v33 = vld [vmem:[%s25855_s3 + $0x290] sm:$0xff]   ;;  %v19532_v31 = vld [vmem:[%s25855_s3 + $0x408] sm:$0xff]  }
 0xb8e   : > { %v22243_v16 = vrot.slane %v5590_v22, %v21781_v7  ;;  %v19537_v37 = vld [vmem:[%s25855_s3 + $0x2d8] sm:$0xff]   ;;  %v19535_v12 = vld [vmem:[%s25855_s3 + $0x450] sm:$0xff]   ;;  %v19545_v48 = vld [vmem:[%s25855_s3 + $0x2e8] sm:$0xff]  }
 0xb8f   : > { %16681 = vmatpush3.bf16.msra.mxu1 %v19489_v34  ;;  %16745 = vmatpush3.bf16.msra.mxu0 %v19487_v41  ;;  %v19538_v38 = vld [vmem:[%s25855_s3 + $0x298] sm:$0xff]   ;;  %v19536_v40 = vld [vmem:[%s25855_s3 + $0x410] sm:$0xff]   ;;  %v19541_v34 = vld [vmem:[%s25855_s3 + $0x2e0] sm:$0xff]  }
 0xb90   : > { %16710 = vmatprep.subr.bf16.mxu1 %v19492_v13  ;;  %16746 = vmatprep.subr.bf16.mxu0 %v19490_v44  ;;  %v19539_v41 = vld [vmem:[%s25855_s3 + $0x458] sm:$0xff]   ;;  %v19542_v13 = vld [vmem:[%s25855_s3 + $0x2a0] sm:$0xff]   ;;  %v19548_v61 = vld [vmem:[%s25855_s3 + $0x428] sm:$0xff]  }
 0xb91   : > { %v19540_v44 = vld [vmem:[%s25855_s3 + $0x418] sm:$0xff]   ;;  %v19581_v22 = vld [vmem:[%s25855_s3 + $0x528] sm:$0xff]  }
 0xb92   : > { %12606 = vmatmul.mubr.bf16.vlgmr.msra.gmra.mrb[36].mxu1 %v5522_v23  ;;  %v19544_v23 = vld [vmem:[%s25855_s3 + $0x420] sm:$0xff]  }
 0xb93   : > { %16711 = vmatpush3.bf16.msra.mxu1 %v19493_v50  ;;  %12685 = vmatprep.mubr.bf16.mxu1 %v5525_v25  ;;  %v19543_v50 = vld [vmem:[%s25855_s3 + $0x460] sm:$0xff]   ;;  %v19547_v25 = vld [vmem:[%s25855_s3 + $0x468] sm:$0xff]  }
 0xb94   : > { %16747 = vmatpush3.bf16.msra.mxu0 %v19491_v47  ;;  %16712 = vmatprep.subr.bf16.mxu1 %v19497_v42  ;;  %v19546_v47 = vld [vmem:[%s25855_s3 + $0x2a8] sm:$0xff]   ;;  %v19549_v42 = vld [vmem:[%s25855_s3 + $0x2f0] sm:$0xff]  }
 0xb95   : > { %16776 = vmatprep.subr.bf16.mxu0 %v19494_v54  ;;  %v19550_v54 = vld [vmem:[%s25855_s3 + $0x2b0] sm:$0xff]  }
 0xb97   : > { %12726 = vmatmul.mubr.bf16.vlgmr.msra.gmra.mrb[20].mxu0 %v22117_v19  ;;  %16713 = vmatpush3.bf16.msra.mxu1 %v19498_v59  ;;  %v19553_v59 = vld [vmem:[%s25855_s3 + $0x2f8] sm:$0xff]  }
 0xb98   : > { %16777 = vmatpush3.bf16.msra.mxu0 %v19495_v53  ;;  %12805 = vmatprep.mubr.bf16.mxu0 %v22126_v63  ;;  %v19551_v53 = vld [vmem:[%s25855_s3 + $0x470] sm:$0xff]  }
 0xb99   : > { %16778 = vmatprep.subr.bf16.mxu0 %v19499_v46  ;;  %16714 = vmatprep.subr.bf16.mxu1 %v19501_v49  ;;  %v5575_v46 = vcombine.high %v22193_v15, %v22193_v15  ;;  %v19554_v49 = vld [vmem:[%s25855_s3 + $0x2b8] sm:$0xff]   ;;  %v19574_v15 = vld [vmem:[%s25855_s3 + $0x3e0] sm:$0xff]  }
 0xb9b   : > { %16715 = vmatpush3.bf16.msra.mxu1 %v19502_v27  ;;  %v19552_v27 = vld [vmem:[%s25855_s3 + $0x430] sm:$0xff]  }
 0xb9c   : > { %16779 = vmatpush3.bf16.msra.mxu0 %v19500_v56  ;;  %16716 = vmatprep.subr.bf16.mxu1 %v19505_v43  ;;  %v19557_v56 = vld [vmem:[%s25855_s3 + $0x3c0] sm:$0xff]   ;;  %v19555_v43 = vld [vmem:[%s25855_s3 + $0x478] sm:$0xff]  }
 0xb9d   : > { %16780 = vmatprep.subr.bf16.mxu0 %v19503_v58  ;;  %v22322_v58 = vrot.slane %v5575_v46, %v21781_v7  ;;  %v19601_v46 = vld [vmem:[%s25855_s3 + $0x610] sm:$0xff]  }
 0xb9f   : > { %16717 = vmatpush3.bf16.msra.mxu1 %v19506_v45  ;;  %v19558_v45 = vld [vmem:[%s25855_s3 + $0x380] sm:$0xff]  }
 0xba0   : > { %16781 = vmatpush3.bf16.msra.mxu0 %v19504_v52  ;;  %16718 = vmatprep.subr.bf16.mxu1 %v19509_v1  ;;  %v19556_v52 = vld [vmem:[%s25855_s3 + $0x438] sm:$0xff]   ;;  %v5571_v1 = vcombine.high %v22117_v19, %v22117_v19  ;;  %v19563_v19 = vld [vmem:[%s25855_s3 + $0x388] sm:$0xff]  }
 0xba1   : > { %16782 = vmatprep.subr.bf16.mxu0 %v19507_v28  ;;  %v19562_v28 = vld [vmem:[%s25855_s3 + $0x3c8] sm:$0xff]  }
 0xba3   : > { %16719 = vmatpush3.bf16.msra.mxu1 %v19510_v2  ;;  %v5574_v2 = vcombine.high %v22126_v63, %v22126_v63  ;;  %v22350_v63 = vrot.slane %v22206_v11, %v21781_v7  ;;  %v19578_v11 = vld [vmem:[%s25855_s3 + $0x3e8] sm:$0xff]  }
 0xba4   : > { %16783 = vmatpush3.bf16.msra.mxu0 %v19508_v4  ;;  %16720 = vmatprep.subr.bf16.mxu1 %v19513_v29  ;;  %v19559_v4 = vld [vmem:[%s25855_s3 + $0x540] sm:$0xff]   ;;  %v5591_v29 = vcombine.high %v22322_v58, %v22322_v58 }
 0xba5   : > { %16784 = vmatprep.subr.bf16.mxu0 %v19511_v39  ;;  %v19560_v39 = vld [vmem:[%s25855_s3 + $0x500] sm:$0xff]  }
 0xba7   : > { %16721 = vmatpush3.bf16.msra.mxu1 %v19514_v36  ;;  %v19564_v36 = vld [vmem:[%s25855_s3 + $0x548] sm:$0xff]  }
 0xba8   : > { %16785 = vmatpush3.bf16.msra.mxu0 %v19512_v5  ;;  %16722 = vmatprep.subr.bf16.mxu1 %v19517_v51  ;;  %v19566_v5 = vld [vmem:[%s25855_s3 + $0x3d0] sm:$0xff]   ;;  %v22359_v51 = vrot.slane %v5591_v29, %v21781_v7  ;;  %v19613_v29 = vld [vmem:[%s25855_s3 + $0x628] sm:$0xff]  }
 0xba9   : > { %16786 = vmatprep.subr.bf16.mxu0 %v19515_v6  ;;  %v19567_v6 = vld [vmem:[%s25855_s3 + $0x390] sm:$0xff]  }
 0xbab   : > { %16723 = vmatpush3.bf16.msra.mxu1 %v19518_v26  ;;  %v19565_v26 = vld [vmem:[%s25855_s3 + $0x508] sm:$0xff]  }
 0xbac   : > { %16787 = vmatpush3.bf16.msra.mxu0 %v19516_v57  ;;  %16724 = vmatprep.subr.bf16.mxu1 %v19521_v9  ;;  %v19570_v57 = vld [vmem:[%s25855_s3 + $0x3d8] sm:$0xff]   ;;  %v19568_v9 = vld [vmem:[%s25855_s3 + $0x550] sm:$0xff]  }
 0xbad   : > { %16788 = vmatprep.subr.bf16.mxu0 %v19519_v60  ;;  %v19571_v60 = vld [vmem:[%s25855_s3 + $0x398] sm:$0xff]  }
 0xbaf   : > { %16725 = vmatpush3.bf16.msra.mxu1 %v19522_v35  ;;  %v19569_v35 = vld [vmem:[%s25855_s3 + $0x510] sm:$0xff]  }
 0xbb0   : > { %16789 = vmatpush3.bf16.msra.mxu0 %v19520_v21  ;;  %16754 = vmatprep.subr.bf16.mxu1 %v19525_v8  ;;  %v19572_v21 = vld [vmem:[%s25855_s3 + $0x558] sm:$0xff]   ;;  %v19575_v8 = vld [vmem:[%s25855_s3 + $0x3a0] sm:$0xff]  }
 0xbb1   : > { %16790 = vmatprep.subr.bf16.mxu0 %v19523_v55  ;;  %v19573_v55 = vld [vmem:[%s25855_s3 + $0x518] sm:$0xff]  }
 0xbb2   : > { %12686 = vmatmul.mubr.bf16.vlgmr.msra.gmra.mrb[40].mxu1 %v5523_v17  ;;  %v19577_v17 = vld [vmem:[%s25855_s3 + $0x520] sm:$0xff]  }
 0xbb3   : > { %16755 = vmatpush3.bf16.msra.mxu1 %v19526_v14  ;;  %12765 = vmatprep.mubr.bf16.mxu1 %v5573_v20  ;;  %v19576_v14 = vld [vmem:[%s25855_s3 + $0x560] sm:$0xff]   ;;  %v19580_v20 = vld [vmem:[%s25855_s3 + $0x568] sm:$0xff]  }
 0xbb4   : > { %16791 = vmatpush3.bf16.msra.mxu0 %v19524_v0  ;;  %16756 = vmatprep.subr.bf16.mxu1 %v19529_v18  ;;  %v19579_v0 = vld [vmem:[%s25855_s3 + $0x3a8] sm:$0xff]   ;;  %v19582_v18 = vld [vmem:[%s25855_s3 + $0x3f0] sm:$0xff]  }
 0xbb5   : > { %16820 = vmatprep.subr.bf16.mxu0 %v19527_v3  ;;  %v19583_v3 = vld [vmem:[%s25855_s3 + $0x3b0] sm:$0xff]  }
 0xbb7   : > { %12806 = vmatmul.mubr.bf16.vlgmr.msra.gmra.mrb[24].mxu0 %v22234_v62  ;;  %16757 = vmatpush3.bf16.msra.mxu1 %v19530_v10  ;;  %v19586_v10 = vld [vmem:[%s25855_s3 + $0x3f8] sm:$0xff]  }
 0xbb8   : > { %16821 = vmatpush3.bf16.msra.mxu0 %v19528_v30  ;;  %12885 = vmatprep.mubr.bf16.mxu0 %v22243_v16  ;;  %v19584_v30 = vld [vmem:[%s25855_s3 + $0x570] sm:$0xff]  }
 0xbb9   : > { %16822 = vmatprep.subr.bf16.mxu0 %v19531_v32  ;;  %16758 = vmatprep.subr.bf16.mxu1 %v19533_v24  ;;  %v19587_v32 = vld [vmem:[%s25855_s3 + $0x3b8] sm:$0xff]   ;;  %v22426_v24 = vld [vmem:[#allocation6 + $0x18] sm:$0xff] }
 0xbbb   : > { %16759 = vmatpush3.bf16.msra.mxu1 %v19534_v33  ;;  %v19585_v33 = vld [vmem:[%s25855_s3 + $0x530] sm:$0xff]  }
 0xbbc   : > { %16823 = vmatpush3.bf16.msra.mxu0 %v19532_v31  ;;  %16760 = vmatprep.subr.bf16.mxu1 %v19537_v37  ;;  %v19590_v31 = vld [vmem:[%s25855_s3 + $0x4c0] sm:$0xff]   ;;  %v19588_v37 = vld [vmem:[%s25855_s3 + $0x578] sm:$0xff]  }
 0xbbd   : > { %16824 = vmatprep.subr.bf16.mxu0 %v19535_v12  ;;  %v22439_v12 = vrot.slane %v22426_v24, %v21781_v7 }
 0xbbf   : > { %16761 = vmatpush3.bf16.msra.mxu1 %v19538_v38  ;;  %v19591_v38 = vld [vmem:[%s25855_s3 + $0x480] sm:$0xff]  }
 0xbc0   : > { %16825 = vmatpush3.bf16.msra.mxu0 %v19536_v40  ;;  %16762 = vmatprep.subr.bf16.mxu1 %v19541_v34  ;;  %v19589_v40 = vld [vmem:[%s25855_s3 + $0x538] sm:$0xff]   ;;  %v5572_v34 = vcombine.high %v22234_v62, %v22234_v62  ;;  %v19595_v62 = vld [vmem:[%s25855_s3 + $0x488] sm:$0xff]  }
 0xbc1   : > { %16826 = vmatprep.subr.bf16.mxu0 %v19539_v41  ;;  %v19594_v41 = vld [vmem:[%s25855_s3 + $0x4c8] sm:$0xff]  }
 0xbc3   : > { %16763 = vmatpush3.bf16.msra.mxu1 %v19542_v13  ;;  %v5622_v13 = vcombine.high %v22243_v16, %v22243_v16  ;;  %v22467_v16 = vrot.slane %v22322_v58, %v21781_v7  ;;  %v19610_v58 = vld [vmem:[%s25855_s3 + $0x4e8] sm:$0xff]  }
 0xbc4   : > { %16827 = vmatpush3.bf16.msra.mxu0 %v19540_v44  ;;  %16764 = vmatprep.subr.bf16.mxu1 %v19545_v48  ;;  %v19592_v44 = vld [vmem:[%s25855_s3 + $0x640] sm:$0xff]   ;;  %v5639_v48 = vcombine.high %v22439_v12, %v22439_v12 }
 0xbc5   : > { %16828 = vmatprep.subr.bf16.mxu0 %v19543_v50  ;;  %v19593_v50 = vld [vmem:[%s25855_s3 + $0x600] sm:$0xff]  }
 0xbc7   : > { %16765 = vmatpush3.bf16.msra.mxu1 %v19546_v47  ;;  %v19596_v47 = vld [vmem:[%s25855_s3 + $0x648] sm:$0xff]  }
 0xbc8   : > { %16829 = vmatpush3.bf16.msra.mxu0 %v19544_v23  ;;  %16766 = vmatprep.subr.bf16.mxu1 %v19549_v42  ;;  %v19598_v23 = vld [vmem:[%s25855_s3 + $0x4d0] sm:$0xff]   ;;  %v22476_v42 = vrot.slane %v5639_v48, %v21781_v7  ;;  %v19646_v48 = vld [vmem:[%s25855_s3 + $0x728] sm:$0xff]  }
 0xbc9   : > { %16830 = vmatprep.subr.bf16.mxu0 %v19547_v25  ;;  %v19599_v25 = vld [vmem:[%s25855_s3 + $0x490] sm:$0xff]  }
 0xbcb   : > { %16767 = vmatpush3.bf16.msra.mxu1 %v19550_v54  ;;  %v19597_v54 = vld [vmem:[%s25855_s3 + $0x608] sm:$0xff]  }
 0xbcc   : > { %16831 = vmatpush3.bf16.msra.mxu0 %v19548_v61  ;;  %16768 = vmatprep.subr.bf16.mxu1 %v19553_v59  ;;  %v19602_v61 = vld [vmem:[%s25855_s3 + $0x4d8] sm:$0xff]   ;;  %v19600_v59 = vld [vmem:[%s25855_s3 + $0x650] sm:$0xff]  }
 0xbcd   : > { %16832 = vmatprep.subr.bf16.mxu0 %v19551_v53  ;;  %v19603_v53 = vld [vmem:[%s25855_s3 + $0x498] sm:$0xff]  }
 0xbcf   : > { %16769 = vmatpush3.bf16.msra.mxu1 %v19554_v49  ;;  %v19606_v49 = vld [vmem:[%s25855_s3 + $0x4e0] sm:$0xff]  }
 0xbd0   : > { %16833 = vmatpush3.bf16.msra.mxu0 %v19552_v27  ;;  %16798 = vmatprep.subr.bf16.mxu1 %v19557_v56  ;;  %v19604_v27 = vld [vmem:[%s25855_s3 + $0x658] sm:$0xff]   ;;  %v19607_v56 = vld [vmem:[%s25855_s3 + $0x4a0] sm:$0xff]  }
 0xbd1   : > { %16834 = vmatprep.subr.bf16.mxu0 %v19555_v43  ;;  %v19605_v43 = vld [vmem:[%s25855_s3 + $0x618] sm:$0xff]  }
 0xbd2   : > { %12766 = vmatmul.mubr.bf16.vlgmr.msra.gmra.mrb[44].mxu1 %v5571_v1  ;;  %v19609_v1 = vld [vmem:[%s25855_s3 + $0x620] sm:$0xff]  }
 0xbd3   : > { %16799 = vmatpush3.bf16.msra.mxu1 %v19558_v45  ;;  %12845 = vmatprep.mubr.bf16.mxu1 %v5574_v2  ;;  %v19608_v45 = vld [vmem:[%s25855_s3 + $0x660] sm:$0xff]   ;;  %v19612_v2 = vld [vmem:[%s25855_s3 + $0x668] sm:$0xff]  }
 0xbd4   : > { %16835 = vmatpush3.bf16.msra.mxu0 %v19556_v52  ;;  %16800 = vmatprep.subr.bf16.mxu1 %v19562_v28  ;;  %v19611_v52 = vld [vmem:[%s25855_s3 + $0x4a8] sm:$0xff]   ;;  %v19614_v28 = vld [vmem:[%s25855_s3 + $0x4f0] sm:$0xff]  }
 0xbd5   : > { %16864 = vmatprep.subr.bf16.mxu0 %v19559_v4  ;;  %v19615_v4 = vld [vmem:[%s25855_s3 + $0x4b0] sm:$0xff]  }
 0xbd7   : > { %12886 = vmatmul.mubr.bf16.vlgmr.msra.gmra.mrb[28].mxu0 %v22350_v63  ;;  %16801 = vmatpush3.bf16.msra.mxu1 %v19563_v19  ;;  %v19618_v19 = vld [vmem:[%s25855_s3 + $0x4f8] sm:$0xff]  }
 0xbd8   : > { %16865 = vmatpush3.bf16.msra.mxu0 %v19560_v39  ;;  %12965 = vmatprep.mubr.bf16.mxu0 %v22359_v51  ;;  %v19616_v39 = vld [vmem:[%s25855_s3 + $0x670] sm:$0xff]  }
 0xbd9   : > { %16866 = vmatprep.subr.bf16.mxu0 %v19564_v36  ;;  %16802 = vmatprep.subr.bf16.mxu1 %v19566_v5  ;;  %v5624_v36 = vcombine.high %v22426_v24, %v22426_v24  ;;  %v19619_v5 = vld [vmem:[%s25855_s3 + $0x4b8] sm:$0xff]   ;;  %v19639_v24 = vld [vmem:[%s25855_s3 + $0x5e0] sm:$0xff]  }
 0xbdb   : > { %16803 = vmatpush3.bf16.msra.mxu1 %v19567_v6  ;;  %v19617_v6 = vld [vmem:[%s25855_s3 + $0x630] sm:$0xff]  }
 0xbdc   : > { %16867 = vmatpush3.bf16.msra.mxu0 %v19565_v26  ;;  %16804 = vmatprep.subr.bf16.mxu1 %v19570_v57  ;;  %v19622_v26 = vld [vmem:[%s25855_s3 + $0x5c0] sm:$0xff]   ;;  %v19620_v57 = vld [vmem:[%s25855_s3 + $0x678] sm:$0xff]  }
 0xbdd   : > { %16868 = vmatprep.subr.bf16.mxu0 %v19568_v9  ;;  %v22555_v9 = vrot.slane %v5624_v36, %v21781_v7  ;;  %v19666_v36 = vld [vmem:[%s25855_s3 + $0x810] sm:$0xff]  }
 0xbdf   : > { %16805 = vmatpush3.bf16.msra.mxu1 %v19571_v60  ;;  %v19623_v60 = vld [vmem:[%s25855_s3 + $0x580] sm:$0xff]  }
 0xbe0   : > { %16869 = vmatpush3.bf16.msra.mxu0 %v19569_v35  ;;  %16806 = vmatprep.subr.bf16.mxu1 %v19574_v15  ;;  %v19621_v35 = vld [vmem:[%s25855_s3 + $0x638] sm:$0xff]   ;;  %v5620_v15 = vcombine.high %v22350_v63, %v22350_v63  ;;  %v19628_v63 = vld [vmem:[%s25855_s3 + $0x588] sm:$0xff]  }
 0xbe1   : > { %16870 = vmatprep.subr.bf16.mxu0 %v19572_v21  ;;  %v19627_v21 = vld [vmem:[%s25855_s3 + $0x5c8] sm:$0xff]  }
 0xbe3   : > { %16807 = vmatpush3.bf16.msra.mxu1 %v19575_v8  ;;  %v5623_v8 = vcombine.high %v22359_v51, %v22359_v51  ;;  %v22583_v51 = vrot.slane %v22439_v12, %v21781_v7  ;;  %v19643_v12 = vld [vmem:[%s25855_s3 + $0x5e8] sm:$0xff]  }
 0xbe4   : > { %16871 = vmatpush3.bf16.msra.mxu0 %v19573_v55  ;;  %16808 = vmatprep.subr.bf16.mxu1 %v19578_v11  ;;  %v19624_v55 = vld [vmem:[%s25855_s3 + $0x740] sm:$0xff]   ;;  %v5640_v11 = vcombine.high %v22555_v9, %v22555_v9 }
 0xbe5   : > { %16872 = vmatprep.subr.bf16.mxu0 %v19576_v14  ;;  %v19625_v14 = vld [vmem:[%s25855_s3 + $0x700] sm:$0xff]  }
 0xbe7   : > { %16809 = vmatpush3.bf16.msra.mxu1 %v19579_v0  ;;  %v19629_v0 = vld [vmem:[%s25855_s3 + $0x748] sm:$0xff]  }
 0xbe8   : > { %16873 = vmatpush3.bf16.msra.mxu0 %v19577_v17  ;;  %16810 = vmatprep.subr.bf16.mxu1 %v19582_v18  ;;  %v19631_v17 = vld [vmem:[%s25855_s3 + $0x5d0] sm:$0xff]   ;;  %v22592_v18 = vrot.slane %v5640_v11, %v21781_v7 }
 0xbe9   : > { %16874 = vmatprep.subr.bf16.mxu0 %v19580_v20  ;;  %v19632_v20 = vld [vmem:[%s25855_s3 + $0x590] sm:$0xff]  }
 0xbeb   : > { %16811 = vmatpush3.bf16.msra.mxu1 %v19583_v3  ;;  %v19630_v3 = vld [vmem:[%s25855_s3 + $0x708] sm:$0xff]  }
 0xbec   : > { %16875 = vmatpush3.bf16.msra.mxu0 %v19581_v22  ;;  %16812 = vmatprep.subr.bf16.mxu1 %v19586_v10  ;;  %v19635_v22 = vld [vmem:[%s25855_s3 + $0x5d8] sm:$0xff]   ;;  %v19633_v10 = vld [vmem:[%s25855_s3 + $0x750] sm:$0xff]  }
 0xbed   : > { %16876 = vmatprep.subr.bf16.mxu0 %v19584_v30  ;;  %v19636_v30 = vld [vmem:[%s25855_s3 + $0x598] sm:$0xff]  }
 0xbef   : > { %16813 = vmatpush3.bf16.msra.mxu1 %v19587_v32  ;;  %v19634_v32 = vld [vmem:[%s25855_s3 + $0x710] sm:$0xff]  }
 0xbf0   : > { %16877 = vmatpush3.bf16.msra.mxu0 %v19585_v33  ;;  %16842 = vmatprep.subr.bf16.mxu1 %v19590_v31  ;;  %v19637_v33 = vld [vmem:[%s25855_s3 + $0x758] sm:$0xff]   ;;  %v19640_v31 = vld [vmem:[%s25855_s3 + $0x5a0] sm:$0xff]  }
 0xbf1   : > { %16878 = vmatprep.subr.bf16.mxu0 %v19588_v37  ;;  %v19638_v37 = vld [vmem:[%s25855_s3 + $0x718] sm:$0xff]  }
 0xbf2   : > { %12846 = vmatmul.mubr.bf16.vlgmr.msra.gmra.mrb[48].mxu1 %v5572_v34  ;;  %v19642_v34 = vld [vmem:[%s25855_s3 + $0x720] sm:$0xff]  }
 0xbf3   : > { %16843 = vmatpush3.bf16.msra.mxu1 %v19591_v38  ;;  %12925 = vmatprep.mubr.bf16.mxu1 %v5622_v13  ;;  %v19641_v38 = vld [vmem:[%s25855_s3 + $0x760] sm:$0xff]   ;;  %v19645_v13 = vld [vmem:[%s25855_s3 + $0x768] sm:$0xff]  }
 0xbf4   : > { %16879 = vmatpush3.bf16.msra.mxu0 %v19589_v40  ;;  %16844 = vmatprep.subr.bf16.mxu1 %v19594_v41  ;;  %v19644_v40 = vld [vmem:[%s25855_s3 + $0x5a8] sm:$0xff]   ;;  %v19647_v41 = vld [vmem:[%s25855_s3 + $0x5f0] sm:$0xff]  }
 0xbf5   : > { %16908 = vmatprep.subr.bf16.mxu0 %v19592_v44  ;;  %v19648_v44 = vld [vmem:[%s25855_s3 + $0x5b0] sm:$0xff]  }
 0xbf7   : > { %12966 = vmatmul.mubr.bf16.vlgmr.msra.gmra.mrb[32].mxu0 %v22467_v16  ;;  %16845 = vmatpush3.bf16.msra.mxu1 %v19595_v62  ;;  %v19651_v62 = vld [vmem:[%s25855_s3 + $0x5f8] sm:$0xff]  }
 0xbf8   : > { %16909 = vmatpush3.bf16.msra.mxu0 %v19593_v50  ;;  %13045 = vmatprep.mubr.bf16.mxu0 %v22476_v42  ;;  %v19649_v50 = vld [vmem:[%s25855_s3 + $0x770] sm:$0xff]  }
 0xbf9   : > { %16910 = vmatprep.subr.bf16.mxu0 %v19596_v47  ;;  %16846 = vmatprep.subr.bf16.mxu1 %v19598_v23  ;;  %v19652_v47 = vld [vmem:[%s25855_s3 + $0x5b8] sm:$0xff]   ;;  %v22659_v23 = vld [vmem:[#allocation6 + $0x20] sm:$0xff] }
 0xbfb   : > { %16847 = vmatpush3.bf16.msra.mxu1 %v19599_v25  ;;  %v19650_v25 = vld [vmem:[%s25855_s3 + $0x730] sm:$0xff]  }
 0xbfc   : > { %16911 = vmatpush3.bf16.msra.mxu0 %v19597_v54  ;;  %16848 = vmatprep.subr.bf16.mxu1 %v19602_v61  ;;  %v19655_v54 = vld [vmem:[%s25855_s3 + $0x6c0] sm:$0xff]   ;;  %v19653_v61 = vld [vmem:[%s25855_s3 + $0x778] sm:$0xff]  }
 0xbfd   : > { %16912 = vmatprep.subr.bf16.mxu0 %v19600_v59  ;;  %v22672_v59 = vrot.slane %v22659_v23, %v21781_v7 }
 0xbff   : > { %16849 = vmatpush3.bf16.msra.mxu1 %v19603_v53  ;;  %v19656_v53 = vld [vmem:[%s25855_s3 + $0x680] sm:$0xff]  }
 0xc00   : > { %16913 = vmatpush3.bf16.msra.mxu0 %v19601_v46  ;;  %16850 = vmatprep.subr.bf16.mxu1 %v19606_v49  ;;  %v19654_v46 = vld [vmem:[%s25855_s3 + $0x738] sm:$0xff]   ;;  %v5621_v49 = vcombine.high %v22467_v16, %v22467_v16  ;;  %v19660_v16 = vld [vmem:[%s25855_s3 + $0x688] sm:$0xff]  }
 0xc01   : > { %16914 = vmatprep.subr.bf16.mxu0 %v19604_v27  ;;  %v19659_v27 = vld [vmem:[%s25855_s3 + $0x6c8] sm:$0xff]  }
 0xc03   : > { %16851 = vmatpush3.bf16.msra.mxu1 %v19607_v56  ;;  %v5671_v56 = vcombine.high %v22476_v42, %v22476_v42  ;;  %v22700_v42 = vrot.slane %v22555_v9, %v21781_v7  ;;  %v19675_v9 = vld [vmem:[%s25855_s3 + $0x6e8] sm:$0xff]  }
 0xc04   : > { %16915 = vmatpush3.bf16.msra.mxu0 %v19605_v43  ;;  %16852 = vmatprep.subr.bf16.mxu1 %v19610_v58  ;;  %v19657_v43 = vld [vmem:[%s25855_s3 + $0x840] sm:$0xff]   ;;  %v5688_v58 = vcombine.high %v22672_v59, %v22672_v59 }
 0xc05   : > { %16916 = vmatprep.subr.bf16.mxu0 %v19608_v45  ;;  %v19658_v45 = vld [vmem:[%s25855_s3 + $0x800] sm:$0xff]  }
 0xc07   : > { %16853 = vmatpush3.bf16.msra.mxu1 %v19611_v52  ;;  %v19661_v52 = vld [vmem:[%s25855_s3 + $0x848] sm:$0xff]  }
 0xc08   : > { %16917 = vmatpush3.bf16.msra.mxu0 %v19609_v1  ;;  %16854 = vmatprep.subr.bf16.mxu1 %v19614_v28  ;;  %v19663_v1 = vld [vmem:[%s25855_s3 + $0x6d0] sm:$0xff]   ;;  %v22709_v28 = vrot.slane %v5688_v58, %v21781_v7  ;;  %v19702_v58 = vld [vmem:[%s25855_s3 + $0x958] sm:$0xff]  }
 0xc09   : > { %16918 = vmatprep.subr.bf16.mxu0 %v19612_v2  ;;  %v19664_v2 = vld [vmem:[%s25855_s3 + $0x690] sm:$0xff]  }
 0xc0b   : > { %16855 = vmatpush3.bf16.msra.mxu1 %v19615_v4  ;;  %v19662_v4 = vld [vmem:[%s25855_s3 + $0x808] sm:$0xff]  }
 0xc0c   : > { %16919 = vmatpush3.bf16.msra.mxu0 %v19613_v29  ;;  %16856 = vmatprep.subr.bf16.mxu1 %v19618_v19  ;;  %v19667_v29 = vld [vmem:[%s25855_s3 + $0x6d8] sm:$0xff]   ;;  %v19665_v19 = vld [vmem:[%s25855_s3 + $0x850] sm:$0xff]  }
 0xc0d   : > { %16920 = vmatprep.subr.bf16.mxu0 %v19616_v39  ;;  %v19668_v39 = vld [vmem:[%s25855_s3 + $0x698] sm:$0xff]  }
 0xc0f   : > { %16857 = vmatpush3.bf16.msra.mxu1 %v19619_v5  ;;  %v19671_v5 = vld [vmem:[%s25855_s3 + $0x6e0] sm:$0xff]  }
 0xc10   : > { %16921 = vmatpush3.bf16.msra.mxu0 %v19617_v6  ;;  %16886 = vmatprep.subr.bf16.mxu1 %v19622_v26  ;;  %v19669_v6 = vld [vmem:[%s25855_s3 + $0x858] sm:$0xff]   ;;  %v19672_v26 = vld [vmem:[%s25855_s3 + $0x6a0] sm:$0xff]  }
 0xc11   : > { %16922 = vmatprep.subr.bf16.mxu0 %v19620_v57  ;;  %v19670_v57 = vld [vmem:[%s25855_s3 + $0x818] sm:$0xff]  }
 0xc12   : > { %12926 = vmatmul.mubr.bf16.vlgmr.msra.gmra.mrb[52].mxu1 %v5620_v15  ;;  %v19674_v15 = vld [vmem:[%s25855_s3 + $0x820] sm:$0xff]  }
 0xc13   : > { %16887 = vmatpush3.bf16.msra.mxu1 %v19623_v60  ;;  %13005 = vmatprep.mubr.bf16.mxu1 %v5623_v8  ;;  %v19673_v60 = vld [vmem:[%s25855_s3 + $0x860] sm:$0xff]  }
 0xc14   : > { %16923 = vmatpush3.bf16.msra.mxu0 %v19621_v35  ;;  %16888 = vmatprep.subr.bf16.mxu1 %v19627_v21  ;;  %v19676_v35 = vld [vmem:[%s25855_s3 + $0x6a8] sm:$0xff]   ;;  %v19679_v21 = vld [vmem:[%s25855_s3 + $0x6f0] sm:$0xff]  }
 0xc15   : > { %16952 = vmatprep.subr.bf16.mxu0 %v19624_v55  ;;  %v19677_v55 = vld [vmem:[%s25855_s3 + $0x868] sm:$0xff]  }
 0xc17   : > { %13046 = vmatmul.mubr.bf16.vlgmr.msra.gmra.mrb[36].mxu0 %v22583_v51  ;;  %16889 = vmatpush3.bf16.msra.mxu1 %v19628_v63 }
 0xc18   : > { %16953 = vmatpush3.bf16.msra.mxu0 %v19625_v14  ;;  %13125 = vmatprep.mubr.bf16.mxu0 %v22592_v18 }
 0xc19   : > { %16954 = vmatprep.subr.bf16.mxu0 %v19629_v0  ;;  %16890 = vmatprep.subr.bf16.mxu1 %v19631_v17  ;;  %v19680_v0 = vld [vmem:[%s25855_s3 + $0x6b0] sm:$0xff]  }
 0xc1b   : > { %16891 = vmatpush3.bf16.msra.mxu1 %v19632_v20  ;;  %v19678_v20 = vld [vmem:[%s25855_s3 + $0x828] sm:$0xff]  }
 0xc1c   : > { %16955 = vmatpush3.bf16.msra.mxu0 %v19630_v3  ;;  %16892 = vmatprep.subr.bf16.mxu1 %v19635_v22  ;;  %v19683_v3 = vld [vmem:[%s25855_s3 + $0x6f8] sm:$0xff]   ;;  %v19681_v22 = vld [vmem:[%s25855_s3 + $0x870] sm:$0xff]  }
 0xc1d   : > { %16956 = vmatprep.subr.bf16.mxu0 %v19633_v10 }
 0xc1f   : > { %16893 = vmatpush3.bf16.msra.mxu1 %v19636_v30  ;;  %v5673_v30 = vcombine.high %v22659_v23, %v22659_v23  ;;  %v19690_v23 = vld [vmem:[%s25855_s3 + $0x900] sm:$0xff]  }
 0xc20   : > { %16957 = vmatpush3.bf16.msra.mxu0 %v19634_v32  ;;  %16894 = vmatprep.subr.bf16.mxu1 %v19639_v24  ;;  %v19684_v24 = vld [vmem:[%s25855_s3 + $0x6b8] sm:$0xff]  }
 0xc21   : > { %16958 = vmatprep.subr.bf16.mxu0 %v19637_v33 }
 0xc23   : > { %16895 = vmatpush3.bf16.msra.mxu1 %v19640_v31 }
 0xc24   : > { %16959 = vmatpush3.bf16.msra.mxu0 %v19638_v37  ;;  %16896 = vmatprep.subr.bf16.mxu1 %v19643_v12  ;;  %v19682_v37 = vld [vmem:[%s25855_s3 + $0x830] sm:$0xff]   ;;  %v19687_v12 = vld [vmem:[%s25855_s3 + $0x7c0] sm:$0xff]  }
 0xc25   : > { %16960 = vmatprep.subr.bf16.mxu0 %v19641_v38 }
 0xc27   : > { %16897 = vmatpush3.bf16.msra.mxu1 %v19644_v40  ;;  %v19685_v40 = vld [vmem:[%s25855_s3 + $0x878] sm:$0xff]  }
 0xc28   : > { %16961 = vmatpush3.bf16.msra.mxu0 %v19642_v34  ;;  %16898 = vmatprep.subr.bf16.mxu1 %v19647_v41  ;;  %v22792_v34 = vrot.slane %v5673_v30, %v21781_v7  ;;  %v19688_v41 = vld [vmem:[%s25855_s3 + $0x780] sm:$0xff]   ;;  %v19718_v30 = vld [vmem:[%s25855_s3 + $0x978] sm:$0xff]  }
 0xc29   : > { %16962 = vmatprep.subr.bf16.mxu0 %v19645_v13  ;;  %v19686_v13 = vld [vmem:[%s25855_s3 + $0x838] sm:$0xff]  }
 0xc2b   : > { %16899 = vmatpush3.bf16.msra.mxu1 %v19648_v44  ;;  %v5669_v44 = vcombine.high %v22583_v51, %v22583_v51  ;;  %v19693_v51 = vld [vmem:[%s25855_s3 + $0x788] sm:$0xff]  }
 0xc2c   : > { %16963 = vmatpush3.bf16.msra.mxu0 %v19646_v48  ;;  %16900 = vmatprep.subr.bf16.mxu1 %v19651_v62  ;;  %v19692_v48 = vld [vmem:[%s25855_s3 + $0x7c8] sm:$0xff]   ;;  %v5672_v62 = vcombine.high %v22592_v18, %v22592_v18  ;;  %v22820_v18 = vrot.slane %v22672_v59, %v21781_v7  ;;  %v19697_v59 = vld [vmem:[%s25855_s3 + $0x790] sm:$0xff]  }
 0xc2d   : > { %16964 = vmatprep.subr.bf16.mxu0 %v19649_v50  ;;  %v19689_v50 = vld [vmem:[%s25855_s3 + $0x940] sm:$0xff]  }
 0xc2f   : > { %16901 = vmatpush3.bf16.msra.mxu1 %v19652_v47  ;;  %v5689_v47 = vcombine.high %v22792_v34, %v22792_v34 }
 0xc30   : > { %16965 = vmatpush3.bf16.msra.mxu0 %v19650_v25  ;;  %16930 = vmatprep.subr.bf16.mxu1 %v19655_v54  ;;  %v19694_v25 = vld [vmem:[%s25855_s3 + $0x948] sm:$0xff]   ;;  %v19696_v54 = vld [vmem:[%s25855_s3 + $0x7d0] sm:$0xff]  }
 0xc31   : > { %16966 = vmatprep.subr.bf16.mxu0 %v19653_v61  ;;  %v22829_v61 = vrot.slane %v5689_v47, %v21781_v7  ;;  %v19730_v47 = vld [vmem:[%s25855_s3 + $0xa50] sm:$0xff]  }
 0xc32   : > { %13006 = vmatmul.mubr.bf16.vlgmr.msra.gmra.mrb[56].mxu1 %v5621_v49  ;;  %v19698_v49 = vld [vmem:[%s25855_s3 + $0x950] sm:$0xff]  }
 0xc33   : > { %16931 = vmatpush3.bf16.msra.mxu1 %v19656_v53  ;;  %13085 = vmatprep.mubr.bf16.mxu1 %v5671_v56  ;;  %v19695_v53 = vld [vmem:[%s25855_s3 + $0x908] sm:$0xff]   ;;  %v19699_v56 = vld [vmem:[%s25855_s3 + $0x910] sm:$0xff]  }
 0xc34   : > { %16967 = vmatpush3.bf16.msra.mxu0 %v19654_v46  ;;  %16932 = vmatprep.subr.bf16.mxu1 %v19659_v27  ;;  %v19700_v46 = vld [vmem:[%s25855_s3 + $0x7d8] sm:$0xff]  }
 0xc35   : > { %16996 = vmatprep.subr.bf16.mxu0 %v19657_v43  ;;  %v19701_v27 = vld [vmem:[%s25855_s3 + $0x798] sm:$0xff]   ;;  %v19704_v43 = vld [vmem:[%s25855_s3 + $0x7e0] sm:$0xff]  }
 0xc37   : > { %13126 = vmatmul.mubr.bf16.vlgmr.msra.gmra.mrb[40].mxu0 %v22700_v42  ;;  %16933 = vmatpush3.bf16.msra.mxu1 %v19660_v16  ;;  %v19705_v16 = vld [vmem:[%s25855_s3 + $0x7a0] sm:$0xff]  }
 0xc38   : > { %16997 = vmatpush3.bf16.msra.mxu0 %v19658_v45  ;;  %13205 = vmatprep.mubr.bf16.mxu0 %v22709_v28  ;;  %v19703_v45 = vld [vmem:[%s25855_s3 + $0x918] sm:$0xff]  }
 0xc39   : > { %16998 = vmatprep.subr.bf16.mxu0 %v19661_v52  ;;  %16934 = vmatprep.subr.bf16.mxu1 %v19663_v1  ;;  %v19708_v52 = vld [vmem:[%s25855_s3 + $0x7e8] sm:$0xff]   ;;  %v19706_v1 = vld [vmem:[%s25855_s3 + $0x960] sm:$0xff]  }
 0xc3b   : > { %16935 = vmatpush3.bf16.msra.mxu1 %v19664_v2  ;;  %v19709_v2 = vld [vmem:[%s25855_s3 + $0x7a8] sm:$0xff]  }
 0xc3c   : > { %16999 = vmatpush3.bf16.msra.mxu0 %v19662_v4  ;;  %16936 = vmatprep.subr.bf16.mxu1 %v19667_v29  ;;  %v3380_v4 = vld [vmem:[%s25856_s4] sm:$0xff] }
 0xc3d   : > { %17000 = vmatprep.subr.bf16.mxu0 %v19665_v19  ;;  %v19707_v29 = vld [vmem:[%s25855_s3 + $0x920] sm:$0xff]   ;;  %v19712_v19 = vld [vmem:[%s25855_s3 + $0x7f0] sm:$0xff]  }
 0xc3f   : > { %16937 = vmatpush3.bf16.msra.mxu1 %v19668_v39 }
 0xc40   : > { %17001 = vmatpush3.bf16.msra.mxu0 %v19666_v36  ;;  %16938 = vmatprep.subr.bf16.mxu1 %v19671_v5  ;;  %v19710_v36 = vld [vmem:[%s25855_s3 + $0x968] sm:$0xff]  }
 0xc41   : > { %17002 = vmatprep.subr.bf16.mxu0 %v19669_v6 }
 0xc43   : > { %16939 = vmatpush3.bf16.msra.mxu1 %v19672_v26 }
 0xc44   : > { %17003 = vmatpush3.bf16.msra.mxu0 %v19670_v57  ;;  %16940 = vmatprep.subr.bf16.mxu1 %v19675_v9  ;;  %v16660_v8 = vpop.f32.mrb[32].mxu1  ;;  %v19713_v9 = vld [vmem:[%s25855_s3 + $0x7b0] sm:$0xff]  }
 0xc45   : > { %17004 = vmatprep.subr.bf16.mxu0 %v19673_v60  ;;  %v16661_v11 = vpop.f32.mrb[33].mxu1 }
 0xc46   : > { %v22761_v63 = vadd.f32 %v16661_v11, %v16660_v8  ;;  %v16663_v14 = vpop.f32.mrb[34].mxu1  ;;  %v19714_v8 = vld [vmem:[%s25855_s3 + $0x970] sm:$0xff]  }
 0xc47   : > { %16941 = vmatpush3.bf16.msra.mxu1 %v19676_v35  ;;  %v16664_v17 = vpop.f32.mrb[35].mxu1  ;;  %v19711_v35 = vld [vmem:[%s25855_s3 + $0x928] sm:$0xff]   ;;  %v19717_v14 = vld [vmem:[%s25855_s3 + $0x7b8] sm:$0xff]  }
 0xc48   : > { %17005 = vmatpush3.bf16.msra.mxu0 %v19674_v15  ;;  %16942 = vmatprep.subr.bf16.mxu1 %v19679_v21  ;;  %v12568_v6 = vadd.f32 %v22761_v63, %v3380_v4  ;;  %v19716_v15 = vld [vmem:[%s25855_s3 + $0x7f8] sm:$0xff]  }
 0xc49   : > { %17006 = vmatprep.subr.bf16.mxu0 %v19677_v55  ;;  %v16704_v10 = vpop.f32.mrb[16].mxu0 }
 0xc4a   : > { %v16705_v32 = vpop.f32.mrb[17].mxu0 }
 0xc4b   : > { %16943 = vmatpush3.bf16.msra.mxu1 %v19680_v0  ;;  %v22780_v33 = vadd.f32 %v16705_v32, %v16704_v10  ;;  %v16707_v31 = vpop.f32.mrb[18].mxu0  ;;  %v22903_v0 = vld [vmem:[#allocation6 + $0x28] sm:$0xff] }
 0xc4c   : > { %17007 = vmatpush3.bf16.msra.mxu0 %v19678_v20  ;;  %16944 = vmatprep.subr.bf16.mxu1 %v19683_v3  ;;  %v16708_v38 = vpop.f32.mrb[19].mxu0  ;;  %v19715_v3 = vld [vmem:[%s25855_s3 + $0x930] sm:$0xff]   ;;  %v22918_v32 = vrot.slane %v22903_v0, %v21781_v7  ;;  %v5670_v31 = vcombine.high %v22700_v42, %v22700_v42  ;;  %v19725_v42 = vld [vmem:[%s25855_s3 + $0x888] sm:$0xff]  }
 0xc4d   : > { %17008 = vmatprep.subr.bf16.mxu0 %v19681_v22  ;;  %v19720_v22 = vld [vmem:[%s25855_s3 + $0x8c0] sm:$0xff]  }
 0xc4e   : > { %v19722_v38 = vld [vmem:[%s25855_s3 + $0xa40] sm:$0xff]  }
 0xc4f   : > { %16945 = vmatpush3.bf16.msra.mxu1 %v19684_v24  ;;  %v19721_v24 = vld [vmem:[%s25855_s3 + $0x880] sm:$0xff]  }
 0xc50   : > { %17009 = vmatpush3.bf16.msra.mxu0 %v19682_v37  ;;  %16974 = vmatprep.subr.bf16.mxu1 %v19687_v12  ;;  %v19724_v37 = vld [vmem:[%s25855_s3 + $0x8c8] sm:$0xff]   ;;  %v5720_v12 = vcombine.high %v22709_v28, %v22709_v28  ;;  %v22946_v28 = vrot.slane %v22792_v34, %v21781_v7  ;;  %v19729_v34 = vld [vmem:[%s25855_s3 + $0x890] sm:$0xff]  }
 0xc51   : > { %17010 = vmatprep.subr.bf16.mxu0 %v19685_v40  ;;  %v5737_v40 = vcombine.high %v22918_v32, %v22918_v32 }
 0xc52   : > { %13086 = vmatmul.mubr.bf16.vlgmr.msra.gmra.mrb[60].mxu1 %v5669_v44  ;;  %v19728_v44 = vld [vmem:[%s25855_s3 + $0x8d0] sm:$0xff]  }
 0xc53   : > { %16975 = vmatpush3.bf16.msra.mxu1 %v19688_v41  ;;  %13165 = vmatprep.mubr.bf16.mxu1 %v5672_v62  ;;  %v19723_v41 = vld [vmem:[%s25855_s3 + $0xa00] sm:$0xff]   ;;  %v19727_v62 = vld [vmem:[%s25855_s3 + $0xa08] sm:$0xff]  }
 0xc54   : > { %17011 = vmatpush3.bf16.msra.mxu0 %v19686_v13  ;;  %16976 = vmatprep.subr.bf16.mxu1 %v19692_v48  ;;  %v19726_v13 = vld [vmem:[%s25855_s3 + $0xa48] sm:$0xff]   ;;  %v22955_v48 = vrot.slane %v5737_v40, %v21781_v7  ;;  %v19764_v40 = vld [vmem:[%s25855_s3 + $0xb10] sm:$0xff]  }
 0xc55   : > { %17040 = vmatprep.subr.bf16.mxu0 %v19689_v50  ;;  %v19732_v50 = vld [vmem:[%s25855_s3 + $0x8d8] sm:$0xff]  }
 0xc57   : > { %13206 = vmatmul.mubr.bf16.vlgmr.msra.gmra.mrb[44].mxu0 %v22820_v18  ;;  %16977 = vmatpush3.bf16.msra.mxu1 %v19693_v51  ;;  %v19733_v51 = vld [vmem:[%s25855_s3 + $0x898] sm:$0xff]  }
 0xc58   : > { %17041 = vmatpush3.bf16.msra.mxu0 %v19690_v23  ;;  %13285 = vmatprep.mubr.bf16.mxu0 %v22829_v61  ;;  %v19731_v23 = vld [vmem:[%s25855_s3 + $0xa10] sm:$0xff]  }
 0xc59   : > { %17042 = vmatprep.subr.bf16.mxu0 %v19694_v25  ;;  %16978 = vmatprep.subr.bf16.mxu1 %v19696_v54  ;;  %v19736_v25 = vld [vmem:[%s25855_s3 + $0x8e0] sm:$0xff]   ;;  %v19734_v54 = vld [vmem:[%s25855_s3 + $0xa58] sm:$0xff]  }
 0xc5b   : > { %16979 = vmatpush3.bf16.msra.mxu1 %v19697_v59  ;;  %v19737_v59 = vld [vmem:[%s25855_s3 + $0x8a0] sm:$0xff]  }
 0xc5c   : > { %17043 = vmatpush3.bf16.msra.mxu0 %v19695_v53  ;;  %16980 = vmatprep.subr.bf16.mxu1 %v19700_v46  ;;  %v19735_v53 = vld [vmem:[%s25855_s3 + $0xa18] sm:$0xff]   ;;  %v19740_v46 = vld [vmem:[%s25855_s3 + $0x8e8] sm:$0xff]  }
 0xc5d   : > { %17044 = vmatprep.subr.bf16.mxu0 %v19698_v49  ;;  %v19738_v49 = vld [vmem:[%s25855_s3 + $0xa60] sm:$0xff]  }
 0xc5f   : > { %16981 = vmatpush3.bf16.msra.mxu1 %v19701_v27  ;;  %v19741_v27 = vld [vmem:[%s25855_s3 + $0x8a8] sm:$0xff]  }
 0xc60   : > { %17045 = vmatpush3.bf16.msra.mxu0 %v19699_v56  ;;  %16982 = vmatprep.subr.bf16.mxu1 %v19704_v43  ;;  %v19739_v56 = vld [vmem:[%s25855_s3 + $0xa20] sm:$0xff]   ;;  %v19744_v43 = vld [vmem:[%s25855_s3 + $0x8f0] sm:$0xff]  }
 0xc61   : > { %17046 = vmatprep.subr.bf16.mxu0 %v19702_v58 }
 0xc63   : > { %16983 = vmatpush3.bf16.msra.mxu1 %v19705_v16  ;;  %v19742_v16 = vld [vmem:[%s25855_s3 + $0xa68] sm:$0xff]  }
 0xc64   : > { %17047 = vmatpush3.bf16.msra.mxu0 %v19703_v45  ;;  %16984 = vmatprep.subr.bf16.mxu1 %v19708_v52 }
 0xc65   : > { %17048 = vmatprep.subr.bf16.mxu0 %v19706_v1  ;;  %v16682_v39 = vpop.f32.mrb[36].mxu1 }
 0xc66   : > { %v16683_v5 = vpop.f32.mrb[37].mxu1 }
 0xc67   : > { %v16684_v26 = vadd.f32 %v16683_v5, %v16682_v39  ;;  %v16685_v57 = vpop.f32.mrb[38].mxu1  ;;  %16985 = vmatpush3.bf16.msra.mxu1 %v19709_v2  ;;  %v19745_v2 = vld [vmem:[%s25855_s3 + $0x8b0] sm:$0xff]  }
 0xc68   : > { %17049 = vmatpush3.bf16.msra.mxu0 %v19707_v29  ;;  %v16686_v60 = vpop.f32.mrb[39].mxu1  ;;  %16986 = vmatprep.subr.bf16.mxu1 %v19712_v19  ;;  %v19743_v29 = vld [vmem:[%s25855_s3 + $0xa28] sm:$0xff]   ;;  %v19748_v19 = vld [vmem:[%s25855_s3 + $0x8f8] sm:$0xff]  }
 0xc69   : > { %v12608_v21 = vadd.f32 %v16684_v26, %v12568_v6  ;;  %17050 = vmatprep.subr.bf16.mxu0 %v19710_v36  ;;  %v19746_v36 = vld [vmem:[%s25855_s3 + $0xa70] sm:$0xff]   ;;  %v5722_v6 = vcombine.high %v22903_v0, %v22903_v0  ;;  %v5718_v0 = vcombine.high %v22820_v18, %v22820_v18  ;;  %v19758_v18 = vld [vmem:[%s25855_s3 + $0x988] sm:$0xff]  }
 0xc6a   : > { %v16748_v55 = vpop.f32.mrb[20].mxu0 }
 0xc6b   : > { %v22898_v11 = vadd.f32 %v22780_v33, %v12608_v21  ;;  %v16749_v63 = vpop.f32.mrb[21].mxu0  ;;  %16987 = vmatpush3.bf16.msra.mxu1 %v19713_v9  ;;  %v19719_v33 = vld [vmem:[%s25855_s3 + $0x938] sm:$0xff]   ;;  %v19752_v21 = vld [vmem:[%s25855_s3 + $0x9c0] sm:$0xff]  }
 0xc6c   : > { %v22905_v17 = vadd.f32 %v16749_v63, %v16748_v55  ;;  %v16751_v20 = vpop.f32.mrb[22].mxu0  ;;  %17051 = vmatpush3.bf16.msra.mxu0 %v19711_v35  ;;  %16988 = vmatprep.subr.bf16.mxu1 %v19716_v15  ;;  %v19749_v9 = vld [vmem:[%s25855_s3 + $0x8b8] sm:$0xff]   ;;  %v19747_v15 = vld [vmem:[%s25855_s3 + $0xa30] sm:$0xff]   ;;  %v19753_v63 = vld [vmem:[%s25855_s3 + $0x980] sm:$0xff]  }
 0xc6d   : > { %v16752_v10 = vpop.f32.mrb[23].mxu0  ;;  %17052 = vmatprep.subr.bf16.mxu0 %v19714_v8  ;;  %v19750_v55 = vld [vmem:[%s25855_s3 + $0xa78] sm:$0xff]   ;;  %v5721_v20 = vcombine.high %v22829_v61, %v22829_v61  ;;  %v23068_v61 = vrot.slane %v22918_v32, %v21781_v7  ;;  %v19762_v32 = vld [vmem:[%s25855_s3 + $0x990] sm:$0xff]  }
 0xc6e   : > { %v19755_v10 = vld [vmem:[%s25855_s3 + $0xb00] sm:$0xff]  }
 0xc6f   : > { %16989 = vmatpush3.bf16.msra.mxu1 %v19717_v14  ;;  %v19751_v14 = vld [vmem:[%s25855_s3 + $0xa38] sm:$0xff]  }
 0xc70   : > { %17053 = vmatpush3.bf16.msra.mxu0 %v19715_v3  ;;  %17018 = vmatprep.subr.bf16.mxu1 %v19720_v22  ;;  %v19754_v3 = vld [vmem:[%s25855_s3 + $0xb40] sm:$0xff]  }
 0xc71   : > { %17054 = vmatprep.subr.bf16.mxu0 %v19718_v30  ;;  %v19759_v30 = vld [vmem:[%s25855_s3 + $0xb48] sm:$0xff]  }
 0xc72   : > { %13166 = vmatmul.mubr.bf16.vlgmr.msra.gmra.mrb[64].mxu1 %v5670_v31  ;;  %v19760_v31 = vld [vmem:[%s25855_s3 + $0xb08] sm:$0xff]  }
 0xc73   : > { %17019 = vmatpush3.bf16.msra.mxu1 %v19721_v24  ;;  %13245 = vmatprep.mubr.bf16.mxu1 %v5720_v12  ;;  %v19761_v24 = vld [vmem:[%s25855_s3 + $0x9d0] sm:$0xff]  }
 0xc74   : > { %17055 = vmatpush3.bf16.msra.mxu0 %v19719_v33  ;;  %17020 = vmatprep.subr.bf16.mxu1 %v19724_v37  ;;  %v19765_v37 = vld [vmem:[%s25855_s3 + $0x9d8] sm:$0xff]   ;;  %v19763_v12 = vld [vmem:[%s25855_s3 + $0xb50] sm:$0xff]  }
 0xc75   : > { %17084 = vmatprep.subr.bf16.mxu0 %v19722_v38  ;;  %v19766_v38 = vld [vmem:[%s25855_s3 + $0x998] sm:$0xff]  }
 0xc77   : > { %13286 = vmatmul.mubr.bf16.vlgmr.msra.gmra.mrb[48].mxu0 %v22946_v28  ;;  %17021 = vmatpush3.bf16.msra.mxu1 %v19725_v42  ;;  %v19769_v42 = vld [vmem:[%s25855_s3 + $0x9e0] sm:$0xff]  }
 0xc78   : > { %17085 = vmatpush3.bf16.msra.mxu0 %v19723_v41  ;;  %13365 = vmatprep.mubr.bf16.mxu0 %v22955_v48  ;;  %v19767_v41 = vld [vmem:[%s25855_s3 + $0xb58] sm:$0xff]  }
 0xc79   : > { %17086 = vmatprep.subr.bf16.mxu0 %v19726_v13  ;;  %17022 = vmatprep.subr.bf16.mxu1 %v19728_v44  ;;  %v19770_v13 = vld [vmem:[%s25855_s3 + $0x9a0] sm:$0xff]   ;;  %v19768_v44 = vld [vmem:[%s25855_s3 + $0xb18] sm:$0xff]  }
 0xc7b   : > { %17023 = vmatpush3.bf16.msra.mxu1 %v19729_v34  ;;  %v19773_v34 = vld [vmem:[%s25855_s3 + $0x9e8] sm:$0xff]  }
 0xc7c   : > { %17087 = vmatpush3.bf16.msra.mxu0 %v19727_v62  ;;  %17024 = vmatprep.subr.bf16.mxu1 %v19732_v50  ;;  %v19771_v62 = vld [vmem:[%s25855_s3 + $0xb60] sm:$0xff]   ;;  %v19774_v50 = vld [vmem:[%s25855_s3 + $0x9a8] sm:$0xff]  }
 0xc7d   : > { %17088 = vmatprep.subr.bf16.mxu0 %v19730_v47  ;;  %v19772_v47 = vld [vmem:[%s25855_s3 + $0xb20] sm:$0xff]  }
 0xc7f   : > { %17025 = vmatpush3.bf16.msra.mxu1 %v19733_v51  ;;  %v19777_v51 = vld [vmem:[%s25855_s3 + $0x9f0] sm:$0xff]  }
 0xc80   : > { %17089 = vmatpush3.bf16.msra.mxu0 %v19731_v23  ;;  %17026 = vmatprep.subr.bf16.mxu1 %v19736_v25  ;;  %v19775_v25 = vld [vmem:[%s25855_s3 + $0xb68] sm:$0xff]  }
 0xc81   : > { %17090 = vmatprep.subr.bf16.mxu0 %v19734_v54 }
 0xc83   : > { %17027 = vmatpush3.bf16.msra.mxu1 %v19737_v59 }
 0xc84   : > { %17091 = vmatpush3.bf16.msra.mxu0 %v19735_v53  ;;  %17028 = vmatprep.subr.bf16.mxu1 %v19740_v46  ;;  %v19778_v46 = vld [vmem:[%s25855_s3 + $0x9b0] sm:$0xff]  }
 0xc85   : > { %17092 = vmatprep.subr.bf16.mxu0 %v19738_v49  ;;  %v16726_v58 = vpop.f32.mrb[40].mxu1 }
 0xc86   : > { %v16727_v45 = vpop.f32.mrb[41].mxu1 }
 0xc87   : > { %v16728_v52 = vadd.f32 %v16727_v45, %v16726_v58  ;;  %v16729_v1 = vpop.f32.mrb[42].mxu1  ;;  %17029 = vmatpush3.bf16.msra.mxu1 %v19741_v27  ;;  %v19776_v27 = vld [vmem:[%s25855_s3 + $0xb28] sm:$0xff]   ;;  %v19779_v58 = vld [vmem:[%s25855_s3 + $0xb70] sm:$0xff]  }
 0xc88   : > { %17093 = vmatpush3.bf16.msra.mxu0 %v19739_v56  ;;  %v16730_v4 = vpop.f32.mrb[43].mxu1  ;;  %17030 = vmatprep.subr.bf16.mxu1 %v19744_v43  ;;  %v19781_v56 = vld [vmem:[%s25855_s3 + $0x9f8] sm:$0xff]   ;;  %v23145_v1 = vld [vmem:[#allocation6 + $0x30] sm:$0xff] }
 0xc89   : > { %v12688_v39 = vadd.f32 %v16728_v52, %v22898_v11  ;;  %17094 = vmatprep.subr.bf16.mxu0 %v19742_v16  ;;  %v23040_v11 = vrot.slane %v5722_v6, %v21781_v7  ;;  %v19782_v52 = vld [vmem:[%s25855_s3 + $0x9b8] sm:$0xff]   ;;  %v23163_v6 = vrot.slane %v23145_v1, %v21781_v7 }
 0xc8a   : > { %v16792_v5 = vpop.f32.mrb[24].mxu0 }
 0xc8b   : > { %v23023_v26 = vadd.f32 %v22905_v17, %v12688_v39  ;;  %v16793_v57 = vpop.f32.mrb[25].mxu0  ;;  %17031 = vmatpush3.bf16.msra.mxu1 %v19745_v2  ;;  %v19757_v17 = vld [vmem:[%s25855_s3 + $0x9c8] sm:$0xff]   ;;  %v5738_v22 = vcombine.high %v23040_v11, %v23040_v11  ;;  %v19785_v39 = vld [vmem:[%s25855_s3 + $0xac0] sm:$0xff]  }
 0xc8c   : > { %v23028_v60 = vadd.f32 %v16793_v57, %v16792_v5  ;;  %v16795_v35 = vpop.f32.mrb[26].mxu0  ;;  %17095 = vmatpush3.bf16.msra.mxu0 %v19743_v29  ;;  %17032 = vmatprep.subr.bf16.mxu1 %v19748_v19  ;;  %v19780_v19 = vld [vmem:[%s25855_s3 + $0xb30] sm:$0xff]   ;;  %v19783_v5 = vld [vmem:[%s25855_s3 + $0xb78] sm:$0xff]  }
 0xc8d   : > { %v16796_v8 = vpop.f32.mrb[27].mxu0  ;;  %17096 = vmatprep.subr.bf16.mxu0 %v19746_v36  ;;  %v23077_v33 = vrot.slane %v5738_v22, %v21781_v7  ;;  %v19784_v57 = vld [vmem:[%s25855_s3 + $0xb38] sm:$0xff]   ;;  %v5769_v35 = vcombine.high %v22955_v48, %v22955_v48  ;;  %v23191_v48 = vrot.slane %v23040_v11, %v21781_v7  ;;  %v19794_v11 = vld [vmem:[%s25855_s3 + $0xa90] sm:$0xff]  }
 0xc8e   : > { %v19788_v8 = vld [vmem:[%s25855_s3 + $0xc00] sm:$0xff]   ;;  %v19796_v22 = vld [vmem:[%s25855_s3 + $0xc10] sm:$0xff]  }
 0xc8f   : > { %17033 = vmatpush3.bf16.msra.mxu1 %v19749_v9  ;;  %v5719_v9 = vcombine.high %v22946_v28, %v22946_v28  ;;  %v19790_v28 = vld [vmem:[%s25855_s3 + $0xa88] sm:$0xff]  }
 0xc90   : > { %17097 = vmatpush3.bf16.msra.mxu0 %v19747_v15  ;;  %17062 = vmatprep.subr.bf16.mxu1 %v19752_v21  ;;  %v19787_v15 = vld [vmem:[%s25855_s3 + $0xc40] sm:$0xff]   ;;  %v5786_v21 = vcombine.high %v23163_v6, %v23163_v6 }
 0xc91   : > { %17098 = vmatprep.subr.bf16.mxu0 %v19750_v55  ;;  %v19791_v55 = vld [vmem:[%s25855_s3 + $0xc48] sm:$0xff]  }
 0xc92   : > { %13246 = vmatmul.mubr.bf16.vlgmr.msra.gmra.mrb[68].mxu1 %v5718_v0  ;;  %v19792_v0 = vld [vmem:[%s25855_s3 + $0xc08] sm:$0xff]  }
 0xc93   : > { %17063 = vmatpush3.bf16.msra.mxu1 %v19753_v63  ;;  %13325 = vmatprep.mubr.bf16.mxu1 %v5721_v20  ;;  %v19793_v63 = vld [vmem:[%s25855_s3 + $0xad0] sm:$0xff]  }
 0xc94   : > { %17099 = vmatpush3.bf16.msra.mxu0 %v19751_v14  ;;  %17064 = vmatprep.subr.bf16.mxu1 %v19757_v17  ;;  %v23200_v14 = vrot.slane %v5786_v21, %v21781_v7  ;;  %v19797_v17 = vld [vmem:[%s25855_s3 + $0xad8] sm:$0xff]   ;;  %v19795_v20 = vld [vmem:[%s25855_s3 + $0xc50] sm:$0xff]  }
 0xc95   : > { %17128 = vmatprep.subr.bf16.mxu0 %v19754_v3  ;;  %v19798_v3 = vld [vmem:[%s25855_s3 + $0xa98] sm:$0xff]   ;;  %v19829_v21 = vld [vmem:[%s25855_s3 + $0xd10] sm:$0xff]  }
 0xc97   : > { %13366 = vmatmul.mubr.bf16.vlgmr.msra.gmra.mrb[52].mxu0 %v23068_v61  ;;  %17065 = vmatpush3.bf16.msra.mxu1 %v19758_v18  ;;  %v19801_v18 = vld [vmem:[%s25855_s3 + $0xae0] sm:$0xff]  }
 0xc98   : > { %17129 = vmatpush3.bf16.msra.mxu0 %v19755_v10  ;;  %13445 = vmatprep.mubr.bf16.mxu0 %v23077_v33  ;;  %v19799_v10 = vld [vmem:[%s25855_s3 + $0xc58] sm:$0xff]  }
 0xc99   : > { %17130 = vmatprep.subr.bf16.mxu0 %v19759_v30  ;;  %17066 = vmatprep.subr.bf16.mxu1 %v19761_v24  ;;  %v19802_v30 = vld [vmem:[%s25855_s3 + $0xaa0] sm:$0xff]   ;;  %v19800_v24 = vld [vmem:[%s25855_s3 + $0xc18] sm:$0xff]  }
 0xc9b   : > { %17067 = vmatpush3.bf16.msra.mxu1 %v19762_v32  ;;  %v19805_v32 = vld [vmem:[%s25855_s3 + $0xae8] sm:$0xff]  }
 0xc9c   : > { %17131 = vmatpush3.bf16.msra.mxu0 %v19760_v31  ;;  %17068 = vmatprep.subr.bf16.mxu1 %v19765_v37  ;;  %v19803_v31 = vld [vmem:[%s25855_s3 + $0xc60] sm:$0xff]   ;;  %v19806_v37 = vld [vmem:[%s25855_s3 + $0xaa8] sm:$0xff]  }
 0xc9d   : > { %17132 = vmatprep.subr.bf16.mxu0 %v19763_v12  ;;  %v19804_v12 = vld [vmem:[%s25855_s3 + $0xc20] sm:$0xff]  }
 0xc9f   : > { %17069 = vmatpush3.bf16.msra.mxu1 %v19766_v38  ;;  %v19809_v38 = vld [vmem:[%s25855_s3 + $0xaf0] sm:$0xff]  }
 0xca0   : > { %17133 = vmatpush3.bf16.msra.mxu0 %v19764_v40  ;;  %17070 = vmatprep.subr.bf16.mxu1 %v19769_v42  ;;  %v19807_v42 = vld [vmem:[%s25855_s3 + $0xc68] sm:$0xff]  }
 0xca1   : > { %17134 = vmatprep.subr.bf16.mxu0 %v19767_v41 }
 0xca3   : > { %17071 = vmatpush3.bf16.msra.mxu1 %v19770_v13 }
 0xca4   : > { %17135 = vmatpush3.bf16.msra.mxu0 %v19768_v44  ;;  %17072 = vmatprep.subr.bf16.mxu1 %v19773_v34  ;;  %v19810_v34 = vld [vmem:[%s25855_s3 + $0xab0] sm:$0xff]  }
 0xca5   : > { %17136 = vmatprep.subr.bf16.mxu0 %v19771_v62  ;;  %v16770_v23 = vpop.f32.mrb[44].mxu1 }
 0xca6   : > { %v16771_v54 = vpop.f32.mrb[45].mxu1 }
 0xca7   : > { %v16772_v59 = vadd.f32 %v16771_v54, %v16770_v23  ;;  %v16773_v53 = vpop.f32.mrb[46].mxu1  ;;  %17073 = vmatpush3.bf16.msra.mxu1 %v19774_v50  ;;  %v19808_v50 = vld [vmem:[%s25855_s3 + $0xc28] sm:$0xff]   ;;  %v19811_v23 = vld [vmem:[%s25855_s3 + $0xc70] sm:$0xff]   ;;  %v5771_v54 = vcombine.high %v23145_v1, %v23145_v1  ;;  %v19816_v1 = vld [vmem:[%s25855_s3 + $0xc38] sm:$0xff]  }
 0xca8   : > { %17137 = vmatpush3.bf16.msra.mxu0 %v19772_v47  ;;  %v16774_v49 = vpop.f32.mrb[47].mxu1  ;;  %17074 = vmatprep.subr.bf16.mxu1 %v19777_v51  ;;  %v19813_v47 = vld [vmem:[%s25855_s3 + $0xaf8] sm:$0xff]  }
 0xca9   : > { %v12768_v43 = vadd.f32 %v16772_v59, %v23023_v26  ;;  %17138 = vmatprep.subr.bf16.mxu0 %v19775_v25  ;;  %v19786_v26 = vld [vmem:[%s25855_s3 + $0xa80] sm:$0xff]   ;;  %v19814_v53 = vld [vmem:[%s25855_s3 + $0xab8] sm:$0xff]  }
 0xcaa   : > { %v16836_v16 = vpop.f32.mrb[28].mxu0 }
 0xcab   : > { %v16837_v45 = vpop.f32.mrb[29].mxu0  ;;  %17075 = vmatpush3.bf16.msra.mxu1 %v19778_v46  ;;  %v23148_v2 = vadd.f32 %v23028_v60, %v12768_v43  ;;  %v19789_v60 = vld [vmem:[%s25855_s3 + $0xac8] sm:$0xff]   ;;  %v19817_v43 = vld [vmem:[%s25855_s3 + $0xbc0] sm:$0xff]  }
 0xcac   : > { %v23150_v4 = vadd.f32 %v16837_v45, %v16836_v16  ;;  %v16839_v29 = vpop.f32.mrb[30].mxu0  ;;  %17139 = vmatpush3.bf16.msra.mxu0 %v19776_v27  ;;  %17076 = vmatprep.subr.bf16.mxu1 %v19781_v56  ;;  %v19812_v56 = vld [vmem:[%s25855_s3 + $0xc30] sm:$0xff]   ;;  %v19815_v16 = vld [vmem:[%s25855_s3 + $0xc78] sm:$0xff]   ;;  %v23285_v45 = vrot.slane %v5771_v54, %v21781_v7 }
 0xcad   : > { %v16840_v36 = vpop.f32.mrb[31].mxu0  ;;  %17140 = vmatprep.subr.bf16.mxu0 %v19779_v58  ;;  %v5770_v29 = vcombine.high %v23077_v33, %v23077_v33  ;;  %v23313_v33 = vrot.slane %v23163_v6, %v21781_v7  ;;  %v19827_v6 = vld [vmem:[%s25855_s3 + $0xb90] sm:$0xff]  }
 0xcae   : > { %v19820_v36 = vld [vmem:[%s25855_s3 + $0xd00] sm:$0xff]  }
 0xcaf   : > { %17077 = vmatpush3.bf16.msra.mxu1 %v19782_v52  ;;  %v19818_v52 = vld [vmem:[%s25855_s3 + $0xb80] sm:$0xff]  }
 0xcb0   : > { %17141 = vmatpush3.bf16.msra.mxu0 %v19780_v19  ;;  %17106 = vmatprep.subr.bf16.mxu1 %v19785_v39  ;;  %v19819_v19 = vld [vmem:[%s25855_s3 + $0xd40] sm:$0xff]   ;;  %v5787_v39 = vcombine.high %v23285_v45, %v23285_v45 }
 0xcb1   : > { %17142 = vmatprep.subr.bf16.mxu0 %v19783_v5  ;;  %v19824_v5 = vld [vmem:[%s25855_s3 + $0xd48] sm:$0xff]  }
 0xcb2   : > { %13326 = vmatmul.mubr.bf16.vlgmr.msra.gmra.mrb[72].mxu1 %v5719_v9  ;;  %v19825_v9 = vld [vmem:[%s25855_s3 + $0xd08] sm:$0xff]  }
 0xcb3   : > { %17107 = vmatpush3.bf16.msra.mxu1 %v19786_v26  ;;  %13405 = vmatprep.mubr.bf16.mxu1 %v5769_v35  ;;  %v19826_v26 = vld [vmem:[%s25855_s3 + $0xbd0] sm:$0xff]  }
 0xcb4   : > { %17143 = vmatpush3.bf16.msra.mxu0 %v19784_v57  ;;  %17108 = vmatprep.subr.bf16.mxu1 %v19789_v60  ;;  %v23322_v57 = vrot.slane %v5787_v39, %v21781_v7  ;;  %v19830_v60 = vld [vmem:[%s25855_s3 + $0xbd8] sm:$0xff]   ;;  %v19828_v35 = vld [vmem:[%s25855_s3 + $0xd50] sm:$0xff]  }
 0xcb5   : > { %17172 = vmatprep.subr.bf16.mxu0 %v19787_v15  ;;  %v19831_v15 = vld [vmem:[%s25855_s3 + $0xb98] sm:$0xff]   ;;  %v19861_v39 = vld [vmem:[%s25855_s3 + $0xe10] sm:$0xff]  }
 0xcb7   : > { %13446 = vmatmul.mubr.bf16.vlgmr.msra.gmra.mrb[56].mxu0 %v23191_v48  ;;  %17109 = vmatpush3.bf16.msra.mxu1 %v19790_v28  ;;  %v19834_v28 = vld [vmem:[%s25855_s3 + $0xbe0] sm:$0xff]  }
 0xcb8   : > { %17173 = vmatpush3.bf16.msra.mxu0 %v19788_v8  ;;  %13525 = vmatprep.mubr.bf16.mxu0 %v23200_v14  ;;  %v19832_v8 = vld [vmem:[%s25855_s3 + $0xd58] sm:$0xff]  }
 0xcb9   : > { %17174 = vmatprep.subr.bf16.mxu0 %v19791_v55  ;;  %17110 = vmatprep.subr.bf16.mxu1 %v19793_v63  ;;  %v19835_v55 = vld [vmem:[%s25855_s3 + $0xba0] sm:$0xff]   ;;  %v19833_v63 = vld [vmem:[%s25855_s3 + $0xd18] sm:$0xff]  }
 0xcbb   : > { %17111 = vmatpush3.bf16.msra.mxu1 %v19794_v11  ;;  %v19838_v11 = vld [vmem:[%s25855_s3 + $0xbe8] sm:$0xff]  }
 0xcbc   : > { %17175 = vmatpush3.bf16.msra.mxu0 %v19792_v0  ;;  %17112 = vmatprep.subr.bf16.mxu1 %v19797_v17  ;;  %v19836_v0 = vld [vmem:[%s25855_s3 + $0xd60] sm:$0xff]   ;;  %v19839_v17 = vld [vmem:[%s25855_s3 + $0xba8] sm:$0xff]  }
 0xcbd   : > { %17176 = vmatprep.subr.bf16.mxu0 %v19795_v20  ;;  %v19837_v20 = vld [vmem:[%s25855_s3 + $0xd20] sm:$0xff]  }
 0xcbf   : > { %17113 = vmatpush3.bf16.msra.mxu1 %v19798_v3  ;;  %v19842_v3 = vld [vmem:[%s25855_s3 + $0xbf0] sm:$0xff]  }
 0xcc0   : > { %17177 = vmatpush3.bf16.msra.mxu0 %v19796_v22  ;;  %17114 = vmatprep.subr.bf16.mxu1 %v19801_v18  ;;  %v19840_v18 = vld [vmem:[%s25855_s3 + $0xd68] sm:$0xff]  }
 0xcc1   : > { %17178 = vmatprep.subr.bf16.mxu0 %v19799_v10 }
 0xcc3   : > { %17115 = vmatpush3.bf16.msra.mxu1 %v19802_v30 }
 0xcc4   : > { %17179 = vmatpush3.bf16.msra.mxu0 %v19800_v24  ;;  %17116 = vmatprep.subr.bf16.mxu1 %v19805_v32  ;;  %v19843_v32 = vld [vmem:[%s25855_s3 + $0xbb0] sm:$0xff]  }
 0xcc5   : > { %17180 = vmatprep.subr.bf16.mxu0 %v19803_v31  ;;  %v16814_v40 = vpop.f32.mrb[48].mxu1 }
 0xcc6   : > { %v16815_v41 = vpop.f32.mrb[49].mxu1 }
 0xcc7   : > { %v16816_v13 = vadd.f32 %v16815_v41, %v16814_v40  ;;  %v16817_v44 = vpop.f32.mrb[50].mxu1  ;;  %17117 = vmatpush3.bf16.msra.mxu1 %v19806_v37  ;;  %v19841_v37 = vld [vmem:[%s25855_s3 + $0xd28] sm:$0xff]   ;;  %v19844_v40 = vld [vmem:[%s25855_s3 + $0xd70] sm:$0xff]  }
 0xcc8   : > { %17181 = vmatpush3.bf16.msra.mxu0 %v19804_v12  ;;  %v16818_v62 = vpop.f32.mrb[51].mxu1  ;;  %17118 = vmatprep.subr.bf16.mxu1 %v19809_v38  ;;  %v19846_v12 = vld [vmem:[%s25855_s3 + $0xbf8] sm:$0xff]   ;;  %v23390_v44 = vld [vmem:[#allocation6 + $0x38] sm:$0xff] }
 0xcc9   : > { %v12848_v51 = vadd.f32 %v16816_v13, %v23148_v2  ;;  %17182 = vmatprep.subr.bf16.mxu0 %v19807_v42  ;;  %v5767_v2 = vcombine.high %v23068_v61, %v23068_v61  ;;  %v19823_v61 = vld [vmem:[%s25855_s3 + $0xb88] sm:$0xff]   ;;  %v19847_v13 = vld [vmem:[%s25855_s3 + $0xbb8] sm:$0xff]   ;;  %v23408_v54 = vrot.slane %v23390_v44, %v21781_v7 }
 0xcca   : > { %v16880_v25 = vpop.f32.mrb[32].mxu0 }
 0xccb   : > { %v16881_v59 = vpop.f32.mrb[33].mxu0  ;;  %17119 = vmatpush3.bf16.msra.mxu1 %v19810_v34  ;;  %v23271_v46 = vadd.f32 %v23150_v4, %v12848_v51  ;;  %v19822_v4 = vld [vmem:[%s25855_s3 + $0xbc8] sm:$0xff]   ;;  %v19850_v51 = vld [vmem:[%s25855_s3 + $0xcc0] sm:$0xff]  }
 0xccc   : > { %v23273_v49 = vadd.f32 %v16881_v59, %v16880_v25  ;;  %v16883_v27 = vpop.f32.mrb[34].mxu0  ;;  %17183 = vmatpush3.bf16.msra.mxu0 %v19808_v50  ;;  %17120 = vmatprep.subr.bf16.mxu1 %v19813_v47  ;;  %v19845_v47 = vld [vmem:[%s25855_s3 + $0xd30] sm:$0xff]   ;;  %v19848_v25 = vld [vmem:[%s25855_s3 + $0xd78] sm:$0xff]   ;;  %v19851_v59 = vld [vmem:[%s25855_s3 + $0xc80] sm:$0xff]  }
 0xccd   : > { %v16884_v58 = vpop.f32.mrb[35].mxu0  ;;  %17184 = vmatprep.subr.bf16.mxu0 %v19811_v23  ;;  %v5818_v27 = vcombine.high %v23200_v14, %v23200_v14  ;;  %v23436_v14 = vrot.slane %v23285_v45, %v21781_v7  ;;  %v19859_v45 = vld [vmem:[%s25855_s3 + $0xc90] sm:$0xff]  }
 0xcce   : > { %v19853_v58 = vld [vmem:[%s25855_s3 + $0xe00] sm:$0xff]  }
 0xccf   : > { %17121 = vmatpush3.bf16.msra.mxu1 %v19814_v53  ;;  %v19849_v53 = vld [vmem:[%s25855_s3 + $0xd38] sm:$0xff]  }
 0xcd0   : > { %17185 = vmatpush3.bf16.msra.mxu0 %v19812_v56  ;;  %17150 = vmatprep.subr.bf16.mxu1 %v19817_v43  ;;  %v19852_v56 = vld [vmem:[%s25855_s3 + $0xe40] sm:$0xff]   ;;  %v5835_v43 = vcombine.high %v23408_v54, %v23408_v54 }
 0xcd1   : > { %17186 = vmatprep.subr.bf16.mxu0 %v19815_v16  ;;  %v19856_v16 = vld [vmem:[%s25855_s3 + $0xe48] sm:$0xff]  }
 0xcd2   : > { %13406 = vmatmul.mubr.bf16.vlgmr.msra.gmra.mrb[76].mxu1 %v5767_v2  ;;  %v19857_v2 = vld [vmem:[%s25855_s3 + $0xe08] sm:$0xff]  }
 0xcd3   : > { %17151 = vmatpush3.bf16.msra.mxu1 %v19818_v52  ;;  %13485 = vmatprep.mubr.bf16.mxu1 %v5770_v29  ;;  %v19858_v52 = vld [vmem:[%s25855_s3 + $0xcd0] sm:$0xff]  }
 0xcd4   : > { %17187 = vmatpush3.bf16.msra.mxu0 %v19816_v1  ;;  %17152 = vmatprep.subr.bf16.mxu1 %v19822_v4  ;;  %v23445_v1 = vrot.slane %v5835_v43, %v21781_v7  ;;  %v19862_v4 = vld [vmem:[%s25855_s3 + $0xcd8] sm:$0xff]   ;;  %v19860_v29 = vld [vmem:[%s25855_s3 + $0xe50] sm:$0xff]  }
 0xcd5   : > { %17216 = vmatprep.subr.bf16.mxu0 %v19819_v19  ;;  %v19863_v19 = vld [vmem:[%s25855_s3 + $0xc98] sm:$0xff]   ;;  %v19894_v43 = vld [vmem:[%s25855_s3 + $0xf10] sm:$0xff]  }
 0xcd7   : > { %13526 = vmatmul.mubr.bf16.vlgmr.msra.gmra.mrb[60].mxu0 %v23313_v33  ;;  %17153 = vmatpush3.bf16.msra.mxu1 %v19823_v61  ;;  %v19866_v61 = vld [vmem:[%s25855_s3 + $0xce0] sm:$0xff]  }
 0xcd8   : > { %17217 = vmatpush3.bf16.msra.mxu0 %v19820_v36  ;;  %13605 = vmatprep.mubr.bf16.mxu0 %v23322_v57  ;;  %v19864_v36 = vld [vmem:[%s25855_s3 + $0xe58] sm:$0xff]  }
 0xcd9   : > { %17218 = vmatprep.subr.bf16.mxu0 %v19824_v5  ;;  %17154 = vmatprep.subr.bf16.mxu1 %v19826_v26  ;;  %v19867_v5 = vld [vmem:[%s25855_s3 + $0xca0] sm:$0xff]   ;;  %v19865_v26 = vld [vmem:[%s25855_s3 + $0xe18] sm:$0xff]  }
 0xcdb   : > { %17155 = vmatpush3.bf16.msra.mxu1 %v19827_v6  ;;  %v19870_v6 = vld [vmem:[%s25855_s3 + $0xce8] sm:$0xff]  }
 0xcdc   : > { %17219 = vmatpush3.bf16.msra.mxu0 %v19825_v9  ;;  %17156 = vmatprep.subr.bf16.mxu1 %v19830_v60  ;;  %v19868_v9 = vld [vmem:[%s25855_s3 + $0xe60] sm:$0xff]   ;;  %v19871_v60 = vld [vmem:[%s25855_s3 + $0xca8] sm:$0xff]  }
 0xcdd   : > { %17220 = vmatprep.subr.bf16.mxu0 %v19828_v35  ;;  %v19869_v35 = vld [vmem:[%s25855_s3 + $0xe20] sm:$0xff]  }
 0xcdf   : > { %17157 = vmatpush3.bf16.msra.mxu1 %v19831_v15  ;;  %v19874_v15 = vld [vmem:[%s25855_s3 + $0xcf0] sm:$0xff]  }
 0xce0   : > { %17221 = vmatpush3.bf16.msra.mxu0 %v19829_v21  ;;  %17158 = vmatprep.subr.bf16.mxu1 %v19834_v28  ;;  %v19872_v28 = vld [vmem:[%s25855_s3 + $0xe68] sm:$0xff]  }
 0xce1   : > { %17222 = vmatprep.subr.bf16.mxu0 %v19832_v8 }
 0xce3   : > { %17159 = vmatpush3.bf16.msra.mxu1 %v19835_v55 }
 0xce4   : > { %17223 = vmatpush3.bf16.msra.mxu0 %v19833_v63  ;;  %17160 = vmatprep.subr.bf16.mxu1 %v19838_v11  ;;  %v19875_v11 = vld [vmem:[%s25855_s3 + $0xcb0] sm:$0xff]  }
 0xce5   : > { %17224 = vmatprep.subr.bf16.mxu0 %v19836_v0  ;;  %v16858_v22 = vpop.f32.mrb[52].mxu1 }
 0xce6   : > { %v16859_v10 = vpop.f32.mrb[53].mxu1 }
 0xce7   : > { %v16860_v30 = vadd.f32 %v16859_v10, %v16858_v22  ;;  %v16861_v24 = vpop.f32.mrb[54].mxu1  ;;  %17161 = vmatpush3.bf16.msra.mxu1 %v19839_v17  ;;  %v19873_v17 = vld [vmem:[%s25855_s3 + $0xe28] sm:$0xff]   ;;  %v19876_v22 = vld [vmem:[%s25855_s3 + $0xe70] sm:$0xff]   ;;  %v5820_v10 = vcombine.high %v23390_v44, %v23390_v44  ;;  %v19881_v44 = vld [vmem:[%s25855_s3 + $0xe38] sm:$0xff]  }
 0xce8   : > { %17225 = vmatpush3.bf16.msra.mxu0 %v19837_v20  ;;  %v16862_v31 = vpop.f32.mrb[55].mxu1  ;;  %17162 = vmatprep.subr.bf16.mxu1 %v19842_v3  ;;  %v19878_v20 = vld [vmem:[%s25855_s3 + $0xcf8] sm:$0xff]  }
 0xce9   : > { %v12928_v38 = vadd.f32 %v16860_v30, %v23271_v46  ;;  %17226 = vmatprep.subr.bf16.mxu0 %v19840_v18  ;;  %v5768_v46 = vcombine.high %v23191_v48, %v23191_v48  ;;  %v19855_v48 = vld [vmem:[%s25855_s3 + $0xc88] sm:$0xff]   ;;  %v19879_v24 = vld [vmem:[%s25855_s3 + $0xcb8] sm:$0xff]  }
 0xcea   : > { %v16924_v42 = vpop.f32.mrb[36].mxu0 }
 0xceb   : > { %v16925_v41 = vpop.f32.mrb[37].mxu0  ;;  %17163 = vmatpush3.bf16.msra.mxu1 %v19843_v32  ;;  %v23393_v34 = vadd.f32 %v23273_v49, %v12928_v38  ;;  %v19854_v49 = vld [vmem:[%s25855_s3 + $0xcc8] sm:$0xff]   ;;  %v19882_v38 = vld [vmem:[%s25855_s3 + $0xdc0] sm:$0xff]  }
 0xcec   : > { %v23395_v62 = vadd.f32 %v16925_v41, %v16924_v42  ;;  %v16927_v50 = vpop.f32.mrb[38].mxu0  ;;  %17227 = vmatpush3.bf16.msra.mxu0 %v19841_v37  ;;  %17164 = vmatprep.subr.bf16.mxu1 %v19846_v12  ;;  %v19877_v12 = vld [vmem:[%s25855_s3 + $0xe30] sm:$0xff]   ;;  %v19880_v42 = vld [vmem:[%s25855_s3 + $0xe78] sm:$0xff]   ;;  %v23530_v41 = vrot.slane %v5820_v10, %v21781_v7 }
 0xced   : > { %v16928_v23 = vpop.f32.mrb[39].mxu0  ;;  %17228 = vmatprep.subr.bf16.mxu0 %v19844_v40  ;;  %v5819_v50 = vcombine.high %v23322_v57, %v23322_v57  ;;  %v23558_v57 = vrot.slane %v23408_v54, %v21781_v7  ;;  %v19892_v54 = vld [vmem:[%s25855_s3 + $0xd90] sm:$0xff]  }
 0xcee   : > { %v19885_v23 = vld [vmem:[%s25855_s3 + $0xf00] sm:$0xff]  }
 0xcef   : > { %17165 = vmatpush3.bf16.msra.mxu1 %v19847_v13  ;;  %v19883_v13 = vld [vmem:[%s25855_s3 + $0xd80] sm:$0xff]  }
 0xcf0   : > { %17229 = vmatpush3.bf16.msra.mxu0 %v19845_v47  ;;  %17194 = vmatprep.subr.bf16.mxu1 %v19850_v51  ;;  %v19884_v47 = vld [vmem:[%s25855_s3 + $0xf40] sm:$0xff]   ;;  %v5836_v51 = vcombine.high %v23530_v41, %v23530_v41 }
 0xcf1   : > { %17230 = vmatprep.subr.bf16.mxu0 %v19848_v25  ;;  %v19889_v25 = vld [vmem:[%s25855_s3 + $0xf48] sm:$0xff]  }
 0xcf2   : > { %13486 = vmatmul.mubr.bf16.vlgmr.msra.gmra.mrb[80].mxu1 %v5768_v46  ;;  %v19890_v46 = vld [vmem:[%s25855_s3 + $0xf08] sm:$0xff]  }
 0xcf3   : > { %17195 = vmatpush3.bf16.msra.mxu1 %v19851_v59  ;;  %13565 = vmatprep.mubr.bf16.mxu1 %v5818_v27  ;;  %v19891_v59 = vld [vmem:[%s25855_s3 + $0xdd0] sm:$0xff]  }
 0xcf4   : > { %17231 = vmatpush3.bf16.msra.mxu0 %v19849_v53  ;;  %17196 = vmatprep.subr.bf16.mxu1 %v19854_v49  ;;  %v23567_v53 = vrot.slane %v5836_v51, %v21781_v7  ;;  %v19895_v49 = vld [vmem:[%s25855_s3 + $0xdd8] sm:$0xff]   ;;  %v19893_v27 = vld [vmem:[%s25855_s3 + $0xf50] sm:$0xff]  }
 0xcf5   : > { %17260 = vmatprep.subr.bf16.mxu0 %v19852_v56  ;;  %v19896_v56 = vld [vmem:[%s25855_s3 + $0xd98] sm:$0xff]   ;;  %v19926_v51 = vld [vmem:[%s25855_s3 + $0x1010] sm:$0xff]  }
 0xcf7   : > { %13606 = vmatmul.mubr.bf16.vlgmr.msra.gmra.mrb[64].mxu0 %v23436_v14  ;;  %17197 = vmatpush3.bf16.msra.mxu1 %v19855_v48  ;;  %v19899_v48 = vld [vmem:[%s25855_s3 + $0xde0] sm:$0xff]  }
 0xcf8   : > { %17261 = vmatpush3.bf16.msra.mxu0 %v19853_v58  ;;  %13685 = vmatprep.mubr.bf16.mxu0 %v23445_v1  ;;  %v19897_v58 = vld [vmem:[%s25855_s3 + $0xf58] sm:$0xff]  }
 0xcf9   : > { %17262 = vmatprep.subr.bf16.mxu0 %v19856_v16  ;;  %17198 = vmatprep.subr.bf16.mxu1 %v19858_v52  ;;  %v19900_v16 = vld [vmem:[%s25855_s3 + $0xda0] sm:$0xff]   ;;  %v19898_v52 = vld [vmem:[%s25855_s3 + $0xf18] sm:$0xff]  }
 0xcfb   : > { %17199 = vmatpush3.bf16.msra.mxu1 %v19859_v45  ;;  %v19903_v45 = vld [vmem:[%s25855_s3 + $0xde8] sm:$0xff]  }
 0xcfc   : > { %17263 = vmatpush3.bf16.msra.mxu0 %v19857_v2  ;;  %17200 = vmatprep.subr.bf16.mxu1 %v19862_v4  ;;  %v19901_v2 = vld [vmem:[%s25855_s3 + $0xf60] sm:$0xff]   ;;  %v19904_v4 = vld [vmem:[%s25855_s3 + $0xda8] sm:$0xff]  }
 0xcfd   : > { %17264 = vmatprep.subr.bf16.mxu0 %v19860_v29  ;;  %v19902_v29 = vld [vmem:[%s25855_s3 + $0xf20] sm:$0xff]  }
 0xcff   : > { %17201 = vmatpush3.bf16.msra.mxu1 %v19863_v19  ;;  %v19907_v19 = vld [vmem:[%s25855_s3 + $0xdf0] sm:$0xff]  }
 0xd00   : > { %17265 = vmatpush3.bf16.msra.mxu0 %v19861_v39  ;;  %17202 = vmatprep.subr.bf16.mxu1 %v19866_v61  ;;  %v19905_v61 = vld [vmem:[%s25855_s3 + $0xf68] sm:$0xff]  }
 0xd01   : > { %17266 = vmatprep.subr.bf16.mxu0 %v19864_v36 }
 0xd03   : > { %17203 = vmatpush3.bf16.msra.mxu1 %v19867_v5 }
 0xd04   : > { %17267 = vmatpush3.bf16.msra.mxu0 %v19865_v26  ;;  %17204 = vmatprep.subr.bf16.mxu1 %v19870_v6  ;;  %v19908_v6 = vld [vmem:[%s25855_s3 + $0xdb0] sm:$0xff]  }
 0xd05   : > { %17268 = vmatprep.subr.bf16.mxu0 %v19868_v9  ;;  %v16902_v21 = vpop.f32.mrb[56].mxu1 }
 0xd06   : > { %v16903_v8 = vpop.f32.mrb[57].mxu1 }
 0xd07   : > { %v16904_v55 = vadd.f32 %v16903_v8, %v16902_v21  ;;  %v16905_v63 = vpop.f32.mrb[58].mxu1  ;;  %17205 = vmatpush3.bf16.msra.mxu1 %v19871_v60  ;;  %v19906_v60 = vld [vmem:[%s25855_s3 + $0xf28] sm:$0xff]   ;;  %v19909_v21 = vld [vmem:[%s25855_s3 + $0xf70] sm:$0xff]  }
 0xd08   : > { %17269 = vmatpush3.bf16.msra.mxu0 %v19869_v35  ;;  %v16906_v0 = vpop.f32.mrb[59].mxu1  ;;  %17206 = vmatprep.subr.bf16.mxu1 %v19874_v15  ;;  %v19911_v35 = vld [vmem:[%s25855_s3 + $0xdf8] sm:$0xff]   ;;  %v23635_v63 = vld [vmem:[#allocation6 + $0x40] sm:$0xff] }
 0xd09   : > { %v13008_v3 = vadd.f32 %v16904_v55, %v23393_v34  ;;  %17270 = vmatprep.subr.bf16.mxu0 %v19872_v28  ;;  %v5816_v34 = vcombine.high %v23313_v33, %v23313_v33  ;;  %v19888_v33 = vld [vmem:[%s25855_s3 + $0xd88] sm:$0xff]   ;;  %v19912_v55 = vld [vmem:[%s25855_s3 + $0xdb8] sm:$0xff]   ;;  %v23653_v10 = vrot.slane %v23635_v63, %v21781_v7 }
 0xd0a   : > { %v16968_v18 = vpop.f32.mrb[40].mxu0 }
 0xd0b   : > { %v16969_v30 = vpop.f32.mrb[41].mxu0  ;;  %17207 = vmatpush3.bf16.msra.mxu1 %v19875_v11  ;;  %v23516_v32 = vadd.f32 %v23395_v62, %v13008_v3  ;;  %v19887_v62 = vld [vmem:[%s25855_s3 + $0xdc8] sm:$0xff]   ;;  %v19915_v3 = vld [vmem:[%s25855_s3 + $0xec0] sm:$0xff]  }
 0xd0c   : > { %v23518_v31 = vadd.f32 %v16969_v30, %v16968_v18  ;;  %v16971_v37 = vpop.f32.mrb[42].mxu0  ;;  %17271 = vmatpush3.bf16.msra.mxu0 %v19873_v17  ;;  %17208 = vmatprep.subr.bf16.mxu1 %v19878_v20  ;;  %v19910_v20 = vld [vmem:[%s25855_s3 + $0xf30] sm:$0xff]   ;;  %v19913_v18 = vld [vmem:[%s25855_s3 + $0xf78] sm:$0xff]   ;;  %v19916_v30 = vld [vmem:[%s25855_s3 + $0xe80] sm:$0xff]  }
 0xd0d   : > { %v16972_v40 = vpop.f32.mrb[43].mxu0  ;;  %17272 = vmatprep.subr.bf16.mxu0 %v19876_v22  ;;  %v5867_v37 = vcombine.high %v23445_v1, %v23445_v1  ;;  %v23681_v1 = vrot.slane %v23530_v41, %v21781_v7  ;;  %v19924_v41 = vld [vmem:[%s25855_s3 + $0xe90] sm:$0xff]  }
 0xd0e   : > { %v19918_v40 = vld [vmem:[%s25855_s3 + $0x1000] sm:$0xff]  }
 0xd0f   : > { %17209 = vmatpush3.bf16.msra.mxu1 %v19879_v24  ;;  %v19914_v24 = vld [vmem:[%s25855_s3 + $0xf38] sm:$0xff]  }
 0xd10   : > { %17273 = vmatpush3.bf16.msra.mxu0 %v19877_v12  ;;  %17238 = vmatprep.subr.bf16.mxu1 %v19882_v38  ;;  %v19917_v12 = vld [vmem:[%s25855_s3 + $0x1040] sm:$0xff]   ;;  %v5884_v38 = vcombine.high %v23653_v10, %v23653_v10 }
 0xd11   : > { %17274 = vmatprep.subr.bf16.mxu0 %v19880_v42  ;;  %v19921_v42 = vld [vmem:[%s25855_s3 + $0x1048] sm:$0xff]  }
 0xd12   : > { %13566 = vmatmul.mubr.bf16.vlgmr.msra.gmra.mrb[84].mxu1 %v5816_v34  ;;  %v19922_v34 = vld [vmem:[%s25855_s3 + $0x1008] sm:$0xff]  }
 0xd13   : > { %17239 = vmatpush3.bf16.msra.mxu1 %v19883_v13  ;;  %13645 = vmatprep.mubr.bf16.mxu1 %v5819_v50  ;;  %v19923_v13 = vld [vmem:[%s25855_s3 + $0xed0] sm:$0xff]  }
 0xd14   : > { %17275 = vmatpush3.bf16.msra.mxu0 %v19881_v44  ;;  %17240 = vmatprep.subr.bf16.mxu1 %v19887_v62  ;;  %v23690_v44 = vrot.slane %v5884_v38, %v21781_v7  ;;  %v19927_v62 = vld [vmem:[%s25855_s3 + $0xed8] sm:$0xff]   ;;  %v19925_v50 = vld [vmem:[%s25855_s3 + $0x1050] sm:$0xff]  }
 0xd15   : > { %17304 = vmatprep.subr.bf16.mxu0 %v19884_v47  ;;  %v19928_v47 = vld [vmem:[%s25855_s3 + $0xe98] sm:$0xff]   ;;  %v19959_v38 = vld [vmem:[%s25855_s3 + $0x1110] sm:$0xff]  }
 0xd17   : > { %13686 = vmatmul.mubr.bf16.vlgmr.msra.gmra.mrb[68].mxu0 %v23558_v57  ;;  %17241 = vmatpush3.bf16.msra.mxu1 %v19888_v33  ;;  %v19931_v33 = vld [vmem:[%s25855_s3 + $0xee0] sm:$0xff]  }
 0xd18   : > { %17305 = vmatpush3.bf16.msra.mxu0 %v19885_v23  ;;  %13765 = vmatprep.mubr.bf16.mxu0 %v23567_v53  ;;  %v19929_v23 = vld [vmem:[%s25855_s3 + $0x1058] sm:$0xff]  }
 0xd19   : > { %17306 = vmatprep.subr.bf16.mxu0 %v19889_v25  ;;  %17242 = vmatprep.subr.bf16.mxu1 %v19891_v59  ;;  %v19932_v25 = vld [vmem:[%s25855_s3 + $0xea0] sm:$0xff]   ;;  %v19930_v59 = vld [vmem:[%s25855_s3 + $0x1018] sm:$0xff]  }
 0xd1b   : > { %17243 = vmatpush3.bf16.msra.mxu1 %v19892_v54  ;;  %v19935_v54 = vld [vmem:[%s25855_s3 + $0xee8] sm:$0xff]  }
 0xd1c   : > { %17307 = vmatpush3.bf16.msra.mxu0 %v19890_v46  ;;  %17244 = vmatprep.subr.bf16.mxu1 %v19895_v49  ;;  %v19933_v46 = vld [vmem:[%s25855_s3 + $0x1060] sm:$0xff]   ;;  %v19936_v49 = vld [vmem:[%s25855_s3 + $0xea8] sm:$0xff]  }
 0xd1d   : > { %17308 = vmatprep.subr.bf16.mxu0 %v19893_v27  ;;  %v19934_v27 = vld [vmem:[%s25855_s3 + $0x1020] sm:$0xff]  }
 0xd1f   : > { %17245 = vmatpush3.bf16.msra.mxu1 %v19896_v56  ;;  %v19939_v56 = vld [vmem:[%s25855_s3 + $0xef0] sm:$0xff]  }
 0xd20   : > { %17309 = vmatpush3.bf16.msra.mxu0 %v19894_v43  ;;  %17246 = vmatprep.subr.bf16.mxu1 %v19899_v48  ;;  %v19937_v48 = vld [vmem:[%s25855_s3 + $0x1068] sm:$0xff]  }
 0xd21   : > { %17310 = vmatprep.subr.bf16.mxu0 %v19897_v58 }
 0xd23   : > { %17247 = vmatpush3.bf16.msra.mxu1 %v19900_v16 }
 0xd24   : > { %17311 = vmatpush3.bf16.msra.mxu0 %v19898_v52  ;;  %17248 = vmatprep.subr.bf16.mxu1 %v19903_v45  ;;  %v19940_v45 = vld [vmem:[%s25855_s3 + $0xeb0] sm:$0xff]  }
 0xd25   : > { %17312 = vmatprep.subr.bf16.mxu0 %v19901_v2  ;;  %v16946_v39 = vpop.f32.mrb[60].mxu1 }
 0xd26   : > { %v16947_v36 = vpop.f32.mrb[61].mxu1 }
 0xd27   : > { %v16948_v5 = vadd.f32 %v16947_v36, %v16946_v39  ;;  %v16949_v26 = vpop.f32.mrb[62].mxu1  ;;  %17249 = vmatpush3.bf16.msra.mxu1 %v19904_v4  ;;  %v19938_v4 = vld [vmem:[%s25855_s3 + $0x1028] sm:$0xff]   ;;  %v19941_v39 = vld [vmem:[%s25855_s3 + $0x1070] sm:$0xff]   ;;  %v5869_v36 = vcombine.high %v23635_v63, %v23635_v63  ;;  %v19946_v63 = vld [vmem:[%s25855_s3 + $0x1038] sm:$0xff]  }
 0xd28   : > { %17313 = vmatpush3.bf16.msra.mxu0 %v19902_v29  ;;  %v16950_v9 = vpop.f32.mrb[63].mxu1  ;;  %17250 = vmatprep.subr.bf16.mxu1 %v19907_v19  ;;  %v19943_v29 = vld [vmem:[%s25855_s3 + $0xef8] sm:$0xff]  }
 0xd29   : > { %v13088_v15 = vadd.f32 %v16948_v5, %v23516_v32  ;;  %17314 = vmatprep.subr.bf16.mxu0 %v19905_v61  ;;  %v5817_v32 = vcombine.high %v23436_v14, %v23436_v14  ;;  %v19920_v14 = vld [vmem:[%s25855_s3 + $0xe88] sm:$0xff]   ;;  %v19944_v26 = vld [vmem:[%s25855_s3 + $0xeb8] sm:$0xff]  }
 0xd2a   : > { %v17012_v28 = vpop.f32.mrb[44].mxu0 }
 0xd2b   : > { %v17013_v8 = vpop.f32.mrb[45].mxu0  ;;  %17251 = vmatpush3.bf16.msra.mxu1 %v19908_v6  ;;  %v23638_v11 = vadd.f32 %v23518_v31, %v13088_v15  ;;  %v19919_v31 = vld [vmem:[%s25855_s3 + $0xec8] sm:$0xff]   ;;  %v19947_v15 = vld [vmem:[%s25855_s3 + $0xfc0] sm:$0xff]  }
 0xd2c   : > { %v23640_v0 = vadd.f32 %v17013_v8, %v17012_v28  ;;  %v17015_v17 = vpop.f32.mrb[46].mxu0  ;;  %17315 = vmatpush3.bf16.msra.mxu0 %v19906_v60  ;;  %17252 = vmatprep.subr.bf16.mxu1 %v19911_v35  ;;  %v19942_v35 = vld [vmem:[%s25855_s3 + $0x1030] sm:$0xff]   ;;  %v19945_v28 = vld [vmem:[%s25855_s3 + $0x1078] sm:$0xff]   ;;  %v23775_v8 = vrot.slane %v5869_v36, %v21781_v7 }
 0xd2d   : > { %v17016_v22 = vpop.f32.mrb[47].mxu0  ;;  %17316 = vmatprep.subr.bf16.mxu0 %v19909_v21  ;;  %v5868_v17 = vcombine.high %v23567_v53, %v23567_v53  ;;  %v23803_v53 = vrot.slane %v23653_v10, %v21781_v7  ;;  %v19957_v10 = vld [vmem:[%s25855_s3 + $0xf90] sm:$0xff]  }
 0xd2e   : > { %v19950_v22 = vld [vmem:[%s25855_s3 + $0x1100] sm:$0xff]  }
 0xd2f   : > { %17253 = vmatpush3.bf16.msra.mxu1 %v19912_v55  ;;  %v19948_v55 = vld [vmem:[%s25855_s3 + $0xf80] sm:$0xff]  }
 0xd30   : > { %17317 = vmatpush3.bf16.msra.mxu0 %v19910_v20  ;;  %17282 = vmatprep.subr.bf16.mxu1 %v19915_v3  ;;  %v19949_v20 = vld [vmem:[%s25855_s3 + $0x1140] sm:$0xff]   ;;  %v5885_v3 = vcombine.high %v23775_v8, %v23775_v8 }
 0xd31   : > { %17318 = vmatprep.subr.bf16.mxu0 %v19913_v18  ;;  %v19954_v18 = vld [vmem:[%s25855_s3 + $0x1148] sm:$0xff]  }
 0xd32   : > { %13646 = vmatmul.mubr.bf16.vlgmr.msra.gmra.mrb[88].mxu1 %v5817_v32  ;;  %v19955_v32 = vld [vmem:[%s25855_s3 + $0x1108] sm:$0xff]  }
 0xd33   : > { %17283 = vmatpush3.bf16.msra.mxu1 %v19916_v30  ;;  %13725 = vmatprep.mubr.bf16.mxu1 %v5867_v37  ;;  %v19956_v30 = vld [vmem:[%s25855_s3 + $0xfd0] sm:$0xff]  }
 0xd34   : > { %17319 = vmatpush3.bf16.msra.mxu0 %v19914_v24  ;;  %17284 = vmatprep.subr.bf16.mxu1 %v19919_v31  ;;  %v23812_v24 = vrot.slane %v5885_v3, %v21781_v7  ;;  %v19960_v31 = vld [vmem:[%s25855_s3 + $0xfd8] sm:$0xff]   ;;  %v19958_v37 = vld [vmem:[%s25855_s3 + $0x1150] sm:$0xff]  }
 0xd35   : > { %17348 = vmatprep.subr.bf16.mxu0 %v19917_v12  ;;  %v19961_v12 = vld [vmem:[%s25855_s3 + $0xf98] sm:$0xff]   ;;  %v19991_v3 = vld [vmem:[%s25855_s3 + $0x1210] sm:$0xff]  }
 0xd37   : > { %13766 = vmatmul.mubr.bf16.vlgmr.msra.gmra.mrb[72].mxu0 %v23681_v1  ;;  %17285 = vmatpush3.bf16.msra.mxu1 %v19920_v14  ;;  %v19964_v14 = vld [vmem:[%s25855_s3 + $0xfe0] sm:$0xff]  }
 0xd38   : > { %17349 = vmatpush3.bf16.msra.mxu0 %v19918_v40  ;;  %13845 = vmatprep.mubr.bf16.mxu0 %v23690_v44  ;;  %v19962_v40 = vld [vmem:[%s25855_s3 + $0x1158] sm:$0xff]  }
 0xd39   : > { %17350 = vmatprep.subr.bf16.mxu0 %v19921_v42  ;;  %17286 = vmatprep.subr.bf16.mxu1 %v19923_v13  ;;  %v19965_v42 = vld [vmem:[%s25855_s3 + $0xfa0] sm:$0xff]   ;;  %v19963_v13 = vld [vmem:[%s25855_s3 + $0x1118] sm:$0xff]  }
 0xd3b   : > { %17287 = vmatpush3.bf16.msra.mxu1 %v19924_v41  ;;  %v19968_v41 = vld [vmem:[%s25855_s3 + $0xfe8] sm:$0xff]  }
 0xd3c   : > { %17351 = vmatpush3.bf16.msra.mxu0 %v19922_v34  ;;  %17288 = vmatprep.subr.bf16.mxu1 %v19927_v62  ;;  %v19966_v34 = vld [vmem:[%s25855_s3 + $0x1160] sm:$0xff]   ;;  %v19969_v62 = vld [vmem:[%s25855_s3 + $0xfa8] sm:$0xff]  }
 0xd3d   : > { %17352 = vmatprep.subr.bf16.mxu0 %v19925_v50  ;;  %v19967_v50 = vld [vmem:[%s25855_s3 + $0x1120] sm:$0xff]  }
 0xd3f   : > { %17289 = vmatpush3.bf16.msra.mxu1 %v19928_v47  ;;  %v19972_v47 = vld [vmem:[%s25855_s3 + $0xff0] sm:$0xff]  }
 0xd40   : > { %17353 = vmatpush3.bf16.msra.mxu0 %v19926_v51  ;;  %17290 = vmatprep.subr.bf16.mxu1 %v19931_v33  ;;  %v19970_v33 = vld [vmem:[%s25855_s3 + $0x1168] sm:$0xff]  }
 0xd41   : > { %17354 = vmatprep.subr.bf16.mxu0 %v19929_v23 }
 0xd43   : > { %17291 = vmatpush3.bf16.msra.mxu1 %v19932_v25 }
 0xd44   : > { %17355 = vmatpush3.bf16.msra.mxu0 %v19930_v59  ;;  %17292 = vmatprep.subr.bf16.mxu1 %v19935_v54  ;;  %v19973_v54 = vld [vmem:[%s25855_s3 + $0xfb0] sm:$0xff]  }
 0xd45   : > { %17356 = vmatprep.subr.bf16.mxu0 %v19933_v46  ;;  %v16990_v43 = vpop.f32.mrb[64].mxu1 }
 0xd46   : > { %v16991_v58 = vpop.f32.mrb[65].mxu1 }
 0xd47   : > { %v16992_v16 = vadd.f32 %v16991_v58, %v16990_v43  ;;  %v16993_v52 = vpop.f32.mrb[66].mxu1  ;;  %17293 = vmatpush3.bf16.msra.mxu1 %v19936_v49  ;;  %v19971_v49 = vld [vmem:[%s25855_s3 + $0x1128] sm:$0xff]   ;;  %v19974_v43 = vld [vmem:[%s25855_s3 + $0x1170] sm:$0xff]  }
 0xd48   : > { %17357 = vmatpush3.bf16.msra.mxu0 %v19934_v27  ;;  %v16994_v2 = vpop.f32.mrb[67].mxu1  ;;  %17294 = vmatprep.subr.bf16.mxu1 %v19939_v56  ;;  %v19976_v27 = vld [vmem:[%s25855_s3 + $0xff8] sm:$0xff]  }
 0xd49   : > { %v13168_v19 = vadd.f32 %v16992_v16, %v23638_v11  ;;  %17358 = vmatprep.subr.bf16.mxu0 %v19937_v48  ;;  %v5865_v11 = vcombine.high %v23558_v57, %v23558_v57  ;;  %v19953_v57 = vld [vmem:[%s25855_s3 + $0xf88] sm:$0xff]   ;;  %v19977_v16 = vld [vmem:[%s25855_s3 + $0xfb8] sm:$0xff]  }
 0xd4a   : > { %v17056_v61 = vpop.f32.mrb[48].mxu0  ;;  %v23880_v52 = vld [vmem:[#allocation6 + $0x48] sm:$0xff] }
 0xd4b   : > { %v17057_v5 = vpop.f32.mrb[49].mxu0  ;;  %17295 = vmatpush3.bf16.msra.mxu1 %v19940_v45  ;;  %v23761_v6 = vadd.f32 %v23640_v0, %v13168_v19  ;;  %v19952_v0 = vld [vmem:[%s25855_s3 + $0xfc8] sm:$0xff]   ;;  %v19980_v19 = vld [vmem:[%s25855_s3 + $0x10c0] sm:$0xff]   ;;  %v23898_v36 = vrot.slane %v23880_v52, %v21781_v7 }
 0xd4c   : > { %v23763_v9 = vadd.f32 %v17057_v5, %v17056_v61  ;;  %v17059_v60 = vpop.f32.mrb[50].mxu0  ;;  %17359 = vmatpush3.bf16.msra.mxu0 %v19938_v4  ;;  %17296 = vmatprep.subr.bf16.mxu1 %v19943_v29  ;;  %v19975_v29 = vld [vmem:[%s25855_s3 + $0x1130] sm:$0xff]   ;;  %v19978_v61 = vld [vmem:[%s25855_s3 + $0x1178] sm:$0xff]   ;;  %v19981_v5 = vld [vmem:[%s25855_s3 + $0x1080] sm:$0xff]  }
 0xd4d   : > { %v17060_v21 = vpop.f32.mrb[51].mxu0  ;;  %17360 = vmatprep.subr.bf16.mxu0 %v19941_v39  ;;  %v5916_v60 = vcombine.high %v23690_v44, %v23690_v44  ;;  %v23926_v44 = vrot.slane %v23775_v8, %v21781_v7  ;;  %v19989_v8 = vld [vmem:[%s25855_s3 + $0x1090] sm:$0xff]  }
 0xd4e   : > { %v19983_v21 = vld [vmem:[%s25855_s3 + $0x1200] sm:$0xff]  }
 0xd4f   : > { %17297 = vmatpush3.bf16.msra.mxu1 %v19944_v26  ;;  %v19979_v26 = vld [vmem:[%s25855_s3 + $0x1138] sm:$0xff]  }
 0xd50   : > { %17361 = vmatpush3.bf16.msra.mxu0 %v19942_v35  ;;  %17326 = vmatprep.subr.bf16.mxu1 %v19947_v15  ;;  %v19982_v35 = vld [vmem:[%s25855_s3 + $0x1240] sm:$0xff]   ;;  %v5933_v15 = vcombine.high %v23898_v36, %v23898_v36 }
 0xd51   : > { %17362 = vmatprep.subr.bf16.mxu0 %v19945_v28  ;;  %v19986_v28 = vld [vmem:[%s25855_s3 + $0x1248] sm:$0xff]  }
 0xd52   : > { %13726 = vmatmul.mubr.bf16.vlgmr.msra.gmra.mrb[92].mxu1 %v5865_v11  ;;  %v19987_v11 = vld [vmem:[%s25855_s3 + $0x1208] sm:$0xff]  }
 0xd53   : > { %17327 = vmatpush3.bf16.msra.mxu1 %v19948_v55  ;;  %13805 = vmatprep.mubr.bf16.mxu1 %v5868_v17  ;;  %v19988_v55 = vld [vmem:[%s25855_s3 + $0x10d0] sm:$0xff]  }
 0xd54   : > { %17363 = vmatpush3.bf16.msra.mxu0 %v19946_v63  ;;  %17328 = vmatprep.subr.bf16.mxu1 %v19952_v0  ;;  %v23935_v63 = vrot.slane %v5933_v15, %v21781_v7  ;;  %v19992_v0 = vld [vmem:[%s25855_s3 + $0x10d8] sm:$0xff]   ;;  %v19990_v17 = vld [vmem:[%s25855_s3 + $0x1250] sm:$0xff]  }
 0xd55   : > { %17392 = vmatprep.subr.bf16.mxu0 %v19949_v20  ;;  %v19993_v20 = vld [vmem:[%s25855_s3 + $0x1098] sm:$0xff]   ;;  %v20024_v15 = vld [vmem:[%s25855_s3 + $0x1310] sm:$0xff]  }
 0xd57   : > { %13846 = vmatmul.mubr.bf16.vlgmr.msra.gmra.mrb[76].mxu0 %v23803_v53  ;;  %17329 = vmatpush3.bf16.msra.mxu1 %v19953_v57  ;;  %v19996_v57 = vld [vmem:[%s25855_s3 + $0x10e0] sm:$0xff]  }
 0xd58   : > { %17393 = vmatpush3.bf16.msra.mxu0 %v19950_v22  ;;  %13925 = vmatprep.mubr.bf16.mxu0 %v23812_v24  ;;  %v19994_v22 = vld [vmem:[%s25855_s3 + $0x1258] sm:$0xff]  }
 0xd59   : > { %17394 = vmatprep.subr.bf16.mxu0 %v19954_v18  ;;  %17330 = vmatprep.subr.bf16.mxu1 %v19956_v30  ;;  %v19997_v18 = vld [vmem:[%s25855_s3 + $0x10a0] sm:$0xff]   ;;  %v19995_v30 = vld [vmem:[%s25855_s3 + $0x1218] sm:$0xff]  }
 0xd5b   : > { %17331 = vmatpush3.bf16.msra.mxu1 %v19957_v10  ;;  %v20000_v10 = vld [vmem:[%s25855_s3 + $0x10e8] sm:$0xff]  }
 0xd5c   : > { %17395 = vmatpush3.bf16.msra.mxu0 %v19955_v32  ;;  %17332 = vmatprep.subr.bf16.mxu1 %v19960_v31  ;;  %v19998_v32 = vld [vmem:[%s25855_s3 + $0x1260] sm:$0xff]   ;;  %v20001_v31 = vld [vmem:[%s25855_s3 + $0x10a8] sm:$0xff]  }
 0xd5d   : > { %17396 = vmatprep.subr.bf16.mxu0 %v19958_v37  ;;  %v19999_v37 = vld [vmem:[%s25855_s3 + $0x1220] sm:$0xff]  }
 0xd5f   : > { %17333 = vmatpush3.bf16.msra.mxu1 %v19961_v12  ;;  %v20004_v12 = vld [vmem:[%s25855_s3 + $0x10f0] sm:$0xff]  }
 0xd60   : > { %17397 = vmatpush3.bf16.msra.mxu0 %v19959_v38  ;;  %17334 = vmatprep.subr.bf16.mxu1 %v19964_v14  ;;  %v20002_v14 = vld [vmem:[%s25855_s3 + $0x1268] sm:$0xff]  }
 0xd61   : > { %17398 = vmatprep.subr.bf16.mxu0 %v19962_v40 }
 0xd63   : > { %17335 = vmatpush3.bf16.msra.mxu1 %v19965_v42 }
 0xd64   : > { %17399 = vmatpush3.bf16.msra.mxu0 %v19963_v13  ;;  %17336 = vmatprep.subr.bf16.mxu1 %v19968_v41  ;;  %v20005_v41 = vld [vmem:[%s25855_s3 + $0x10b0] sm:$0xff]  }
 0xd65   : > { %17400 = vmatprep.subr.bf16.mxu0 %v19966_v34  ;;  %v17034_v51 = vpop.f32.mrb[68].mxu1 }
 0xd66   : > { %v17035_v23 = vpop.f32.mrb[69].mxu1 }
 0xd67   : > { %v17036_v25 = vadd.f32 %v17035_v23, %v17034_v51  ;;  %v17037_v59 = vpop.f32.mrb[70].mxu1  ;;  %17337 = vmatpush3.bf16.msra.mxu1 %v19969_v62  ;;  %v20003_v62 = vld [vmem:[%s25855_s3 + $0x1228] sm:$0xff]   ;;  %v20006_v51 = vld [vmem:[%s25855_s3 + $0x1270] sm:$0xff]   ;;  %v5918_v23 = vcombine.high %v23880_v52, %v23880_v52  ;;  %v20011_v52 = vld [vmem:[%s25855_s3 + $0x1238] sm:$0xff]  }
 0xd68   : > { %17401 = vmatpush3.bf16.msra.mxu0 %v19967_v50  ;;  %v17038_v46 = vpop.f32.mrb[71].mxu1  ;;  %17338 = vmatprep.subr.bf16.mxu1 %v19972_v47  ;;  %v20008_v50 = vld [vmem:[%s25855_s3 + $0x10f8] sm:$0xff]  }
 0xd69   : > { %v13248_v56 = vadd.f32 %v17036_v25, %v23761_v6  ;;  %17402 = vmatprep.subr.bf16.mxu0 %v19970_v33  ;;  %v5866_v6 = vcombine.high %v23681_v1, %v23681_v1  ;;  %v19985_v1 = vld [vmem:[%s25855_s3 + $0x1088] sm:$0xff]   ;;  %v20009_v59 = vld [vmem:[%s25855_s3 + $0x10b8] sm:$0xff]  }
 0xd6a   : > { %v17100_v48 = vpop.f32.mrb[52].mxu0 }
 0xd6b   : > { %v17101_v58 = vpop.f32.mrb[53].mxu0  ;;  %17339 = vmatpush3.bf16.msra.mxu1 %v19973_v54  ;;  %v23883_v45 = vadd.f32 %v23763_v9, %v13248_v56  ;;  %v19984_v9 = vld [vmem:[%s25855_s3 + $0x10c8] sm:$0xff]   ;;  %v20012_v56 = vld [vmem:[%s25855_s3 + $0x11c0] sm:$0xff]  }
 0xd6c   : > { %v23885_v2 = vadd.f32 %v17101_v58, %v17100_v48  ;;  %v17103_v4 = vpop.f32.mrb[54].mxu0  ;;  %17403 = vmatpush3.bf16.msra.mxu0 %v19971_v49  ;;  %17340 = vmatprep.subr.bf16.mxu1 %v19976_v27  ;;  %v20007_v27 = vld [vmem:[%s25855_s3 + $0x1230] sm:$0xff]   ;;  %v20010_v48 = vld [vmem:[%s25855_s3 + $0x1278] sm:$0xff]   ;;  %v24020_v58 = vrot.slane %v5918_v23, %v21781_v7 }
 0xd6d   : > { %v17104_v39 = vpop.f32.mrb[55].mxu0  ;;  %17404 = vmatprep.subr.bf16.mxu0 %v19974_v43  ;;  %v5917_v4 = vcombine.high %v23812_v24, %v23812_v24  ;;  %v24048_v24 = vrot.slane %v23898_v36, %v21781_v7  ;;  %v20022_v36 = vld [vmem:[%s25855_s3 + $0x1190] sm:$0xff]  }
 0xd6e   : > { %v20015_v39 = vld [vmem:[%s25855_s3 + $0x1300] sm:$0xff]  }
 0xd6f   : > { %17341 = vmatpush3.bf16.msra.mxu1 %v19977_v16  ;;  %v20013_v16 = vld [vmem:[%s25855_s3 + $0x1180] sm:$0xff]  }
 0xd70   : > { %17405 = vmatpush3.bf16.msra.mxu0 %v19975_v29  ;;  %17370 = vmatprep.subr.bf16.mxu1 %v19980_v19  ;;  %v20014_v29 = vld [vmem:[%s25855_s3 + $0x1340] sm:$0xff]   ;;  %v5934_v19 = vcombine.high %v24020_v58, %v24020_v58 }
 0xd71   : > { %17406 = vmatprep.subr.bf16.mxu0 %v19978_v61  ;;  %v20019_v61 = vld [vmem:[%s25855_s3 + $0x1348] sm:$0xff]  }
 0xd72   : > { %13806 = vmatmul.mubr.bf16.vlgmr.msra.gmra.mrb[96].mxu1 %v5866_v6  ;;  %v20020_v6 = vld [vmem:[%s25855_s3 + $0x1308] sm:$0xff]  }
 0xd73   : > { %17371 = vmatpush3.bf16.msra.mxu1 %v19981_v5  ;;  %13885 = vmatprep.mubr.bf16.mxu1 %v5916_v60  ;;  %v20021_v5 = vld [vmem:[%s25855_s3 + $0x11d0] sm:$0xff]  }
 0xd74   : > { %17407 = vmatpush3.bf16.msra.mxu0 %v19979_v26  ;;  %17372 = vmatprep.subr.bf16.mxu1 %v19984_v9  ;;  %v24057_v26 = vrot.slane %v5934_v19, %v21781_v7  ;;  %v20025_v9 = vld [vmem:[%s25855_s3 + $0x11d8] sm:$0xff]   ;;  %v20023_v60 = vld [vmem:[%s25855_s3 + $0x1350] sm:$0xff]  }
 0xd75   : > { %17436 = vmatprep.subr.bf16.mxu0 %v19982_v35  ;;  %v20026_v35 = vld [vmem:[%s25855_s3 + $0x1198] sm:$0xff]   ;;  %v20056_v19 = vld [vmem:[%s25855_s3 + $0x1410] sm:$0xff]  }
 0xd77   : > { %13926 = vmatmul.mubr.bf16.vlgmr.msra.gmra.mrb[80].mxu0 %v23926_v44  ;;  %17373 = vmatpush3.bf16.msra.mxu1 %v19985_v1  ;;  %v20029_v1 = vld [vmem:[%s25855_s3 + $0x11e0] sm:$0xff]  }
 0xd78   : > { %17437 = vmatpush3.bf16.msra.mxu0 %v19983_v21  ;;  %14005 = vmatprep.mubr.bf16.mxu0 %v23935_v63  ;;  %v20027_v21 = vld [vmem:[%s25855_s3 + $0x1358] sm:$0xff]  }
 0xd79   : > { %17438 = vmatprep.subr.bf16.mxu0 %v19986_v28  ;;  %17374 = vmatprep.subr.bf16.mxu1 %v19988_v55  ;;  %v20030_v28 = vld [vmem:[%s25855_s3 + $0x11a0] sm:$0xff]   ;;  %v20028_v55 = vld [vmem:[%s25855_s3 + $0x1318] sm:$0xff]  }
 0xd7b   : > { %17375 = vmatpush3.bf16.msra.mxu1 %v19989_v8  ;;  %v20033_v8 = vld [vmem:[%s25855_s3 + $0x11e8] sm:$0xff]  }
 0xd7c   : > { %17439 = vmatpush3.bf16.msra.mxu0 %v19987_v11  ;;  %17376 = vmatprep.subr.bf16.mxu1 %v19992_v0  ;;  %v20031_v11 = vld [vmem:[%s25855_s3 + $0x1360] sm:$0xff]   ;;  %v20034_v0 = vld [vmem:[%s25855_s3 + $0x11a8] sm:$0xff]  }
 0xd7d   : > { %17440 = vmatprep.subr.bf16.mxu0 %v19990_v17  ;;  %v20032_v17 = vld [vmem:[%s25855_s3 + $0x1320] sm:$0xff]  }
 0xd7f   : > { %17377 = vmatpush3.bf16.msra.mxu1 %v19993_v20  ;;  %v20037_v20 = vld [vmem:[%s25855_s3 + $0x11f0] sm:$0xff]  }
 0xd80   : > { %17441 = vmatpush3.bf16.msra.mxu0 %v19991_v3  ;;  %17378 = vmatprep.subr.bf16.mxu1 %v19996_v57  ;;  %v20035_v57 = vld [vmem:[%s25855_s3 + $0x1368] sm:$0xff]  }
 0xd81   : > { %17442 = vmatprep.subr.bf16.mxu0 %v19994_v22 }
 0xd83   : > { %17379 = vmatpush3.bf16.msra.mxu1 %v19997_v18 }
 0xd84   : > { %17443 = vmatpush3.bf16.msra.mxu0 %v19995_v30  ;;  %17380 = vmatprep.subr.bf16.mxu1 %v20000_v10  ;;  %v20038_v10 = vld [vmem:[%s25855_s3 + $0x11b0] sm:$0xff]  }
 0xd85   : > { %17444 = vmatprep.subr.bf16.mxu0 %v19998_v32  ;;  %v17078_v38 = vpop.f32.mrb[72].mxu1 }
 0xd86   : > { %v17079_v40 = vpop.f32.mrb[73].mxu1 }
 0xd87   : > { %v17080_v42 = vadd.f32 %v17079_v40, %v17078_v38  ;;  %v17081_v13 = vpop.f32.mrb[74].mxu1  ;;  %17381 = vmatpush3.bf16.msra.mxu1 %v20001_v31  ;;  %v20036_v31 = vld [vmem:[%s25855_s3 + $0x1328] sm:$0xff]   ;;  %v20039_v38 = vld [vmem:[%s25855_s3 + $0x1370] sm:$0xff]  }
 0xd88   : > { %17445 = vmatpush3.bf16.msra.mxu0 %v19999_v37  ;;  %v17082_v34 = vpop.f32.mrb[75].mxu1  ;;  %17382 = vmatprep.subr.bf16.mxu1 %v20004_v12  ;;  %v20041_v37 = vld [vmem:[%s25855_s3 + $0x11f8] sm:$0xff]   ;;  %v24125_v13 = vld [vmem:[#allocation6 + $0x50] sm:$0xff] }
 0xd89   : > { %v13328_v47 = vadd.f32 %v17080_v42, %v23883_v45  ;;  %17446 = vmatprep.subr.bf16.mxu0 %v20002_v14  ;;  %v5914_v45 = vcombine.high %v23803_v53, %v23803_v53  ;;  %v20018_v53 = vld [vmem:[%s25855_s3 + $0x1188] sm:$0xff]   ;;  %v20042_v42 = vld [vmem:[%s25855_s3 + $0x11b8] sm:$0xff]   ;;  %v24143_v23 = vrot.slane %v24125_v13, %v21781_v7 }
 0xd8a   : > { %v17144_v33 = vpop.f32.mrb[56].mxu0 }
 0xd8b   : > { %v17145_v25 = vpop.f32.mrb[57].mxu0  ;;  %17383 = vmatpush3.bf16.msra.mxu1 %v20005_v41  ;;  %v24006_v54 = vadd.f32 %v23885_v2, %v13328_v47  ;;  %v20017_v2 = vld [vmem:[%s25855_s3 + $0x11c8] sm:$0xff]   ;;  %v20045_v47 = vld [vmem:[%s25855_s3 + $0x12c0] sm:$0xff]  }
 0xd8c   : > { %v24008_v46 = vadd.f32 %v17145_v25, %v17144_v33  ;;  %v17147_v49 = vpop.f32.mrb[58].mxu0  ;;  %17447 = vmatpush3.bf16.msra.mxu0 %v20003_v62  ;;  %17384 = vmatprep.subr.bf16.mxu1 %v20008_v50  ;;  %v20040_v50 = vld [vmem:[%s25855_s3 + $0x1330] sm:$0xff]   ;;  %v20043_v33 = vld [vmem:[%s25855_s3 + $0x1378] sm:$0xff]   ;;  %v20046_v25 = vld [vmem:[%s25855_s3 + $0x1280] sm:$0xff]  }
 0xd8d   : > { %v17148_v43 = vpop.f32.mrb[59].mxu0  ;;  %17448 = vmatprep.subr.bf16.mxu0 %v20006_v51  ;;  %v5965_v49 = vcombine.high %v23935_v63, %v23935_v63  ;;  %v24171_v63 = vrot.slane %v24020_v58, %v21781_v7  ;;  %v20054_v58 = vld [vmem:[%s25855_s3 + $0x1290] sm:$0xff]  }
 0xd8e   : > { %v20048_v43 = vld [vmem:[%s25855_s3 + $0x1400] sm:$0xff]  }
 0xd8f   : > { %17385 = vmatpush3.bf16.msra.mxu1 %v20009_v59  ;;  %v20044_v59 = vld [vmem:[%s25855_s3 + $0x1338] sm:$0xff]  }
 0xd90   : > { %17449 = vmatpush3.bf16.msra.mxu0 %v20007_v27  ;;  %17414 = vmatprep.subr.bf16.mxu1 %v20012_v56  ;;  %v20047_v27 = vld [vmem:[%s25855_s3 + $0x1440] sm:$0xff]   ;;  %v5982_v56 = vcombine.high %v24143_v23, %v24143_v23 }
 0xd91   : > { %17450 = vmatprep.subr.bf16.mxu0 %v20010_v48  ;;  %v20051_v48 = vld [vmem:[%s25855_s3 + $0x1448] sm:$0xff]  }
 0xd92   : > { %13886 = vmatmul.mubr.bf16.vlgmr.msra.gmra.mrb[100].mxu1 %v5914_v45  ;;  %v20052_v45 = vld [vmem:[%s25855_s3 + $0x1408] sm:$0xff]  }
 0xd93   : > { %17415 = vmatpush3.bf16.msra.mxu1 %v20013_v16  ;;  %13965 = vmatprep.mubr.bf16.mxu1 %v5917_v4  ;;  %v20053_v16 = vld [vmem:[%s25855_s3 + $0x12d0] sm:$0xff]  }
 0xd94   : > { %17451 = vmatpush3.bf16.msra.mxu0 %v20011_v52  ;;  %17416 = vmatprep.subr.bf16.mxu1 %v20017_v2  ;;  %v24180_v52 = vrot.slane %v5982_v56, %v21781_v7  ;;  %v20057_v2 = vld [vmem:[%s25855_s3 + $0x12d8] sm:$0xff]   ;;  %v20055_v4 = vld [vmem:[%s25855_s3 + $0x1450] sm:$0xff]  }
 0xd95   : > { %17480 = vmatprep.subr.bf16.mxu0 %v20014_v29  ;;  %v20058_v29 = vld [vmem:[%s25855_s3 + $0x1298] sm:$0xff]   ;;  %v20089_v56 = vld [vmem:[%s25855_s3 + $0x1510] sm:$0xff]  }
 0xd97   : > { %14006 = vmatmul.mubr.bf16.vlgmr.msra.gmra.mrb[84].mxu0 %v24048_v24  ;;  %17417 = vmatpush3.bf16.msra.mxu1 %v20018_v53  ;;  %v20061_v53 = vld [vmem:[%s25855_s3 + $0x12e0] sm:$0xff]  }
 0xd98   : > { %17481 = vmatpush3.bf16.msra.mxu0 %v20015_v39  ;;  %14085 = vmatprep.mubr.bf16.mxu0 %v24057_v26  ;;  %v20059_v39 = vld [vmem:[%s25855_s3 + $0x1458] sm:$0xff]  }
 0xd99   : > { %17482 = vmatprep.subr.bf16.mxu0 %v20019_v61  ;;  %17418 = vmatprep.subr.bf16.mxu1 %v20021_v5  ;;  %v20062_v61 = vld [vmem:[%s25855_s3 + $0x12a0] sm:$0xff]   ;;  %v20060_v5 = vld [vmem:[%s25855_s3 + $0x1418] sm:$0xff]  }
 0xd9b   : > { %17419 = vmatpush3.bf16.msra.mxu1 %v20022_v36  ;;  %v20065_v36 = vld [vmem:[%s25855_s3 + $0x12e8] sm:$0xff]  }
 0xd9c   : > { %17483 = vmatpush3.bf16.msra.mxu0 %v20020_v6  ;;  %17420 = vmatprep.subr.bf16.mxu1 %v20025_v9  ;;  %v20063_v6 = vld [vmem:[%s25855_s3 + $0x1460] sm:$0xff]   ;;  %v20066_v9 = vld [vmem:[%s25855_s3 + $0x12a8] sm:$0xff]  }
 0xd9d   : > { %17484 = vmatprep.subr.bf16.mxu0 %v20023_v60  ;;  %v20064_v60 = vld [vmem:[%s25855_s3 + $0x1420] sm:$0xff]  }
 0xd9f   : > { %17421 = vmatpush3.bf16.msra.mxu1 %v20026_v35  ;;  %v20069_v35 = vld [vmem:[%s25855_s3 + $0x12f0] sm:$0xff]  }
 0xda0   : > { %17485 = vmatpush3.bf16.msra.mxu0 %v20024_v15  ;;  %17422 = vmatprep.subr.bf16.mxu1 %v20029_v1  ;;  %v20067_v1 = vld [vmem:[%s25855_s3 + $0x1468] sm:$0xff]  }
 0xda1   : > { %17486 = vmatprep.subr.bf16.mxu0 %v20027_v21 }
 0xda3   : > { %17423 = vmatpush3.bf16.msra.mxu1 %v20030_v28 }
 0xda4   : > { %17487 = vmatpush3.bf16.msra.mxu0 %v20028_v55  ;;  %17424 = vmatprep.subr.bf16.mxu1 %v20033_v8  ;;  %v20070_v8 = vld [vmem:[%s25855_s3 + $0x12b0] sm:$0xff]  }
 0xda5   : > { %17488 = vmatprep.subr.bf16.mxu0 %v20031_v11  ;;  %v17122_v3 = vpop.f32.mrb[76].mxu1 }
 0xda6   : > { %v17123_v22 = vpop.f32.mrb[77].mxu1 }
 0xda7   : > { %v17124_v18 = vadd.f32 %v17123_v22, %v17122_v3  ;;  %v17125_v30 = vpop.f32.mrb[78].mxu1  ;;  %17425 = vmatpush3.bf16.msra.mxu1 %v20034_v0  ;;  %v20068_v0 = vld [vmem:[%s25855_s3 + $0x1428] sm:$0xff]   ;;  %v20071_v3 = vld [vmem:[%s25855_s3 + $0x1470] sm:$0xff]   ;;  %v5967_v22 = vcombine.high %v24125_v13, %v24125_v13  ;;  %v20076_v13 = vld [vmem:[%s25855_s3 + $0x1438] sm:$0xff]  }
 0xda8   : > { %17489 = vmatpush3.bf16.msra.mxu0 %v20032_v17  ;;  %v17126_v32 = vpop.f32.mrb[79].mxu1  ;;  %17426 = vmatprep.subr.bf16.mxu1 %v20037_v20  ;;  %v20073_v17 = vld [vmem:[%s25855_s3 + $0x12f8] sm:$0xff]  }
 0xda9   : > { %v13408_v12 = vadd.f32 %v17124_v18, %v24006_v54  ;;  %17490 = vmatprep.subr.bf16.mxu0 %v20035_v57  ;;  %v5915_v54 = vcombine.high %v23926_v44, %v23926_v44  ;;  %v20050_v44 = vld [vmem:[%s25855_s3 + $0x1288] sm:$0xff]   ;;  %v20074_v30 = vld [vmem:[%s25855_s3 + $0x12b8] sm:$0xff]  }
 0xdaa   : > { %v17188_v14 = vpop.f32.mrb[60].mxu0 }
 0xdab   : > { %v17189_v40 = vpop.f32.mrb[61].mxu0  ;;  %17427 = vmatpush3.bf16.msra.mxu1 %v20038_v10  ;;  %v24128_v41 = vadd.f32 %v24008_v46, %v13408_v12  ;;  %v20049_v46 = vld [vmem:[%s25855_s3 + $0x12c8] sm:$0xff]   ;;  %v20077_v12 = vld [vmem:[%s25855_s3 + $0x13c0] sm:$0xff]  }
 0xdac   : > { %v24130_v34 = vadd.f32 %v17189_v40, %v17188_v14  ;;  %v17191_v62 = vpop.f32.mrb[62].mxu0  ;;  %17491 = vmatpush3.bf16.msra.mxu0 %v20036_v31  ;;  %17428 = vmatprep.subr.bf16.mxu1 %v20041_v37  ;;  %v20072_v37 = vld [vmem:[%s25855_s3 + $0x1430] sm:$0xff]   ;;  %v20075_v14 = vld [vmem:[%s25855_s3 + $0x1478] sm:$0xff]   ;;  %v24265_v40 = vrot.slane %v5967_v22, %v21781_v7 }
 0xdad   : > { %v17192_v51 = vpop.f32.mrb[63].mxu0  ;;  %17492 = vmatprep.subr.bf16.mxu0 %v20039_v38  ;;  %v5966_v62 = vcombine.high %v24057_v26, %v24057_v26  ;;  %v24293_v26 = vrot.slane %v24143_v23, %v21781_v7  ;;  %v20087_v23 = vld [vmem:[%s25855_s3 + $0x1390] sm:$0xff]  }
 0xdae   : > { %v20080_v51 = vld [vmem:[%s25855_s3 + $0x1500] sm:$0xff]  }
 0xdaf   : > { %17429 = vmatpush3.bf16.msra.mxu1 %v20042_v42  ;;  %v20078_v42 = vld [vmem:[%s25855_s3 + $0x1380] sm:$0xff]  }
 0xdb0   : > { %17493 = vmatpush3.bf16.msra.mxu0 %v20040_v50  ;;  %17458 = vmatprep.subr.bf16.mxu1 %v20045_v47  ;;  %v20079_v50 = vld [vmem:[%s25855_s3 + $0x1540] sm:$0xff]   ;;  %v5983_v47 = vcombine.high %v24265_v40, %v24265_v40 }
 0xdb1   : > { %17494 = vmatprep.subr.bf16.mxu0 %v20043_v33  ;;  %v20084_v33 = vld [vmem:[%s25855_s3 + $0x1548] sm:$0xff]  }
 0xdb2   : > { %13966 = vmatmul.mubr.bf16.vlgmr.msra.gmra.mrb[104].mxu1 %v5915_v54  ;;  %v20085_v54 = vld [vmem:[%s25855_s3 + $0x1508] sm:$0xff]  }
 0xdb3   : > { %17459 = vmatpush3.bf16.msra.mxu1 %v20046_v25  ;;  %14045 = vmatprep.mubr.bf16.mxu1 %v5965_v49  ;;  %v20086_v25 = vld [vmem:[%s25855_s3 + $0x13d0] sm:$0xff]  }
 0xdb4   : > { %17495 = vmatpush3.bf16.msra.mxu0 %v20044_v59  ;;  %17460 = vmatprep.subr.bf16.mxu1 %v20049_v46  ;;  %v24302_v59 = vrot.slane %v5983_v47, %v21781_v7  ;;  %v20090_v46 = vld [vmem:[%s25855_s3 + $0x13d8] sm:$0xff]   ;;  %v20088_v49 = vld [vmem:[%s25855_s3 + $0x1550] sm:$0xff]  }
 0xdb5   : > { %17524 = vmatprep.subr.bf16.mxu0 %v20047_v27  ;;  %v20091_v27 = vld [vmem:[%s25855_s3 + $0x1398] sm:$0xff]   ;;  %v20121_v47 = vld [vmem:[%s25855_s3 + $0x1610] sm:$0xff]  }
 0xdb7   : > { %14086 = vmatmul.mubr.bf16.vlgmr.msra.gmra.mrb[88].mxu0 %v24171_v63  ;;  %17461 = vmatpush3.bf16.msra.mxu1 %v20050_v44  ;;  %v20094_v44 = vld [vmem:[%s25855_s3 + $0x13e0] sm:$0xff]  }
 0xdb8   : > { %17525 = vmatpush3.bf16.msra.mxu0 %v20048_v43  ;;  %14165 = vmatprep.mubr.bf16.mxu0 %v24180_v52  ;;  %v20092_v43 = vld [vmem:[%s25855_s3 + $0x1558] sm:$0xff]  }
 0xdb9   : > { %17526 = vmatprep.subr.bf16.mxu0 %v20051_v48  ;;  %17462 = vmatprep.subr.bf16.mxu1 %v20053_v16  ;;  %v20095_v48 = vld [vmem:[%s25855_s3 + $0x13a0] sm:$0xff]   ;;  %v20093_v16 = vld [vmem:[%s25855_s3 + $0x1518] sm:$0xff]  }
 0xdbb   : > { %17463 = vmatpush3.bf16.msra.mxu1 %v20054_v58  ;;  %v20098_v58 = vld [vmem:[%s25855_s3 + $0x13e8] sm:$0xff]  }
 0xdbc   : > { %17527 = vmatpush3.bf16.msra.mxu0 %v20052_v45  ;;  %17464 = vmatprep.subr.bf16.mxu1 %v20057_v2  ;;  %v20096_v45 = vld [vmem:[%s25855_s3 + $0x1560] sm:$0xff]   ;;  %v20099_v2 = vld [vmem:[%s25855_s3 + $0x13a8] sm:$0xff]  }
 0xdbd   : > { %17528 = vmatprep.subr.bf16.mxu0 %v20055_v4  ;;  %v20097_v4 = vld [vmem:[%s25855_s3 + $0x1520] sm:$0xff]  }
 0xdbf   : > { %17465 = vmatpush3.bf16.msra.mxu1 %v20058_v29  ;;  %v20102_v29 = vld [vmem:[%s25855_s3 + $0x13f0] sm:$0xff]  }
 0xdc0   : > { %17529 = vmatpush3.bf16.msra.mxu0 %v20056_v19  ;;  %17466 = vmatprep.subr.bf16.mxu1 %v20061_v53  ;;  %v20100_v53 = vld [vmem:[%s25855_s3 + $0x1568] sm:$0xff]  }
 0xdc1   : > { %17530 = vmatprep.subr.bf16.mxu0 %v20059_v39 }
 0xdc3   : > { %17467 = vmatpush3.bf16.msra.mxu1 %v20062_v61 }
 0xdc4   : > { %17531 = vmatpush3.bf16.msra.mxu0 %v20060_v5  ;;  %17468 = vmatprep.subr.bf16.mxu1 %v20065_v36  ;;  %v20103_v36 = vld [vmem:[%s25855_s3 + $0x13b0] sm:$0xff]  }
 0xdc5   : > { %17532 = vmatprep.subr.bf16.mxu0 %v20063_v6  ;;  %v17166_v15 = vpop.f32.mrb[80].mxu1 }
 0xdc6   : > { %v17167_v21 = vpop.f32.mrb[81].mxu1 }
 0xdc7   : > { %v17168_v28 = vadd.f32 %v17167_v21, %v17166_v15  ;;  %v17169_v55 = vpop.f32.mrb[82].mxu1  ;;  %17469 = vmatpush3.bf16.msra.mxu1 %v20066_v9  ;;  %v20101_v9 = vld [vmem:[%s25855_s3 + $0x1528] sm:$0xff]   ;;  %v20104_v15 = vld [vmem:[%s25855_s3 + $0x1570] sm:$0xff]  }
 0xdc8   : > { %17533 = vmatpush3.bf16.msra.mxu0 %v20064_v60  ;;  %v17170_v11 = vpop.f32.mrb[83].mxu1  ;;  %17470 = vmatprep.subr.bf16.mxu1 %v20069_v35  ;;  %v20106_v60 = vld [vmem:[%s25855_s3 + $0x13f8] sm:$0xff]   ;;  %v24370_v55 = vld [vmem:[#allocation6 + $0x58] sm:$0xff] }
 0xdc9   : > { %v13488_v20 = vadd.f32 %v17168_v28, %v24128_v41  ;;  %17534 = vmatprep.subr.bf16.mxu0 %v20067_v1  ;;  %v5963_v41 = vcombine.high %v24048_v24, %v24048_v24  ;;  %v20083_v24 = vld [vmem:[%s25855_s3 + $0x1388] sm:$0xff]   ;;  %v20107_v28 = vld [vmem:[%s25855_s3 + $0x13b8] sm:$0xff]   ;;  %v24388_v22 = vrot.slane %v24370_v55, %v21781_v7 }
 0xdca   : > { %v17232_v57 = vpop.f32.mrb[64].mxu0 }
 0xdcb   : > { %v17233_v18 = vpop.f32.mrb[65].mxu0  ;;  %17471 = vmatpush3.bf16.msra.mxu1 %v20070_v8  ;;  %v24251_v10 = vadd.f32 %v24130_v34, %v13488_v20  ;;  %v20082_v34 = vld [vmem:[%s25855_s3 + $0x13c8] sm:$0xff]   ;;  %v20110_v20 = vld [vmem:[%s25855_s3 + $0x14c0] sm:$0xff]  }
 0xdcc   : > { %v24253_v32 = vadd.f32 %v17233_v18, %v17232_v57  ;;  %v17235_v31 = vpop.f32.mrb[66].mxu0  ;;  %17535 = vmatpush3.bf16.msra.mxu0 %v20068_v0  ;;  %17472 = vmatprep.subr.bf16.mxu1 %v20073_v17  ;;  %v20105_v17 = vld [vmem:[%s25855_s3 + $0x1530] sm:$0xff]   ;;  %v20108_v57 = vld [vmem:[%s25855_s3 + $0x1578] sm:$0xff]   ;;  %v20111_v18 = vld [vmem:[%s25855_s3 + $0x1480] sm:$0xff]  }
 0xdcd   : > { %v17236_v38 = vpop.f32.mrb[67].mxu0  ;;  %17536 = vmatprep.subr.bf16.mxu0 %v20071_v3  ;;  %v6014_v31 = vcombine.high %v24180_v52, %v24180_v52  ;;  %v24416_v52 = vrot.slane %v24265_v40, %v21781_v7  ;;  %v20119_v40 = vld [vmem:[%s25855_s3 + $0x1490] sm:$0xff]  }
 0xdce   : > { %v20113_v38 = vld [vmem:[%s25855_s3 + $0x1600] sm:$0xff]  }
 0xdcf   : > { %17473 = vmatpush3.bf16.msra.mxu1 %v20074_v30  ;;  %v20109_v30 = vld [vmem:[%s25855_s3 + $0x1538] sm:$0xff]  }
 0xdd0   : > { %17537 = vmatpush3.bf16.msra.mxu0 %v20072_v37  ;;  %17502 = vmatprep.subr.bf16.mxu1 %v20077_v12  ;;  %v20112_v37 = vld [vmem:[%s25855_s3 + $0x1640] sm:$0xff]   ;;  %v6031_v12 = vcombine.high %v24388_v22, %v24388_v22 }
 0xdd1   : > { %17538 = vmatprep.subr.bf16.mxu0 %v20075_v14  ;;  %v20116_v14 = vld [vmem:[%s25855_s3 + $0x1648] sm:$0xff]  }
 0xdd2   : > { %14046 = vmatmul.mubr.bf16.vlgmr.msra.gmra.mrb[108].mxu1 %v5963_v41  ;;  %v20117_v41 = vld [vmem:[%s25855_s3 + $0x1608] sm:$0xff]  }
 0xdd3   : > { %17503 = vmatpush3.bf16.msra.mxu1 %v20078_v42  ;;  %14125 = vmatprep.mubr.bf16.mxu1 %v5966_v62  ;;  %v20118_v42 = vld [vmem:[%s25855_s3 + $0x14d0] sm:$0xff]  }
 0xdd4   : > { %17539 = vmatpush3.bf16.msra.mxu0 %v20076_v13  ;;  %17504 = vmatprep.subr.bf16.mxu1 %v20082_v34  ;;  %v24425_v13 = vrot.slane %v6031_v12, %v21781_v7  ;;  %v20122_v34 = vld [vmem:[%s25855_s3 + $0x14d8] sm:$0xff]   ;;  %v20120_v62 = vld [vmem:[%s25855_s3 + $0x1650] sm:$0xff]  }
 0xdd5   : > { %17568 = vmatprep.subr.bf16.mxu0 %v20079_v50  ;;  %v20123_v50 = vld [vmem:[%s25855_s3 + $0x1498] sm:$0xff]   ;;  %v20154_v12 = vld [vmem:[%s25855_s3 + $0x1710] sm:$0xff]  }
 0xdd7   : > { %14166 = vmatmul.mubr.bf16.vlgmr.msra.gmra.mrb[92].mxu0 %v24293_v26  ;;  %17505 = vmatpush3.bf16.msra.mxu1 %v20083_v24  ;;  %v20126_v24 = vld [vmem:[%s25855_s3 + $0x14e0] sm:$0xff]  }
 0xdd8   : > { %17569 = vmatpush3.bf16.msra.mxu0 %v20080_v51  ;;  %14245 = vmatprep.mubr.bf16.mxu0 %v24302_v59  ;;  %v20124_v51 = vld [vmem:[%s25855_s3 + $0x1658] sm:$0xff]  }
 0xdd9   : > { %17570 = vmatprep.subr.bf16.mxu0 %v20084_v33  ;;  %17506 = vmatprep.subr.bf16.mxu1 %v20086_v25  ;;  %v20127_v33 = vld [vmem:[%s25855_s3 + $0x14a0] sm:$0xff]   ;;  %v20125_v25 = vld [vmem:[%s25855_s3 + $0x1618] sm:$0xff]  }
 0xddb   : > { %17507 = vmatpush3.bf16.msra.mxu1 %v20087_v23  ;;  %v20130_v23 = vld [vmem:[%s25855_s3 + $0x14e8] sm:$0xff]  }
 0xddc   : > { %17571 = vmatpush3.bf16.msra.mxu0 %v20085_v54  ;;  %17508 = vmatprep.subr.bf16.mxu1 %v20090_v46  ;;  %v20128_v54 = vld [vmem:[%s25855_s3 + $0x1660] sm:$0xff]   ;;  %v20131_v46 = vld [vmem:[%s25855_s3 + $0x14a8] sm:$0xff]  }
 0xddd   : > { %17572 = vmatprep.subr.bf16.mxu0 %v20088_v49  ;;  %v20129_v49 = vld [vmem:[%s25855_s3 + $0x1620] sm:$0xff]  }
 0xddf   : > { %17509 = vmatpush3.bf16.msra.mxu1 %v20091_v27  ;;  %v20134_v27 = vld [vmem:[%s25855_s3 + $0x14f0] sm:$0xff]  }
 0xde0   : > { %17573 = vmatpush3.bf16.msra.mxu0 %v20089_v56  ;;  %17510 = vmatprep.subr.bf16.mxu1 %v20094_v44  ;;  %v20132_v44 = vld [vmem:[%s25855_s3 + $0x1668] sm:$0xff]  }
 0xde1   : > { %17574 = vmatprep.subr.bf16.mxu0 %v20092_v43 }
 0xde3   : > { %17511 = vmatpush3.bf16.msra.mxu1 %v20095_v48 }
 0xde4   : > { %17575 = vmatpush3.bf16.msra.mxu0 %v20093_v16  ;;  %17512 = vmatprep.subr.bf16.mxu1 %v20098_v58  ;;  %v20135_v58 = vld [vmem:[%s25855_s3 + $0x14b0] sm:$0xff]  }
 0xde5   : > { %17576 = vmatprep.subr.bf16.mxu0 %v20096_v45  ;;  %v17210_v19 = vpop.f32.mrb[84].mxu1 }
 0xde6   : > { %v17211_v39 = vpop.f32.mrb[85].mxu1 }
 0xde7   : > { %v17212_v61 = vadd.f32 %v17211_v39, %v17210_v19  ;;  %v17213_v5 = vpop.f32.mrb[86].mxu1  ;;  %17513 = vmatpush3.bf16.msra.mxu1 %v20099_v2  ;;  %v20133_v2 = vld [vmem:[%s25855_s3 + $0x1628] sm:$0xff]   ;;  %v20136_v19 = vld [vmem:[%s25855_s3 + $0x1670] sm:$0xff]   ;;  %v6016_v39 = vcombine.high %v24370_v55, %v24370_v55  ;;  %v20141_v55 = vld [vmem:[%s25855_s3 + $0x1638] sm:$0xff]  }
 0xde8   : > { %17577 = vmatpush3.bf16.msra.mxu0 %v20097_v4  ;;  %v17214_v6 = vpop.f32.mrb[87].mxu1  ;;  %17514 = vmatprep.subr.bf16.mxu1 %v20102_v29  ;;  %v20138_v4 = vld [vmem:[%s25855_s3 + $0x14f8] sm:$0xff]  }
 0xde9   : > { %v13568_v35 = vadd.f32 %v17212_v61, %v24251_v10  ;;  %17578 = vmatprep.subr.bf16.mxu0 %v20100_v53  ;;  %v5964_v10 = vcombine.high %v24171_v63, %v24171_v63  ;;  %v20115_v63 = vld [vmem:[%s25855_s3 + $0x1488] sm:$0xff]   ;;  %v20139_v5 = vld [vmem:[%s25855_s3 + $0x14b8] sm:$0xff]  }
 0xdea   : > { %v17276_v1 = vpop.f32.mrb[68].mxu0 }
 0xdeb   : > { %v17277_v21 = vpop.f32.mrb[69].mxu0  ;;  %17515 = vmatpush3.bf16.msra.mxu1 %v20103_v36  ;;  %v24373_v8 = vadd.f32 %v24253_v32, %v13568_v35  ;;  %v20114_v32 = vld [vmem:[%s25855_s3 + $0x14c8] sm:$0xff]   ;;  %v20142_v35 = vld [vmem:[%s25855_s3 + $0x15c0] sm:$0xff]  }
 0xdec   : > { %v24375_v11 = vadd.f32 %v17277_v21, %v17276_v1  ;;  %v17279_v0 = vpop.f32.mrb[70].mxu0  ;;  %17579 = vmatpush3.bf16.msra.mxu0 %v20101_v9  ;;  %17516 = vmatprep.subr.bf16.mxu1 %v20106_v60  ;;  %v20137_v60 = vld [vmem:[%s25855_s3 + $0x1630] sm:$0xff]   ;;  %v20140_v1 = vld [vmem:[%s25855_s3 + $0x1678] sm:$0xff]   ;;  %v24510_v21 = vrot.slane %v6016_v39, %v21781_v7 }
 0xded   : > { %v17280_v3 = vpop.f32.mrb[71].mxu0  ;;  %17580 = vmatprep.subr.bf16.mxu0 %v20104_v15  ;;  %v6015_v0 = vcombine.high %v24302_v59, %v24302_v59  ;;  %v24538_v59 = vrot.slane %v24388_v22, %v21781_v7  ;;  %v20152_v22 = vld [vmem:[%s25855_s3 + $0x1590] sm:$0xff]  }
 0xdee   : > { %v20145_v3 = vld [vmem:[%s25855_s3 + $0x1700] sm:$0xff]  }
 0xdef   : > { %17517 = vmatpush3.bf16.msra.mxu1 %v20107_v28  ;;  %v20143_v28 = vld [vmem:[%s25855_s3 + $0x1580] sm:$0xff]  }
 0xdf0   : > { %17581 = vmatpush3.bf16.msra.mxu0 %v20105_v17  ;;  %17546 = vmatprep.subr.bf16.mxu1 %v20110_v20  ;;  %v20144_v17 = vld [vmem:[%s25855_s3 + $0x1740] sm:$0xff]   ;;  %v6032_v20 = vcombine.high %v24510_v21, %v24510_v21 }
 0xdf1   : > { %17582 = vmatprep.subr.bf16.mxu0 %v20108_v57  ;;  %v20149_v57 = vld [vmem:[%s25855_s3 + $0x1748] sm:$0xff]  }
 0xdf2   : > { %14126 = vmatmul.mubr.bf16.vlgmr.msra.gmra.mrb[112].mxu1 %v5964_v10  ;;  %v20150_v10 = vld [vmem:[%s25855_s3 + $0x1708] sm:$0xff]  }
 0xdf3   : > { %17547 = vmatpush3.bf16.msra.mxu1 %v20111_v18  ;;  %14205 = vmatprep.mubr.bf16.mxu1 %v6014_v31  ;;  %v20151_v18 = vld [vmem:[%s25855_s3 + $0x15d0] sm:$0xff]  }
 0xdf4   : > { %17583 = vmatpush3.bf16.msra.mxu0 %v20109_v30  ;;  %17548 = vmatprep.subr.bf16.mxu1 %v20114_v32  ;;  %v24547_v30 = vrot.slane %v6032_v20, %v21781_v7  ;;  %v20155_v32 = vld [vmem:[%s25855_s3 + $0x15d8] sm:$0xff]   ;;  %v20153_v31 = vld [vmem:[%s25855_s3 + $0x1750] sm:$0xff]  }
 0xdf5   : > { %17612 = vmatprep.subr.bf16.mxu0 %v20112_v37  ;;  %v20156_v37 = vld [vmem:[%s25855_s3 + $0x1598] sm:$0xff]   ;;  %v20186_v20 = vld [vmem:[%s25855_s3 + $0x1810] sm:$0xff]  }
 0xdf7   : > { %14246 = vmatmul.mubr.bf16.vlgmr.msra.gmra.mrb[96].mxu0 %v24416_v52  ;;  %17549 = vmatpush3.bf16.msra.mxu1 %v20115_v63  ;;  %v20159_v63 = vld [vmem:[%s25855_s3 + $0x15e0] sm:$0xff]  }
 0xdf8   : > { %17613 = vmatpush3.bf16.msra.mxu0 %v20113_v38  ;;  %14325 = vmatprep.mubr.bf16.mxu0 %v24425_v13  ;;  %v20157_v38 = vld [vmem:[%s25855_s3 + $0x1758] sm:$0xff]  }
 0xdf9   : > { %17614 = vmatprep.subr.bf16.mxu0 %v20116_v14  ;;  %17550 = vmatprep.subr.bf16.mxu1 %v20118_v42  ;;  %v20160_v14 = vld [vmem:[%s25855_s3 + $0x15a0] sm:$0xff]   ;;  %v20158_v42 = vld [vmem:[%s25855_s3 + $0x1718] sm:$0xff]  }
 0xdfb   : > { %17551 = vmatpush3.bf16.msra.mxu1 %v20119_v40  ;;  %v20163_v40 = vld [vmem:[%s25855_s3 + $0x15e8] sm:$0xff]  }
 0xdfc   : > { %17615 = vmatpush3.bf16.msra.mxu0 %v20117_v41  ;;  %17552 = vmatprep.subr.bf16.mxu1 %v20122_v34  ;;  %v20161_v41 = vld [vmem:[%s25855_s3 + $0x1760] sm:$0xff]   ;;  %v20164_v34 = vld [vmem:[%s25855_s3 + $0x15a8] sm:$0xff]  }
 0xdfd   : > { %17616 = vmatprep.subr.bf16.mxu0 %v20120_v62  ;;  %v20162_v62 = vld [vmem:[%s25855_s3 + $0x1720] sm:$0xff]  }
 0xdff   : > { %17553 = vmatpush3.bf16.msra.mxu1 %v20123_v50  ;;  %v20167_v50 = vld [vmem:[%s25855_s3 + $0x15f0] sm:$0xff]  }
 0xe00   : > { %17617 = vmatpush3.bf16.msra.mxu0 %v20121_v47  ;;  %17554 = vmatprep.subr.bf16.mxu1 %v20126_v24  ;;  %v20165_v24 = vld [vmem:[%s25855_s3 + $0x1768] sm:$0xff]  }
 0xe01   : > { %17618 = vmatprep.subr.bf16.mxu0 %v20124_v51 }
 0xe03   : > { %17555 = vmatpush3.bf16.msra.mxu1 %v20127_v33 }
 0xe04   : > { %17619 = vmatpush3.bf16.msra.mxu0 %v20125_v25  ;;  %17556 = vmatprep.subr.bf16.mxu1 %v20130_v23  ;;  %v20168_v23 = vld [vmem:[%s25855_s3 + $0x15b0] sm:$0xff]  }
 0xe05   : > { %17620 = vmatprep.subr.bf16.mxu0 %v20128_v54  ;;  %v17254_v56 = vpop.f32.mrb[88].mxu1 }
 0xe06   : > { %v17255_v43 = vpop.f32.mrb[89].mxu1 }
 0xe07   : > { %v17256_v48 = vadd.f32 %v17255_v43, %v17254_v56  ;;  %v17257_v16 = vpop.f32.mrb[90].mxu1  ;;  %17557 = vmatpush3.bf16.msra.mxu1 %v20131_v46  ;;  %v20166_v46 = vld [vmem:[%s25855_s3 + $0x1728] sm:$0xff]   ;;  %v20169_v56 = vld [vmem:[%s25855_s3 + $0x1770] sm:$0xff]  }
 0xe08   : > { %17621 = vmatpush3.bf16.msra.mxu0 %v20129_v49  ;;  %v17258_v45 = vpop.f32.mrb[91].mxu1  ;;  %17558 = vmatprep.subr.bf16.mxu1 %v20134_v27  ;;  %v20171_v49 = vld [vmem:[%s25855_s3 + $0x15f8] sm:$0xff]   ;;  %v24615_v16 = vld [vmem:[#allocation6 + $0x60] sm:$0xff] }
 0xe09   : > { %v13648_v29 = vadd.f32 %v17256_v48, %v24373_v8  ;;  %17622 = vmatprep.subr.bf16.mxu0 %v20132_v44  ;;  %v6012_v8 = vcombine.high %v24293_v26, %v24293_v26  ;;  %v20148_v26 = vld [vmem:[%s25855_s3 + $0x1588] sm:$0xff]   ;;  %v20172_v48 = vld [vmem:[%s25855_s3 + $0x15b8] sm:$0xff]   ;;  %v24633_v39 = vrot.slane %v24615_v16, %v21781_v7 }
 0xe0a   : > { %v17320_v53 = vpop.f32.mrb[72].mxu0 }
 0xe0b   : > { %v17321_v61 = vpop.f32.mrb[73].mxu0  ;;  %17559 = vmatpush3.bf16.msra.mxu1 %v20135_v58  ;;  %v24496_v36 = vadd.f32 %v24375_v11, %v13648_v29  ;;  %v20147_v11 = vld [vmem:[%s25855_s3 + $0x15c8] sm:$0xff]   ;;  %v20175_v29 = vld [vmem:[%s25855_s3 + $0x16c0] sm:$0xff]  }
 0xe0c   : > { %v24498_v6 = vadd.f32 %v17321_v61, %v17320_v53  ;;  %v17323_v9 = vpop.f32.mrb[74].mxu0  ;;  %17623 = vmatpush3.bf16.msra.mxu0 %v20133_v2  ;;  %17560 = vmatprep.subr.bf16.mxu1 %v20138_v4  ;;  %v20170_v4 = vld [vmem:[%s25855_s3 + $0x1730] sm:$0xff]   ;;  %v20173_v53 = vld [vmem:[%s25855_s3 + $0x1778] sm:$0xff]   ;;  %v20176_v61 = vld [vmem:[%s25855_s3 + $0x1680] sm:$0xff]  }
 0xe0d   : > { %v17324_v15 = vpop.f32.mrb[75].mxu0  ;;  %17624 = vmatprep.subr.bf16.mxu0 %v20136_v19  ;;  %v6063_v9 = vcombine.high %v24425_v13, %v24425_v13  ;;  %v24661_v13 = vrot.slane %v24510_v21, %v21781_v7  ;;  %v20184_v21 = vld [vmem:[%s25855_s3 + $0x1690] sm:$0xff]  }
 0xe0e   : > { %v20178_v15 = vld [vmem:[%s25855_s3 + $0x1800] sm:$0xff]  }
 0xe0f   : > { %17561 = vmatpush3.bf16.msra.mxu1 %v20139_v5  ;;  %v20174_v5 = vld [vmem:[%s25855_s3 + $0x1738] sm:$0xff]  }
 0xe10   : > { %17625 = vmatpush3.bf16.msra.mxu0 %v20137_v60  ;;  %17590 = vmatprep.subr.bf16.mxu1 %v20142_v35  ;;  %v20177_v60 = vld [vmem:[%s25855_s3 + $0x1840] sm:$0xff]   ;;  %v6080_v35 = vcombine.high %v24633_v39, %v24633_v39 }
 0xe11   : > { %17626 = vmatprep.subr.bf16.mxu0 %v20140_v1  ;;  %v20181_v1 = vld [vmem:[%s25855_s3 + $0x1848] sm:$0xff]  }
 0xe12   : > { %14206 = vmatmul.mubr.bf16.vlgmr.msra.gmra.mrb[116].mxu1 %v6012_v8  ;;  %v20182_v8 = vld [vmem:[%s25855_s3 + $0x1808] sm:$0xff]  }
 0xe13   : > { %17591 = vmatpush3.bf16.msra.mxu1 %v20143_v28  ;;  %14285 = vmatprep.mubr.bf16.mxu1 %v6015_v0  ;;  %v20183_v28 = vld [vmem:[%s25855_s3 + $0x16d0] sm:$0xff]  }
 0xe14   : > { %17627 = vmatpush3.bf16.msra.mxu0 %v20141_v55  ;;  %17592 = vmatprep.subr.bf16.mxu1 %v20147_v11  ;;  %v24670_v55 = vrot.slane %v6080_v35, %v21781_v7  ;;  %v20187_v11 = vld [vmem:[%s25855_s3 + $0x16d8] sm:$0xff]   ;;  %v20185_v0 = vld [vmem:[%s25855_s3 + $0x1850] sm:$0xff]  }
 0xe15   : > { %17656 = vmatprep.subr.bf16.mxu0 %v20144_v17  ;;  %v20188_v17 = vld [vmem:[%s25855_s3 + $0x1698] sm:$0xff]   ;;  %v20219_v35 = vld [vmem:[%s25855_s3 + $0x1910] sm:$0xff]  }
 0xe17   : > { %14326 = vmatmul.mubr.bf16.vlgmr.msra.gmra.mrb[100].mxu0 %v24538_v59  ;;  %17593 = vmatpush3.bf16.msra.mxu1 %v20148_v26  ;;  %v20191_v26 = vld [vmem:[%s25855_s3 + $0x16e0] sm:$0xff]  }
 0xe18   : > { %17657 = vmatpush3.bf16.msra.mxu0 %v20145_v3  ;;  %14405 = vmatprep.mubr.bf16.mxu0 %v24547_v30  ;;  %v20189_v3 = vld [vmem:[%s25855_s3 + $0x1858] sm:$0xff]  }
 0xe19   : > { %17658 = vmatprep.subr.bf16.mxu0 %v20149_v57  ;;  %17594 = vmatprep.subr.bf16.mxu1 %v20151_v18  ;;  %v20192_v57 = vld [vmem:[%s25855_s3 + $0x16a0] sm:$0xff]   ;;  %v20190_v18 = vld [vmem:[%s25855_s3 + $0x1818] sm:$0xff]  }
 0xe1b   : > { %17595 = vmatpush3.bf16.msra.mxu1 %v20152_v22  ;;  %v20195_v22 = vld [vmem:[%s25855_s3 + $0x16e8] sm:$0xff]  }
 0xe1c   : > { %17659 = vmatpush3.bf16.msra.mxu0 %v20150_v10  ;;  %17596 = vmatprep.subr.bf16.mxu1 %v20155_v32  ;;  %v20193_v10 = vld [vmem:[%s25855_s3 + $0x1860] sm:$0xff]   ;;  %v20196_v32 = vld [vmem:[%s25855_s3 + $0x16a8] sm:$0xff]  }
 0xe1d   : > { %17660 = vmatprep.subr.bf16.mxu0 %v20153_v31  ;;  %v20194_v31 = vld [vmem:[%s25855_s3 + $0x1820] sm:$0xff]  }
 0xe1f   : > { %17597 = vmatpush3.bf16.msra.mxu1 %v20156_v37  ;;  %v20199_v37 = vld [vmem:[%s25855_s3 + $0x16f0] sm:$0xff]  }
 0xe20   : > { %17661 = vmatpush3.bf16.msra.mxu0 %v20154_v12  ;;  %17598 = vmatprep.subr.bf16.mxu1 %v20159_v63  ;;  %v20197_v63 = vld [vmem:[%s25855_s3 + $0x1868] sm:$0xff]  }
 0xe21   : > { %17662 = vmatprep.subr.bf16.mxu0 %v20157_v38 }
 0xe23   : > { %17599 = vmatpush3.bf16.msra.mxu1 %v20160_v14 }
 0xe24   : > { %17663 = vmatpush3.bf16.msra.mxu0 %v20158_v42  ;;  %17600 = vmatprep.subr.bf16.mxu1 %v20163_v40  ;;  %v20200_v40 = vld [vmem:[%s25855_s3 + $0x16b0] sm:$0xff]  }
 0xe25   : > { %17664 = vmatprep.subr.bf16.mxu0 %v20161_v41  ;;  %v17298_v47 = vpop.f32.mrb[92].mxu1 }
 0xe26   : > { %v17299_v51 = vpop.f32.mrb[93].mxu1 }
 0xe27   : > { %v17300_v33 = vadd.f32 %v17299_v51, %v17298_v47  ;;  %v17301_v25 = vpop.f32.mrb[94].mxu1  ;;  %17601 = vmatpush3.bf16.msra.mxu1 %v20164_v34  ;;  %v20198_v34 = vld [vmem:[%s25855_s3 + $0x1828] sm:$0xff]   ;;  %v20201_v47 = vld [vmem:[%s25855_s3 + $0x1870] sm:$0xff]   ;;  %v6065_v51 = vcombine.high %v24615_v16, %v24615_v16  ;;  %v20206_v16 = vld [vmem:[%s25855_s3 + $0x1838] sm:$0xff]  }
 0xe28   : > { %17665 = vmatpush3.bf16.msra.mxu0 %v20162_v62  ;;  %v17302_v54 = vpop.f32.mrb[95].mxu1  ;;  %17602 = vmatprep.subr.bf16.mxu1 %v20167_v50  ;;  %v20203_v62 = vld [vmem:[%s25855_s3 + $0x16f8] sm:$0xff]  }
 0xe29   : > { %v13728_v27 = vadd.f32 %v17300_v33, %v24496_v36  ;;  %17666 = vmatprep.subr.bf16.mxu0 %v20165_v24  ;;  %v6013_v36 = vcombine.high %v24416_v52, %v24416_v52  ;;  %v20180_v52 = vld [vmem:[%s25855_s3 + $0x1688] sm:$0xff]   ;;  %v20204_v25 = vld [vmem:[%s25855_s3 + $0x16b8] sm:$0xff]  }
 0xe2a   : > { %v17364_v44 = vpop.f32.mrb[76].mxu0 }
 0xe2b   : > { %v17365_v43 = vpop.f32.mrb[77].mxu0  ;;  %17603 = vmatpush3.bf16.msra.mxu1 %v20168_v23  ;;  %v24618_v58 = vadd.f32 %v24498_v6, %v13728_v27  ;;  %v20179_v6 = vld [vmem:[%s25855_s3 + $0x16c8] sm:$0xff]   ;;  %v20207_v27 = vld [vmem:[%s25855_s3 + $0x17c0] sm:$0xff]  }
 0xe2c   : > { %v24620_v45 = vadd.f32 %v17365_v43, %v17364_v44  ;;  %v17367_v2 = vpop.f32.mrb[78].mxu0  ;;  %17667 = vmatpush3.bf16.msra.mxu0 %v20166_v46  ;;  %17604 = vmatprep.subr.bf16.mxu1 %v20171_v49  ;;  %v20202_v49 = vld [vmem:[%s25855_s3 + $0x1830] sm:$0xff]   ;;  %v20205_v44 = vld [vmem:[%s25855_s3 + $0x1878] sm:$0xff]   ;;  %v24755_v43 = vrot.slane %v6065_v51, %v21781_v7 }
 0xe2d   : > { %v17368_v19 = vpop.f32.mrb[79].mxu0  ;;  %17668 = vmatprep.subr.bf16.mxu0 %v20169_v56  ;;  %v6064_v2 = vcombine.high %v24547_v30, %v24547_v30  ;;  %v24783_v30 = vrot.slane %v24633_v39, %v21781_v7  ;;  %v20217_v39 = vld [vmem:[%s25855_s3 + $0x1790] sm:$0xff]  }
 0xe2e   : > { %v20210_v19 = vld [vmem:[%s25855_s3 + $0x1900] sm:$0xff]  }
 0xe2f   : > { %17605 = vmatpush3.bf16.msra.mxu1 %v20172_v48  ;;  %v20208_v48 = vld [vmem:[%s25855_s3 + $0x1780] sm:$0xff]  }
 0xe30   : > { %17669 = vmatpush3.bf16.msra.mxu0 %v20170_v4  ;;  %17634 = vmatprep.subr.bf16.mxu1 %v20175_v29  ;;  %v20209_v4 = vld [vmem:[%s25855_s3 + $0x1940] sm:$0xff]   ;;  %v6081_v29 = vcombine.high %v24755_v43, %v24755_v43 }
 0xe31   : > { %17670 = vmatprep.subr.bf16.mxu0 %v20173_v53  ;;  %v20214_v53 = vld [vmem:[%s25855_s3 + $0x1948] sm:$0xff]  }
 0xe32   : > { %14286 = vmatmul.mubr.bf16.vlgmr.msra.gmra.mrb[120].mxu1 %v6013_v36  ;;  %v20215_v36 = vld [vmem:[%s25855_s3 + $0x1908] sm:$0xff]  }
 0xe33   : > { %17635 = vmatpush3.bf16.msra.mxu1 %v20176_v61  ;;  %14365 = vmatprep.mubr.bf16.mxu1 %v6063_v9  ;;  %v20216_v61 = vld [vmem:[%s25855_s3 + $0x17d0] sm:$0xff]  }
 0xe34   : > { %17671 = vmatpush3.bf16.msra.mxu0 %v20174_v5  ;;  %17636 = vmatprep.subr.bf16.mxu1 %v20179_v6  ;;  %v24792_v5 = vrot.slane %v6081_v29, %v21781_v7  ;;  %v20220_v6 = vld [vmem:[%s25855_s3 + $0x17d8] sm:$0xff]   ;;  %v20218_v9 = vld [vmem:[%s25855_s3 + $0x1950] sm:$0xff]  }
 0xe35   : > { %17700 = vmatprep.subr.bf16.mxu0 %v20177_v60  ;;  %v20221_v60 = vld [vmem:[%s25855_s3 + $0x1798] sm:$0xff]   ;;  %v20251_v29 = vld [vmem:[%s25855_s3 + $0x1a10] sm:$0xff]  }
 0xe37   : > { %14406 = vmatmul.mubr.bf16.vlgmr.msra.gmra.mrb[104].mxu0 %v24661_v13  ;;  %17637 = vmatpush3.bf16.msra.mxu1 %v20180_v52  ;;  %v20224_v52 = vld [vmem:[%s25855_s3 + $0x17e0] sm:$0xff]  }
 0xe38   : > { %17701 = vmatpush3.bf16.msra.mxu0 %v20178_v15  ;;  %14485 = vmatprep.mubr.bf16.mxu0 %v24670_v55  ;;  %v20222_v15 = vld [vmem:[%s25855_s3 + $0x1958] sm:$0xff]  }
 0xe39   : > { %17702 = vmatprep.subr.bf16.mxu0 %v20181_v1  ;;  %17638 = vmatprep.subr.bf16.mxu1 %v20183_v28  ;;  %v20225_v1 = vld [vmem:[%s25855_s3 + $0x17a0] sm:$0xff]   ;;  %v20223_v28 = vld [vmem:[%s25855_s3 + $0x1918] sm:$0xff]  }
 0xe3b   : > { %17639 = vmatpush3.bf16.msra.mxu1 %v20184_v21  ;;  %v20228_v21 = vld [vmem:[%s25855_s3 + $0x17e8] sm:$0xff]  }
 0xe3c   : > { %17703 = vmatpush3.bf16.msra.mxu0 %v20182_v8  ;;  %17640 = vmatprep.subr.bf16.mxu1 %v20187_v11  ;;  %v20226_v8 = vld [vmem:[%s25855_s3 + $0x1960] sm:$0xff]   ;;  %v20229_v11 = vld [vmem:[%s25855_s3 + $0x17a8] sm:$0xff]  }
 0xe3d   : > { %17704 = vmatprep.subr.bf16.mxu0 %v20185_v0  ;;  %v20227_v0 = vld [vmem:[%s25855_s3 + $0x1920] sm:$0xff]  }
 0xe3f   : > { %17641 = vmatpush3.bf16.msra.mxu1 %v20188_v17  ;;  %v20232_v17 = vld [vmem:[%s25855_s3 + $0x17f0] sm:$0xff]  }
 0xe40   : > { %17705 = vmatpush3.bf16.msra.mxu0 %v20186_v20  ;;  %17642 = vmatprep.subr.bf16.mxu1 %v20191_v26  ;;  %v20230_v26 = vld [vmem:[%s25855_s3 + $0x1968] sm:$0xff]  }
 0xe41   : > { %17706 = vmatprep.subr.bf16.mxu0 %v20189_v3 }
 0xe43   : > { %17643 = vmatpush3.bf16.msra.mxu1 %v20192_v57 }
 0xe44   : > { %17707 = vmatpush3.bf16.msra.mxu0 %v20190_v18  ;;  %17644 = vmatprep.subr.bf16.mxu1 %v20195_v22  ;;  %v20233_v22 = vld [vmem:[%s25855_s3 + $0x17b0] sm:$0xff]  }
 0xe45   : > { %17708 = vmatprep.subr.bf16.mxu0 %v20193_v10  ;;  %v17342_v12 = vpop.f32.mrb[96].mxu1 }
 0xe46   : > { %v17343_v38 = vpop.f32.mrb[97].mxu1 }
 0xe47   : > { %v17344_v14 = vadd.f32 %v17343_v38, %v17342_v12  ;;  %v17345_v42 = vpop.f32.mrb[98].mxu1  ;;  %17645 = vmatpush3.bf16.msra.mxu1 %v20196_v32  ;;  %v20231_v32 = vld [vmem:[%s25855_s3 + $0x1928] sm:$0xff]   ;;  %v20234_v12 = vld [vmem:[%s25855_s3 + $0x1970] sm:$0xff]  }
 0xe48   : > { %17709 = vmatpush3.bf16.msra.mxu0 %v20194_v31  ;;  %v17346_v41 = vpop.f32.mrb[99].mxu1  ;;  %17646 = vmatprep.subr.bf16.mxu1 %v20199_v37  ;;  %v20236_v31 = vld [vmem:[%s25855_s3 + $0x17f8] sm:$0xff]  }
 0xe49   : > { %v13808_v50 = vadd.f32 %v17344_v14, %v24618_v58  ;;  %17710 = vmatprep.subr.bf16.mxu0 %v20197_v63  ;;  %v6061_v58 = vcombine.high %v24538_v59, %v24538_v59  ;;  %v20213_v59 = vld [vmem:[%s25855_s3 + $0x1788] sm:$0xff]   ;;  %v20237_v14 = vld [vmem:[%s25855_s3 + $0x17b8] sm:$0xff]  }
 0xe4a   : > { %v17408_v24 = vpop.f32.mrb[80].mxu0  ;;  %v24860_v42 = vld [vmem:[#allocation6 + $0x68] sm:$0xff] }
 0xe4b   : > { %v17409_v33 = vpop.f32.mrb[81].mxu0  ;;  %17647 = vmatpush3.bf16.msra.mxu1 %v20200_v40  ;;  %v24741_v23 = vadd.f32 %v24620_v45, %v13808_v50  ;;  %v20212_v45 = vld [vmem:[%s25855_s3 + $0x17c8] sm:$0xff]   ;;  %v20240_v50 = vld [vmem:[%s25855_s3 + $0x18c0] sm:$0xff]   ;;  %v24878_v51 = vrot.slane %v24860_v42, %v21781_v7 }
 0xe4c   : > { %v24743_v54 = vadd.f32 %v17409_v33, %v17408_v24  ;;  %v17411_v46 = vpop.f32.mrb[82].mxu0  ;;  %17711 = vmatpush3.bf16.msra.mxu0 %v20198_v34  ;;  %17648 = vmatprep.subr.bf16.mxu1 %v20203_v62  ;;  %v20235_v62 = vld [vmem:[%s25855_s3 + $0x1930] sm:$0xff]   ;;  %v20238_v24 = vld [vmem:[%s25855_s3 + $0x1978] sm:$0xff]   ;;  %v20241_v33 = vld [vmem:[%s25855_s3 + $0x1880] sm:$0xff]  }
 0xe4d   : > { %v17412_v56 = vpop.f32.mrb[83].mxu0  ;;  %17712 = vmatprep.subr.bf16.mxu0 %v20201_v47  ;;  %v6112_v46 = vcombine.high %v24670_v55, %v24670_v55  ;;  %v24906_v55 = vrot.slane %v24755_v43, %v21781_v7  ;;  %v20249_v43 = vld [vmem:[%s25855_s3 + $0x1890] sm:$0xff]  }
 0xe4e   : > { %v20243_v56 = vld [vmem:[%s25855_s3 + $0x1a00] sm:$0xff]  }
 0xe4f   : > { %17649 = vmatpush3.bf16.msra.mxu1 %v20204_v25  ;;  %v20239_v25 = vld [vmem:[%s25855_s3 + $0x1938] sm:$0xff]  }
 0xe50   : > { %17713 = vmatpush3.bf16.msra.mxu0 %v20202_v49  ;;  %17678 = vmatprep.subr.bf16.mxu1 %v20207_v27  ;;  %v20242_v49 = vld [vmem:[%s25855_s3 + $0x1a40] sm:$0xff]   ;;  %v6129_v27 = vcombine.high %v24878_v51, %v24878_v51 }
 0xe51   : > { %17714 = vmatprep.subr.bf16.mxu0 %v20205_v44  ;;  %v20246_v44 = vld [vmem:[%s25855_s3 + $0x1a48] sm:$0xff]  }
 0xe52   : > { %14366 = vmatmul.mubr.bf16.vlgmr.msra.gmra.mrb[124].mxu1 %v6061_v58  ;;  %v20247_v58 = vld [vmem:[%s25855_s3 + $0x1a08] sm:$0xff]  }
 0xe53   : > { %17679 = vmatpush3.bf16.msra.mxu1 %v20208_v48  ;;  %14445 = vmatprep.mubr.bf16.mxu1 %v6064_v2  ;;  %v20248_v48 = vld [vmem:[%s25855_s3 + $0x18d0] sm:$0xff]  }
 0xe54   : > { %17715 = vmatpush3.bf16.msra.mxu0 %v20206_v16  ;;  %17680 = vmatprep.subr.bf16.mxu1 %v20212_v45  ;;  %v24915_v16 = vrot.slane %v6129_v27, %v21781_v7  ;;  %v20252_v45 = vld [vmem:[%s25855_s3 + $0x18d8] sm:$0xff]   ;;  %v20250_v2 = vld [vmem:[%s25855_s3 + $0x1a50] sm:$0xff]  }
 0xe55   : > { %17744 = vmatprep.subr.bf16.mxu0 %v20209_v4  ;;  %v20253_v4 = vld [vmem:[%s25855_s3 + $0x1898] sm:$0xff]   ;;  %v20284_v27 = vld [vmem:[%s25855_s3 + $0x1b10] sm:$0xff]  }
 0xe57   : > { %14486 = vmatmul.mubr.bf16.vlgmr.msra.gmra.mrb[108].mxu0 %v24783_v30  ;;  %17681 = vmatpush3.bf16.msra.mxu1 %v20213_v59  ;;  %v20256_v59 = vld [vmem:[%s25855_s3 + $0x18e0] sm:$0xff]  }
 0xe58   : > { %17745 = vmatpush3.bf16.msra.mxu0 %v20210_v19  ;;  %14565 = vmatprep.mubr.bf16.mxu0 %v24792_v5  ;;  %v20254_v19 = vld [vmem:[%s25855_s3 + $0x1a58] sm:$0xff]  }
 0xe59   : > { %17746 = vmatprep.subr.bf16.mxu0 %v20214_v53  ;;  %17682 = vmatprep.subr.bf16.mxu1 %v20216_v61  ;;  %v20257_v53 = vld [vmem:[%s25855_s3 + $0x18a0] sm:$0xff]   ;;  %v20255_v61 = vld [vmem:[%s25855_s3 + $0x1a18] sm:$0xff]  }
 0xe5b   : > { %17683 = vmatpush3.bf16.msra.mxu1 %v20217_v39  ;;  %v20260_v39 = vld [vmem:[%s25855_s3 + $0x18e8] sm:$0xff]  }
 0xe5c   : > { %17747 = vmatpush3.bf16.msra.mxu0 %v20215_v36  ;;  %17684 = vmatprep.subr.bf16.mxu1 %v20220_v6  ;;  %v20258_v36 = vld [vmem:[%s25855_s3 + $0x1a60] sm:$0xff]   ;;  %v20261_v6 = vld [vmem:[%s25855_s3 + $0x18a8] sm:$0xff]  }
 0xe5d   : > { %17748 = vmatprep.subr.bf16.mxu0 %v20218_v9  ;;  %v20259_v9 = vld [vmem:[%s25855_s3 + $0x1a20] sm:$0xff]  }
 0xe5f   : > { %17685 = vmatpush3.bf16.msra.mxu1 %v20221_v60  ;;  %v20264_v60 = vld [vmem:[%s25855_s3 + $0x18f0] sm:$0xff]  }
 0xe60   : > { %17749 = vmatpush3.bf16.msra.mxu0 %v20219_v35  ;;  %17686 = vmatprep.subr.bf16.mxu1 %v20224_v52  ;;  %v20262_v52 = vld [vmem:[%s25855_s3 + $0x1a68] sm:$0xff]  }
 0xe61   : > { %17750 = vmatprep.subr.bf16.mxu0 %v20222_v15 }
 0xe63   : > { %17687 = vmatpush3.bf16.msra.mxu1 %v20225_v1 }
 0xe64   : > { %17751 = vmatpush3.bf16.msra.mxu0 %v20223_v28  ;;  %17688 = vmatprep.subr.bf16.mxu1 %v20228_v21  ;;  %v20265_v21 = vld [vmem:[%s25855_s3 + $0x18b0] sm:$0xff]  }
 0xe65   : > { %17752 = vmatprep.subr.bf16.mxu0 %v20226_v8  ;;  %v17386_v20 = vpop.f32.mrb[100].mxu1 }
 0xe66   : > { %v17387_v3 = vpop.f32.mrb[101].mxu1 }
 0xe67   : > { %v17388_v57 = vadd.f32 %v17387_v3, %v17386_v20  ;;  %v17389_v18 = vpop.f32.mrb[102].mxu1  ;;  %17689 = vmatpush3.bf16.msra.mxu1 %v20229_v11  ;;  %v20263_v11 = vld [vmem:[%s25855_s3 + $0x1a28] sm:$0xff]   ;;  %v20266_v20 = vld [vmem:[%s25855_s3 + $0x1a70] sm:$0xff]   ;;  %v6114_v3 = vcombine.high %v24860_v42, %v24860_v42  ;;  %v20271_v42 = vld [vmem:[%s25855_s3 + $0x1a38] sm:$0xff]  }
 0xe68   : > { %17753 = vmatpush3.bf16.msra.mxu0 %v20227_v0  ;;  %v17390_v10 = vpop.f32.mrb[103].mxu1  ;;  %17690 = vmatprep.subr.bf16.mxu1 %v20232_v17  ;;  %v20268_v0 = vld [vmem:[%s25855_s3 + $0x18f8] sm:$0xff]  }
 0xe69   : > { %v13888_v37 = vadd.f32 %v17388_v57, %v24741_v23  ;;  %17754 = vmatprep.subr.bf16.mxu0 %v20230_v26  ;;  %v6062_v23 = vcombine.high %v24661_v13, %v24661_v13  ;;  %v20245_v13 = vld [vmem:[%s25855_s3 + $0x1888] sm:$0xff]   ;;  %v20269_v18 = vld [vmem:[%s25855_s3 + $0x18b8] sm:$0xff]  }
 0xe6a   : > { %v17452_v63 = vpop.f32.mrb[84].mxu0 }
 0xe6b   : > { %v17453_v38 = vpop.f32.mrb[85].mxu0  ;;  %17691 = vmatpush3.bf16.msra.mxu1 %v20233_v22  ;;  %v24863_v40 = vadd.f32 %v24743_v54, %v13888_v37  ;;  %v20244_v54 = vld [vmem:[%s25855_s3 + $0x18c8] sm:$0xff]   ;;  %v20272_v37 = vld [vmem:[%s25855_s3 + $0x19c0] sm:$0xff]  }
 0xe6c   : > { %v24865_v41 = vadd.f32 %v17453_v38, %v17452_v63  ;;  %v17455_v34 = vpop.f32.mrb[86].mxu0  ;;  %17755 = vmatpush3.bf16.msra.mxu0 %v20231_v32  ;;  %17692 = vmatprep.subr.bf16.mxu1 %v20236_v31  ;;  %v20267_v31 = vld [vmem:[%s25855_s3 + $0x1a30] sm:$0xff]   ;;  %v20270_v63 = vld [vmem:[%s25855_s3 + $0x1a78] sm:$0xff]   ;;  %v25000_v38 = vrot.slane %v6114_v3, %v21781_v7 }
 0xe6d   : > { %v17456_v47 = vpop.f32.mrb[87].mxu0  ;;  %17756 = vmatprep.subr.bf16.mxu0 %v20234_v12  ;;  %v6113_v34 = vcombine.high %v24792_v5, %v24792_v5  ;;  %v25028_v5 = vrot.slane %v24878_v51, %v21781_v7  ;;  %v20282_v51 = vld [vmem:[%s25855_s3 + $0x1990] sm:$0xff]  }
 0xe6e   : > { %v20275_v47 = vld [vmem:[%s25855_s3 + $0x1b00] sm:$0xff]  }
 0xe6f   : > { %17693 = vmatpush3.bf16.msra.mxu1 %v20237_v14  ;;  %v20273_v14 = vld [vmem:[%s25855_s3 + $0x1980] sm:$0xff]  }
 0xe70   : > { %17757 = vmatpush3.bf16.msra.mxu0 %v20235_v62  ;;  %17722 = vmatprep.subr.bf16.mxu1 %v20240_v50  ;;  %v20274_v62 = vld [vmem:[%s25855_s3 + $0x1b40] sm:$0xff]   ;;  %v6130_v50 = vcombine.high %v25000_v38, %v25000_v38 }
 0xe71   : > { %17758 = vmatprep.subr.bf16.mxu0 %v20238_v24  ;;  %v20279_v24 = vld [vmem:[%s25855_s3 + $0x1b48] sm:$0xff]  }
 0xe72   : > { %14446 = vmatmul.mubr.bf16.vlgmr.msra.gmra.mrb[128].mxu1 %v6062_v23  ;;  %v20280_v23 = vld [vmem:[%s25855_s3 + $0x1b08] sm:$0xff]  }
 0xe73   : > { %17723 = vmatpush3.bf16.msra.mxu1 %v20241_v33  ;;  %14525 = vmatprep.mubr.bf16.mxu1 %v6112_v46  ;;  %v20281_v33 = vld [vmem:[%s25855_s3 + $0x19d0] sm:$0xff]  }
 0xe74   : > { %17759 = vmatpush3.bf16.msra.mxu0 %v20239_v25  ;;  %17724 = vmatprep.subr.bf16.mxu1 %v20244_v54  ;;  %v25037_v25 = vrot.slane %v6130_v50, %v21781_v7  ;;  %v20285_v54 = vld [vmem:[%s25855_s3 + $0x19d8] sm:$0xff]   ;;  %v20283_v46 = vld [vmem:[%s25855_s3 + $0x1b50] sm:$0xff]  }
 0xe75   : > { %17788 = vmatprep.subr.bf16.mxu0 %v20242_v49  ;;  %v20286_v49 = vld [vmem:[%s25855_s3 + $0x1998] sm:$0xff]   ;;  %v20316_v50 = vld [vmem:[%s25855_s3 + $0x1c10] sm:$0xff]  }
 0xe77   : > { %14566 = vmatmul.mubr.bf16.vlgmr.msra.gmra.mrb[112].mxu0 %v24906_v55  ;;  %17725 = vmatpush3.bf16.msra.mxu1 %v20245_v13  ;;  %v20289_v13 = vld [vmem:[%s25855_s3 + $0x19e0] sm:$0xff]  }
 0xe78   : > { %17789 = vmatpush3.bf16.msra.mxu0 %v20243_v56  ;;  %14645 = vmatprep.mubr.bf16.mxu0 %v24915_v16  ;;  %v20287_v56 = vld [vmem:[%s25855_s3 + $0x1b58] sm:$0xff]  }
 0xe79   : > { %17790 = vmatprep.subr.bf16.mxu0 %v20246_v44  ;;  %17726 = vmatprep.subr.bf16.mxu1 %v20248_v48  ;;  %v20290_v44 = vld [vmem:[%s25855_s3 + $0x19a0] sm:$0xff]   ;;  %v20288_v48 = vld [vmem:[%s25855_s3 + $0x1b18] sm:$0xff]  }
 0xe7b   : > { %17727 = vmatpush3.bf16.msra.mxu1 %v20249_v43  ;;  %v20293_v43 = vld [vmem:[%s25855_s3 + $0x19e8] sm:$0xff]  }
 0xe7c   : > { %17791 = vmatpush3.bf16.msra.mxu0 %v20247_v58  ;;  %17728 = vmatprep.subr.bf16.mxu1 %v20252_v45  ;;  %v20291_v58 = vld [vmem:[%s25855_s3 + $0x1b60] sm:$0xff]   ;;  %v20294_v45 = vld [vmem:[%s25855_s3 + $0x19a8] sm:$0xff]  }
 0xe7d   : > { %17792 = vmatprep.subr.bf16.mxu0 %v20250_v2  ;;  %v20292_v2 = vld [vmem:[%s25855_s3 + $0x1b20] sm:$0xff]  }
 0xe7f   : > { %17729 = vmatpush3.bf16.msra.mxu1 %v20253_v4  ;;  %v20297_v4 = vld [vmem:[%s25855_s3 + $0x19f0] sm:$0xff]  }
 0xe80   : > { %17793 = vmatpush3.bf16.msra.mxu0 %v20251_v29  ;;  %17730 = vmatprep.subr.bf16.mxu1 %v20256_v59  ;;  %v20295_v59 = vld [vmem:[%s25855_s3 + $0x1b68] sm:$0xff]  }
 0xe81   : > { %17794 = vmatprep.subr.bf16.mxu0 %v20254_v19 }
 0xe83   : > { %17731 = vmatpush3.bf16.msra.mxu1 %v20257_v53 }
 0xe84   : > { %17795 = vmatpush3.bf16.msra.mxu0 %v20255_v61  ;;  %17732 = vmatprep.subr.bf16.mxu1 %v20260_v39  ;;  %v20298_v39 = vld [vmem:[%s25855_s3 + $0x19b0] sm:$0xff]  }
 0xe85   : > { %17796 = vmatprep.subr.bf16.mxu0 %v20258_v36  ;;  %v17430_v35 = vpop.f32.mrb[104].mxu1 }
 0xe86   : > { %v17431_v15 = vpop.f32.mrb[105].mxu1 }
 0xe87   : > { %v17432_v1 = vadd.f32 %v17431_v15, %v17430_v35  ;;  %v17433_v28 = vpop.f32.mrb[106].mxu1  ;;  %17733 = vmatpush3.bf16.msra.mxu1 %v20261_v6  ;;  %v20296_v6 = vld [vmem:[%s25855_s3 + $0x1b28] sm:$0xff]   ;;  %v20299_v35 = vld [vmem:[%s25855_s3 + $0x1b70] sm:$0xff]  }
 0xe88   : > { %17797 = vmatpush3.bf16.msra.mxu0 %v20259_v9  ;;  %v17434_v8 = vpop.f32.mrb[107].mxu1  ;;  %17734 = vmatprep.subr.bf16.mxu1 %v20264_v60  ;;  %v20301_v9 = vld [vmem:[%s25855_s3 + $0x19f8] sm:$0xff]   ;;  %v25105_v28 = vld [vmem:[#allocation6 + $0x70] sm:$0xff] }
 0xe89   : > { %v13968_v17 = vadd.f32 %v17432_v1, %v24863_v40  ;;  %17798 = vmatprep.subr.bf16.mxu0 %v20262_v52  ;;  %v6110_v40 = vcombine.high %v24783_v30, %v24783_v30  ;;  %v20278_v30 = vld [vmem:[%s25855_s3 + $0x1988] sm:$0xff]   ;;  %v20302_v1 = vld [vmem:[%s25855_s3 + $0x19b8] sm:$0xff]   ;;  %v25123_v3 = vrot.slane %v25105_v28, %v21781_v7 }
 0xe8a   : > { %v17496_v26 = vpop.f32.mrb[88].mxu0 }
 0xe8b   : > { %v17497_v57 = vpop.f32.mrb[89].mxu0  ;;  %17735 = vmatpush3.bf16.msra.mxu1 %v20265_v21  ;;  %v24986_v22 = vadd.f32 %v24865_v41, %v13968_v17  ;;  %v20277_v41 = vld [vmem:[%s25855_s3 + $0x19c8] sm:$0xff]   ;;  %v20305_v17 = vld [vmem:[%s25855_s3 + $0x1ac0] sm:$0xff]  }
 0xe8c   : > { %v24988_v10 = vadd.f32 %v17497_v57, %v17496_v26  ;;  %v17499_v32 = vpop.f32.mrb[90].mxu0  ;;  %17799 = vmatpush3.bf16.msra.mxu0 %v20263_v11  ;;  %17736 = vmatprep.subr.bf16.mxu1 %v20268_v0  ;;  %v20300_v0 = vld [vmem:[%s25855_s3 + $0x1b30] sm:$0xff]   ;;  %v20303_v26 = vld [vmem:[%s25855_s3 + $0x1b78] sm:$0xff]   ;;  %v20306_v57 = vld [vmem:[%s25855_s3 + $0x1a80] sm:$0xff]  }
 0xe8d   : > { %v17500_v12 = vpop.f32.mrb[91].mxu0  ;;  %17800 = vmatprep.subr.bf16.mxu0 %v20266_v20  ;;  %v6161_v32 = vcombine.high %v24915_v16, %v24915_v16  ;;  %v25151_v16 = vrot.slane %v25000_v38, %v21781_v7  ;;  %v20314_v38 = vld [vmem:[%s25855_s3 + $0x1a90] sm:$0xff]  }
 0xe8e   : > { %v20308_v12 = vld [vmem:[%s25855_s3 + $0x1c00] sm:$0xff]  }
 0xe8f   : > { %17737 = vmatpush3.bf16.msra.mxu1 %v20269_v18  ;;  %v20304_v18 = vld [vmem:[%s25855_s3 + $0x1b38] sm:$0xff]  }
 0xe90   : > { %17801 = vmatpush3.bf16.msra.mxu0 %v20267_v31  ;;  %17766 = vmatprep.subr.bf16.mxu1 %v20272_v37  ;;  %v20307_v31 = vld [vmem:[%s25855_s3 + $0x1c40] sm:$0xff]   ;;  %v6178_v37 = vcombine.high %v25123_v3, %v25123_v3 }
 0xe91   : > { %17802 = vmatprep.subr.bf16.mxu0 %v20270_v63  ;;  %v20311_v63 = vld [vmem:[%s25855_s3 + $0x1c48] sm:$0xff]  }
 0xe92   : > { %14526 = vmatmul.mubr.bf16.vlgmr.msra.gmra.mrb[132].mxu1 %v6110_v40  ;;  %v20312_v40 = vld [vmem:[%s25855_s3 + $0x1c08] sm:$0xff]  }
 0xe93   : > { %17767 = vmatpush3.bf16.msra.mxu1 %v20273_v14  ;;  %14605 = vmatprep.mubr.bf16.mxu1 %v6113_v34  ;;  %v20313_v14 = vld [vmem:[%s25855_s3 + $0x1ad0] sm:$0xff]  }
 0xe94   : > { %17803 = vmatpush3.bf16.msra.mxu0 %v20271_v42  ;;  %17768 = vmatprep.subr.bf16.mxu1 %v20277_v41  ;;  %v25160_v42 = vrot.slane %v6178_v37, %v21781_v7  ;;  %v20317_v41 = vld [vmem:[%s25855_s3 + $0x1ad8] sm:$0xff]   ;;  %v20315_v34 = vld [vmem:[%s25855_s3 + $0x1c50] sm:$0xff]  }
 0xe95   : > { %17832 = vmatprep.subr.bf16.mxu0 %v20274_v62  ;;  %v20318_v62 = vld [vmem:[%s25855_s3 + $0x1a98] sm:$0xff]   ;;  %v20349_v37 = vld [vmem:[%s25855_s3 + $0x1d10] sm:$0xff]  }
 0xe97   : > { %14646 = vmatmul.mubr.bf16.vlgmr.msra.gmra.mrb[116].mxu0 %v25028_v5  ;;  %17769 = vmatpush3.bf16.msra.mxu1 %v20278_v30  ;;  %v20321_v30 = vld [vmem:[%s25855_s3 + $0x1ae0] sm:$0xff]  }
 0xe98   : > { %17833 = vmatpush3.bf16.msra.mxu0 %v20275_v47  ;;  %14725 = vmatprep.mubr.bf16.mxu0 %v25037_v25  ;;  %v20319_v47 = vld [vmem:[%s25855_s3 + $0x1c58] sm:$0xff]  }
 0xe99   : > { %17834 = vmatprep.subr.bf16.mxu0 %v20279_v24  ;;  %17770 = vmatprep.subr.bf16.mxu1 %v20281_v33  ;;  %v20322_v24 = vld [vmem:[%s25855_s3 + $0x1aa0] sm:$0xff]   ;;  %v20320_v33 = vld [vmem:[%s25855_s3 + $0x1c18] sm:$0xff]  }
 0xe9b   : > { %17771 = vmatpush3.bf16.msra.mxu1 %v20282_v51  ;;  %v20325_v51 = vld [vmem:[%s25855_s3 + $0x1ae8] sm:$0xff]  }
 0xe9c   : > { %17835 = vmatpush3.bf16.msra.mxu0 %v20280_v23  ;;  %17772 = vmatprep.subr.bf16.mxu1 %v20285_v54  ;;  %v20323_v23 = vld [vmem:[%s25855_s3 + $0x1c60] sm:$0xff]   ;;  %v20326_v54 = vld [vmem:[%s25855_s3 + $0x1aa8] sm:$0xff]  }
 0xe9d   : > { %17836 = vmatprep.subr.bf16.mxu0 %v20283_v46  ;;  %v20324_v46 = vld [vmem:[%s25855_s3 + $0x1c20] sm:$0xff]  }
 0xe9f   : > { %17773 = vmatpush3.bf16.msra.mxu1 %v20286_v49  ;;  %v20329_v49 = vld [vmem:[%s25855_s3 + $0x1af0] sm:$0xff]  }
 0xea0   : > { %17837 = vmatpush3.bf16.msra.mxu0 %v20284_v27  ;;  %17774 = vmatprep.subr.bf16.mxu1 %v20289_v13  ;;  %v20327_v13 = vld [vmem:[%s25855_s3 + $0x1c68] sm:$0xff]  }
 0xea1   : > { %17838 = vmatprep.subr.bf16.mxu0 %v20287_v56 }
 0xea3   : > { %17775 = vmatpush3.bf16.msra.mxu1 %v20290_v44 }
 0xea4   : > { %17839 = vmatpush3.bf16.msra.mxu0 %v20288_v48  ;;  %17776 = vmatprep.subr.bf16.mxu1 %v20293_v43  ;;  %v20330_v43 = vld [vmem:[%s25855_s3 + $0x1ab0] sm:$0xff]  }
 0xea5   : > { %17840 = vmatprep.subr.bf16.mxu0 %v20291_v58  ;;  %v17474_v29 = vpop.f32.mrb[108].mxu1 }
 0xea6   : > { %v17475_v19 = vpop.f32.mrb[109].mxu1 }
 0xea7   : > { %v17476_v53 = vadd.f32 %v17475_v19, %v17474_v29  ;;  %v17477_v61 = vpop.f32.mrb[110].mxu1  ;;  %17777 = vmatpush3.bf16.msra.mxu1 %v20294_v45  ;;  %v20328_v45 = vld [vmem:[%s25855_s3 + $0x1c28] sm:$0xff]   ;;  %v20331_v29 = vld [vmem:[%s25855_s3 + $0x1c70] sm:$0xff]   ;;  %v6163_v19 = vcombine.high %v25105_v28, %v25105_v28  ;;  %v20336_v28 = vld [vmem:[%s25855_s3 + $0x1c38] sm:$0xff]  }
 0xea8   : > { %17841 = vmatpush3.bf16.msra.mxu0 %v20292_v2  ;;  %v17478_v36 = vpop.f32.mrb[111].mxu1  ;;  %17778 = vmatprep.subr.bf16.mxu1 %v20297_v4  ;;  %v20333_v2 = vld [vmem:[%s25855_s3 + $0x1af8] sm:$0xff]  }
 0xea9   : > { %v14048_v60 = vadd.f32 %v17476_v53, %v24986_v22  ;;  %17842 = vmatprep.subr.bf16.mxu0 %v20295_v59  ;;  %v6111_v22 = vcombine.high %v24906_v55, %v24906_v55  ;;  %v20310_v55 = vld [vmem:[%s25855_s3 + $0x1a88] sm:$0xff]   ;;  %v20334_v61 = vld [vmem:[%s25855_s3 + $0x1ab8] sm:$0xff]  }
 0xeaa   : > { %v17540_v52 = vpop.f32.mrb[92].mxu0 }
 0xeab   : > { %v17541_v15 = vpop.f32.mrb[93].mxu0  ;;  %17779 = vmatpush3.bf16.msra.mxu1 %v20298_v39  ;;  %v25108_v21 = vadd.f32 %v24988_v10, %v14048_v60  ;;  %v20309_v10 = vld [vmem:[%s25855_s3 + $0x1ac8] sm:$0xff]   ;;  %v20337_v60 = vld [vmem:[%s25855_s3 + $0x1bc0] sm:$0xff]  }
 0xeac   : > { %v25110_v8 = vadd.f32 %v17541_v15, %v17540_v52  ;;  %v17543_v11 = vpop.f32.mrb[94].mxu0  ;;  %17843 = vmatpush3.bf16.msra.mxu0 %v20296_v6  ;;  %17780 = vmatprep.subr.bf16.mxu1 %v20301_v9  ;;  %v20332_v9 = vld [vmem:[%s25855_s3 + $0x1c30] sm:$0xff]   ;;  %v20335_v52 = vld [vmem:[%s25855_s3 + $0x1c78] sm:$0xff]   ;;  %v25245_v15 = vrot.slane %v6163_v19, %v21781_v7 }
 0xead   : > { %v17544_v20 = vpop.f32.mrb[95].mxu0  ;;  %17844 = vmatprep.subr.bf16.mxu0 %v20299_v35  ;;  %v6162_v11 = vcombine.high %v25037_v25, %v25037_v25  ;;  %v25273_v25 = vrot.slane %v25123_v3, %v21781_v7  ;;  %v20347_v3 = vld [vmem:[%s25855_s3 + $0x1b90] sm:$0xff]  }
 0xeae   : > { %v20340_v20 = vld [vmem:[%s25855_s3 + $0x1d00] sm:$0xff]  }
 0xeaf   : > { %17781 = vmatpush3.bf16.msra.mxu1 %v20302_v1  ;;  %v20338_v1 = vld [vmem:[%s25855_s3 + $0x1b80] sm:$0xff]  }
 0xeb0   : > { %17845 = vmatpush3.bf16.msra.mxu0 %v20300_v0  ;;  %17810 = vmatprep.subr.bf16.mxu1 %v20305_v17  ;;  %v20339_v0 = vld [vmem:[%s25855_s3 + $0x1d40] sm:$0xff]   ;;  %v6179_v17 = vcombine.high %v25245_v15, %v25245_v15 }
 0xeb1   : > { %17846 = vmatprep.subr.bf16.mxu0 %v20303_v26  ;;  %v20344_v26 = vld [vmem:[%s25855_s3 + $0x1d48] sm:$0xff]  }
 0xeb2   : > { %14606 = vmatmul.mubr.bf16.vlgmr.msra.gmra.mrb[136].mxu1 %v6111_v22  ;;  %v20345_v22 = vld [vmem:[%s25855_s3 + $0x1d08] sm:$0xff]  }
 0xeb3   : > { %17811 = vmatpush3.bf16.msra.mxu1 %v20306_v57  ;;  %14685 = vmatprep.mubr.bf16.mxu1 %v6161_v32  ;;  %v20346_v57 = vld [vmem:[%s25855_s3 + $0x1bd0] sm:$0xff]  }
 0xeb4   : > { %17847 = vmatpush3.bf16.msra.mxu0 %v20304_v18  ;;  %17812 = vmatprep.subr.bf16.mxu1 %v20309_v10  ;;  %v25282_v18 = vrot.slane %v6179_v17, %v21781_v7  ;;  %v20350_v10 = vld [vmem:[%s25855_s3 + $0x1bd8] sm:$0xff]   ;;  %v20348_v32 = vld [vmem:[%s25855_s3 + $0x1d50] sm:$0xff]  }
 0xeb5   : > { %17876 = vmatprep.subr.bf16.mxu0 %v20307_v31  ;;  %v20351_v31 = vld [vmem:[%s25855_s3 + $0x1b98] sm:$0xff]   ;;  %v20381_v17 = vld [vmem:[%s25855_s3 + $0x1e10] sm:$0xff]  }
 0xeb7   : > { %14726 = vmatmul.mubr.bf16.vlgmr.msra.gmra.mrb[120].mxu0 %v25151_v16  ;;  %17813 = vmatpush3.bf16.msra.mxu1 %v20310_v55  ;;  %v20354_v55 = vld [vmem:[%s25855_s3 + $0x1be0] sm:$0xff]  }
 0xeb8   : > { %17877 = vmatpush3.bf16.msra.mxu0 %v20308_v12  ;;  %14805 = vmatprep.mubr.bf16.mxu0 %v25160_v42  ;;  %v20352_v12 = vld [vmem:[%s25855_s3 + $0x1d58] sm:$0xff]  }
 0xeb9   : > { %17878 = vmatprep.subr.bf16.mxu0 %v20311_v63  ;;  %17814 = vmatprep.subr.bf16.mxu1 %v20313_v14  ;;  %v20355_v63 = vld [vmem:[%s25855_s3 + $0x1ba0] sm:$0xff]   ;;  %v20353_v14 = vld [vmem:[%s25855_s3 + $0x1d18] sm:$0xff]  }
 0xebb   : > { %17815 = vmatpush3.bf16.msra.mxu1 %v20314_v38  ;;  %v20358_v38 = vld [vmem:[%s25855_s3 + $0x1be8] sm:$0xff]  }
 0xebc   : > { %17879 = vmatpush3.bf16.msra.mxu0 %v20312_v40  ;;  %17816 = vmatprep.subr.bf16.mxu1 %v20317_v41  ;;  %v20356_v40 = vld [vmem:[%s25855_s3 + $0x1d60] sm:$0xff]   ;;  %v20359_v41 = vld [vmem:[%s25855_s3 + $0x1ba8] sm:$0xff]  }
 0xebd   : > { %17880 = vmatprep.subr.bf16.mxu0 %v20315_v34  ;;  %v20357_v34 = vld [vmem:[%s25855_s3 + $0x1d20] sm:$0xff]  }
 0xebf   : > { %17817 = vmatpush3.bf16.msra.mxu1 %v20318_v62  ;;  %v20362_v62 = vld [vmem:[%s25855_s3 + $0x1bf0] sm:$0xff]  }
 0xec0   : > { %17881 = vmatpush3.bf16.msra.mxu0 %v20316_v50  ;;  %17818 = vmatprep.subr.bf16.mxu1 %v20321_v30  ;;  %v20360_v30 = vld [vmem:[%s25855_s3 + $0x1d68] sm:$0xff]  }
 0xec1   : > { %17882 = vmatprep.subr.bf16.mxu0 %v20319_v47 }
 0xec3   : > { %17819 = vmatpush3.bf16.msra.mxu1 %v20322_v24 }
 0xec4   : > { %17883 = vmatpush3.bf16.msra.mxu0 %v20320_v33  ;;  %17820 = vmatprep.subr.bf16.mxu1 %v20325_v51  ;;  %v20363_v51 = vld [vmem:[%s25855_s3 + $0x1bb0] sm:$0xff]  }
 0xec5   : > { %17884 = vmatprep.subr.bf16.mxu0 %v20323_v23  ;;  %v17518_v27 = vpop.f32.mrb[112].mxu1 }
 0xec6   : > { %v17519_v56 = vpop.f32.mrb[113].mxu1 }
 0xec7   : > { %v17520_v44 = vadd.f32 %v17519_v56, %v17518_v27  ;;  %v17521_v48 = vpop.f32.mrb[114].mxu1  ;;  %17821 = vmatpush3.bf16.msra.mxu1 %v20326_v54  ;;  %v20361_v54 = vld [vmem:[%s25855_s3 + $0x1d28] sm:$0xff]   ;;  %v20364_v27 = vld [vmem:[%s25855_s3 + $0x1d70] sm:$0xff]  }
 0xec8   : > { %17885 = vmatpush3.bf16.msra.mxu0 %v20324_v46  ;;  %v17522_v58 = vpop.f32.mrb[115].mxu1  ;;  %17822 = vmatprep.subr.bf16.mxu1 %v20329_v49  ;;  %v20366_v46 = vld [vmem:[%s25855_s3 + $0x1bf8] sm:$0xff]   ;;  %v25350_v48 = vld [vmem:[#allocation6 + $0x78] sm:$0xff] }
 0xec9   : > { %v14128_v4 = vadd.f32 %v17520_v44, %v25108_v21  ;;  %17886 = vmatprep.subr.bf16.mxu0 %v20327_v13  ;;  %v6159_v21 = vcombine.high %v25028_v5, %v25028_v5  ;;  %v20343_v5 = vld [vmem:[%s25855_s3 + $0x1b88] sm:$0xff]   ;;  %v20367_v44 = vld [vmem:[%s25855_s3 + $0x1bb8] sm:$0xff]   ;;  %v25368_v19 = vrot.slane %v25350_v48, %v21781_v7 }
 0xeca   : > { %v17584_v59 = vpop.f32.mrb[96].mxu0 }
 0xecb   : > { %v17585_v53 = vpop.f32.mrb[97].mxu0  ;;  %17823 = vmatpush3.bf16.msra.mxu1 %v20330_v43  ;;  %v25231_v39 = vadd.f32 %v25110_v8, %v14128_v4  ;;  %v20342_v8 = vld [vmem:[%s25855_s3 + $0x1bc8] sm:$0xff]   ;;  %v20370_v4 = vld [vmem:[%s25855_s3 + $0x1cc0] sm:$0xff]  }
 0xecc   : > { %v25233_v36 = vadd.f32 %v17585_v53, %v17584_v59  ;;  %v17587_v6 = vpop.f32.mrb[98].mxu0  ;;  %17887 = vmatpush3.bf16.msra.mxu0 %v20328_v45  ;;  %17824 = vmatprep.subr.bf16.mxu1 %v20333_v2  ;;  %v20365_v2 = vld [vmem:[%s25855_s3 + $0x1d30] sm:$0xff]   ;;  %v20368_v59 = vld [vmem:[%s25855_s3 + $0x1d78] sm:$0xff]   ;;  %v20371_v53 = vld [vmem:[%s25855_s3 + $0x1c80] sm:$0xff]  }
 0xecd   : > { %v17588_v35 = vpop.f32.mrb[99].mxu0  ;;  %17888 = vmatprep.subr.bf16.mxu0 %v20331_v29  ;;  %v6210_v6 = vcombine.high %v25160_v42, %v25160_v42  ;;  %v25396_v42 = vrot.slane %v25245_v15, %v21781_v7  ;;  %v20379_v15 = vld [vmem:[%s25855_s3 + $0x1c90] sm:$0xff]  }
 0xece   : > { %v20373_v35 = vld [vmem:[%s25855_s3 + $0x1e00] sm:$0xff]  }
 0xecf   : > { %17825 = vmatpush3.bf16.msra.mxu1 %v20334_v61  ;;  %v20369_v61 = vld [vmem:[%s25855_s3 + $0x1d38] sm:$0xff]  }
 0xed0   : > { %17889 = vmatpush3.bf16.msra.mxu0 %v20332_v9  ;;  %17854 = vmatprep.subr.bf16.mxu1 %v20337_v60  ;;  %v20372_v9 = vld [vmem:[%s25855_s3 + $0x1e40] sm:$0xff]   ;;  %v6227_v60 = vcombine.high %v25368_v19, %v25368_v19 }
 0xed1   : > { %17890 = vmatprep.subr.bf16.mxu0 %v20335_v52  ;;  %v20376_v52 = vld [vmem:[%s25855_s3 + $0x1e48] sm:$0xff]  }
 0xed2   : > { %14686 = vmatmul.mubr.bf16.vlgmr.msra.gmra.mrb[140].mxu1 %v6159_v21  ;;  %v20377_v21 = vld [vmem:[%s25855_s3 + $0x1e08] sm:$0xff]  }
 0xed3   : > { %17855 = vmatpush3.bf16.msra.mxu1 %v20338_v1  ;;  %14765 = vmatprep.mubr.bf16.mxu1 %v6162_v11  ;;  %v20378_v1 = vld [vmem:[%s25855_s3 + $0x1cd0] sm:$0xff]  }
 0xed4   : > { %17891 = vmatpush3.bf16.msra.mxu0 %v20336_v28  ;;  %17856 = vmatprep.subr.bf16.mxu1 %v20342_v8  ;;  %v25405_v28 = vrot.slane %v6227_v60, %v21781_v7  ;;  %v20382_v8 = vld [vmem:[%s25855_s3 + $0x1cd8] sm:$0xff]   ;;  %v20380_v11 = vld [vmem:[%s25855_s3 + $0x1e50] sm:$0xff]  }
 0xed5   : > { %17920 = vmatprep.subr.bf16.mxu0 %v20339_v0  ;;  %v20383_v0 = vld [vmem:[%s25855_s3 + $0x1c98] sm:$0xff]   ;;  %v20414_v60 = vld [vmem:[%s25855_s3 + $0x1f10] sm:$0xff]  }
 0xed7   : > { %14806 = vmatmul.mubr.bf16.vlgmr.msra.gmra.mrb[124].mxu0 %v25273_v25  ;;  %17857 = vmatpush3.bf16.msra.mxu1 %v20343_v5  ;;  %v20386_v5 = vld [vmem:[%s25855_s3 + $0x1ce0] sm:$0xff]  }
 0xed8   : > { %17921 = vmatpush3.bf16.msra.mxu0 %v20340_v20  ;;  %14885 = vmatprep.mubr.bf16.mxu0 %v25282_v18  ;;  %v20384_v20 = vld [vmem:[%s25855_s3 + $0x1e58] sm:$0xff]  }
 0xed9   : > { %17922 = vmatprep.subr.bf16.mxu0 %v20344_v26  ;;  %17858 = vmatprep.subr.bf16.mxu1 %v20346_v57  ;;  %v20387_v26 = vld [vmem:[%s25855_s3 + $0x1ca0] sm:$0xff]   ;;  %v20385_v57 = vld [vmem:[%s25855_s3 + $0x1e18] sm:$0xff]  }
 0xedb   : > { %17859 = vmatpush3.bf16.msra.mxu1 %v20347_v3  ;;  %v20390_v3 = vld [vmem:[%s25855_s3 + $0x1ce8] sm:$0xff]  }
 0xedc   : > { %17923 = vmatpush3.bf16.msra.mxu0 %v20345_v22  ;;  %17860 = vmatprep.subr.bf16.mxu1 %v20350_v10  ;;  %v20388_v22 = vld [vmem:[%s25855_s3 + $0x1e60] sm:$0xff]   ;;  %v20391_v10 = vld [vmem:[%s25855_s3 + $0x1ca8] sm:$0xff]  }
 0xedd   : > { %17924 = vmatprep.subr.bf16.mxu0 %v20348_v32  ;;  %v20389_v32 = vld [vmem:[%s25855_s3 + $0x1e20] sm:$0xff]  }
 0xedf   : > { %17861 = vmatpush3.bf16.msra.mxu1 %v20351_v31  ;;  %v20394_v31 = vld [vmem:[%s25855_s3 + $0x1cf0] sm:$0xff]  }
 0xee0   : > { %17925 = vmatpush3.bf16.msra.mxu0 %v20349_v37  ;;  %17862 = vmatprep.subr.bf16.mxu1 %v20354_v55  ;;  %v20392_v55 = vld [vmem:[%s25855_s3 + $0x1e68] sm:$0xff]  }
 0xee1   : > { %17926 = vmatprep.subr.bf16.mxu0 %v20352_v12 }
 0xee3   : > { %17863 = vmatpush3.bf16.msra.mxu1 %v20355_v63 }
 0xee4   : > { %17927 = vmatpush3.bf16.msra.mxu0 %v20353_v14  ;;  %17864 = vmatprep.subr.bf16.mxu1 %v20358_v38  ;;  %v20395_v38 = vld [vmem:[%s25855_s3 + $0x1cb0] sm:$0xff]  }
 0xee5   : > { %17928 = vmatprep.subr.bf16.mxu0 %v20356_v40  ;;  %v17562_v50 = vpop.f32.mrb[116].mxu1 }
 0xee6   : > { %v17563_v47 = vpop.f32.mrb[117].mxu1 }
 0xee7   : > { %v17564_v24 = vadd.f32 %v17563_v47, %v17562_v50  ;;  %v17565_v33 = vpop.f32.mrb[118].mxu1  ;;  %17865 = vmatpush3.bf16.msra.mxu1 %v20359_v41  ;;  %v20393_v41 = vld [vmem:[%s25855_s3 + $0x1e28] sm:$0xff]   ;;  %v20396_v50 = vld [vmem:[%s25855_s3 + $0x1e70] sm:$0xff]   ;;  %v6212_v47 = vcombine.high %v25350_v48, %v25350_v48  ;;  %v20401_v48 = vld [vmem:[%s25855_s3 + $0x1e38] sm:$0xff]  }
 0xee8   : > { %17929 = vmatpush3.bf16.msra.mxu0 %v20357_v34  ;;  %v17566_v23 = vpop.f32.mrb[119].mxu1  ;;  %17866 = vmatprep.subr.bf16.mxu1 %v20362_v62  ;;  %v20398_v34 = vld [vmem:[%s25855_s3 + $0x1cf8] sm:$0xff]  }
 0xee9   : > { %v14208_v49 = vadd.f32 %v17564_v24, %v25231_v39  ;;  %17930 = vmatprep.subr.bf16.mxu0 %v20360_v30  ;;  %v6160_v39 = vcombine.high %v25151_v16, %v25151_v16  ;;  %v20375_v16 = vld [vmem:[%s25855_s3 + $0x1c88] sm:$0xff]   ;;  %v20399_v33 = vld [vmem:[%s25855_s3 + $0x1cb8] sm:$0xff]  }
 0xeea   : > { %v17628_v13 = vpop.f32.mrb[100].mxu0 }
 0xeeb   : > { %v17629_v56 = vpop.f32.mrb[101].mxu0  ;;  %17867 = vmatpush3.bf16.msra.mxu1 %v20363_v51  ;;  %v25353_v43 = vadd.f32 %v25233_v36, %v14208_v49  ;;  %v20374_v36 = vld [vmem:[%s25855_s3 + $0x1cc8] sm:$0xff]   ;;  %v20402_v49 = vld [vmem:[%s25855_s3 + $0x1dc0] sm:$0xff]  }
 0xeec   : > { %v25355_v58 = vadd.f32 %v17629_v56, %v17628_v13  ;;  %v17631_v45 = vpop.f32.mrb[102].mxu0  ;;  %17931 = vmatpush3.bf16.msra.mxu0 %v20361_v54  ;;  %17868 = vmatprep.subr.bf16.mxu1 %v20366_v46  ;;  %v20397_v46 = vld [vmem:[%s25855_s3 + $0x1e30] sm:$0xff]   ;;  %v20400_v13 = vld [vmem:[%s25855_s3 + $0x1e78] sm:$0xff]   ;;  %v25490_v56 = vrot.slane %v6212_v47, %v21781_v7 }
 0xeed   : > { %v17632_v29 = vpop.f32.mrb[103].mxu0  ;;  %17932 = vmatprep.subr.bf16.mxu0 %v20364_v27  ;;  %v6211_v45 = vcombine.high %v25282_v18, %v25282_v18  ;;  %v25518_v18 = vrot.slane %v25368_v19, %v21781_v7  ;;  %v20412_v19 = vld [vmem:[%s25855_s3 + $0x1d90] sm:$0xff]   ;;  %v20434_v47 = vld [vmem:[%s25855_s3 + $0x1f38] sm:$0xff]  }
 0xeee   : > { %v20405_v29 = vld [vmem:[%s25855_s3 + $0x1f00] sm:$0xff]  }
 0xeef   : > { %17869 = vmatpush3.bf16.msra.mxu1 %v20367_v44  ;;  %v20403_v44 = vld [vmem:[%s25855_s3 + $0x1d80] sm:$0xff]  }
 0xef0   : > { %17933 = vmatpush3.bf16.msra.mxu0 %v20365_v2  ;;  %17898 = vmatprep.subr.bf16.mxu1 %v20370_v4  ;;  %v20404_v2 = vld [vmem:[%s25855_s3 + $0x1f40] sm:$0xff]   ;;  %v6228_v4 = vcombine.high %v25490_v56, %v25490_v56 }
 0xef1   : > { %17934 = vmatprep.subr.bf16.mxu0 %v20368_v59  ;;  %v20409_v59 = vld [vmem:[%s25855_s3 + $0x1f48] sm:$0xff]  }
 0xef2   : > { %14766 = vmatmul.mubr.bf16.vlgmr.msra.gmra.mrb[144].mxu1 %v6160_v39  ;;  %v20410_v39 = vld [vmem:[%s25855_s3 + $0x1f08] sm:$0xff]  }
 0xef3   : > { %17899 = vmatpush3.bf16.msra.mxu1 %v20371_v53  ;;  %14845 = vmatprep.mubr.bf16.mxu1 %v6210_v6  ;;  %v20411_v53 = vld [vmem:[%s25855_s3 + $0x1dd0] sm:$0xff]  }
 0xef4   : > { %17935 = vmatpush3.bf16.msra.mxu0 %v20369_v61  ;;  %17900 = vmatprep.subr.bf16.mxu1 %v20374_v36  ;;  %v25527_v61 = vrot.slane %v6228_v4, %v21781_v7  ;;  %v20415_v36 = vld [vmem:[%s25855_s3 + $0x1dd8] sm:$0xff]   ;;  %v20413_v6 = vld [vmem:[%s25855_s3 + $0x1f50] sm:$0xff]  }
 0xef5   : > { %17964 = vmatprep.subr.bf16.mxu0 %v20372_v9  ;;  %v20416_v9 = vld [vmem:[%s25855_s3 + $0x1d98] sm:$0xff]  }
 0xef7   : > { %14886 = vmatmul.mubr.bf16.vlgmr.msra.gmra.mrb[128].mxu0 %v25396_v42  ;;  %17901 = vmatpush3.bf16.msra.mxu1 %v20375_v16  ;;  %v20419_v16 = vld [vmem:[%s25855_s3 + $0x1de0] sm:$0xff]  }
 0xef8   : > { %17965 = vmatpush3.bf16.msra.mxu0 %v20373_v35  ;;  %14965 = vmatprep.mubr.bf16.mxu0 %v25405_v28  ;;  %v20417_v35 = vld [vmem:[%s25855_s3 + $0x1f58] sm:$0xff]  }
 0xef9   : > { %17966 = vmatprep.subr.bf16.mxu0 %v20376_v52  ;;  %17902 = vmatprep.subr.bf16.mxu1 %v20378_v1  ;;  %v20420_v52 = vld [vmem:[%s25855_s3 + $0x1da0] sm:$0xff]   ;;  %v20418_v1 = vld [vmem:[%s25855_s3 + $0x1f18] sm:$0xff]  }
 0xefb   : > { %17903 = vmatpush3.bf16.msra.mxu1 %v20379_v15  ;;  %v20423_v15 = vld [vmem:[%s25855_s3 + $0x1de8] sm:$0xff]  }
 0xefc   : > { %17967 = vmatpush3.bf16.msra.mxu0 %v20377_v21  ;;  %17904 = vmatprep.subr.bf16.mxu1 %v20382_v8  ;;  %v20421_v21 = vld [vmem:[%s25855_s3 + $0x1f60] sm:$0xff]   ;;  %v20424_v8 = vld [vmem:[%s25855_s3 + $0x1da8] sm:$0xff]  }
 0xefd   : > { %17968 = vmatprep.subr.bf16.mxu0 %v20380_v11  ;;  %v20422_v11 = vld [vmem:[%s25855_s3 + $0x1f20] sm:$0xff]  }
 0xeff   : > { %17905 = vmatpush3.bf16.msra.mxu1 %v20383_v0  ;;  %v20427_v0 = vld [vmem:[%s25855_s3 + $0x1df0] sm:$0xff]  }
 0xf00   : > { %17969 = vmatpush3.bf16.msra.mxu0 %v20381_v17  ;;  %17906 = vmatprep.subr.bf16.mxu1 %v20386_v5  ;;  %v20425_v5 = vld [vmem:[%s25855_s3 + $0x1f68] sm:$0xff]  }
 0xf01   : > { %17970 = vmatprep.subr.bf16.mxu0 %v20384_v20 }
 0xf03   : > { %17907 = vmatpush3.bf16.msra.mxu1 %v20387_v26 }
 0xf04   : > { %17971 = vmatpush3.bf16.msra.mxu0 %v20385_v57  ;;  %17908 = vmatprep.subr.bf16.mxu1 %v20390_v3  ;;  %v20428_v3 = vld [vmem:[%s25855_s3 + $0x1db0] sm:$0xff]  }
 0xf05   : > { %17972 = vmatprep.subr.bf16.mxu0 %v20388_v22  ;;  %v17606_v37 = vpop.f32.mrb[120].mxu1 }
 0xf06   : > { %v17607_v12 = vpop.f32.mrb[121].mxu1 }
 0xf07   : > { %v17608_v63 = vadd.f32 %v17607_v12, %v17606_v37  ;;  %v17609_v14 = vpop.f32.mrb[122].mxu1  ;;  %17909 = vmatpush3.bf16.msra.mxu1 %v20391_v10  ;;  %v20426_v10 = vld [vmem:[%s25855_s3 + $0x1f28] sm:$0xff]   ;;  %v20429_v37 = vld [vmem:[%s25855_s3 + $0x1f70] sm:$0xff]  }
 0xf08   : > { %17973 = vmatpush3.bf16.msra.mxu0 %v20389_v32  ;;  %v17610_v40 = vpop.f32.mrb[123].mxu1  ;;  %17910 = vmatprep.subr.bf16.mxu1 %v20394_v31  ;;  %v20431_v32 = vld [vmem:[%s25855_s3 + $0x1df8] sm:$0xff]  }
 0xf09   : > { %v14288_v62 = vadd.f32 %v17608_v63, %v25353_v43  ;;  %17974 = vmatprep.subr.bf16.mxu0 %v20392_v55  ;;  %v6208_v43 = vcombine.high %v25273_v25, %v25273_v25  ;;  %v20408_v25 = vld [vmem:[%s25855_s3 + $0x1d88] sm:$0xff]   ;;  %v20432_v63 = vld [vmem:[%s25855_s3 + $0x1db8] sm:$0xff]  }
 0xf0a   : > { %v17672_v30 = vpop.f32.mrb[104].mxu0 }
 0xf0b   : > { %v17673_v24 = vpop.f32.mrb[105].mxu0  ;;  %17911 = vmatpush3.bf16.msra.mxu1 %v20395_v38  ;;  %v25476_v51 = vadd.f32 %v25355_v58, %v14288_v62  ;;  %v20407_v58 = vld [vmem:[%s25855_s3 + $0x1dc8] sm:$0xff]  }
 0xf0c   : > { %v25478_v23 = vadd.f32 %v17673_v24, %v17672_v30  ;;  %v17675_v54 = vpop.f32.mrb[106].mxu0  ;;  %17975 = vmatpush3.bf16.msra.mxu0 %v20393_v41  ;;  %17912 = vmatprep.subr.bf16.mxu1 %v20398_v34  ;;  %v20430_v41 = vld [vmem:[%s25855_s3 + $0x1f30] sm:$0xff]   ;;  %v20435_v34 = vld [vmem:[%s25855_s3 + $0x1ec0] sm:$0xff]   ;;  %v6209_v24 = vcombine.high %v25396_v42, %v25396_v42 }
 0xf0d   : > { %v17676_v27 = vpop.f32.mrb[107].mxu0  ;;  %17976 = vmatprep.subr.bf16.mxu0 %v20396_v50  ;;  %v20433_v50 = vld [vmem:[%s25855_s3 + $0x1f78] sm:$0xff]   ;;  %v20436_v30 = vld [vmem:[%s25855_s3 + $0x1e80] sm:$0xff]   ;;  %v20439_v42 = vld [vmem:[%s25855_s3 + $0x1ed0] sm:$0xff]   ;;  %v25626_v54 = vrot.slane %v25490_v56, %v21781_v7 }
 0xf0e   : > { %v20443_v7 = vld [vmem:[%s25855_s3 + $0x1ee0] sm:$0xff]   ;;  %v20446_v56 = vld [vmem:[%s25855_s3 + $0x1ea8] sm:$0xff]  }
 0xf0f   : > { %17913 = vmatpush3.bf16.msra.mxu1 %v20399_v33  ;;  %v20437_v33 = vld [vmem:[%s25855_s3 + $0x1ec8] sm:$0xff]   ;;  %v20444_v27 = vld [vmem:[%s25855_s3 + $0x1ea0] sm:$0xff]  }
 0xf10   : > { %17977 = vmatpush3.bf16.msra.mxu0 %v20397_v46  ;;  %17942 = vmatprep.subr.bf16.mxu1 %v20402_v49  ;;  %v20441_v46 = vld [vmem:[%s25855_s3 + $0x1ed8] sm:$0xff]  }
 0xf11   : > { %17978 = vmatprep.subr.bf16.mxu0 %v20400_v13  ;;  %v20442_v49 = vld [vmem:[%s25855_s3 + $0x1e98] sm:$0xff]   ;;  %v20445_v13 = vld [vmem:[%s25855_s3 + $0x1ee8] sm:$0xff]  }
 0xf12   : > { %14846 = vmatmul.mubr.bf16.vlgmr.msra.gmra.mrb[148].mxu1 %v6208_v43 }
 0xf13   : > { %17943 = vmatpush3.bf16.msra.mxu1 %v20403_v44  ;;  %14925 = vmatprep.mubr.bf16.mxu1 %v6211_v45  ;;  %v20447_v44 = vld [vmem:[%s25855_s3 + $0x1ef0] sm:$0xff]  }
 0xf14   : > { %17979 = vmatpush3.bf16.msra.mxu0 %v20401_v48  ;;  %17944 = vmatprep.subr.bf16.mxu1 %v20407_v58 }
 0xf15   : > { %18008 = vmatprep.subr.bf16.mxu0 %v20404_v2  ;;  %v20448_v2 = vld [vmem:[%s25855_s3 + $0x1eb0] sm:$0xff]  }
 0xf17   : > { %14966 = vmatmul.mubr.bf16.vlgmr.msra.gmra.mrb[132].mxu0 %v25518_v18  ;;  %17945 = vmatpush3.bf16.msra.mxu1 %v20408_v25  ;;  %v20449_v25 = vld [vmem:[%s25855_s3 + $0x1ef8] sm:$0xff]  }
 0xf18   : > { %18009 = vmatpush3.bf16.msra.mxu0 %v20405_v29  ;;  %15045 = vmatprep.mubr.bf16.mxu0 %v25527_v61 }
 0xf19   : > { %18010 = vmatprep.subr.bf16.mxu0 %v20409_v59  ;;  %17946 = vmatprep.subr.bf16.mxu1 %v20411_v53 }
 0xf1b   : > { %17947 = vmatpush3.bf16.msra.mxu1 %v20412_v19  ;;  %v20450_v19 = vld [vmem:[%s25855_s3 + $0x1eb8] sm:$0xff]  }
 0xf1c   : > { %18011 = vmatpush3.bf16.msra.mxu0 %v20410_v39  ;;  %17948 = vmatprep.subr.bf16.mxu1 %v20415_v36 }
 0xf1d   : > { %18012 = vmatprep.subr.bf16.mxu0 %v20413_v6 }
 0xf1f   : > { %17949 = vmatpush3.bf16.msra.mxu1 %v20416_v9  ;;  %v20451_v9 = vld [vmem:[%s25855_s3 + $0x1fc0] sm:$0xff]  }
 0xf20   : > { %18013 = vmatpush3.bf16.msra.mxu0 %v20414_v60  ;;  %17950 = vmatprep.subr.bf16.mxu1 %v20419_v16  ;;  %v20452_v16 = vld [vmem:[%s25855_s3 + $0x1f80] sm:$0xff]  }
 0xf21   : > { %18014 = vmatprep.subr.bf16.mxu0 %v20417_v35  ;;  %v6257_v35 = vcombine.high %v25518_v18, %v25518_v18  ;;  %v20455_v18 = vld [vmem:[%s25855_s3 + $0x1fd0] sm:$0xff]  }
 0xf23   : > { %17951 = vmatpush3.bf16.msra.mxu1 %v20420_v52  ;;  %v20453_v52 = vld [vmem:[%s25855_s3 + $0x1fc8] sm:$0xff]  }
 0xf24   : > { %18015 = vmatpush3.bf16.msra.mxu0 %v20418_v1  ;;  %17952 = vmatprep.subr.bf16.mxu1 %v20423_v15  ;;  %v6260_v1 = vcombine.high %v25527_v61, %v25527_v61  ;;  %v20454_v15 = vld [vmem:[%s25855_s3 + $0x1f88] sm:$0xff]   ;;  %v20457_v61 = vld [vmem:[%s25855_s3 + $0x1fd8] sm:$0xff]  }
 0xf25   : > { %18016 = vmatprep.subr.bf16.mxu0 %v20421_v21  ;;  %v17650_v17 = vpop.f32.mrb[124].mxu1  ;;  %v20456_v21 = vld [vmem:[%s25855_s3 + $0x1f90] sm:$0xff]  }
 0xf26   : > { %v17651_v20 = vpop.f32.mrb[125].mxu1 }
 0xf27   : > { %v17652_v26 = vadd.f32 %v17651_v20, %v17650_v17  ;;  %v17653_v57 = vpop.f32.mrb[126].mxu1  ;;  %17953 = vmatpush3.bf16.msra.mxu1 %v20424_v8  ;;  %v20458_v8 = vld [vmem:[%s25855_s3 + $0x1f98] sm:$0xff]   ;;  %v20461_v17 = vld [vmem:[%s25855_s3 + $0x1fe8] sm:$0xff]   ;;  %v20463_v20 = vld [vmem:[%s25855_s3 + $0x1ff0] sm:$0xff]  }
 0xf28   : > { %18017 = vmatpush3.bf16.msra.mxu0 %v20422_v11  ;;  %v17654_v22 = vpop.f32.mrb[127].mxu1  ;;  %17954 = vmatprep.subr.bf16.mxu1 %v20427_v0  ;;  %v20459_v11 = vld [vmem:[%s25855_s3 + $0x1fe0] sm:$0xff]  }
 0xf29   : > { %v14368_v31 = vadd.f32 %v17652_v26, %v25476_v51  ;;  %18018 = vmatprep.subr.bf16.mxu0 %v20425_v5  ;;  %v6259_v51 = vcombine.high %v25405_v28, %v25405_v28  ;;  %v20440_v28 = vld [vmem:[%s25855_s3 + $0x1e90] sm:$0xff]   ;;  %v20460_v0 = vld [vmem:[%s25855_s3 + $0x1fa0] sm:$0xff]   ;;  %v20462_v5 = vld [vmem:[%s25855_s3 + $0x1fa8] sm:$0xff]  }
 0xf2a   : > { %v17716_v55 = vpop.f32.mrb[108].mxu0 }
 0xf2b   : > { %v17717_v12 = vpop.f32.mrb[109].mxu0  ;;  %17955 = vmatpush3.bf16.msra.mxu1 %v20428_v3  ;;  %v14408_v14 = vadd.f32 %v25478_v23, %v14368_v31  ;;  %v20438_v23 = vld [vmem:[%s25855_s3 + $0x1e88] sm:$0xff]   ;;  %v20465_v31 = vld [vmem:[%s25855_s3 + $0x1ff8] sm:$0xff]  }
 0xf2c   : > { %v17718_v38 = vadd.f32 %v17717_v12, %v17716_v55  ;;  %v17719_v40 = vpop.f32.mrb[110].mxu0  ;;  %18019 = vmatpush3.bf16.msra.mxu0 %v20426_v10  ;;  %17956 = vmatprep.subr.bf16.mxu1 %v20431_v32  ;;  %v20464_v10 = vld [vmem:[%s25855_s3 + $0x1fb0] sm:$0xff]  }
 0xf2d   : > { %v17720_v62 = vpop.f32.mrb[111].mxu0  ;;  %18020 = vmatprep.subr.bf16.mxu0 %v20429_v37 }
 0xf2f   : > { %17957 = vmatpush3.bf16.msra.mxu1 %v20432_v63  ;;  %v20466_v63 = vld [vmem:[%s25855_s3 + $0x1fb8] sm:$0xff]  }
 0xf30   : > { %18021 = vmatpush3.bf16.msra.mxu0 %v20430_v41  ;;  %17986 = vmatprep.subr.bf16.mxu1 %v20435_v34  ;;  %v6258_v34 = vcombine.high %v25626_v54, %v25626_v54 }
 0xf31   : > { %18022 = vmatprep.subr.bf16.mxu0 %v20433_v50 }
 0xf32   : > { %14926 = vmatmul.mubr.bf16.vlgmr.msra.gmra.mrb[152].mxu1 %v6209_v24 }
 0xf33   : > { %17987 = vmatpush3.bf16.msra.mxu1 %v20436_v30  ;;  %15005 = vmatprep.mubr.bf16.mxu1 %v6259_v51 }
 0xf34   : > { %18023 = vmatpush3.bf16.msra.mxu0 %v20434_v47  ;;  %17988 = vmatprep.subr.bf16.mxu1 %v20437_v33 }
 0xf37   : > { %15046 = vmatmul.mubr.bf16.vlgmr.msra.gmra.mrb[136].mxu0 %v25626_v54  ;;  %17989 = vmatpush3.bf16.msra.mxu1 %v20438_v23 }
 0xf38   : > { %17990 = vmatprep.subr.bf16.mxu1 %v20439_v42 }
 0xf3b   : > { %17991 = vmatpush3.bf16.msra.mxu1 %v20440_v28 }
 0xf3c   : > { %17992 = vmatprep.subr.bf16.mxu1 %v20441_v46 }
 0xf3f   : > { %17993 = vmatpush3.bf16.msra.mxu1 %v20442_v49 }
 0xf40   : > { %17994 = vmatprep.subr.bf16.mxu1 %v20443_v7 }
 0xf43   : > { %17995 = vmatpush3.bf16.msra.mxu1 %v20444_v27 }
 0xf44   : > { %17996 = vmatprep.subr.bf16.mxu1 %v20445_v13 }
 0xf45   : > { %v17694_v48 = vpop.f32.mrb[128].mxu1 }
 0xf46   : > { %v17695_v43 = vpop.f32.mrb[129].mxu1 }
 0xf47   : > { %v17696_v58 = vadd.f32 %v17695_v43, %v17694_v48  ;;  %v17697_v45 = vpop.f32.mrb[130].mxu1  ;;  %17997 = vmatpush3.bf16.msra.mxu1 %v20446_v56 }
 0xf48   : > { %v17698_v4 = vpop.f32.mrb[131].mxu1  ;;  %17998 = vmatprep.subr.bf16.mxu1 %v20447_v44 }
 0xf49   : > { %v14448_v29 = vadd.f32 %v17696_v58, %v14408_v14 }
 0xf4a   : > { %v17760_v59 = vpop.f32.mrb[112].mxu0 }
 0xf4b   : > { %v17761_v53 = vpop.f32.mrb[113].mxu0  ;;  %17999 = vmatpush3.bf16.msra.mxu1 %v20448_v2  ;;  %v14488_v39 = vadd.f32 %v17718_v38, %v14448_v29 }
 0xf4c   : > { %v17762_v36 = vadd.f32 %v17761_v53, %v17760_v59  ;;  %v17763_v6 = vpop.f32.mrb[114].mxu0  ;;  %18000 = vmatprep.subr.bf16.mxu1 %v20449_v25 }
 0xf4d   : > { %v17764_v60 = vpop.f32.mrb[115].mxu0 }
 0xf4e   : > { %v3381_v60 = vld [vmem:[%s25856_s4 + $0x8] sm:$0xff] }
 0xf4f   : > { %18001 = vmatpush3.bf16.msra.mxu1 %v20450_v19 }
 0xf50   : > { %18030 = vmatprep.subr.bf16.mxu1 %v20451_v9 }
 0xf52   : > { %15006 = vmatmul.mubr.bf16.vlgmr.msra.gmra.mrb[156].mxu1 %v6257_v35  ;;  %v20500_v35 = vld [vmem:[%s25856_s4] sm:$0xff] }
 0xf53   : > { %18031 = vmatpush3.bf16.msra.mxu1 %v20452_v16  ;;  %15085 = vmatprep.mubr.bf16.mxu1 %v6260_v1  ;;  %v3382_v16 = vld [vmem:[%s25856_s4 + $0x10] sm:$0xff] }
 0xf54   : > { %18032 = vmatprep.subr.bf16.mxu1 %v20453_v52  ;;  %v15100_v52 = vrot.slane %v20500_v35, 1 }
 0xf57   : > { %18033 = vmatpush3.bf16.msra.mxu1 %v20454_v15 }
 0xf58   : > { %18034 = vmatprep.subr.bf16.mxu1 %v20455_v18  ;;  %v20579_v18 = vmov 0.0|0.0  }
 0xf59   : > { %18292 = vmatprep.subr.bf16.mxu0 %v20579_v18 }
 0xf5b   : > { %18035 = vmatpush3.bf16.msra.mxu1 %v20456_v21  ;;  %v15101_v21 = vrot.slane %v3381_v60, 1 }
 0xf5c   : > { %18036 = vmatprep.subr.bf16.mxu1 %v20457_v61  ;;  %v15103_v61 = vrot.slane %v3382_v16, 1  ;;  %v3388_v16 = vld [vmem:[%s25856_s4 + $0x40] sm:$0xff] }
 0xf5f   : > { %18037 = vmatpush3.bf16.msra.mxu1 %v20458_v8  ;;  %v3383_v8 = vld [vmem:[%s25856_s4 + $0x18] sm:$0xff] }
 0xf60   : > { %18038 = vmatprep.subr.bf16.mxu1 %v20459_v11  ;;  %v25732_v11 = vld [vmem:[%s25856_s4 + $0x20] sm:$0xff] }
 0xf63   : > { %18039 = vmatpush3.bf16.msra.mxu1 %v20460_v0 }
 0xf64   : > { %18040 = vmatprep.subr.bf16.mxu1 %v20461_v17  ;;  %v15105_v17 = vrot.slane %v3383_v8, 1 }
 0xf65   : > { %v17738_v26 = vpop.f32.mrb[132].mxu1 }
 0xf66   : > { %v17739_v57 = vpop.f32.mrb[133].mxu1 }
 0xf67   : > { %v17740_v3 = vadd.f32 %v17739_v57, %v17738_v26  ;;  %v17741_v22 = vpop.f32.mrb[134].mxu1  ;;  %18041 = vmatpush3.bf16.msra.mxu1 %v20462_v5  ;;  %v15107_v5 = vrot.slane %v25732_v11, 1  ;;  %v15102_v26 = vsel %vm15099_vm5, %v15100_v52, %v15101_v21  ;;  %v15104_v57 = vsel %vm15099_vm5, %v15101_v21, %v15103_v61 }
 0xf68   : > { %v17742_v32 = vpop.f32.mrb[135].mxu1  ;;  %18042 = vmatprep.subr.bf16.mxu1 %v20463_v20  ;;  %v25736_v20 = vld [vmem:[#allocation2] sm:$0xff]  ;;  %v15106_v22 = vsel %vm15099_vm5, %v15103_v61, %v15105_v17  ;;  %v15201_v52 = vrot.slane %v3388_v16, 2 }
 0xf69   : > { %v14528_v37 = vadd.f32 %v17740_v3, %v14488_v39  ;;  %18080 = vmatprep.mubr.msk.f32.mxu0 %vm20580_vm6, %v25736_v20  ;;  %v18293_v3 = vpack.c.bf16 %v15104_v57, %v15102_v26 }
 0xf6a   : > { %v17804_v55 = vpop.f32.mrb[116].mxu0 }
 0xf6b   : > { %v17805_v12 = vpop.f32.mrb[117].mxu0  ;;  %18043 = vmatpush3.bf16.msra.mxu1 %v20464_v10  ;;  %v14568_v14 = vadd.f32 %v17762_v36, %v14528_v37  ;;  %v15108_v10 = vsel %vm15099_vm5, %v15105_v17, %v15107_v5  ;;  %18294 = vmatpush3.bf16.msra.mxu0 %v18293_v3 }
 0xf6c   : > { %v17806_v38 = vadd.f32 %v17805_v12, %v17804_v55  ;;  %v17807_v40 = vpop.f32.mrb[118].mxu0  ;;  %18044 = vmatprep.subr.bf16.mxu1 %v20465_v31  ;;  %v18296_v32 = vpack.c.bf16 %v15108_v10, %v15106_v22  ;;  %18295 = vmatprep.subr.bf16.mxu0 %v20579_v18  ;;  %v3389_v10 = vld [vmem:[%s25856_s4 + $0x48] sm:$0xff] }
 0xf6d   : > { %v17808_v41 = vpop.f32.mrb[119].mxu0 }
 0xf6f   : > { %18045 = vmatpush3.bf16.msra.mxu1 %v20466_v63  ;;  %18297 = vmatpush3.bf16.msra.mxu0 %v18296_v32  ;;  %v3390_v32 = vld [vmem:[%s25856_s4 + $0x50] sm:$0xff] }
 0xf70   : > { %18304 = vmatprep.subr.bf16.mxu1 %v20579_v18  ;;  %18298 = vmatprep.subr.bf16.mxu0 %v20579_v18 }
 0xf72   : > { %15086 = vmatmul.mubr.bf16.vlgmr.msra.gmra.mrb[160].mxu1 %v6258_v34 }
 0xf73   : > { %18102 = vmatprep.mubr.msk.f32.mxu1 %vm20580_vm6, %v25736_v20 }
 0xf85   : > { %v17782_v62 = vpop.f32.mrb[136].mxu1 }
 0xf86   : > { %v17783_v50 = vpop.f32.mrb[137].mxu1 }
 0xf87   : > { %v17784_v30 = vadd.f32 %v17783_v50, %v17782_v62  ;;  %v17785_v47 = vpop.f32.mrb[138].mxu1 }
 0xf88   : > { %v17786_v24 = vpop.f32.mrb[139].mxu1 }
 0xf89   : > { %v14608_v33 = vadd.f32 %v17784_v30, %v14568_v14 }
 0xf8a   : > { %v17848_v51 = vpop.f32.mrb[120].mxu0 }
 0xf8b   : > { %v17849_v23 = vpop.f32.mrb[121].mxu0  ;;  %v14648_v42 = vadd.f32 %v17806_v38, %v14608_v33 }
 0xf8c   : > { %v17850_v28 = vadd.f32 %v17849_v23, %v17848_v51  ;;  %v17851_v46 = vpop.f32.mrb[122].mxu0 }
 0xf8d   : > { %v17852_v49 = vpop.f32.mrb[123].mxu0 }
 0xfa5   : > { %v17826_v7 = vpop.f32.mrb[140].mxu1 }
 0xfa6   : > { %v17827_v27 = vpop.f32.mrb[141].mxu1 }
 0xfa7   : > { %v17828_v13 = vadd.f32 %v17827_v27, %v17826_v7  ;;  %v17829_v56 = vpop.f32.mrb[142].mxu1 }
 0xfa8   : > { %v17830_v44 = vpop.f32.mrb[143].mxu1 }
 0xfa9   : > { %v14688_v48 = vadd.f32 %v17828_v13, %v14648_v42 }
 0xfaa   : > { %v17892_v54 = vpop.f32.mrb[124].mxu0 }
 0xfab   : > { %v17893_v43 = vpop.f32.mrb[125].mxu0  ;;  %v14728_v58 = vadd.f32 %v17850_v28, %v14688_v48 }
 0xfac   : > { %v17894_v45 = vadd.f32 %v17893_v43, %v17892_v54  ;;  %v17895_v2 = vpop.f32.mrb[126].mxu0 }
 0xfad   : > { %v17896_v4 = vpop.f32.mrb[127].mxu0 }
 0xfc5   : > { %v17870_v25 = vpop.f32.mrb[144].mxu1 }
 0xfc6   : > { %v17871_v29 = vpop.f32.mrb[145].mxu1 }
 0xfc7   : > { %v17872_v59 = vadd.f32 %v17871_v29, %v17870_v25  ;;  %v17873_v53 = vpop.f32.mrb[146].mxu1 }
 0xfc8   : > { %v17874_v19 = vpop.f32.mrb[147].mxu1 }
 0xfc9   : > { %v14768_v39 = vadd.f32 %v17872_v59, %v14728_v58  ;;  %v3385_v19 = vld [vmem:[%s25856_s4 + $0x28] sm:$0xff] }
 0xfca   : > { %v17936_v36 = vpop.f32.mrb[128].mxu0 }
 0xfcb   : > { %v17937_v6 = vpop.f32.mrb[129].mxu0  ;;  %v14808_v9 = vadd.f32 %v17894_v45, %v14768_v39  ;;  %v3386_v39 = vld [vmem:[%s25856_s4 + $0x30] sm:$0xff] }
 0xfcc   : > { %v17938_v1 = vadd.f32 %v17937_v6, %v17936_v36  ;;  %v17939_v15 = vpop.f32.mrb[130].mxu0  ;;  %v15194_v36 = vrot.slane %v25732_v11, 2  ;;  %v3387_v6 = vld [vmem:[%s25856_s4 + $0x38] sm:$0xff]  ;;  %v15197_v60 = vrot.slane %v3386_v39, 2 }
 0xfcd   : > { %v17940_v0 = vpop.f32.mrb[131].mxu0  ;;  %v15199_v35 = vrot.slane %v3387_v6, 2  ;;  %v3391_v11 = vld [vmem:[%s25856_s4 + $0x58] sm:$0xff] }
 0xfcf   : > { %v15200_v21 = vsel %vm15193_vm8, %v15197_v60, %v15199_v35  ;;  %v15202_v8 = vsel %vm15193_vm8, %v15199_v35, %v15201_v52 }
 0xfd0   : > { %v18302_v0 = vpack.c.bf16 %v15202_v8, %v15200_v21 }
 0xfe5   : > { %v17914_v31 = vpop.f32.mrb[148].mxu1 }
 0xfe6   : > { %v17915_v37 = vpop.f32.mrb[149].mxu1 }
 0xfe7   : > { %v17916_v55 = vadd.f32 %v17915_v37, %v17914_v31  ;;  %v17917_v12 = vpop.f32.mrb[150].mxu1  ;;  %v15286_v31 = vrot.slane %v3388_v16, 3  ;;  %v15289_v37 = vrot.slane %v3390_v32, 3 }
 0xfe8   : > { %v17918_v63 = vpop.f32.mrb[151].mxu1 }
 0xfe9   : > { %v14848_v14 = vadd.f32 %v17916_v55, %v14808_v9  ;;  %v15195_v9 = vrot.slane %v3385_v19, 2  ;;  %v3392_v55 = vld [vmem:[%s25856_s4 + $0x60] sm:$0xff] }
 0xfea   : > { %v17980_v38 = vpop.f32.mrb[132].mxu0  ;;  %v15293_v12 = vrot.slane %v3392_v55, 3 }
 0xfeb   : > { %v17981_v40 = vpop.f32.mrb[133].mxu0  ;;  %v14888_v41 = vadd.f32 %v17938_v1, %v14848_v14  ;;  %v15196_v1 = vsel %vm15193_vm8, %v15194_v36, %v15195_v9  ;;  %v15198_v15 = vsel %vm15193_vm8, %v15195_v9, %v15197_v60 }
 0xfec   : > { %v17982_v34 = vadd.f32 %v17981_v40, %v17980_v38  ;;  %v17983_v62 = vpop.f32.mrb[134].mxu0  ;;  %v18299_v61 = vpack.c.bf16 %v15198_v15, %v15196_v1 }
 0xfed   : > { %v17984_v50 = vpop.f32.mrb[135].mxu0 }
0x1005   : > { %v17958_v30 = vpop.f32.mrb[152].mxu1 }
0x1006   : > { %v17959_v47 = vpop.f32.mrb[153].mxu1 }
0x1007   : > { %v17960_v24 = vadd.f32 %v17959_v47, %v17958_v30  ;;  %v17961_v33 = vpop.f32.mrb[154].mxu1 }
0x1008   : > { %v17962_v51 = vpop.f32.mrb[155].mxu1  ;;  %v3394_v33 = vld [vmem:[%s25856_s4 + $0x70] sm:$0xff] }
0x1009   : > { %v14928_v23 = vadd.f32 %v17960_v24, %v14888_v41  ;;  %v3393_v24 = vld [vmem:[%s25856_s4 + $0x68] sm:$0xff]  ;;  %v15380_v51 = vrot.slane %v3392_v55, 4 }
0x100a   : > { %v18024_v42 = vpop.f32.mrb[136].mxu0 }
0x100b   : > { %v18025_v28 = vpop.f32.mrb[137].mxu0  ;;  %v14968_v46 = vadd.f32 %v17982_v34, %v14928_v23  ;;  %v3395_v23 = vld [vmem:[%s25856_s4 + $0x78] sm:$0xff] }
0x100c   : > { %v18026_v49 = vadd.f32 %v18025_v28, %v18024_v42  ;;  %v18027_v7 = vpop.f32.mrb[138].mxu0  ;;  %v15381_v42 = vrot.slane %v3393_v24, 4  ;;  %v15383_v28 = vrot.slane %v3394_v33, 4 }
0x100d   : > { %v18028_v27 = vpop.f32.mrb[139].mxu0 }
0x100e   : > { %v15382_v27 = vsel %vm15379_vm1, %v15380_v51, %v15381_v42 }
0x1025   : > { %v18002_v13 = vpop.f32.mrb[156].mxu1 }
0x1026   : > { %v18003_v56 = vpop.f32.mrb[157].mxu1 }
0x1027   : > { %v18004_v44 = vadd.f32 %v18003_v56, %v18002_v13  ;;  %v18005_v48 = vpop.f32.mrb[158].mxu1  ;;  %v15384_v13 = vsel %vm15379_vm1, %v15381_v42, %v15383_v28 }
0x1028   : > { %v18006_v54 = vpop.f32.mrb[159].mxu1 }
0x1029   : > { %v15008_v43 = vadd.f32 %v18004_v44, %v14968_v46  ;;  %v3396_v46 = vld [vmem:[%s25856_s4 + $0x80] sm:$0x1f]  ;;  %v18311_v44 = vpack.c.bf16 %v15384_v13, %v15382_v27 }
0x102a   : > { %v15387_v7 = vrot.slane %v3396_v46, 4 }
0x102b   : > { %v15048_v58 = vadd.f32 %v18026_v49, %v15008_v43  ;;  %v15385_v49 = vrot.slane %v3395_v23, 4 }
0x102d   : > { %v15386_v56 = vsel %vm15379_vm1, %v15383_v28, %v15385_v49  ;;  %v15388_v48 = vsel %vm15379_vm1, %v15385_v49, %v15387_v7 }
0x102e   : > { %v18314_v54 = vpack.c.bf16 %v15388_v48, %v15386_v56 }
0x1045   : > { %v18046_v45 = vpop.f32.mrb[160].mxu1 }
0x1046   : > { %v18047_v2 = vpop.f32.mrb[161].mxu1 }
0x1047   : > { %v18048_v4 = vadd.f32 %v18047_v2, %v18046_v45  ;;  %v18049_v25 = vpop.f32.mrb[162].mxu1 }
0x1048   : > { %v18050_v29 = vpop.f32.mrb[163].mxu1 }
0x1049   : > { %v15088_v59 = vadd.f32 %v18048_v4, %v15048_v58 }
0x104b   : > { %20491 = vtanh.f32 %v15088_v59 }
0x1055   : > { %v20492_v53 = vpop.eup %20491 }
0x1056   : > { %18081 = vmatmul.mubr.msk.f32.vlgmr.msra.gmra.mrb[14].mxu0 %vm25873_vm7, %v20492_v53 }
0x1057   : > { %18091 = vmatprep.mubr.msk.f32.mxu0 %vm20580_vm6, %v25736_v20  ;;  %18300 = vmatpush3.bf16.msra.mxu0 %v18299_v61 }
0x1058   : > { %18301 = vmatprep.subr.bf16.mxu0 %v20579_v18 }
0x105b   : > { %18303 = vmatpush3.bf16.msra.mxu0 %v18302_v0 }
0x105c   : > { %18310 = vmatprep.subr.bf16.mxu0 %v20579_v18 }
0x1129   : > { %v15183_v17 = vpop.f32.mrb[14].mxu0 }
0x112a   : > { %v15184_v26 = vadd.f32 %v15183_v17, %v15107_v5  ;;  %v18082_v57 = vpop.f32.mrb[15].mxu0  ;;  %v15287_v5 = vrot.slane %v3389_v10, 3 }
0x112c   : > { %v15187_v3 = vmul.f32 0.01, %v15184_v26  ;;  %v15288_v63 = vsel %vm25875_vm11, %v15286_v31, %v15287_v5  ;;  %v15290_v14 = vsel %vm25876_vm0, %v15287_v5, %v15289_v37 }
0x112d   : > { %v18305_v40 = vpack.c.bf16 %v15290_v14, %v15288_v63 }
0x112e   : > { %v15188_v22 = vmax.f32 %v15184_v26, %v15187_v3 }
0x112f   : > { %18306 = vmatpush3.bf16.msra.mxu1 %v18305_v40 }
0x1130   : > { %18092 = vmatmul.mubr.msk.f32.vlgmr.msra.gmra.mrb[140].mxu0 %vm25874_vm10, %v15188_v22  ;;  %18307 = vmatprep.subr.bf16.mxu1 %v20579_v18 }
0x1131   : > { %18113 = vmatprep.mubr.msk.f32.mxu0 %vm20580_vm6, %v25736_v20  ;;  %v15291_v20 = vrot.slane %v3391_v11, 3  ;;  %18312 = vmatpush3.bf16.msra.mxu0 %v18311_v44 }
0x1132   : > { %18313 = vmatprep.subr.bf16.mxu0 %v20579_v18 }
0x1133   : > { %v15292_v38 = vsel %vm25877_vm12, %v15289_v37, %v15291_v20  ;;  %v15294_v41 = vsel %vm25878_vm13, %v15291_v20, %v15293_v12 }
0x1134   : > { %v18308_v34 = vpack.c.bf16 %v15294_v41, %v15292_v38 }
0x1135   : > { %18315 = vmatpush3.bf16.msra.mxu0 %v18314_v54 }
0x1136   : > { %18309 = vmatpush3.bf16.msra.mxu1 %v18308_v34 }
0x1203   : > { %v15277_v62 = vpop.f32.mrb[140].mxu0 }
0x1204   : > { %v15278_v50 = vadd.f32 %v15277_v62, %v15201_v52  ;;  %v18093_v30 = vpop.f32.mrb[141].mxu0 }
0x1206   : > { %20493 = vtanh.f32 %v15278_v50 }
0x1210   : > { %v20494_v47 = vpop.eup %20493 }
0x1211   : > { %18103 = vmatmul.mubr.msk.f32.vlgmr.msra.gmra.mrb[30].mxu1 %vm25879_vm14, %v20494_v47 }
0x12e4   : > { %v15369_v43 = vpop.f32.mrb[30].mxu1 }
0x12e5   : > { %v15370_v58 = vadd.f32 %v15369_v43, %v15293_v12  ;;  %v18104_v45 = vpop.f32.mrb[31].mxu1 }
0x12e7   : > { %v15373_v2 = vmul.f32 0.01, %v15370_v58 }
0x12e9   : > { %v15374_v4 = vmax.f32 %v15370_v58, %v15373_v2 }
0x12eb   : > { %18114 = vmatmul.mubr.msk.f32.vlgmr.msra.gmra.mrb[142].mxu0 %vm25880_vm15, %v15374_v4 }
0x13be   : > { %v15463_v25 = vpop.f32.mrb[142].mxu0 }
0x13bf   : > { %v15464_v29 = vadd.f32 %v15463_v25, %v15387_v7  ;;  %v18115_v59 = vpop.f32.mrb[143].mxu0 }
0x13c1   : > { %15468 = vst.msk [vmem:[%s216_s9] sm:$0x1] %vm15467_vm2, %v15464_v29 }
0x13c2   : > { %20515 = shalt.err (!%p20512_p3)
}
0x13c3   : > { %s20516_s17 = scalar_lea.hbm %s25810_s11, 16  ;;  %s20520_s26 = scalar_lea.hbm %s25857_s5, 32 }
0x13c4   : > { %p20517_p4 = scmp.ne.s32.totalorder %s25810_s11, %s20516_s17  ;;  %p20521_p9 = scmp.lt.u32.totalorder %s25810_s11, %s25857_s5 }
0x13c5   : > { %p20522_p10 = scmp.lt.u32.totalorder %s20520_s26, %s20516_s17  ;;  %p20524_p12 = scmp.lt.u32.totalorder %s20516_s17, %s25810_s11 }
0x13c6   : > { %p20518_p7 = pnand %p20517_p4, %p20650_p5 }
0x13c7   : > { %p20523_p11 = por %p20522_p10, %p20521_p9 }
0x13c8   : > { %p20519_p8 = pneg %p20518_p7 }
0x13c9   : > { %p20525_p13 = por %p20524_p12, %p20523_p11 }
0x13cb   : > { %p20526_p0 = pnand %p20525_p13, %p20519_p8 }
0x13cd   : > { %20529 = shalt.err (!%p20526_p0)
}
0x13ce   : > { %18336 = dma.vmem_to_hbm [thread:$0]  (%p20650_p5), %s25812_s12, 16, %s25810_s11, %s15470_s14  }
0x13cf PF: > { %p18342_p1 = scmp.ge.s32.totalorder %s20564_s21, 2  ;;  %s15494_s30 = sand.u32 1, %s20552_s18  }
0x13d0   : > { %s15495_s9 = scalar_lea.sflag [#allocation8], %s15494_s30 }
0x13d1   : > { %p18339_p2 = pnand %p18342_p1, %p20654_p6 }
0x13d3   : > { %20547 = dma.done.wait (!%p18339_p2), %s15495_s9, 16  }
0x13d4   : > { %20549 = vsyncadd (!%p18339_p2), %s15495_s9, 4294967280  ;;  %p15_p3 = scmp.ge.s32.totalorder %s20637_s24, 4   ;;  %s25881_s18 = smov %s20556_s19 }
0x13d5   : > { %s25882_s19 = smov %s20560_s20  ;;  %s25883_s20 = smov %s20648_s27 }
0x13d6   : > { %s25884_s21 = smov %s20637_s24  ;;  %17 = sbr.rel (!%p15_p3) target bundleno = 3 (0x3), region = 75 }
0x13dd   :  { %15499 = vsyncpa [#allocation8], 1 }
0x13de   :  { %15501 = vsyncpa [#allocation8 + $0x1], 1 }

</bundles_post_ra>
